<compile_context>
chip_gen: v5e
topology: v5e:2x2
jax: 0.10.0
libtpu: 0.0.40
codegen_flags: <defaults>
</compile_context>

<pallas_src>
import jax
import jax.numpy as jnp
from jax.experimental import pallas as pl
from jax.experimental.pallas import tpu as pltpu

KSIZE = 5
CONV_OUT = 100
GRU_H = 50
SKIP_H = 13
DEC_H = 76
SEQ_LEN = 168          # forward requires seq_len == 7 * 24 (c.view(B, 100, 7, 24))
GPAD = 128             # per-gate lane padding (one lane tile per gate)
G3 = 3 * GPAD


def _round_up(n, m):
    return ((n + m - 1) // m) * m


# ----------------------------------------------------------------------------
# Fused forward kernel (specialized to static shapes).
# ----------------------------------------------------------------------------
def _make_fused_kernel(batch, bp, t, f):
    c_half = KSIZE // 2

    def gru_gates(gx, gh, h):
        # gx/gh: (rows, 3*GPAD) pre-activations; gx includes b_ih, gh includes b_hh.
        # Gate order (r, z, n); r and z share one batched sigmoid over 2 lane tiles.
        rz = jax.nn.sigmoid(gx[:, :2 * GPAD] + gh[:, :2 * GPAD])
        r = rz[:, :GPAD]
        z = rz[:, GPAD:]
        n = jnp.tanh(gx[:, 2 * GPAD:] + r * gh[:, 2 * GPAD:])
        return (1.0 - z) * n + z * h

    def kernel(xcol_ref, wc_ref, bc_ref,
               wih_g_ref, whh_g_ref, bih_g_ref, bhh_g_ref,
               wih_s_ref, whh_s_ref, bih_s_ref, bhh_s_ref,
               wih_d_ref, whh_d_ref, bih_d_ref, bhh_d_ref,
               wout_ref, bout_ref,
               out_ref,
               c_s, gx_s):
        # ---- Conv1d(k=5, pad=2) + ReLU: one im2col matmul over all (t, b) rows.
        #      xcol row index = t*BP + b (time-major), lanes = [tap0 F, ..., tap4 F].
        c_s[...] = jnp.maximum(
            jnp.dot(xcol_ref[...], wc_ref[...],
                    preferred_element_type=jnp.float32) + bc_ref[...], 0.0)

        # ---- Main GRU: hoisted input projection for ALL T steps (one matmul).
        gx_s[...] = (jnp.dot(c_s[...], wih_g_ref[...],
                             preferred_element_type=jnp.float32) + bih_g_ref[...])

        # ---- Main GRU recurrence; h stays in registers (one (BP,128) vreg).
        def step(i, h):
            base = pl.multiple_of(i * bp, bp)
            gx = gx_s[pl.ds(base, bp), :]                       # (BP, 3*GPAD)
            gh = (jnp.dot(h, whh_g_ref[...],
                          preferred_element_type=jnp.float32) + bhh_g_ref[...])
            return gru_gates(gx, gh, h)

        h_main = jax.lax.fori_loop(0, t, step,
                                   jnp.zeros((bp, GPAD), jnp.float32))

        # ---- Skip GRU: 7 steps over hours {22, 23} of each day.
        #      "batch" rows [0:BP] are hour 22 (j=0), rows [BP:2BP] hour 23 (j=1).
        h_sk = jnp.zeros((2 * bp, GPAD), jnp.float32)
        for i7 in range(7):                                     # static unroll
            r0 = (i7 * 24 + 22) * bp
            xs = jnp.concatenate([c_s[r0:r0 + bp, :],
                                  c_s[r0 + bp:r0 + 2 * bp, :]], axis=0)
            gx = (jnp.dot(xs, wih_s_ref[...],
                          preferred_element_type=jnp.float32) + bih_s_ref[...])
            gh = (jnp.dot(h_sk, whh_s_ref[...],
                          preferred_element_type=jnp.float32) + bhh_s_ref[...])
            h_sk = gru_gates(gx, gh, h_sk)

        # ---- rc = cat(r, s): (BP, 76) zero-padded into the 128-lane decoder slot.
        rc = jnp.concatenate(
            [h_main[:, :GRU_H],
             h_sk[:bp, :SKIP_H],          # j = 0 half
             h_sk[bp:, :SKIP_H],          # j = 1 half
             jnp.zeros((bp, GPAD - DEC_H), jnp.float32)], axis=1)

        # ---- Decoder GRU: single step on x[:, -1, :] with h0 = rc,
        #      fused with the final Linear(76 -> 1).
        #      x[:, -1, :] lives in the centre tap of the last im2col time row.
        x_last = xcol_ref[(t - 1) * bp:t * bp, c_half * f:(c_half + 1) * f]
        gx = (jnp.dot(x_last, wih_d_ref[...],
                      preferred_element_type=jnp.float32) + bih_d_ref[...])
        gh = (jnp.dot(rc, whh_d_ref[...],
                      preferred_element_type=jnp.float32) + bhh_d_ref[...])
        h_dec = gru_gates(gx, gh, rc)
        out_full = (jnp.dot(h_dec, wout_ref[...],
                            preferred_element_type=jnp.float32) + bout_ref[...])
        out_ref[...] = out_full[:batch, :]

    return kernel


# ----------------------------------------------------------------------------
# Wrapper: single tiny XLA prologue (transpose + pad + im2col) + one pallas_call.
# ----------------------------------------------------------------------------
def _prep_im2col(x, bp):
    """(B,T,F) -> (T*BP, KSIZE*F) time-major im2col, zero-padded batch/time."""
    b, t, f = x.shape
    x_tm = jnp.transpose(x, (1, 0, 2)).astype(jnp.float32)            # (T, B, F)
    x_tm = jnp.pad(x_tm, ((KSIZE // 2, KSIZE // 2), (0, bp - b), (0, 0)))
    cols = jnp.concatenate([x_tm[k:k + t] for k in range(KSIZE)], axis=-1)
    return cols.reshape(t * bp, KSIZE * f)


@jax.jit
def deepcm_forward(x, params):
    b, t, f = x.shape
    assert t == 7 * 24, "DeepCM.forward requires seq_len == 168 (7*24)"
    bp = _round_up(b, 8)                                   # pad batch to 8 sublanes

    xcol = _prep_im2col(x, bp)                             # (T*BP, K*F)
    kernel = _make_fused_kernel(b, bp, t, f)

    return pl.pallas_call(
        kernel,
        out_shape=jax.ShapeDtypeStruct((b, 1), jnp.float32),
        scratch_shapes=[
            pltpu.VMEM((t * bp, CONV_OUT), jnp.float32),   # conv output c (time-major)
            pltpu.VMEM((t * bp, G3), jnp.float32),         # hoisted GRU input projection
        ],
        compiler_params=pltpu.CompilerParams(
            vmem_limit_bytes=48 * 1024 * 1024),
    )(xcol,
      params['conv_w'], params['conv_b'],
      params['gru_wih'], params['gru_whh'], params['gru_bih'], params['gru_bhh'],
      params['skip_wih'], params['skip_whh'], params['skip_bih'], params['skip_bhh'],
      params['dec_wih'], params['dec_whh'], params['dec_bih'], params['dec_bhh'],
      params['out_w'], params['out_b'])


# ----------------------------------------------------------------------------
# Parameters (deterministic synthetic init, PyTorch-like uniform scales).
# Gate weights are stored concatenated along lanes, each gate zero-padded to a
# 128-lane slot; W_hh rows (previous-h lanes) zero-padded to 128 as well.
# conv_w[k*F + f, o] corresponds to torch Conv1d weight[o, f, k].
# ----------------------------------------------------------------------------
def init_params(key, in_features):
    ks = jax.random.split(key, 16)

    def u(k, shape, fan):
        bound = 1.0 / float(fan) ** 0.5
        return jax.random.uniform(k, shape, jnp.float32, -bound, bound)

    def gru_p(k0, k1, k2, k3, i_dim, h_dim):
        wih = u(k0, (i_dim, 3, h_dim), h_dim)
        whh = u(k1, (h_dim, 3, h_dim), h_dim)
        bih = u(k2, (3, h_dim), h_dim)
        bhh = u(k3, (3, h_dim), h_dim)
        wih_p = jnp.zeros((i_dim, 3, GPAD), jnp.float32).at[:, :, :h_dim].set(wih)
        whh_p = jnp.zeros((GPAD, 3, GPAD), jnp.float32).at[:h_dim, :, :h_dim].set(whh)
        bih_p = jnp.zeros((3, GPAD), jnp.float32).at[:, :h_dim].set(bih)
        bhh_p = jnp.zeros((3, GPAD), jnp.float32).at[:, :h_dim].set(bhh)
        return (wih_p.reshape(i_dim, G3), whh_p.reshape(GPAD, G3),
                bih_p.reshape(1, G3), bhh_p.reshape(1, G3))

    p = {}
    fan_c = in_features * KSIZE
    p['conv_w'] = u(ks[0], (KSIZE * in_features, CONV_OUT), fan_c)
    p['conv_b'] = u(ks[1], (1, CONV_OUT), fan_c)
    (p['gru_wih'], p['gru_whh'], p['gru_bih'], p['gru_bhh']) = gru_p(
        ks[2], ks[3], ks[4], ks[5], CONV_OUT, GRU_H)
    (p['skip_wih'], p['skip_whh'], p['skip_bih'], p['skip_bhh']) = gru_p(
        ks[6], ks[7], ks[8], ks[9], CONV_OUT, SKIP_H)
    (p['dec_wih'], p['dec_whh'], p['dec_bih'], p['dec_bhh']) = gru_p(
        ks[10], ks[11], ks[12], ks[13], in_features, DEC_H)
    out_w = u(ks[14], (DEC_H, 1), DEC_H)
    p['out_w'] = jnp.zeros((GPAD, 1), jnp.float32).at[:DEC_H, :].set(out_w)
    p['out_b'] = u(ks[15], (1, 1), DEC_H)
    return p


# ----------------------------------------------------------------------------
# Pure-JAX reference (mirrors the PyTorch module; used for validation).
# ----------------------------------------------------------------------------
def _reference_forward(x, params):
    b, t, f = x.shape

    def unpack(wih, whh, bih, bhh, i_dim, h):
        return (wih.reshape(i_dim, 3, GPAD)[:, :, :h],
                whh.reshape(GPAD, 3, GPAD)[:h, :, :h],
                bih.reshape(3, GPAD)[:, :h],
                bhh.reshape(3, GPAD)[:, :h])

    def gru_scan(x_seq, wih, whh, bih, bhh, h0):
        def step(h, x_t):
            gx = jnp.einsum('bi,igh->bgh', x_t, wih) + bih
            gh = jnp.einsum('bh,hgn->bgn', h, whh) + bhh
            r = jax.nn.sigmoid(gx[:, 0] + gh[:, 0])
            z = jax.nn.sigmoid(gx[:, 1] + gh[:, 1])
            n = jnp.tanh(gx[:, 2] + r * gh[:, 2])
            return (1.0 - z) * n + z * h, None
        h_fin, _ = jax.lax.scan(step, h0, x_seq)
        return h_fin

    wc = params['conv_w']
    xp = jnp.pad(x, ((0, 0), (KSIZE // 2, KSIZE // 2), (0, 0)))
    c = jnp.zeros((b, t, CONV_OUT), jnp.float32)
    for k in range(KSIZE):
        c = c + jnp.einsum('btf,fo->bto', xp[:, k:k + t, :], wc[k * f:(k + 1) * f, :])
    c = jnp.maximum(c + params['conv_b'][0], 0.0)

    wih, whh, bih, bhh = unpack(params['gru_wih'], params['gru_whh'],
                                params['gru_bih'], params['gru_bhh'], CONV_OUT, GRU_H)
    r = gru_scan(jnp.transpose(c, (1, 0, 2)), wih, whh, bih, bhh,
                 jnp.zeros((b, GRU_H), jnp.float32))

    s_in = c.reshape(b, 7, 24, CONV_OUT)[:, :, -2:, :]
    s_in = jnp.transpose(s_in, (1, 0, 2, 3)).reshape(7, b * 2, CONV_OUT)
    wih, whh, bih, bhh = unpack(params['skip_wih'], params['skip_whh'],
                                params['skip_bih'], params['skip_bhh'],
                                CONV_OUT, SKIP_H)
    s = gru_scan(s_in, wih, whh, bih, bhh,
                 jnp.zeros((b * 2, SKIP_H), jnp.float32)).reshape(b, 2 * SKIP_H)

    rc = jnp.concatenate([r, s], axis=1)
    wih, whh, bih, bhh = unpack(params['dec_wih'], params['dec_whh'],
                                params['dec_bih'], params['dec_bhh'], f, DEC_H)
    h = gru_scan(jnp.transpose(x[:, -1:, :], (1, 0, 2)), wih, whh, bih, bhh, rc)
    return h @ params['out_w'][:DEC_H, :] + params['out_b']


if __name__ == "__main__":
    key = jax.random.PRNGKey(0)
    k_x, k_p = jax.random.split(key)

    batch = 2
    in_features = 8             # seq_len must be 168 (= 7 * 24) per the forward's view()
    x = jax.random.normal(k_x, (batch, SEQ_LEN, in_features), jnp.float32)
    params = init_params(k_p, in_features)

    out = jax.block_until_ready(deepcm_forward(x, params))
    assert out.shape == (batch, 1), out.shape
    assert bool(jnp.all(jnp.isfinite(out)))

    ref = jax.block_until_ready(_reference_forward(x, params))
    assert bool(jnp.allclose(out, ref, atol=5e-3, rtol=5e-3)), (
        float(jnp.max(jnp.abs(out - ref))))

    print("KERNEL_OK")
</pallas_src>

<mosaic_0001>
module attributes {stable_mosaic.version = 11 : i64} {
  func.func @kernel(%arg0: memref<1344x40xf32, #tpu.memory_space<vmem>>, %arg1: memref<40x100xf32, #tpu.memory_space<vmem>>, %arg2: memref<1x100xf32, #tpu.memory_space<vmem>>, %arg3: memref<100x384xf32, #tpu.memory_space<vmem>>, %arg4: memref<128x384xf32, #tpu.memory_space<vmem>>, %arg5: memref<1x384xf32, #tpu.memory_space<vmem>>, %arg6: memref<1x384xf32, #tpu.memory_space<vmem>>, %arg7: memref<100x384xf32, #tpu.memory_space<vmem>>, %arg8: memref<128x384xf32, #tpu.memory_space<vmem>>, %arg9: memref<1x384xf32, #tpu.memory_space<vmem>>, %arg10: memref<1x384xf32, #tpu.memory_space<vmem>>, %arg11: memref<8x384xf32, #tpu.memory_space<vmem>>, %arg12: memref<128x384xf32, #tpu.memory_space<vmem>>, %arg13: memref<1x384xf32, #tpu.memory_space<vmem>>, %arg14: memref<1x384xf32, #tpu.memory_space<vmem>>, %arg15: memref<128x1xf32, #tpu.memory_space<vmem>>, %arg16: memref<1x1xf32, #tpu.memory_space<vmem>>, %arg17: memref<2x1xf32, #tpu.memory_space<vmem>>, %arg18: memref<1344x100xf32, #tpu.memory_space<vmem>>, %arg19: memref<1344x384xf32, #tpu.memory_space<vmem>>) attributes {dimension_semantics = [], scalar_prefetch = 0 : i64, scratch_operands = 2 : i64, tpu.core_type = #tpu.core_type<tc>} {
    %c0 = arith.constant 0 : index
    %c0_0 = arith.constant 0 : index
    %0 = vector.load %arg0[%c0, %c0_0] : memref<1344x40xf32, #tpu.memory_space<vmem>>, vector<1344x40xf32>
    %c0_1 = arith.constant 0 : index
    %c0_2 = arith.constant 0 : index
    %1 = vector.load %arg1[%c0_1, %c0_2] : memref<40x100xf32, #tpu.memory_space<vmem>>, vector<40x100xf32>
    %cst = arith.constant dense<0.000000e+00> : vector<1344x100xf32>
    %2 = tpu.matmul %0, %1, %cst {dimension_numbers = #tpu.dot_dimension_numbers<[1], [0], [0], [1], [0, 0, 1, 1], [], []>} : vector<1344x40xf32>, vector<40x100xf32>, vector<1344x100xf32> -> vector<1344x100xf32>
    %c0_3 = arith.constant 0 : index
    %c0_4 = arith.constant 0 : index
    %3 = vector.load %arg2[%c0_3, %c0_4] : memref<1x100xf32, #tpu.memory_space<vmem>>, vector<1x100xf32>
    %4 = vector.broadcast %3 : vector<1x100xf32> to vector<1344x100xf32>
    %5 = arith.addf %2, %4 : vector<1344x100xf32>
    %cst_5 = arith.constant 0.000000e+00 : f32
    %6 = vector.broadcast %cst_5 : f32 to vector<1344x100xf32>
    %7 = arith.maximumf %5, %6 : vector<1344x100xf32>
    %c0_6 = arith.constant 0 : index
    %c0_7 = arith.constant 0 : index
    %8 = vector.load %arg18[%c0_6, %c0_7] : memref<1344x100xf32, #tpu.memory_space<vmem>>, vector<1344x100xf32>
    tpu.vector_store %arg18[%c0_6, %c0_7], %7 {strides = array<i32>} : memref<1344x100xf32, #tpu.memory_space<vmem>>, vector<1344x100xf32>,
    %c0_8 = arith.constant 0 : index
    %c0_9 = arith.constant 0 : index
    %9 = vector.load %arg18[%c0_8, %c0_9] : memref<1344x100xf32, #tpu.memory_space<vmem>>, vector<1344x100xf32>
    %c0_10 = arith.constant 0 : index
    %c0_11 = arith.constant 0 : index
    %10 = vector.load %arg3[%c0_10, %c0_11] : memref<100x384xf32, #tpu.memory_space<vmem>>, vector<100x384xf32>
    %cst_12 = arith.constant dense<0.000000e+00> : vector<1344x384xf32>
    %11 = tpu.matmul %9, %10, %cst_12 {dimension_numbers = #tpu.dot_dimension_numbers<[1], [0], [0], [1], [0, 0, 1, 1], [], []>} : vector<1344x100xf32>, vector<100x384xf32>, vector<1344x384xf32> -> vector<1344x384xf32>
    %c0_13 = arith.constant 0 : index
    %c0_14 = arith.constant 0 : index
    %12 = vector.load %arg5[%c0_13, %c0_14] : memref<1x384xf32, #tpu.memory_space<vmem>>, vector<1x384xf32>
    %13 = vector.broadcast %12 : vector<1x384xf32> to vector<1344x384xf32>
    %14 = arith.addf %11, %13 : vector<1344x384xf32>
    %c0_15 = arith.constant 0 : index
    %c0_16 = arith.constant 0 : index
    %15 = vector.load %arg19[%c0_15, %c0_16] : memref<1344x384xf32, #tpu.memory_space<vmem>>, vector<1344x384xf32>
    tpu.vector_store %arg19[%c0_15, %c0_16], %14 {strides = array<i32>} : memref<1344x384xf32, #tpu.memory_space<vmem>>, vector<1344x384xf32>,
    %cst_17 = arith.constant 0.000000e+00 : f32
    %16 = vector.broadcast %cst_17 : f32 to vector<8x128xf32>
    %c0_i32 = arith.constant 0 : i32
    %c168_i32 = arith.constant 168 : i32
    %17 = arith.addi %c0_i32, %c168_i32 : i32
    %c1_i32 = arith.constant 1 : i32
    %18 = scf.for %arg20 = %c0_i32 to %17 step %c1_i32 iter_args(%arg21 = %16) -> (vector<8x128xf32>)  : i32 {
      %c8_i32 = arith.constant 8 : i32
      %294 = arith.muli %arg20, %c8_i32 : i32
      %295 = tpu.assume_multiple %294, 8 : i32
      %296 = arith.index_cast %295 : i32 to index
      %c0_139 = arith.constant 0 : index
      %297 = vector.load %arg19[%296, %c0_139] : memref<1344x384xf32, #tpu.memory_space<vmem>>, vector<8x384xf32>
      %c0_140 = arith.constant 0 : index
      %c0_141 = arith.constant 0 : index
      %298 = vector.load %arg4[%c0_140, %c0_141] : memref<128x384xf32, #tpu.memory_space<vmem>>, vector<128x384xf32>
      %cst_142 = arith.constant dense<0.000000e+00> : vector<8x384xf32>
      %299 = tpu.matmul %arg21, %298, %cst_142 {dimension_numbers = #tpu.dot_dimension_numbers<[1], [0], [0], [1], [0, 0, 1, 1], [], []>} : vector<8x128xf32>, vector<128x384xf32>, vector<8x384xf32> -> vector<8x384xf32>
      %c0_143 = arith.constant 0 : index
      %c0_144 = arith.constant 0 : index
      %300 = vector.load %arg6[%c0_143, %c0_144] : memref<1x384xf32, #tpu.memory_space<vmem>>, vector<1x384xf32>
      %301 = vector.broadcast %300 : vector<1x384xf32> to vector<8x384xf32>
      %302 = arith.addf %299, %301 : vector<8x384xf32>
      %303 = vector.extract_strided_slice %297 {offsets = [0, 0], sizes = [8, 256], strides = [1, 1]} : vector<8x384xf32> to vector<8x256xf32>
      %304 = vector.extract_strided_slice %302 {offsets = [0, 0], sizes = [8, 256], strides = [1, 1]} : vector<8x384xf32> to vector<8x256xf32>
      %305 = arith.addf %303, %304 : vector<8x256xf32>
      %306 = arith.negf %305 : vector<8x256xf32>
      %307 = math.exp %306 : vector<8x256xf32>
      %cst_145 = arith.constant 1.000000e+00 : f32
      %308 = vector.broadcast %cst_145 : f32 to vector<8x256xf32>
      %309 = arith.addf %308, %307 : vector<8x256xf32>
      %310 = arith.divf %308, %309 : vector<8x256xf32>
      %311 = vector.extract_strided_slice %310 {offsets = [0, 0], sizes = [8, 128], strides = [1, 1]} : vector<8x256xf32> to vector<8x128xf32>
      %312 = vector.extract_strided_slice %310 {offsets = [0, 128], sizes = [8, 128], strides = [1, 1]} : vector<8x256xf32> to vector<8x128xf32>
      %313 = vector.extract_strided_slice %297 {offsets = [0, 256], sizes = [8, 128], strides = [1, 1]} : vector<8x384xf32> to vector<8x128xf32>
      %314 = vector.extract_strided_slice %302 {offsets = [0, 256], sizes = [8, 128], strides = [1, 1]} : vector<8x384xf32> to vector<8x128xf32>
      %315 = arith.mulf %311, %314 : vector<8x128xf32>
      %316 = arith.addf %313, %315 : vector<8x128xf32>
      %317 = math.tanh %316 : vector<8x128xf32>
      %cst_146 = arith.constant 1.000000e+00 : f32
      %318 = vector.broadcast %cst_146 : f32 to vector<8x128xf32>
      %319 = arith.subf %318, %312 : vector<8x128xf32>
      %320 = arith.mulf %319, %317 : vector<8x128xf32>
      %321 = arith.mulf %312, %arg21 : vector<8x128xf32>
      %322 = arith.addf %320, %321 : vector<8x128xf32>
      scf.yield %322 : vector<8x128xf32>
    }
    %c168_i32_18 = arith.constant 168 : i32
    %cst_19 = arith.constant 0.000000e+00 : f32
    %19 = vector.broadcast %cst_19 : f32 to vector<16x128xf32>
    %c176 = arith.constant 176 : index
    %c0_20 = arith.constant 0 : index
    %20 = vector.load %arg18[%c176, %c0_20] : memref<1344x100xf32, #tpu.memory_space<vmem>>, vector<8x100xf32>
    %c184 = arith.constant 184 : index
    %c0_21 = arith.constant 0 : index
    %21 = vector.load %arg18[%c184, %c0_21] : memref<1344x100xf32, #tpu.memory_space<vmem>>, vector<8x100xf32>
    %22 = tpu.concatenate %20, %21 in 0 : vector<8x100xf32>, vector<8x100xf32> -> vector<16x100xf32>
    %c0_22 = arith.constant 0 : index
    %c0_23 = arith.constant 0 : index
    %23 = vector.load %arg7[%c0_22, %c0_23] : memref<100x384xf32, #tpu.memory_space<vmem>>, vector<100x384xf32>
    %cst_24 = arith.constant dense<0.000000e+00> : vector<16x384xf32>
    %24 = tpu.matmul %22, %23, %cst_24 {dimension_numbers = #tpu.dot_dimension_numbers<[1], [0], [0], [1], [0, 0, 1, 1], [], []>} : vector<16x100xf32>, vector<100x384xf32>, vector<16x384xf32> -> vector<16x384xf32>
    %c0_25 = arith.constant 0 : index
    %c0_26 = arith.constant 0 : index
    %25 = vector.load %arg9[%c0_25, %c0_26] : memref<1x384xf32, #tpu.memory_space<vmem>>, vector<1x384xf32>
    %26 = vector.broadcast %25 : vector<1x384xf32> to vector<16x384xf32>
    %27 = arith.addf %24, %26 : vector<16x384xf32>
    %c0_27 = arith.constant 0 : index
    %c0_28 = arith.constant 0 : index
    %28 = vector.load %arg8[%c0_27, %c0_28] : memref<128x384xf32, #tpu.memory_space<vmem>>, vector<128x384xf32>
    %cst_29 = arith.constant dense<0.000000e+00> : vector<16x384xf32>
    %29 = tpu.matmul %19, %28, %cst_29 {dimension_numbers = #tpu.dot_dimension_numbers<[1], [0], [0], [1], [0, 0, 1, 1], [], []>} : vector<16x128xf32>, vector<128x384xf32>, vector<16x384xf32> -> vector<16x384xf32>
    %c0_30 = arith.constant 0 : index
    %c0_31 = arith.constant 0 : index
    %30 = vector.load %arg10[%c0_30, %c0_31] : memref<1x384xf32, #tpu.memory_space<vmem>>, vector<1x384xf32>
    %31 = vector.broadcast %30 : vector<1x384xf32> to vector<16x384xf32>
    %32 = arith.addf %29, %31 : vector<16x384xf32>
    %33 = vector.extract_strided_slice %27 {offsets = [0, 0], sizes = [16, 256], strides = [1, 1]} : vector<16x384xf32> to vector<16x256xf32>
    %34 = vector.extract_strided_slice %32 {offsets = [0, 0], sizes = [16, 256], strides = [1, 1]} : vector<16x384xf32> to vector<16x256xf32>
    %35 = arith.addf %33, %34 : vector<16x256xf32>
    %36 = arith.negf %35 : vector<16x256xf32>
    %37 = math.exp %36 : vector<16x256xf32>
    %cst_32 = arith.constant 1.000000e+00 : f32
    %38 = vector.broadcast %cst_32 : f32 to vector<16x256xf32>
    %39 = arith.addf %38, %37 : vector<16x256xf32>
    %40 = arith.divf %38, %39 : vector<16x256xf32>
    %41 = vector.extract_strided_slice %40 {offsets = [0, 0], sizes = [16, 128], strides = [1, 1]} : vector<16x256xf32> to vector<16x128xf32>
    %42 = vector.extract_strided_slice %40 {offsets = [0, 128], sizes = [16, 128], strides = [1, 1]} : vector<16x256xf32> to vector<16x128xf32>
    %43 = vector.extract_strided_slice %27 {offsets = [0, 256], sizes = [16, 128], strides = [1, 1]} : vector<16x384xf32> to vector<16x128xf32>
    %44 = vector.extract_strided_slice %32 {offsets = [0, 256], sizes = [16, 128], strides = [1, 1]} : vector<16x384xf32> to vector<16x128xf32>
    %45 = arith.mulf %41, %44 : vector<16x128xf32>
    %46 = arith.addf %43, %45 : vector<16x128xf32>
    %47 = math.tanh %46 : vector<16x128xf32>
    %cst_33 = arith.constant 1.000000e+00 : f32
    %48 = vector.broadcast %cst_33 : f32 to vector<16x128xf32>
    %49 = arith.subf %48, %42 : vector<16x128xf32>
    %50 = arith.mulf %49, %47 : vector<16x128xf32>
    %51 = arith.mulf %42, %19 : vector<16x128xf32>
    %52 = arith.addf %50, %51 : vector<16x128xf32>
    %c368 = arith.constant 368 : index
    %c0_34 = arith.constant 0 : index
    %53 = vector.load %arg18[%c368, %c0_34] : memref<1344x100xf32, #tpu.memory_space<vmem>>, vector<8x100xf32>
    %c376 = arith.constant 376 : index
    %c0_35 = arith.constant 0 : index
    %54 = vector.load %arg18[%c376, %c0_35] : memref<1344x100xf32, #tpu.memory_space<vmem>>, vector<8x100xf32>
    %55 = tpu.concatenate %53, %54 in 0 : vector<8x100xf32>, vector<8x100xf32> -> vector<16x100xf32>
    %c0_36 = arith.constant 0 : index
    %c0_37 = arith.constant 0 : index
    %56 = vector.load %arg7[%c0_36, %c0_37] : memref<100x384xf32, #tpu.memory_space<vmem>>, vector<100x384xf32>
    %cst_38 = arith.constant dense<0.000000e+00> : vector<16x384xf32>
    %57 = tpu.matmul %55, %56, %cst_38 {dimension_numbers = #tpu.dot_dimension_numbers<[1], [0], [0], [1], [0, 0, 1, 1], [], []>} : vector<16x100xf32>, vector<100x384xf32>, vector<16x384xf32> -> vector<16x384xf32>
    %c0_39 = arith.constant 0 : index
    %c0_40 = arith.constant 0 : index
    %58 = vector.load %arg9[%c0_39, %c0_40] : memref<1x384xf32, #tpu.memory_space<vmem>>, vector<1x384xf32>
    %59 = vector.broadcast %58 : vector<1x384xf32> to vector<16x384xf32>
    %60 = arith.addf %57, %59 : vector<16x384xf32>
    %c0_41 = arith.constant 0 : index
    %c0_42 = arith.constant 0 : index
    %61 = vector.load %arg8[%c0_41, %c0_42] : memref<128x384xf32, #tpu.memory_space<vmem>>, vector<128x384xf32>
    %cst_43 = arith.constant dense<0.000000e+00> : vector<16x384xf32>
    %62 = tpu.matmul %52, %61, %cst_43 {dimension_numbers = #tpu.dot_dimension_numbers<[1], [0], [0], [1], [0, 0, 1, 1], [], []>} : vector<16x128xf32>, vector<128x384xf32>, vector<16x384xf32> -> vector<16x384xf32>
    %c0_44 = arith.constant 0 : index
    %c0_45 = arith.constant 0 : index
    %63 = vector.load %arg10[%c0_44, %c0_45] : memref<1x384xf32, #tpu.memory_space<vmem>>, vector<1x384xf32>
    %64 = vector.broadcast %63 : vector<1x384xf32> to vector<16x384xf32>
    %65 = arith.addf %62, %64 : vector<16x384xf32>
    %66 = vector.extract_strided_slice %60 {offsets = [0, 0], sizes = [16, 256], strides = [1, 1]} : vector<16x384xf32> to vector<16x256xf32>
    %67 = vector.extract_strided_slice %65 {offsets = [0, 0], sizes = [16, 256], strides = [1, 1]} : vector<16x384xf32> to vector<16x256xf32>
    %68 = arith.addf %66, %67 : vector<16x256xf32>
    %69 = arith.negf %68 : vector<16x256xf32>
    %70 = math.exp %69 : vector<16x256xf32>
    %cst_46 = arith.constant 1.000000e+00 : f32
    %71 = vector.broadcast %cst_46 : f32 to vector<16x256xf32>
    %72 = arith.addf %71, %70 : vector<16x256xf32>
    %73 = arith.divf %71, %72 : vector<16x256xf32>
    %74 = vector.extract_strided_slice %73 {offsets = [0, 0], sizes = [16, 128], strides = [1, 1]} : vector<16x256xf32> to vector<16x128xf32>
    %75 = vector.extract_strided_slice %73 {offsets = [0, 128], sizes = [16, 128], strides = [1, 1]} : vector<16x256xf32> to vector<16x128xf32>
    %76 = vector.extract_strided_slice %60 {offsets = [0, 256], sizes = [16, 128], strides = [1, 1]} : vector<16x384xf32> to vector<16x128xf32>
    %77 = vector.extract_strided_slice %65 {offsets = [0, 256], sizes = [16, 128], strides = [1, 1]} : vector<16x384xf32> to vector<16x128xf32>
    %78 = arith.mulf %74, %77 : vector<16x128xf32>
    %79 = arith.addf %76, %78 : vector<16x128xf32>
    %80 = math.tanh %79 : vector<16x128xf32>
    %cst_47 = arith.constant 1.000000e+00 : f32
    %81 = vector.broadcast %cst_47 : f32 to vector<16x128xf32>
    %82 = arith.subf %81, %75 : vector<16x128xf32>
    %83 = arith.mulf %82, %80 : vector<16x128xf32>
    %84 = arith.mulf %75, %52 : vector<16x128xf32>
    %85 = arith.addf %83, %84 : vector<16x128xf32>
    %c560 = arith.constant 560 : index
    %c0_48 = arith.constant 0 : index
    %86 = vector.load %arg18[%c560, %c0_48] : memref<1344x100xf32, #tpu.memory_space<vmem>>, vector<8x100xf32>
    %c568 = arith.constant 568 : index
    %c0_49 = arith.constant 0 : index
    %87 = vector.load %arg18[%c568, %c0_49] : memref<1344x100xf32, #tpu.memory_space<vmem>>, vector<8x100xf32>
    %88 = tpu.concatenate %86, %87 in 0 : vector<8x100xf32>, vector<8x100xf32> -> vector<16x100xf32>
    %c0_50 = arith.constant 0 : index
    %c0_51 = arith.constant 0 : index
    %89 = vector.load %arg7[%c0_50, %c0_51] : memref<100x384xf32, #tpu.memory_space<vmem>>, vector<100x384xf32>
    %cst_52 = arith.constant dense<0.000000e+00> : vector<16x384xf32>
    %90 = tpu.matmul %88, %89, %cst_52 {dimension_numbers = #tpu.dot_dimension_numbers<[1], [0], [0], [1], [0, 0, 1, 1], [], []>} : vector<16x100xf32>, vector<100x384xf32>, vector<16x384xf32> -> vector<16x384xf32>
    %c0_53 = arith.constant 0 : index
    %c0_54 = arith.constant 0 : index
    %91 = vector.load %arg9[%c0_53, %c0_54] : memref<1x384xf32, #tpu.memory_space<vmem>>, vector<1x384xf32>
    %92 = vector.broadcast %91 : vector<1x384xf32> to vector<16x384xf32>
    %93 = arith.addf %90, %92 : vector<16x384xf32>
    %c0_55 = arith.constant 0 : index
    %c0_56 = arith.constant 0 : index
    %94 = vector.load %arg8[%c0_55, %c0_56] : memref<128x384xf32, #tpu.memory_space<vmem>>, vector<128x384xf32>
    %cst_57 = arith.constant dense<0.000000e+00> : vector<16x384xf32>
    %95 = tpu.matmul %85, %94, %cst_57 {dimension_numbers = #tpu.dot_dimension_numbers<[1], [0], [0], [1], [0, 0, 1, 1], [], []>} : vector<16x128xf32>, vector<128x384xf32>, vector<16x384xf32> -> vector<16x384xf32>
    %c0_58 = arith.constant 0 : index
    %c0_59 = arith.constant 0 : index
    %96 = vector.load %arg10[%c0_58, %c0_59] : memref<1x384xf32, #tpu.memory_space<vmem>>, vector<1x384xf32>
    %97 = vector.broadcast %96 : vector<1x384xf32> to vector<16x384xf32>
    %98 = arith.addf %95, %97 : vector<16x384xf32>
    %99 = vector.extract_strided_slice %93 {offsets = [0, 0], sizes = [16, 256], strides = [1, 1]} : vector<16x384xf32> to vector<16x256xf32>
    %100 = vector.extract_strided_slice %98 {offsets = [0, 0], sizes = [16, 256], strides = [1, 1]} : vector<16x384xf32> to vector<16x256xf32>
    %101 = arith.addf %99, %100 : vector<16x256xf32>
    %102 = arith.negf %101 : vector<16x256xf32>
    %103 = math.exp %102 : vector<16x256xf32>
    %cst_60 = arith.constant 1.000000e+00 : f32
    %104 = vector.broadcast %cst_60 : f32 to vector<16x256xf32>
    %105 = arith.addf %104, %103 : vector<16x256xf32>
    %106 = arith.divf %104, %105 : vector<16x256xf32>
    %107 = vector.extract_strided_slice %106 {offsets = [0, 0], sizes = [16, 128], strides = [1, 1]} : vector<16x256xf32> to vector<16x128xf32>
    %108 = vector.extract_strided_slice %106 {offsets = [0, 128], sizes = [16, 128], strides = [1, 1]} : vector<16x256xf32> to vector<16x128xf32>
    %109 = vector.extract_strided_slice %93 {offsets = [0, 256], sizes = [16, 128], strides = [1, 1]} : vector<16x384xf32> to vector<16x128xf32>
    %110 = vector.extract_strided_slice %98 {offsets = [0, 256], sizes = [16, 128], strides = [1, 1]} : vector<16x384xf32> to vector<16x128xf32>
    %111 = arith.mulf %107, %110 : vector<16x128xf32>
    %112 = arith.addf %109, %111 : vector<16x128xf32>
    %113 = math.tanh %112 : vector<16x128xf32>
    %cst_61 = arith.constant 1.000000e+00 : f32
    %114 = vector.broadcast %cst_61 : f32 to vector<16x128xf32>
    %115 = arith.subf %114, %108 : vector<16x128xf32>
    %116 = arith.mulf %115, %113 : vector<16x128xf32>
    %117 = arith.mulf %108, %85 : vector<16x128xf32>
    %118 = arith.addf %116, %117 : vector<16x128xf32>
    %c752 = arith.constant 752 : index
    %c0_62 = arith.constant 0 : index
    %119 = vector.load %arg18[%c752, %c0_62] : memref<1344x100xf32, #tpu.memory_space<vmem>>, vector<8x100xf32>
    %c760 = arith.constant 760 : index
    %c0_63 = arith.constant 0 : index
    %120 = vector.load %arg18[%c760, %c0_63] : memref<1344x100xf32, #tpu.memory_space<vmem>>, vector<8x100xf32>
    %121 = tpu.concatenate %119, %120 in 0 : vector<8x100xf32>, vector<8x100xf32> -> vector<16x100xf32>
    %c0_64 = arith.constant 0 : index
    %c0_65 = arith.constant 0 : index
    %122 = vector.load %arg7[%c0_64, %c0_65] : memref<100x384xf32, #tpu.memory_space<vmem>>, vector<100x384xf32>
    %cst_66 = arith.constant dense<0.000000e+00> : vector<16x384xf32>
    %123 = tpu.matmul %121, %122, %cst_66 {dimension_numbers = #tpu.dot_dimension_numbers<[1], [0], [0], [1], [0, 0, 1, 1], [], []>} : vector<16x100xf32>, vector<100x384xf32>, vector<16x384xf32> -> vector<16x384xf32>
    %c0_67 = arith.constant 0 : index
    %c0_68 = arith.constant 0 : index
    %124 = vector.load %arg9[%c0_67, %c0_68] : memref<1x384xf32, #tpu.memory_space<vmem>>, vector<1x384xf32>
    %125 = vector.broadcast %124 : vector<1x384xf32> to vector<16x384xf32>
    %126 = arith.addf %123, %125 : vector<16x384xf32>
    %c0_69 = arith.constant 0 : index
    %c0_70 = arith.constant 0 : index
    %127 = vector.load %arg8[%c0_69, %c0_70] : memref<128x384xf32, #tpu.memory_space<vmem>>, vector<128x384xf32>
    %cst_71 = arith.constant dense<0.000000e+00> : vector<16x384xf32>
    %128 = tpu.matmul %118, %127, %cst_71 {dimension_numbers = #tpu.dot_dimension_numbers<[1], [0], [0], [1], [0, 0, 1, 1], [], []>} : vector<16x128xf32>, vector<128x384xf32>, vector<16x384xf32> -> vector<16x384xf32>
    %c0_72 = arith.constant 0 : index
    %c0_73 = arith.constant 0 : index
    %129 = vector.load %arg10[%c0_72, %c0_73] : memref<1x384xf32, #tpu.memory_space<vmem>>, vector<1x384xf32>
    %130 = vector.broadcast %129 : vector<1x384xf32> to vector<16x384xf32>
    %131 = arith.addf %128, %130 : vector<16x384xf32>
    %132 = vector.extract_strided_slice %126 {offsets = [0, 0], sizes = [16, 256], strides = [1, 1]} : vector<16x384xf32> to vector<16x256xf32>
    %133 = vector.extract_strided_slice %131 {offsets = [0, 0], sizes = [16, 256], strides = [1, 1]} : vector<16x384xf32> to vector<16x256xf32>
    %134 = arith.addf %132, %133 : vector<16x256xf32>
    %135 = arith.negf %134 : vector<16x256xf32>
    %136 = math.exp %135 : vector<16x256xf32>
    %cst_74 = arith.constant 1.000000e+00 : f32
    %137 = vector.broadcast %cst_74 : f32 to vector<16x256xf32>
    %138 = arith.addf %137, %136 : vector<16x256xf32>
    %139 = arith.divf %137, %138 : vector<16x256xf32>
    %140 = vector.extract_strided_slice %139 {offsets = [0, 0], sizes = [16, 128], strides = [1, 1]} : vector<16x256xf32> to vector<16x128xf32>
    %141 = vector.extract_strided_slice %139 {offsets = [0, 128], sizes = [16, 128], strides = [1, 1]} : vector<16x256xf32> to vector<16x128xf32>
    %142 = vector.extract_strided_slice %126 {offsets = [0, 256], sizes = [16, 128], strides = [1, 1]} : vector<16x384xf32> to vector<16x128xf32>
    %143 = vector.extract_strided_slice %131 {offsets = [0, 256], sizes = [16, 128], strides = [1, 1]} : vector<16x384xf32> to vector<16x128xf32>
    %144 = arith.mulf %140, %143 : vector<16x128xf32>
    %145 = arith.addf %142, %144 : vector<16x128xf32>
    %146 = math.tanh %145 : vector<16x128xf32>
    %cst_75 = arith.constant 1.000000e+00 : f32
    %147 = vector.broadcast %cst_75 : f32 to vector<16x128xf32>
    %148 = arith.subf %147, %141 : vector<16x128xf32>
    %149 = arith.mulf %148, %146 : vector<16x128xf32>
    %150 = arith.mulf %141, %118 : vector<16x128xf32>
    %151 = arith.addf %149, %150 : vector<16x128xf32>
    %c944 = arith.constant 944 : index
    %c0_76 = arith.constant 0 : index
    %152 = vector.load %arg18[%c944, %c0_76] : memref<1344x100xf32, #tpu.memory_space<vmem>>, vector<8x100xf32>
    %c952 = arith.constant 952 : index
    %c0_77 = arith.constant 0 : index
    %153 = vector.load %arg18[%c952, %c0_77] : memref<1344x100xf32, #tpu.memory_space<vmem>>, vector<8x100xf32>
    %154 = tpu.concatenate %152, %153 in 0 : vector<8x100xf32>, vector<8x100xf32> -> vector<16x100xf32>
    %c0_78 = arith.constant 0 : index
    %c0_79 = arith.constant 0 : index
    %155 = vector.load %arg7[%c0_78, %c0_79] : memref<100x384xf32, #tpu.memory_space<vmem>>, vector<100x384xf32>
    %cst_80 = arith.constant dense<0.000000e+00> : vector<16x384xf32>
    %156 = tpu.matmul %154, %155, %cst_80 {dimension_numbers = #tpu.dot_dimension_numbers<[1], [0], [0], [1], [0, 0, 1, 1], [], []>} : vector<16x100xf32>, vector<100x384xf32>, vector<16x384xf32> -> vector<16x384xf32>
    %c0_81 = arith.constant 0 : index
    %c0_82 = arith.constant 0 : index
    %157 = vector.load %arg9[%c0_81, %c0_82] : memref<1x384xf32, #tpu.memory_space<vmem>>, vector<1x384xf32>
    %158 = vector.broadcast %157 : vector<1x384xf32> to vector<16x384xf32>
    %159 = arith.addf %156, %158 : vector<16x384xf32>
    %c0_83 = arith.constant 0 : index
    %c0_84 = arith.constant 0 : index
    %160 = vector.load %arg8[%c0_83, %c0_84] : memref<128x384xf32, #tpu.memory_space<vmem>>, vector<128x384xf32>
    %cst_85 = arith.constant dense<0.000000e+00> : vector<16x384xf32>
    %161 = tpu.matmul %151, %160, %cst_85 {dimension_numbers = #tpu.dot_dimension_numbers<[1], [0], [0], [1], [0, 0, 1, 1], [], []>} : vector<16x128xf32>, vector<128x384xf32>, vector<16x384xf32> -> vector<16x384xf32>
    %c0_86 = arith.constant 0 : index
    %c0_87 = arith.constant 0 : index
    %162 = vector.load %arg10[%c0_86, %c0_87] : memref<1x384xf32, #tpu.memory_space<vmem>>, vector<1x384xf32>
    %163 = vector.broadcast %162 : vector<1x384xf32> to vector<16x384xf32>
    %164 = arith.addf %161, %163 : vector<16x384xf32>
    %165 = vector.extract_strided_slice %159 {offsets = [0, 0], sizes = [16, 256], strides = [1, 1]} : vector<16x384xf32> to vector<16x256xf32>
    %166 = vector.extract_strided_slice %164 {offsets = [0, 0], sizes = [16, 256], strides = [1, 1]} : vector<16x384xf32> to vector<16x256xf32>
    %167 = arith.addf %165, %166 : vector<16x256xf32>
    %168 = arith.negf %167 : vector<16x256xf32>
    %169 = math.exp %168 : vector<16x256xf32>
    %cst_88 = arith.constant 1.000000e+00 : f32
    %170 = vector.broadcast %cst_88 : f32 to vector<16x256xf32>
    %171 = arith.addf %170, %169 : vector<16x256xf32>
    %172 = arith.divf %170, %171 : vector<16x256xf32>
    %173 = vector.extract_strided_slice %172 {offsets = [0, 0], sizes = [16, 128], strides = [1, 1]} : vector<16x256xf32> to vector<16x128xf32>
    %174 = vector.extract_strided_slice %172 {offsets = [0, 128], sizes = [16, 128], strides = [1, 1]} : vector<16x256xf32> to vector<16x128xf32>
    %175 = vector.extract_strided_slice %159 {offsets = [0, 256], sizes = [16, 128], strides = [1, 1]} : vector<16x384xf32> to vector<16x128xf32>
    %176 = vector.extract_strided_slice %164 {offsets = [0, 256], sizes = [16, 128], strides = [1, 1]} : vector<16x384xf32> to vector<16x128xf32>
    %177 = arith.mulf %173, %176 : vector<16x128xf32>
    %178 = arith.addf %175, %177 : vector<16x128xf32>
    %179 = math.tanh %178 : vector<16x128xf32>
    %cst_89 = arith.constant 1.000000e+00 : f32
    %180 = vector.broadcast %cst_89 : f32 to vector<16x128xf32>
    %181 = arith.subf %180, %174 : vector<16x128xf32>
    %182 = arith.mulf %181, %179 : vector<16x128xf32>
    %183 = arith.mulf %174, %151 : vector<16x128xf32>
    %184 = arith.addf %182, %183 : vector<16x128xf32>
    %c1136 = arith.constant 1136 : index
    %c0_90 = arith.constant 0 : index
    %185 = vector.load %arg18[%c1136, %c0_90] : memref<1344x100xf32, #tpu.memory_space<vmem>>, vector<8x100xf32>
    %c1144 = arith.constant 1144 : index
    %c0_91 = arith.constant 0 : index
    %186 = vector.load %arg18[%c1144, %c0_91] : memref<1344x100xf32, #tpu.memory_space<vmem>>, vector<8x100xf32>
    %187 = tpu.concatenate %185, %186 in 0 : vector<8x100xf32>, vector<8x100xf32> -> vector<16x100xf32>
    %c0_92 = arith.constant 0 : index
    %c0_93 = arith.constant 0 : index
    %188 = vector.load %arg7[%c0_92, %c0_93] : memref<100x384xf32, #tpu.memory_space<vmem>>, vector<100x384xf32>
    %cst_94 = arith.constant dense<0.000000e+00> : vector<16x384xf32>
    %189 = tpu.matmul %187, %188, %cst_94 {dimension_numbers = #tpu.dot_dimension_numbers<[1], [0], [0], [1], [0, 0, 1, 1], [], []>} : vector<16x100xf32>, vector<100x384xf32>, vector<16x384xf32> -> vector<16x384xf32>
    %c0_95 = arith.constant 0 : index
    %c0_96 = arith.constant 0 : index
    %190 = vector.load %arg9[%c0_95, %c0_96] : memref<1x384xf32, #tpu.memory_space<vmem>>, vector<1x384xf32>
    %191 = vector.broadcast %190 : vector<1x384xf32> to vector<16x384xf32>
    %192 = arith.addf %189, %191 : vector<16x384xf32>
    %c0_97 = arith.constant 0 : index
    %c0_98 = arith.constant 0 : index
    %193 = vector.load %arg8[%c0_97, %c0_98] : memref<128x384xf32, #tpu.memory_space<vmem>>, vector<128x384xf32>
    %cst_99 = arith.constant dense<0.000000e+00> : vector<16x384xf32>
    %194 = tpu.matmul %184, %193, %cst_99 {dimension_numbers = #tpu.dot_dimension_numbers<[1], [0], [0], [1], [0, 0, 1, 1], [], []>} : vector<16x128xf32>, vector<128x384xf32>, vector<16x384xf32> -> vector<16x384xf32>
    %c0_100 = arith.constant 0 : index
    %c0_101 = arith.constant 0 : index
    %195 = vector.load %arg10[%c0_100, %c0_101] : memref<1x384xf32, #tpu.memory_space<vmem>>, vector<1x384xf32>
    %196 = vector.broadcast %195 : vector<1x384xf32> to vector<16x384xf32>
    %197 = arith.addf %194, %196 : vector<16x384xf32>
    %198 = vector.extract_strided_slice %192 {offsets = [0, 0], sizes = [16, 256], strides = [1, 1]} : vector<16x384xf32> to vector<16x256xf32>
    %199 = vector.extract_strided_slice %197 {offsets = [0, 0], sizes = [16, 256], strides = [1, 1]} : vector<16x384xf32> to vector<16x256xf32>
    %200 = arith.addf %198, %199 : vector<16x256xf32>
    %201 = arith.negf %200 : vector<16x256xf32>
    %202 = math.exp %201 : vector<16x256xf32>
    %cst_102 = arith.constant 1.000000e+00 : f32
    %203 = vector.broadcast %cst_102 : f32 to vector<16x256xf32>
    %204 = arith.addf %203, %202 : vector<16x256xf32>
    %205 = arith.divf %203, %204 : vector<16x256xf32>
    %206 = vector.extract_strided_slice %205 {offsets = [0, 0], sizes = [16, 128], strides = [1, 1]} : vector<16x256xf32> to vector<16x128xf32>
    %207 = vector.extract_strided_slice %205 {offsets = [0, 128], sizes = [16, 128], strides = [1, 1]} : vector<16x256xf32> to vector<16x128xf32>
    %208 = vector.extract_strided_slice %192 {offsets = [0, 256], sizes = [16, 128], strides = [1, 1]} : vector<16x384xf32> to vector<16x128xf32>
    %209 = vector.extract_strided_slice %197 {offsets = [0, 256], sizes = [16, 128], strides = [1, 1]} : vector<16x384xf32> to vector<16x128xf32>
    %210 = arith.mulf %206, %209 : vector<16x128xf32>
    %211 = arith.addf %208, %210 : vector<16x128xf32>
    %212 = math.tanh %211 : vector<16x128xf32>
    %cst_103 = arith.constant 1.000000e+00 : f32
    %213 = vector.broadcast %cst_103 : f32 to vector<16x128xf32>
    %214 = arith.subf %213, %207 : vector<16x128xf32>
    %215 = arith.mulf %214, %212 : vector<16x128xf32>
    %216 = arith.mulf %207, %184 : vector<16x128xf32>
    %217 = arith.addf %215, %216 : vector<16x128xf32>
    %c1328 = arith.constant 1328 : index
    %c0_104 = arith.constant 0 : index
    %218 = vector.load %arg18[%c1328, %c0_104] : memref<1344x100xf32, #tpu.memory_space<vmem>>, vector<8x100xf32>
    %c1336 = arith.constant 1336 : index
    %c0_105 = arith.constant 0 : index
    %219 = vector.load %arg18[%c1336, %c0_105] : memref<1344x100xf32, #tpu.memory_space<vmem>>, vector<8x100xf32>
    %220 = tpu.concatenate %218, %219 in 0 : vector<8x100xf32>, vector<8x100xf32> -> vector<16x100xf32>
    %c0_106 = arith.constant 0 : index
    %c0_107 = arith.constant 0 : index
    %221 = vector.load %arg7[%c0_106, %c0_107] : memref<100x384xf32, #tpu.memory_space<vmem>>, vector<100x384xf32>
    %cst_108 = arith.constant dense<0.000000e+00> : vector<16x384xf32>
    %222 = tpu.matmul %220, %221, %cst_108 {dimension_numbers = #tpu.dot_dimension_numbers<[1], [0], [0], [1], [0, 0, 1, 1], [], []>} : vector<16x100xf32>, vector<100x384xf32>, vector<16x384xf32> -> vector<16x384xf32>
    %c0_109 = arith.constant 0 : index
    %c0_110 = arith.constant 0 : index
    %223 = vector.load %arg9[%c0_109, %c0_110] : memref<1x384xf32, #tpu.memory_space<vmem>>, vector<1x384xf32>
    %224 = vector.broadcast %223 : vector<1x384xf32> to vector<16x384xf32>
    %225 = arith.addf %222, %224 : vector<16x384xf32>
    %c0_111 = arith.constant 0 : index
    %c0_112 = arith.constant 0 : index
    %226 = vector.load %arg8[%c0_111, %c0_112] : memref<128x384xf32, #tpu.memory_space<vmem>>, vector<128x384xf32>
    %cst_113 = arith.constant dense<0.000000e+00> : vector<16x384xf32>
    %227 = tpu.matmul %217, %226, %cst_113 {dimension_numbers = #tpu.dot_dimension_numbers<[1], [0], [0], [1], [0, 0, 1, 1], [], []>} : vector<16x128xf32>, vector<128x384xf32>, vector<16x384xf32> -> vector<16x384xf32>
    %c0_114 = arith.constant 0 : index
    %c0_115 = arith.constant 0 : index
    %228 = vector.load %arg10[%c0_114, %c0_115] : memref<1x384xf32, #tpu.memory_space<vmem>>, vector<1x384xf32>
    %229 = vector.broadcast %228 : vector<1x384xf32> to vector<16x384xf32>
    %230 = arith.addf %227, %229 : vector<16x384xf32>
    %231 = vector.extract_strided_slice %225 {offsets = [0, 0], sizes = [16, 256], strides = [1, 1]} : vector<16x384xf32> to vector<16x256xf32>
    %232 = vector.extract_strided_slice %230 {offsets = [0, 0], sizes = [16, 256], strides = [1, 1]} : vector<16x384xf32> to vector<16x256xf32>
    %233 = arith.addf %231, %232 : vector<16x256xf32>
    %234 = arith.negf %233 : vector<16x256xf32>
    %235 = math.exp %234 : vector<16x256xf32>
    %cst_116 = arith.constant 1.000000e+00 : f32
    %236 = vector.broadcast %cst_116 : f32 to vector<16x256xf32>
    %237 = arith.addf %236, %235 : vector<16x256xf32>
    %238 = arith.divf %236, %237 : vector<16x256xf32>
    %239 = vector.extract_strided_slice %238 {offsets = [0, 0], sizes = [16, 128], strides = [1, 1]} : vector<16x256xf32> to vector<16x128xf32>
    %240 = vector.extract_strided_slice %238 {offsets = [0, 128], sizes = [16, 128], strides = [1, 1]} : vector<16x256xf32> to vector<16x128xf32>
    %241 = vector.extract_strided_slice %225 {offsets = [0, 256], sizes = [16, 128], strides = [1, 1]} : vector<16x384xf32> to vector<16x128xf32>
    %242 = vector.extract_strided_slice %230 {offsets = [0, 256], sizes = [16, 128], strides = [1, 1]} : vector<16x384xf32> to vector<16x128xf32>
    %243 = arith.mulf %239, %242 : vector<16x128xf32>
    %244 = arith.addf %241, %243 : vector<16x128xf32>
    %245 = math.tanh %244 : vector<16x128xf32>
    %cst_117 = arith.constant 1.000000e+00 : f32
    %246 = vector.broadcast %cst_117 : f32 to vector<16x128xf32>
    %247 = arith.subf %246, %240 : vector<16x128xf32>
    %248 = arith.mulf %247, %245 : vector<16x128xf32>
    %249 = arith.mulf %240, %217 : vector<16x128xf32>
    %250 = arith.addf %248, %249 : vector<16x128xf32>
    %251 = vector.extract_strided_slice %18 {offsets = [0, 0], sizes = [8, 50], strides = [1, 1]} : vector<8x128xf32> to vector<8x50xf32>
    %252 = vector.extract_strided_slice %250 {offsets = [0, 0], sizes = [8, 13], strides = [1, 1]} : vector<16x128xf32> to vector<8x13xf32>
    %253 = vector.extract_strided_slice %250 {offsets = [8, 0], sizes = [8, 13], strides = [1, 1]} : vector<16x128xf32> to vector<8x13xf32>
    %cst_118 = arith.constant 0.000000e+00 : f32
    %254 = vector.broadcast %cst_118 : f32 to vector<8x52xf32>
    %255 = tpu.concatenate %251, %252, %253, %254 in 1 : vector<8x50xf32>, vector<8x13xf32>, vector<8x13xf32>, vector<8x52xf32> -> vector<8x128xf32>
    %c1336_119 = arith.constant 1336 : index
    %c16 = arith.constant 16 : index
    %256 = vector.load %arg0[%c1336_119, %c16] : memref<1344x40xf32, #tpu.memory_space<vmem>>, vector<8x8xf32>
    %c0_120 = arith.constant 0 : index
    %c0_121 = arith.constant 0 : index
    %257 = vector.load %arg11[%c0_120, %c0_121] : memref<8x384xf32, #tpu.memory_space<vmem>>, vector<8x384xf32>
    %cst_122 = arith.constant dense<0.000000e+00> : vector<8x384xf32>
    %258 = tpu.matmul %256, %257, %cst_122 {dimension_numbers = #tpu.dot_dimension_numbers<[1], [0], [0], [1], [0, 0, 1, 1], [], []>} : vector<8x8xf32>, vector<8x384xf32>, vector<8x384xf32> -> vector<8x384xf32>
    %c0_123 = arith.constant 0 : index
    %c0_124 = arith.constant 0 : index
    %259 = vector.load %arg13[%c0_123, %c0_124] : memref<1x384xf32, #tpu.memory_space<vmem>>, vector<1x384xf32>
    %260 = vector.broadcast %259 : vector<1x384xf32> to vector<8x384xf32>
    %261 = arith.addf %258, %260 : vector<8x384xf32>
    %c0_125 = arith.constant 0 : index
    %c0_126 = arith.constant 0 : index
    %262 = vector.load %arg12[%c0_125, %c0_126] : memref<128x384xf32, #tpu.memory_space<vmem>>, vector<128x384xf32>
    %cst_127 = arith.constant dense<0.000000e+00> : vector<8x384xf32>
    %263 = tpu.matmul %255, %262, %cst_127 {dimension_numbers = #tpu.dot_dimension_numbers<[1], [0], [0], [1], [0, 0, 1, 1], [], []>} : vector<8x128xf32>, vector<128x384xf32>, vector<8x384xf32> -> vector<8x384xf32>
    %c0_128 = arith.constant 0 : index
    %c0_129 = arith.constant 0 : index
    %264 = vector.load %arg14[%c0_128, %c0_129] : memref<1x384xf32, #tpu.memory_space<vmem>>, vector<1x384xf32>
    %265 = vector.broadcast %264 : vector<1x384xf32> to vector<8x384xf32>
    %266 = arith.addf %263, %265 : vector<8x384xf32>
    %267 = vector.extract_strided_slice %261 {offsets = [0, 0], sizes = [8, 256], strides = [1, 1]} : vector<8x384xf32> to vector<8x256xf32>
    %268 = vector.extract_strided_slice %266 {offsets = [0, 0], sizes = [8, 256], strides = [1, 1]} : vector<8x384xf32> to vector<8x256xf32>
    %269 = arith.addf %267, %268 : vector<8x256xf32>
    %270 = arith.negf %269 : vector<8x256xf32>
    %271 = math.exp %270 : vector<8x256xf32>
    %cst_130 = arith.constant 1.000000e+00 : f32
    %272 = vector.broadcast %cst_130 : f32 to vector<8x256xf32>
    %273 = arith.addf %272, %271 : vector<8x256xf32>
    %274 = arith.divf %272, %273 : vector<8x256xf32>
    %275 = vector.extract_strided_slice %274 {offsets = [0, 0], sizes = [8, 128], strides = [1, 1]} : vector<8x256xf32> to vector<8x128xf32>
    %276 = vector.extract_strided_slice %274 {offsets = [0, 128], sizes = [8, 128], strides = [1, 1]} : vector<8x256xf32> to vector<8x128xf32>
    %277 = vector.extract_strided_slice %261 {offsets = [0, 256], sizes = [8, 128], strides = [1, 1]} : vector<8x384xf32> to vector<8x128xf32>
    %278 = vector.extract_strided_slice %266 {offsets = [0, 256], sizes = [8, 128], strides = [1, 1]} : vector<8x384xf32> to vector<8x128xf32>
    %279 = arith.mulf %275, %278 : vector<8x128xf32>
    %280 = arith.addf %277, %279 : vector<8x128xf32>
    %281 = math.tanh %280 : vector<8x128xf32>
    %cst_131 = arith.constant 1.000000e+00 : f32
    %282 = vector.broadcast %cst_131 : f32 to vector<8x128xf32>
    %283 = arith.subf %282, %276 : vector<8x128xf32>
    %284 = arith.mulf %283, %281 : vector<8x128xf32>
    %285 = arith.mulf %276, %255 : vector<8x128xf32>
    %286 = arith.addf %284, %285 : vector<8x128xf32>
    %c0_132 = arith.constant 0 : index
    %c0_133 = arith.constant 0 : index
    %287 = vector.load %arg15[%c0_132, %c0_133] : memref<128x1xf32, #tpu.memory_space<vmem>>, vector<128x1xf32>
    %cst_134 = arith.constant dense<0.000000e+00> : vector<8x1xf32>
    %288 = tpu.matmul %286, %287, %cst_134 {dimension_numbers = #tpu.dot_dimension_numbers<[1], [0], [0], [1], [0, 0, 1, 1], [], []>} : vector<8x128xf32>, vector<128x1xf32>, vector<8x1xf32> -> vector<8x1xf32>
    %c0_135 = arith.constant 0 : index
    %c0_136 = arith.constant 0 : index
    %289 = vector.load %arg16[%c0_135, %c0_136] : memref<1x1xf32, #tpu.memory_space<vmem>>, vector<1x1xf32>
    %290 = vector.broadcast %289 : vector<1x1xf32> to vector<8x1xf32>
    %291 = arith.addf %288, %290 : vector<8x1xf32>
    %292 = vector.extract_strided_slice %291 {offsets = [0, 0], sizes = [2, 1], strides = [1, 1]} : vector<8x1xf32> to vector<2x1xf32>
    %c0_137 = arith.constant 0 : index
    %c0_138 = arith.constant 0 : index
    %293 = vector.load %arg17[%c0_137, %c0_138] : memref<2x1xf32, #tpu.memory_space<vmem>>, vector<2x1xf32>
    tpu.vector_store %arg17[%c0_137, %c0_138], %292 {strides = array<i32>} : memref<2x1xf32, #tpu.memory_space<vmem>>, vector<2x1xf32>,
    return
  }
}

</mosaic_0001>

<bundles_post_ra>
// kernel: deepcm_forward.1
= control target key start
LH: loop header
LB: loop body
LE: loop exit
PB: predicated region body
PF: predicated region fallthrough
CT: control target
= control target key end

     0   :  { %vm235_vm0 = vcmask 326656   ;;  %vm2317_vm1 = vcmask 1043456   ;;  %vm1429_vm2 = vcmask 818176   ;;  %s12499_s1 = inlined_call_operand.vmem [shape: f32[40,100], index: 1, kind: input, shape index: {}]   ;;  %s12500_s4 = inlined_call_operand.vmem [shape: f32[128,384], index: 4, kind: input, shape index: {}]   ;;  %s12501_s6 = inlined_call_operand.vmem [shape: f32[1,384], index: 6, kind: input, shape index: {}]   ;;  %s12502_s7 = inlined_call_operand.vmem [shape: f32[100,384], index: 7, kind: input, shape index: {}]   ;;  %s12503_s8 = inlined_call_operand.vmem [shape: f32[128,384], index: 8, kind: input, shape index: {}]   ;;  %s12504_s9 = inlined_call_operand.vmem [shape: f32[1,384], index: 9, kind: input, shape index: {}]   ;;  %s12505_s10 = inlined_call_operand.vmem [shape: f32[1,384], index: 10, kind: input, shape index: {}]   ;;  %s12506_s11 = inlined_call_operand.vmem [shape: f32[8,384], index: 11, kind: input, shape index: {}]   ;;  %s12507_s12 = inlined_call_operand.vmem [shape: f32[128,384], index: 12, kind: input, shape index: {}]   ;;  %s12508_s13 = inlined_call_operand.vmem [shape: f32[1,384], index: 13, kind: input, shape index: {}]   ;;  %s12509_s14 = inlined_call_operand.vmem [shape: f32[1,384], index: 14, kind: input, shape index: {}]   ;;  %s12510_s15 = inlined_call_operand.vmem [shape: f32[128,1], index: 15, kind: input, shape index: {}]   ;;  %s12511_s16 = inlined_call_operand.<no memory space> [shape: f32[1,1], index: 16, kind: input, shape index: {}]   ;;  %s12512_s17 = inlined_call_operand.vmem [shape: f32[2,1], index: 17, kind: output, shape index: {}]   ;;  %s12513_s2 = inlined_call_operand.vmem [shape: f32[1,100], index: 2, kind: input, shape index: {}]   ;;  %s12514_s0 = inlined_call_operand.vmem [shape: f32[1344,40], index: 0, kind: input, shape index: {}]   ;;  %s12515_s3 = inlined_call_operand.vmem [shape: f32[100,384], index: 3, kind: input, shape index: {}]   ;;  %s12516_s5 = inlined_call_operand.vmem [shape: f32[1,384], index: 5, kind: input, shape index: {}]  }
   0x1   :  { %12721 = sst [smem:[#allocation74_spill]] %s12499_s1  ;;  %v22_v0 = vstv %s12511_s16  ;;  %v58_v6 = vld [vmem:[%s12514_s0] sm:$0xff]  ;;  %v59_v7 = vld [vmem:[%s12514_s0 + $0x8] sm:$0xff]  ;;  %v60_v8 = vld [vmem:[%s12514_s0 + $0x10] sm:$0xff]  ;;  %s10066_s1 = smov 0  }
   0x2   :  { %12722 = sst [smem:[#allocation75_spill]] %s12500_s4  ;;  %23 = vst [vmem:[#allocation4] sm:$0x1] %v22_v0  ;;  %v61_v9 = vld [vmem:[%s12514_s0 + $0x18] sm:$0xff]  ;;  %v62_v10 = vld [vmem:[%s12514_s0 + $0x20] sm:$0xff]  ;;  %v63_v11 = vld [vmem:[%s12514_s0 + $0x28] sm:$0xff] }
   0x3   :  { %s12723_s28 = sld [smem:[#allocation74_spill]]  ;;  %v64_v12 = vld [vmem:[%s12514_s0 + $0x30] sm:$0xff]  ;;  %v65_v13 = vld [vmem:[%s12514_s0 + $0x38] sm:$0xff]  ;;  %v66_v14 = vld [vmem:[%s12514_s0 + $0x40] sm:$0xff] }
   0x4   :  { %v67_v15 = vld [vmem:[%s12514_s0 + $0x48] sm:$0xff]  ;;  %v68_v16 = vld [vmem:[%s12514_s0 + $0x50] sm:$0xff]  ;;  %v1802_v17 = vld [vmem:[%s12515_s3 + $0x120] sm:$0xf] }
   0x5   :  { %v1803_v18 = vld [vmem:[%s12515_s3 + $0x128] sm:$0xf]  ;;  %6844 = vmatpush.msk.msra.mxu1 %vm2317_vm1, %v1802_v17  ;;  %v1804_v20 = vld [vmem:[%s12515_s3 + $0x130] sm:$0xf]  ;;  %v1801_v22 = vld [vmem:[%s12515_s3 + $0x118] sm:$0xff] }
   0x6   :  { %v1799_v19 = vld [vmem:[%s12515_s3 + $0x108] sm:$0xff]  ;;  %7013 = vmatpush.msk.msra.mxu2 %vm2317_vm1, %v1803_v18  ;;  %v1800_v21 = vld [vmem:[%s12515_s3 + $0x110] sm:$0xff]  ;;  %7182 = vmatpush.msk.msra.mxu3 %vm2317_vm1, %v1804_v20  ;;  %v1797_v24 = vld [vmem:[%s12515_s3 + $0xf8] sm:$0xff] }
   0x7   :  { %v1796_v23 = vld [vmem:[%s12515_s3 + $0xf0] sm:$0xff]  ;;  %2331 = vmatpush.msra.mxu1 %v1799_v19  ;;  %v1798_v25 = vld [vmem:[%s12515_s3 + $0x100] sm:$0xff]  ;;  %v1793_v26 = vld [vmem:[%s12515_s3 + $0xd8] sm:$0xff] }
   0x8   :  { %2852 = vmatpush.msra.mxu2 %v1800_v21  ;;  %3373 = vmatpush.msra.mxu3 %v1801_v22  ;;  %v1794_v27 = vld [vmem:[%s12515_s3 + $0xe0] sm:$0xff]  ;;  %v69_v28 = vld [vmem:[%s12514_s0 + $0x58] sm:$0xff]  ;;  %v1795_v29 = vld [vmem:[%s12515_s3 + $0xe8] sm:$0xff] }
   0x9   :  { %v230_v1 = vld [vmem:[%s12723_s28 + $0x20] sm:$0xff]  ;;  %v229_v2 = vld [vmem:[%s12723_s28 + $0x18] sm:$0xff]  ;;  %v228_v3 = vld [vmem:[%s12723_s28 + $0x10] sm:$0xff]  ;;  %2332 = vmatpush.msra.mxu1 %v1796_v23 }
   0xa   :  { %751 = vmatpush.msra.mxu0 %v230_v1  ;;  %v227_v4 = vld [vmem:[%s12723_s28 + $0x8] sm:$0xff]  ;;  %v226_v5 = vld [vmem:[%s12723_s28] sm:$0xff]  ;;  %2853 = vmatpush.msra.mxu2 %v1797_v24  ;;  %v1792_v32 = vld [vmem:[%s12515_s3 + $0xd0] sm:$0xff] }
   0xb   :  { %3374 = vmatpush.msra.mxu3 %v1798_v25  ;;  %2333 = vmatpush.msra.mxu1 %v1793_v26  ;;  %v1790_v30 = vld [vmem:[%s12515_s3 + $0xc0] sm:$0xff]  ;;  %v1791_v31 = vld [vmem:[%s12515_s3 + $0xc8] sm:$0xff]  ;;  %v1788_v34 = vld [vmem:[%s12515_s3 + $0xb0] sm:$0xff] }
   0xc   :  { %752 = vmatpush.msra.mxu0 %v229_v2  ;;  %2854 = vmatpush.msra.mxu2 %v1794_v27  ;;  %v1787_v33 = vld [vmem:[%s12515_s3 + $0xa8] sm:$0xff]  ;;  %v1789_v35 = vld [vmem:[%s12515_s3 + $0xb8] sm:$0xff]  ;;  %v1784_v36 = vld [vmem:[%s12515_s3 + $0x90] sm:$0xff] }
   0xd   :  { %3375 = vmatpush.msra.mxu3 %v1795_v29  ;;  %2334 = vmatpush.msra.mxu1 %v1790_v30  ;;  %v1785_v37 = vld [vmem:[%s12515_s3 + $0x98] sm:$0xff]  ;;  %v1786_v38 = vld [vmem:[%s12515_s3 + $0xa0] sm:$0xff]  ;;  %v1783_v42 = vld [vmem:[%s12515_s3 + $0x88] sm:$0xff] }
   0xe   :  { %753 = vmatpush.msra.mxu0 %v228_v3  ;;  %2855 = vmatpush.msra.mxu2 %v1791_v31  ;;  %v70_v39 = vld [vmem:[%s12514_s0 + $0x60] sm:$0xff]  ;;  %v1781_v40 = vld [vmem:[%s12515_s3 + $0x78] sm:$0xff]  ;;  %v1779_v44 = vld [vmem:[%s12515_s3 + $0x68] sm:$0xff] }
   0xf   :  { %3376 = vmatpush.msra.mxu3 %v1792_v32  ;;  %2335 = vmatpush.msra.mxu1 %v1787_v33  ;;  %v1782_v41 = vld [vmem:[%s12515_s3 + $0x80] sm:$0xff]  ;;  %v1780_v45 = vld [vmem:[%s12515_s3 + $0x70] sm:$0xff]  ;;  %v1775_v46 = vld [vmem:[%s12515_s3 + $0x48] sm:$0xff] }
  0x10   :  { %754 = vmatpush.msra.mxu0 %v227_v4  ;;  %2856 = vmatpush.msra.mxu2 %v1788_v34  ;;  %v1778_v43 = vld [vmem:[%s12515_s3 + $0x60] sm:$0xff]  ;;  %v1776_v47 = vld [vmem:[%s12515_s3 + $0x50] sm:$0xff]  ;;  %v1777_v48 = vld [vmem:[%s12515_s3 + $0x58] sm:$0xff] }
  0x11   :  { %3377 = vmatpush.msra.mxu3 %v1789_v35  ;;  %2336 = vmatpush.msra.mxu1 %v1784_v36  ;;  %v1772_v49 = vld [vmem:[%s12515_s3 + $0x30] sm:$0xff]  ;;  %v1773_v50 = vld [vmem:[%s12515_s3 + $0x38] sm:$0xff]  ;;  %v1774_v51 = vld [vmem:[%s12515_s3 + $0x40] sm:$0xff] }
  0x12   :  { %755 = vmatpush.msra.mxu0 %v226_v5  ;;  %2857 = vmatpush.msra.mxu2 %v1785_v37  ;;  %v71_v52 = vld [vmem:[%s12514_s0 + $0x68] sm:$0xff]  ;;  %v1769_v53 = vld [vmem:[%s12515_s3 + $0x18] sm:$0xff]  ;;  %v1770_v54 = vld [vmem:[%s12515_s3 + $0x20] sm:$0xff] }
  0x13   :  { %6676 = vmatmul.msk.f32.vlgmr.msra.gmra.mxu0 %vm235_vm0, %v58_v6  ;;  %3378 = vmatpush.msra.mxu3 %v1786_v38  ;;  %v1771_v55 = vld [vmem:[%s12515_s3 + $0x28] sm:$0xff]  ;;  %v1766_v56 = vld [vmem:[%s12515_s3] sm:$0xff]  ;;  %v1768_v58 = vld [vmem:[%s12515_s3 + $0x10] sm:$0xff] }
  0x14   :  { %2337 = vmatpush.msra.mxu1 %v1781_v40  ;;  %2858 = vmatpush.msra.mxu2 %v1782_v41  ;;  %v1767_v57 = vld [vmem:[%s12515_s3 + $0x8] sm:$0xff]  ;;  %v72_v59 = vld [vmem:[%s12514_s0 + $0x70] sm:$0xff]  ;;  %v73_v60 = vld [vmem:[%s12514_s0 + $0x78] sm:$0xff] }
  0x15   :  { %3379 = vmatpush.msra.mxu3 %v1783_v42  ;;  %v8076_v61 = vld [vmem:[%s12513_s2] ss:$0 sm:$0xff]  ;;  %v75_v3 = vld [vmem:[%s12514_s0 + $0x88] sm:$0xff]  ;;  %v81_v33 = vld [vmem:[%s12514_s0 + $0xb8] sm:$0xff] }
  0x16   :  { %2338 = vmatpush.msra.mxu1 %v1778_v43  ;;  %2859 = vmatpush.msra.mxu2 %v1779_v44  ;;  %v74_v63 = vld [vmem:[%s12514_s0 + $0x80] sm:$0xff]  ;;  %v79_v23 = vld [vmem:[%s12514_s0 + $0xa8] sm:$0xff] }
  0x17   :  { %3380 = vmatpush.msra.mxu3 %v1780_v45  ;;  %v78_v18 = vld [vmem:[%s12514_s0 + $0xa0] sm:$0xff]  ;;  %v83_v43 = vld [vmem:[%s12514_s0 + $0xc8] sm:$0xff] }
  0x18   :  { %2339 = vmatpush.msra.mxu1 %v1775_v46  ;;  %2860 = vmatpush.msra.mxu2 %v1776_v47  ;;  %v82_v38 = vld [vmem:[%s12514_s0 + $0xc0] sm:$0xff] }
  0x19   :  { %3381 = vmatpush.msra.mxu3 %v1777_v48  ;;  %v84_v48 = vld [vmem:[%s12514_s0 + $0xd0] sm:$0xff] }
  0x1a   :  { %2340 = vmatpush.msra.mxu1 %v1772_v49  ;;  %2861 = vmatpush.msra.mxu2 %v1773_v50 }
  0x1b   :  { %6677 = vmatmul.msk.f32.gmra.mxu0 %vm235_vm0, %v59_v7  ;;  %3382 = vmatpush.msra.mxu3 %v1774_v51 }
  0x1c   :  { %2341 = vmatpush.msra.mxu1 %v1769_v53  ;;  %2862 = vmatpush.msra.mxu2 %v1770_v54  ;;  %v85_v53 = vld [vmem:[%s12514_s0 + $0xd8] sm:$0xff] }
  0x1d   :  { %3383 = vmatpush.msra.mxu3 %v1771_v55 }
  0x1e   :  { %2342 = vmatpush.msra.mxu1 %v1766_v56  ;;  %2863 = vmatpush.msra.mxu2 %v1767_v57 }
  0x1f   :  { %3384 = vmatpush.msra.mxu3 %v1768_v58  ;;  %v86_v58 = vld [vmem:[%s12514_s0 + $0xe0] sm:$0xff] }
  0x23   :  { %6678 = vmatmul.msk.f32.gmra.mxu0 %vm235_vm0, %v60_v8  ;;  %v76_v8 = vld [vmem:[%s12514_s0 + $0x90] sm:$0xff] }
  0x2b   :  { %6679 = vmatmul.msk.f32.gmra.mxu0 %vm235_vm0, %v61_v9 }
  0x33   :  { %6680 = vmatmul.msk.f32.gmra.mxu0 %vm235_vm0, %v62_v10 }
  0x3b   :  { %6681 = vmatmul.msk.f32.gmra.mxu0 %vm235_vm0, %v63_v11 }
  0x43   :  { %6682 = vmatmul.msk.f32.gmra.mxu0 %vm235_vm0, %v64_v12 }
  0x4b   :  { %6683 = vmatmul.msk.f32.gmra.mxu0 %vm235_vm0, %v65_v13  ;;  %v77_v13 = vld [vmem:[%s12514_s0 + $0x98] sm:$0xff] }
  0x53   :  { %6684 = vmatmul.msk.f32.gmra.mxu0 %vm235_vm0, %v66_v14 }
  0x5b   :  { %6685 = vmatmul.msk.f32.gmra.mxu0 %vm235_vm0, %v67_v15 }
  0x63   :  { %6686 = vmatmul.msk.f32.gmra.mxu0 %vm235_vm0, %v68_v16 }
  0x6b   :  { %6687 = vmatmul.msk.f32.gmra.mxu0 %vm235_vm0, %v69_v28  ;;  %v80_v28 = vld [vmem:[%s12514_s0 + $0xb0] sm:$0xff] }
  0x73   :  { %6688 = vmatmul.msk.f32.gmra.mxu0 %vm235_vm0, %v70_v39 }
  0x7b   :  { %6689 = vmatmul.msk.f32.gmra.mxu0 %vm235_vm0, %v71_v52 }
  0x83   :  { %6690 = vmatmul.msk.f32.gmra.mxu0 %vm235_vm0, %v72_v59 }
  0x8b   :  { %6691 = vmatmul.msk.f32.gmra.mxu0 %vm235_vm0, %v73_v60 }
  0x90   :  { %v757_v62 = vpop.f32.mrf.mxu0 }
  0x91   :  { %v758_v0 = vadd.f32 %v8076_v61, %v757_v62 }
  0x93   :  { %v1261_v1 = vmax.f32 %v758_v0, 0.0  ;;  %6692 = vmatmul.msk.f32.gmra.mxu0 %vm235_vm0, %v74_v63  ;;  %v87_v0 = vld [vmem:[%s12514_s0 + $0xe8] sm:$0xff] }
  0x95   :  { %1430 = vst.msk [vmem:[#allocation2] sm:$0xff] %vm1429_vm2, %v1261_v1 }
  0x98   :  { %v760_v2 = vpop.f32.mrf.mxu0 }
  0x99   :  { %v761_v4 = vadd.f32 %v8076_v61, %v760_v2 }
  0x9b   :  { %v1262_v5 = vmax.f32 %v761_v4, 0.0  ;;  %6693 = vmatmul.msk.f32.gmra.mxu0 %vm235_vm0, %v75_v3 }
  0x9c   :  { %v1598_v6 = vld [vmem:[#allocation2] sm:$0xff] }
  0x9d   :  { %1431 = vst.msk [vmem:[#allocation2 + $0x8] sm:$0xff] %vm1429_vm2, %v1262_v5  ;;  %6845 = vmatmul.msk.f32.vlgmr.msra.gmra.mxu1 %vm1429_vm2, %v1598_v6  ;;  %7014 = vmatmul.msk.f32.vlgmr.msra.gmra.mxu2 %vm1429_vm2, %v1598_v6  ;;  %v88_v5 = vld [vmem:[%s12514_s0 + $0xf0] sm:$0xff] }
  0x9e   :  { %7183 = vmatmul.msk.f32.vlgmr.msra.gmra.mxu3 %vm1429_vm2, %v1598_v6 }
  0xa0   :  { %v763_v7 = vpop.f32.mrf.mxu0 }
  0xa1   :  { %v764_v9 = vadd.f32 %v8076_v61, %v763_v7 }
  0xa3   :  { %v1263_v10 = vmax.f32 %v764_v9, 0.0  ;;  %6694 = vmatmul.msk.f32.gmra.mxu0 %vm235_vm0, %v76_v8 }
  0xa4   :  { %v1599_v11 = vld [vmem:[#allocation2 + $0x8] sm:$0xff] }
  0xa5   :  { %1432 = vst.msk [vmem:[#allocation2 + $0x10] sm:$0xff] %vm1429_vm2, %v1263_v10  ;;  %6846 = vmatmul.msk.f32.gmra.mxu1 %vm1429_vm2, %v1599_v11  ;;  %7015 = vmatmul.msk.f32.gmra.mxu2 %vm1429_vm2, %v1599_v11  ;;  %v89_v10 = vld [vmem:[%s12514_s0 + $0xf8] sm:$0xff] }
  0xa6   :  { %7184 = vmatmul.msk.f32.gmra.mxu3 %vm1429_vm2, %v1599_v11 }
  0xa8   :  { %v766_v12 = vpop.f32.mrf.mxu0 }
  0xa9   :  { %v767_v14 = vadd.f32 %v8076_v61, %v766_v12 }
  0xab   :  { %v1264_v15 = vmax.f32 %v767_v14, 0.0  ;;  %6695 = vmatmul.msk.f32.gmra.mxu0 %vm235_vm0, %v77_v13 }
  0xac   :  { %v1600_v16 = vld [vmem:[#allocation2 + $0x10] sm:$0xff] }
  0xad   :  { %1433 = vst.msk [vmem:[#allocation2 + $0x18] sm:$0xff] %vm1429_vm2, %v1264_v15  ;;  %6847 = vmatmul.msk.f32.gmra.mxu1 %vm1429_vm2, %v1600_v16  ;;  %7016 = vmatmul.msk.f32.gmra.mxu2 %vm1429_vm2, %v1600_v16  ;;  %v90_v15 = vld [vmem:[%s12514_s0 + $0x100] sm:$0xff] }
  0xae   :  { %7185 = vmatmul.msk.f32.gmra.mxu3 %vm1429_vm2, %v1600_v16 }
  0xb0   :  { %v769_v17 = vpop.f32.mrf.mxu0 }
  0xb1   :  { %v770_v19 = vadd.f32 %v8076_v61, %v769_v17 }
  0xb3   :  { %v1265_v20 = vmax.f32 %v770_v19, 0.0  ;;  %6696 = vmatmul.msk.f32.gmra.mxu0 %vm235_vm0, %v78_v18  ;;  %v1805_v19 = vld [vmem:[%s12516_s5] sm:$0x7] }
  0xb4   :  { %v1601_v21 = vld [vmem:[#allocation2 + $0x18] sm:$0xff] }
  0xb5   :  { %1434 = vst.msk [vmem:[#allocation2 + $0x20] sm:$0xff] %vm1429_vm2, %v1265_v20  ;;  %6848 = vmatmul.msk.f32.gmra.mxu1 %vm1429_vm2, %v1601_v21  ;;  %7017 = vmatmul.msk.f32.gmra.mxu2 %vm1429_vm2, %v1601_v21  ;;  %v8231_v20 = vperm.slane %v1805_v19, 0 }
  0xb6   :  { %7186 = vmatmul.msk.f32.gmra.mxu3 %vm1429_vm2, %v1601_v21 }
  0xb8   :  { %v772_v22 = vpop.f32.mrf.mxu0 }
  0xb9   :  { %v773_v24 = vadd.f32 %v8076_v61, %v772_v22  ;;  %v91_v22 = vld [vmem:[%s12514_s0 + $0x108] sm:$0xff] }
  0xbb   :  { %v1266_v25 = vmax.f32 %v773_v24, 0.0  ;;  %6697 = vmatmul.msk.f32.gmra.mxu0 %vm235_vm0, %v79_v23 }
  0xbc   :  { %v1602_v26 = vld [vmem:[#allocation2 + $0x20] sm:$0xff] }
  0xbd   :  { %1435 = vst.msk [vmem:[#allocation2 + $0x28] sm:$0xff] %vm1429_vm2, %v1266_v25  ;;  %6849 = vmatmul.msk.f32.gmra.mxu1 %vm1429_vm2, %v1602_v26  ;;  %7018 = vmatmul.msk.f32.gmra.mxu2 %vm1429_vm2, %v1602_v26 }
  0xbe   :  { %7187 = vmatmul.msk.f32.gmra.mxu3 %vm1429_vm2, %v1602_v26 }
  0xc0   :  { %v775_v27 = vpop.f32.mrf.mxu0 }
  0xc1   :  { %v776_v29 = vadd.f32 %v8076_v61, %v775_v27 }
  0xc3   :  { %v1267_v30 = vmax.f32 %v776_v29, 0.0  ;;  %6698 = vmatmul.msk.f32.gmra.mxu0 %vm235_vm0, %v80_v28  ;;  %v8242_v28 = vperm.slane %v1805_v19, 1  ;;  %v8245_v29 = vperm.slane %v1805_v19, 2 }
  0xc4   :  { %v1603_v31 = vld [vmem:[#allocation2 + $0x28] sm:$0xff] }
  0xc5   :  { %1436 = vst.msk [vmem:[#allocation2 + $0x30] sm:$0xff] %vm1429_vm2, %v1267_v30  ;;  %6850 = vmatmul.msk.f32.gmra.mxu1 %vm1429_vm2, %v1603_v31  ;;  %7019 = vmatmul.msk.f32.gmra.mxu2 %vm1429_vm2, %v1603_v31 }
  0xc6   :  { %7188 = vmatmul.msk.f32.gmra.mxu3 %vm1429_vm2, %v1603_v31 }
  0xc8   :  { %v778_v32 = vpop.f32.mrf.mxu0 }
  0xc9   :  { %v779_v34 = vadd.f32 %v8076_v61, %v778_v32  ;;  %v92_v32 = vld [vmem:[%s12514_s0 + $0x110] sm:$0xff] }
  0xcb   :  { %v1268_v35 = vmax.f32 %v779_v34, 0.0  ;;  %6699 = vmatmul.msk.f32.gmra.mxu0 %vm235_vm0, %v81_v33 }
  0xcc   :  { %v1604_v36 = vld [vmem:[#allocation2 + $0x30] sm:$0xff] }
  0xcd   :  { %1437 = vst.msk [vmem:[#allocation2 + $0x38] sm:$0xff] %vm1429_vm2, %v1268_v35  ;;  %6851 = vmatmul.msk.f32.gmra.mxu1 %vm1429_vm2, %v1604_v36  ;;  %7020 = vmatmul.msk.f32.gmra.mxu2 %vm1429_vm2, %v1604_v36 }
  0xce   :  { %7189 = vmatmul.msk.f32.gmra.mxu3 %vm1429_vm2, %v1604_v36 }
  0xd0   :  { %v781_v37 = vpop.f32.mrf.mxu0 }
  0xd1   :  { %v782_v39 = vadd.f32 %v8076_v61, %v781_v37 }
  0xd3   :  { %v1269_v40 = vmax.f32 %v782_v39, 0.0  ;;  %6700 = vmatmul.msk.f32.gmra.mxu0 %vm235_vm0, %v82_v38 }
  0xd4   :  { %v1605_v41 = vld [vmem:[#allocation2 + $0x38] sm:$0xff] }
  0xd5   :  { %1438 = vst.msk [vmem:[#allocation2 + $0x40] sm:$0xff] %vm1429_vm2, %v1269_v40  ;;  %6852 = vmatmul.msk.f32.gmra.mxu1 %vm1429_vm2, %v1605_v41  ;;  %7021 = vmatmul.msk.f32.gmra.mxu2 %vm1429_vm2, %v1605_v41 }
  0xd6   :  { %7190 = vmatmul.msk.f32.gmra.mxu3 %vm1429_vm2, %v1605_v41 }
  0xd8   :  { %v784_v42 = vpop.f32.mrf.mxu0 }
  0xd9   :  { %v785_v44 = vadd.f32 %v8076_v61, %v784_v42 }
  0xdb   :  { %v1270_v45 = vmax.f32 %v785_v44, 0.0  ;;  %6701 = vmatmul.msk.f32.gmra.mxu0 %vm235_vm0, %v83_v43  ;;  %v93_v43 = vld [vmem:[%s12514_s0 + $0x118] sm:$0xff] }
  0xdc   :  { %v1606_v46 = vld [vmem:[#allocation2 + $0x40] sm:$0xff] }
  0xdd   :  { %1439 = vst.msk [vmem:[#allocation2 + $0x48] sm:$0xff] %vm1429_vm2, %v1270_v45  ;;  %6853 = vmatmul.msk.f32.gmra.mxu1 %vm1429_vm2, %v1606_v46  ;;  %7022 = vmatmul.msk.f32.gmra.mxu2 %vm1429_vm2, %v1606_v46 }
  0xde   :  { %7191 = vmatmul.msk.f32.gmra.mxu3 %vm1429_vm2, %v1606_v46 }
  0xe0   :  { %v787_v47 = vpop.f32.mrf.mxu0 }
  0xe1   :  { %v788_v49 = vadd.f32 %v8076_v61, %v787_v47 }
  0xe3   :  { %v1271_v50 = vmax.f32 %v788_v49, 0.0  ;;  %6702 = vmatmul.msk.f32.gmra.mxu0 %vm235_vm0, %v84_v48 }
  0xe4   :  { %v1607_v51 = vld [vmem:[#allocation2 + $0x48] sm:$0xff] }
  0xe5   :  { %1440 = vst.msk [vmem:[#allocation2 + $0x50] sm:$0xff] %vm1429_vm2, %v1271_v50  ;;  %6854 = vmatmul.msk.f32.gmra.mxu1 %vm1429_vm2, %v1607_v51  ;;  %7023 = vmatmul.msk.f32.gmra.mxu2 %vm1429_vm2, %v1607_v51 }
  0xe6   :  { %7192 = vmatmul.msk.f32.gmra.mxu3 %vm1429_vm2, %v1607_v51 }
  0xe8   :  { %v790_v52 = vpop.f32.mrf.mxu0 }
  0xe9   :  { %v791_v54 = vadd.f32 %v8076_v61, %v790_v52 }
  0xeb   :  { %v1272_v55 = vmax.f32 %v791_v54, 0.0  ;;  %6703 = vmatmul.msk.f32.gmra.mxu0 %vm235_vm0, %v85_v53  ;;  %v94_v54 = vld [vmem:[%s12514_s0 + $0x120] sm:$0xff] }
  0xec   :  { %v1608_v56 = vld [vmem:[#allocation2 + $0x50] sm:$0xff] }
  0xed   :  { %1441 = vst.msk [vmem:[#allocation2 + $0x58] sm:$0xff] %vm1429_vm2, %v1272_v55  ;;  %6855 = vmatmul.msk.f32.gmra.mxu1 %vm1429_vm2, %v1608_v56  ;;  %7024 = vmatmul.msk.f32.gmra.mxu2 %vm1429_vm2, %v1608_v56 }
  0xee   :  { %7193 = vmatmul.msk.f32.gmra.mxu3 %vm1429_vm2, %v1608_v56 }
  0xf0   :  { %v793_v57 = vpop.f32.mrf.mxu0 }
  0xf1   :  { %v794_v59 = vadd.f32 %v8076_v61, %v793_v57 }
  0xf3   :  { %v1273_v60 = vmax.f32 %v794_v59, 0.0  ;;  %6704 = vmatmul.msk.f32.gmra.mxu0 %vm235_vm0, %v86_v58 }
  0xf4   :  { %v1609_v62 = vld [vmem:[#allocation2 + $0x58] sm:$0xff] }
  0xf5   :  { %1442 = vst.msk [vmem:[#allocation2 + $0x60] sm:$0xff] %vm1429_vm2, %v1273_v60  ;;  %6856 = vmatmul.msk.f32.gmra.mxu1 %vm1429_vm2, %v1609_v62  ;;  %7025 = vmatmul.msk.f32.gmra.mxu2 %vm1429_vm2, %v1609_v62 }
  0xf6   :  { %7194 = vmatmul.msk.f32.gmra.mxu3 %vm1429_vm2, %v1609_v62 }
  0xf8   :  { %v796_v63 = vpop.f32.mrf.mxu0 }
  0xf9   :  { %v797_v1 = vadd.f32 %v8076_v61, %v796_v63 }
  0xfb   :  { %v1274_v2 = vmax.f32 %v797_v1, 0.0  ;;  %6705 = vmatmul.msk.f32.gmra.mxu0 %vm235_vm0, %v87_v0 }
  0xfc   :  { %v1610_v3 = vld [vmem:[#allocation2 + $0x60] sm:$0xff] }
  0xfd   :  { %1443 = vst.msk [vmem:[#allocation2 + $0x68] sm:$0xff] %vm1429_vm2, %v1274_v2  ;;  %6857 = vmatmul.msk.f32.gmra.mxu1 %vm1429_vm2, %v1610_v3  ;;  %7026 = vmatmul.msk.f32.gmra.mxu2 %vm1429_vm2, %v1610_v3  ;;  %v95_v2 = vld [vmem:[%s12514_s0 + $0x128] sm:$0xff] }
  0xfe   :  { %7195 = vmatmul.msk.f32.gmra.mxu3 %vm1429_vm2, %v1610_v3 }
 0x100   :  { %v799_v4 = vpop.f32.mrf.mxu0 }
 0x101   :  { %v800_v6 = vadd.f32 %v8076_v61, %v799_v4 }
 0x103   :  { %v1275_v7 = vmax.f32 %v800_v6, 0.0  ;;  %6706 = vmatmul.msk.f32.gmra.mxu0 %vm235_vm0, %v88_v5 }
 0x104   :  { %v1611_v8 = vld [vmem:[#allocation2 + $0x68] sm:$0xff] }
 0x105   :  { %1444 = vst.msk [vmem:[#allocation2 + $0x70] sm:$0xff] %vm1429_vm2, %v1275_v7  ;;  %6858 = vmatmul.msk.f32.gmra.mxu1 %vm1429_vm2, %v1611_v8  ;;  %7027 = vmatmul.msk.f32.gmra.mxu2 %vm1429_vm2, %v1611_v8 }
 0x106   :  { %7196 = vmatmul.msk.f32.gmra.mxu3 %vm1429_vm2, %v1611_v8 }
 0x108   :  { %v802_v9 = vpop.f32.mrf.mxu0 }
 0x109   :  { %v803_v11 = vadd.f32 %v8076_v61, %v802_v9 }
 0x10b   :  { %v1276_v12 = vmax.f32 %v803_v11, 0.0  ;;  %6707 = vmatmul.msk.f32.gmra.mxu0 %vm235_vm0, %v89_v10 }
 0x10c   :  { %v1612_v13 = vld [vmem:[#allocation2 + $0x70] sm:$0xff] }
 0x10d   :  { %1445 = vst.msk [vmem:[#allocation2 + $0x78] sm:$0xff] %vm1429_vm2, %v1276_v12  ;;  %6859 = vmatmul.msk.f32.gmra.mxu1 %vm1429_vm2, %v1612_v13  ;;  %7028 = vmatmul.msk.f32.gmra.mxu2 %vm1429_vm2, %v1612_v13 }
 0x10e   :  { %7197 = vmatmul.msk.f32.gmra.mxu3 %vm1429_vm2, %v1612_v13  ;;  %v96_v13 = vld [vmem:[%s12514_s0 + $0x130] sm:$0xff] }
 0x110   :  { %v805_v14 = vpop.f32.mrf.mxu0 }
 0x111   :  { %v806_v16 = vadd.f32 %v8076_v61, %v805_v14 }
 0x113   :  { %v1277_v17 = vmax.f32 %v806_v16, 0.0  ;;  %6708 = vmatmul.msk.f32.gmra.mxu0 %vm235_vm0, %v90_v15 }
 0x114   :  { %v1613_v18 = vld [vmem:[#allocation2 + $0x78] sm:$0xff] }
 0x115   :  { %1446 = vst.msk [vmem:[#allocation2 + $0x80] sm:$0xff] %vm1429_vm2, %v1277_v17  ;;  %6860 = vmatmul.msk.f32.gmra.mxu1 %vm1429_vm2, %v1613_v18  ;;  %7029 = vmatmul.msk.f32.gmra.mxu2 %vm1429_vm2, %v1613_v18 }
 0x116   :  { %7198 = vmatmul.msk.f32.gmra.mxu3 %vm1429_vm2, %v1613_v18 }
 0x118   :  { %v808_v21 = vpop.f32.mrf.mxu0 }
 0x119   :  { %v809_v23 = vadd.f32 %v8076_v61, %v808_v21 }
 0x11a   :  { %v2344_v24 = vpop.f32.mrf.mxu1 }
 0x11b   :  { %v1278_v25 = vmax.f32 %v809_v23, 0.0  ;;  %v2345_v26 = vadd.f32 %v2344_v24, %v8231_v20  ;;  %6709 = vmatmul.msk.f32.gmra.mxu0 %vm235_vm0, %v91_v22 }
 0x11c   :  { %v1614_v27 = vld [vmem:[#allocation2 + $0x80] sm:$0xff] }
 0x11d   :  { %1447 = vst.msk [vmem:[#allocation2 + $0x88] sm:$0xff] %vm1429_vm2, %v1278_v25  ;;  %6861 = vmatmul.msk.f32.gmra.mxu1 %vm1429_vm2, %v1614_v27  ;;  %7030 = vmatmul.msk.f32.gmra.mxu2 %vm1429_vm2, %v1614_v27  ;;  %v97_v25 = vld [vmem:[%s12514_s0 + $0x138] sm:$0xff] }
 0x11e   :  { %3890 = vst [vmem:[#allocation3] sm:$0xff] %v2345_v26  ;;  %7199 = vmatmul.msk.f32.gmra.mxu3 %vm1429_vm2, %v1614_v27 }
 0x120   :  { %v811_v30 = vpop.f32.mrf.mxu0  ;;  %v2865_v31 = vpop.f32.mrf.mxu2 }
 0x121   :  { %v812_v33 = vadd.f32 %v8076_v61, %v811_v30  ;;  %v2866_v34 = vadd.f32 %v2865_v31, %v8242_v28  ;;  %v3386_v35 = vpop.f32.mrf.mxu3 }
 0x122   :  { %v3387_v36 = vadd.f32 %v3386_v35, %v8245_v29  ;;  %v2347_v37 = vpop.f32.mrf.mxu1 }
 0x123   :  { %v1279_v38 = vmax.f32 %v812_v33, 0.0  ;;  %3891 = vst [vmem:[#allocation3 + $0x8] sm:$0xff] %v2866_v34  ;;  %v2348_v39 = vadd.f32 %v2347_v37, %v8231_v20  ;;  %6710 = vmatmul.msk.f32.gmra.mxu0 %vm235_vm0, %v92_v32 }
 0x124   :  { %3892 = vst [vmem:[#allocation3 + $0x10] sm:$0xff] %v3387_v36  ;;  %v1615_v40 = vld [vmem:[#allocation2 + $0x88] sm:$0xff] }
 0x125   :  { %1448 = vst.msk [vmem:[#allocation2 + $0x90] sm:$0xff] %vm1429_vm2, %v1279_v38  ;;  %6862 = vmatmul.msk.f32.gmra.mxu1 %vm1429_vm2, %v1615_v40  ;;  %7031 = vmatmul.msk.f32.gmra.mxu2 %vm1429_vm2, %v1615_v40  ;;  %v98_v38 = vld [vmem:[%s12514_s0 + $0x140] sm:$0xff] }
 0x126   :  { %3893 = vst [vmem:[#allocation3 + $0x18] sm:$0xff] %v2348_v39  ;;  %7200 = vmatmul.msk.f32.gmra.mxu3 %vm1429_vm2, %v1615_v40 }
 0x128   :  { %v814_v41 = vpop.f32.mrf.mxu0  ;;  %v2868_v42 = vpop.f32.mrf.mxu2 }
 0x129   :  { %v815_v44 = vadd.f32 %v8076_v61, %v814_v41  ;;  %v2869_v45 = vadd.f32 %v2868_v42, %v8242_v28  ;;  %v3389_v46 = vpop.f32.mrf.mxu3 }
 0x12a   :  { %v3390_v47 = vadd.f32 %v3389_v46, %v8245_v29  ;;  %v2350_v48 = vpop.f32.mrf.mxu1 }
 0x12b   :  { %v1280_v49 = vmax.f32 %v815_v44, 0.0  ;;  %3894 = vst [vmem:[#allocation3 + $0x20] sm:$0xff] %v2869_v45  ;;  %v2351_v50 = vadd.f32 %v2350_v48, %v8231_v20  ;;  %6711 = vmatmul.msk.f32.gmra.mxu0 %vm235_vm0, %v93_v43 }
 0x12c   :  { %3895 = vst [vmem:[#allocation3 + $0x28] sm:$0xff] %v3390_v47  ;;  %v1616_v51 = vld [vmem:[#allocation2 + $0x90] sm:$0xff] }
 0x12d   :  { %1449 = vst.msk [vmem:[#allocation2 + $0x98] sm:$0xff] %vm1429_vm2, %v1280_v49  ;;  %6863 = vmatmul.msk.f32.gmra.mxu1 %vm1429_vm2, %v1616_v51  ;;  %7032 = vmatmul.msk.f32.gmra.mxu2 %vm1429_vm2, %v1616_v51  ;;  %v99_v49 = vld [vmem:[%s12514_s0 + $0x148] sm:$0xff] }
 0x12e   :  { %3896 = vst [vmem:[#allocation3 + $0x30] sm:$0xff] %v2351_v50  ;;  %7201 = vmatmul.msk.f32.gmra.mxu3 %vm1429_vm2, %v1616_v51 }
 0x130   :  { %v817_v52 = vpop.f32.mrf.mxu0  ;;  %v2871_v53 = vpop.f32.mrf.mxu2 }
 0x131   :  { %v818_v55 = vadd.f32 %v8076_v61, %v817_v52  ;;  %v2872_v56 = vadd.f32 %v2871_v53, %v8242_v28  ;;  %v3392_v57 = vpop.f32.mrf.mxu3 }
 0x132   :  { %v3393_v58 = vadd.f32 %v3392_v57, %v8245_v29  ;;  %v2353_v59 = vpop.f32.mrf.mxu1 }
 0x133   :  { %v1281_v60 = vmax.f32 %v818_v55, 0.0  ;;  %3897 = vst [vmem:[#allocation3 + $0x38] sm:$0xff] %v2872_v56  ;;  %v2354_v62 = vadd.f32 %v2353_v59, %v8231_v20  ;;  %6712 = vmatmul.msk.f32.gmra.mxu0 %vm235_vm0, %v94_v54 }
 0x134   :  { %3898 = vst [vmem:[#allocation3 + $0x40] sm:$0xff] %v3393_v58  ;;  %v1617_v63 = vld [vmem:[#allocation2 + $0x98] sm:$0xff] }
 0x135   :  { %1450 = vst.msk [vmem:[#allocation2 + $0xa0] sm:$0xff] %vm1429_vm2, %v1281_v60  ;;  %6864 = vmatmul.msk.f32.gmra.mxu1 %vm1429_vm2, %v1617_v63  ;;  %7033 = vmatmul.msk.f32.gmra.mxu2 %vm1429_vm2, %v1617_v63  ;;  %v100_v60 = vld [vmem:[%s12514_s0 + $0x150] sm:$0xff] }
 0x136   :  { %3899 = vst [vmem:[#allocation3 + $0x48] sm:$0xff] %v2354_v62  ;;  %7202 = vmatmul.msk.f32.gmra.mxu3 %vm1429_vm2, %v1617_v63 }
 0x138   :  { %v820_v0 = vpop.f32.mrf.mxu0  ;;  %v2874_v1 = vpop.f32.mrf.mxu2 }
 0x139   :  { %v821_v3 = vadd.f32 %v8076_v61, %v820_v0  ;;  %v2875_v4 = vadd.f32 %v2874_v1, %v8242_v28  ;;  %v3395_v5 = vpop.f32.mrf.mxu3 }
 0x13a   :  { %v3396_v6 = vadd.f32 %v3395_v5, %v8245_v29  ;;  %v2356_v7 = vpop.f32.mrf.mxu1 }
 0x13b   :  { %v1282_v8 = vmax.f32 %v821_v3, 0.0  ;;  %3900 = vst [vmem:[#allocation3 + $0x50] sm:$0xff] %v2875_v4  ;;  %v2357_v9 = vadd.f32 %v2356_v7, %v8231_v20  ;;  %6713 = vmatmul.msk.f32.gmra.mxu0 %vm235_vm0, %v95_v2 }
 0x13c   :  { %3901 = vst [vmem:[#allocation3 + $0x58] sm:$0xff] %v3396_v6  ;;  %v1618_v10 = vld [vmem:[#allocation2 + $0xa0] sm:$0xff] }
 0x13d   :  { %1451 = vst.msk [vmem:[#allocation2 + $0xa8] sm:$0xff] %vm1429_vm2, %v1282_v8  ;;  %6865 = vmatmul.msk.f32.gmra.mxu1 %vm1429_vm2, %v1618_v10  ;;  %7034 = vmatmul.msk.f32.gmra.mxu2 %vm1429_vm2, %v1618_v10  ;;  %v101_v8 = vld [vmem:[%s12514_s0 + $0x158] sm:$0xff] }
 0x13e   :  { %3902 = vst [vmem:[#allocation3 + $0x60] sm:$0xff] %v2357_v9  ;;  %7203 = vmatmul.msk.f32.gmra.mxu3 %vm1429_vm2, %v1618_v10 }
 0x140   :  { %v823_v11 = vpop.f32.mrf.mxu0  ;;  %v2877_v12 = vpop.f32.mrf.mxu2 }
 0x141   :  { %v824_v14 = vadd.f32 %v8076_v61, %v823_v11  ;;  %v2878_v15 = vadd.f32 %v2877_v12, %v8242_v28  ;;  %v3398_v16 = vpop.f32.mrf.mxu3 }
 0x142   :  { %v3399_v17 = vadd.f32 %v3398_v16, %v8245_v29  ;;  %v2359_v18 = vpop.f32.mrf.mxu1 }
 0x143   :  { %v1283_v19 = vmax.f32 %v824_v14, 0.0  ;;  %3903 = vst [vmem:[#allocation3 + $0x68] sm:$0xff] %v2878_v15  ;;  %v2360_v21 = vadd.f32 %v2359_v18, %v8231_v20  ;;  %6714 = vmatmul.msk.f32.gmra.mxu0 %vm235_vm0, %v96_v13 }
 0x144   :  { %3904 = vst [vmem:[#allocation3 + $0x70] sm:$0xff] %v3399_v17  ;;  %v1619_v22 = vld [vmem:[#allocation2 + $0xa8] sm:$0xff] }
 0x145   :  { %1452 = vst.msk [vmem:[#allocation2 + $0xb0] sm:$0xff] %vm1429_vm2, %v1283_v19  ;;  %6866 = vmatmul.msk.f32.gmra.mxu1 %vm1429_vm2, %v1619_v22  ;;  %7035 = vmatmul.msk.f32.gmra.mxu2 %vm1429_vm2, %v1619_v22  ;;  %v102_v19 = vld [vmem:[%s12514_s0 + $0x160] sm:$0xff] }
 0x146   :  { %3905 = vst [vmem:[#allocation3 + $0x78] sm:$0xff] %v2360_v21  ;;  %7204 = vmatmul.msk.f32.gmra.mxu3 %vm1429_vm2, %v1619_v22 }
 0x148   :  { %v826_v23 = vpop.f32.mrf.mxu0  ;;  %v2880_v24 = vpop.f32.mrf.mxu2 }
 0x149   :  { %v827_v26 = vadd.f32 %v8076_v61, %v826_v23  ;;  %v2881_v27 = vadd.f32 %v2880_v24, %v8242_v28  ;;  %v3401_v30 = vpop.f32.mrf.mxu3 }
 0x14a   :  { %v3402_v31 = vadd.f32 %v3401_v30, %v8245_v29  ;;  %v2362_v32 = vpop.f32.mrf.mxu1 }
 0x14b   :  { %v1284_v33 = vmax.f32 %v827_v26, 0.0  ;;  %3906 = vst [vmem:[#allocation3 + $0x80] sm:$0xff] %v2881_v27  ;;  %v2363_v34 = vadd.f32 %v2362_v32, %v8231_v20  ;;  %6715 = vmatmul.msk.f32.gmra.mxu0 %vm235_vm0, %v97_v25 }
 0x14c   :  { %3907 = vst [vmem:[#allocation3 + $0x88] sm:$0xff] %v3402_v31  ;;  %v1620_v35 = vld [vmem:[#allocation2 + $0xb0] sm:$0xff] }
 0x14d   :  { %1453 = vst.msk [vmem:[#allocation2 + $0xb8] sm:$0xff] %vm1429_vm2, %v1284_v33  ;;  %6867 = vmatmul.msk.f32.gmra.mxu1 %vm1429_vm2, %v1620_v35  ;;  %7036 = vmatmul.msk.f32.gmra.mxu2 %vm1429_vm2, %v1620_v35  ;;  %v103_v33 = vld [vmem:[%s12514_s0 + $0x168] sm:$0xff] }
 0x14e   :  { %3908 = vst [vmem:[#allocation3 + $0x90] sm:$0xff] %v2363_v34  ;;  %7205 = vmatmul.msk.f32.gmra.mxu3 %vm1429_vm2, %v1620_v35 }
 0x150   :  { %v829_v36 = vpop.f32.mrf.mxu0  ;;  %v2883_v37 = vpop.f32.mrf.mxu2 }
 0x151   :  { %v830_v39 = vadd.f32 %v8076_v61, %v829_v36  ;;  %v2884_v40 = vadd.f32 %v2883_v37, %v8242_v28  ;;  %v3404_v41 = vpop.f32.mrf.mxu3 }
 0x152   :  { %v3405_v42 = vadd.f32 %v3404_v41, %v8245_v29  ;;  %v2365_v43 = vpop.f32.mrf.mxu1 }
 0x153   :  { %v1285_v44 = vmax.f32 %v830_v39, 0.0  ;;  %3909 = vst [vmem:[#allocation3 + $0x98] sm:$0xff] %v2884_v40  ;;  %v2366_v45 = vadd.f32 %v2365_v43, %v8231_v20  ;;  %6716 = vmatmul.msk.f32.gmra.mxu0 %vm235_vm0, %v98_v38 }
 0x154   :  { %3910 = vst [vmem:[#allocation3 + $0xa0] sm:$0xff] %v3405_v42  ;;  %v1621_v46 = vld [vmem:[#allocation2 + $0xb8] sm:$0xff] }
 0x155   :  { %1454 = vst.msk [vmem:[#allocation2 + $0xc0] sm:$0xff] %vm1429_vm2, %v1285_v44  ;;  %6868 = vmatmul.msk.f32.gmra.mxu1 %vm1429_vm2, %v1621_v46  ;;  %7037 = vmatmul.msk.f32.gmra.mxu2 %vm1429_vm2, %v1621_v46  ;;  %v104_v44 = vld [vmem:[%s12514_s0 + $0x170] sm:$0xff] }
 0x156   :  { %3911 = vst [vmem:[#allocation3 + $0xa8] sm:$0xff] %v2366_v45  ;;  %7206 = vmatmul.msk.f32.gmra.mxu3 %vm1429_vm2, %v1621_v46 }
 0x158   :  { %v832_v47 = vpop.f32.mrf.mxu0  ;;  %v2886_v48 = vpop.f32.mrf.mxu2 }
 0x159   :  { %v833_v50 = vadd.f32 %v8076_v61, %v832_v47  ;;  %v2887_v51 = vadd.f32 %v2886_v48, %v8242_v28  ;;  %v3407_v52 = vpop.f32.mrf.mxu3 }
 0x15a   :  { %v3408_v53 = vadd.f32 %v3407_v52, %v8245_v29  ;;  %v2368_v54 = vpop.f32.mrf.mxu1 }
 0x15b   :  { %v1286_v55 = vmax.f32 %v833_v50, 0.0  ;;  %3912 = vst [vmem:[#allocation3 + $0xb0] sm:$0xff] %v2887_v51  ;;  %v2369_v56 = vadd.f32 %v2368_v54, %v8231_v20  ;;  %6717 = vmatmul.msk.f32.gmra.mxu0 %vm235_vm0, %v99_v49 }
 0x15c   :  { %3913 = vst [vmem:[#allocation3 + $0xb8] sm:$0xff] %v3408_v53  ;;  %v1622_v57 = vld [vmem:[#allocation2 + $0xc0] sm:$0xff] }
 0x15d   :  { %1455 = vst.msk [vmem:[#allocation2 + $0xc8] sm:$0xff] %vm1429_vm2, %v1286_v55  ;;  %6869 = vmatmul.msk.f32.gmra.mxu1 %vm1429_vm2, %v1622_v57  ;;  %7038 = vmatmul.msk.f32.gmra.mxu2 %vm1429_vm2, %v1622_v57  ;;  %v105_v55 = vld [vmem:[%s12514_s0 + $0x178] sm:$0xff] }
 0x15e   :  { %3914 = vst [vmem:[#allocation3 + $0xc0] sm:$0xff] %v2369_v56  ;;  %7207 = vmatmul.msk.f32.gmra.mxu3 %vm1429_vm2, %v1622_v57 }
 0x160   :  { %v835_v58 = vpop.f32.mrf.mxu0  ;;  %v2889_v59 = vpop.f32.mrf.mxu2 }
 0x161   :  { %v836_v62 = vadd.f32 %v8076_v61, %v835_v58  ;;  %v2890_v63 = vadd.f32 %v2889_v59, %v8242_v28  ;;  %v3410_v0 = vpop.f32.mrf.mxu3 }
 0x162   :  { %v3411_v1 = vadd.f32 %v3410_v0, %v8245_v29  ;;  %v2371_v2 = vpop.f32.mrf.mxu1 }
 0x163   :  { %v1287_v3 = vmax.f32 %v836_v62, 0.0  ;;  %3915 = vst [vmem:[#allocation3 + $0xc8] sm:$0xff] %v2890_v63  ;;  %v2372_v4 = vadd.f32 %v2371_v2, %v8231_v20  ;;  %6718 = vmatmul.msk.f32.gmra.mxu0 %vm235_vm0, %v100_v60 }
 0x164   :  { %3916 = vst [vmem:[#allocation3 + $0xd0] sm:$0xff] %v3411_v1  ;;  %v1623_v5 = vld [vmem:[#allocation2 + $0xc8] sm:$0xff] }
 0x165   :  { %1456 = vst.msk [vmem:[#allocation2 + $0xd0] sm:$0xff] %vm1429_vm2, %v1287_v3  ;;  %6870 = vmatmul.msk.f32.gmra.mxu1 %vm1429_vm2, %v1623_v5  ;;  %7039 = vmatmul.msk.f32.gmra.mxu2 %vm1429_vm2, %v1623_v5  ;;  %v106_v3 = vld [vmem:[%s12514_s0 + $0x180] sm:$0xff] }
 0x166   :  { %3917 = vst [vmem:[#allocation3 + $0xd8] sm:$0xff] %v2372_v4  ;;  %7208 = vmatmul.msk.f32.gmra.mxu3 %vm1429_vm2, %v1623_v5 }
 0x168   :  { %v838_v6 = vpop.f32.mrf.mxu0  ;;  %v2892_v7 = vpop.f32.mrf.mxu2 }
 0x169   :  { %v839_v9 = vadd.f32 %v8076_v61, %v838_v6  ;;  %v2893_v10 = vadd.f32 %v2892_v7, %v8242_v28  ;;  %v3413_v11 = vpop.f32.mrf.mxu3 }
 0x16a   :  { %v3414_v12 = vadd.f32 %v3413_v11, %v8245_v29  ;;  %v2374_v13 = vpop.f32.mrf.mxu1 }
 0x16b   :  { %v1288_v14 = vmax.f32 %v839_v9, 0.0  ;;  %3918 = vst [vmem:[#allocation3 + $0xe0] sm:$0xff] %v2893_v10  ;;  %v2375_v15 = vadd.f32 %v2374_v13, %v8231_v20  ;;  %6719 = vmatmul.msk.f32.gmra.mxu0 %vm235_vm0, %v101_v8 }
 0x16c   :  { %3919 = vst [vmem:[#allocation3 + $0xe8] sm:$0xff] %v3414_v12  ;;  %v1624_v16 = vld [vmem:[#allocation2 + $0xd0] sm:$0xff] }
 0x16d   :  { %1457 = vst.msk [vmem:[#allocation2 + $0xd8] sm:$0xff] %vm1429_vm2, %v1288_v14  ;;  %6871 = vmatmul.msk.f32.gmra.mxu1 %vm1429_vm2, %v1624_v16  ;;  %7040 = vmatmul.msk.f32.gmra.mxu2 %vm1429_vm2, %v1624_v16  ;;  %v107_v14 = vld [vmem:[%s12514_s0 + $0x188] sm:$0xff] }
 0x16e   :  { %3920 = vst [vmem:[#allocation3 + $0xf0] sm:$0xff] %v2375_v15  ;;  %7209 = vmatmul.msk.f32.gmra.mxu3 %vm1429_vm2, %v1624_v16 }
 0x170   :  { %v841_v17 = vpop.f32.mrf.mxu0  ;;  %v2895_v18 = vpop.f32.mrf.mxu2 }
 0x171   :  { %v842_v21 = vadd.f32 %v8076_v61, %v841_v17  ;;  %v2896_v22 = vadd.f32 %v2895_v18, %v8242_v28  ;;  %v3416_v23 = vpop.f32.mrf.mxu3 }
 0x172   :  { %v3417_v24 = vadd.f32 %v3416_v23, %v8245_v29  ;;  %v2377_v25 = vpop.f32.mrf.mxu1 }
 0x173   :  { %v1289_v26 = vmax.f32 %v842_v21, 0.0  ;;  %3921 = vst [vmem:[#allocation3 + $0xf8] sm:$0xff] %v2896_v22  ;;  %v2378_v27 = vadd.f32 %v2377_v25, %v8231_v20  ;;  %6720 = vmatmul.msk.f32.gmra.mxu0 %vm235_vm0, %v102_v19 }
 0x174   :  { %3922 = vst [vmem:[#allocation3 + $0x100] sm:$0xff] %v3417_v24  ;;  %v1625_v30 = vld [vmem:[#allocation2 + $0xd8] sm:$0xff] }
 0x175   :  { %1458 = vst.msk [vmem:[#allocation2 + $0xe0] sm:$0xff] %vm1429_vm2, %v1289_v26  ;;  %6872 = vmatmul.msk.f32.gmra.mxu1 %vm1429_vm2, %v1625_v30  ;;  %7041 = vmatmul.msk.f32.gmra.mxu2 %vm1429_vm2, %v1625_v30  ;;  %v108_v26 = vld [vmem:[%s12514_s0 + $0x190] sm:$0xff] }
 0x176   :  { %3923 = vst [vmem:[#allocation3 + $0x108] sm:$0xff] %v2378_v27  ;;  %7210 = vmatmul.msk.f32.gmra.mxu3 %vm1429_vm2, %v1625_v30 }
 0x178   :  { %v844_v31 = vpop.f32.mrf.mxu0  ;;  %v2898_v32 = vpop.f32.mrf.mxu2 }
 0x179   :  { %v845_v34 = vadd.f32 %v8076_v61, %v844_v31  ;;  %v2899_v35 = vadd.f32 %v2898_v32, %v8242_v28  ;;  %v3419_v36 = vpop.f32.mrf.mxu3 }
 0x17a   :  { %v3420_v37 = vadd.f32 %v3419_v36, %v8245_v29  ;;  %v2380_v38 = vpop.f32.mrf.mxu1 }
 0x17b   :  { %v1290_v39 = vmax.f32 %v845_v34, 0.0  ;;  %3924 = vst [vmem:[#allocation3 + $0x110] sm:$0xff] %v2899_v35  ;;  %v2381_v40 = vadd.f32 %v2380_v38, %v8231_v20  ;;  %6721 = vmatmul.msk.f32.gmra.mxu0 %vm235_vm0, %v103_v33  ;;  %v109_v38 = vld [vmem:[%s12514_s0 + $0x198] sm:$0xff] }
 0x17c   :  { %3925 = vst [vmem:[#allocation3 + $0x118] sm:$0xff] %v3420_v37  ;;  %v1626_v41 = vld [vmem:[#allocation2 + $0xe0] sm:$0xff] }
 0x17d   :  { %1459 = vst.msk [vmem:[#allocation2 + $0xe8] sm:$0xff] %vm1429_vm2, %v1290_v39  ;;  %6873 = vmatmul.msk.f32.gmra.mxu1 %vm1429_vm2, %v1626_v41  ;;  %7042 = vmatmul.msk.f32.gmra.mxu2 %vm1429_vm2, %v1626_v41  ;;  %v8457_v39 = vld [vmem:[%s12513_s2] ss:$0 sm:$0xff] }
 0x17e   :  { %3926 = vst [vmem:[#allocation3 + $0x120] sm:$0xff] %v2381_v40  ;;  %7211 = vmatmul.msk.f32.gmra.mxu3 %vm1429_vm2, %v1626_v41 }
 0x180   :  { %v847_v42 = vpop.f32.mrf.mxu0  ;;  %v2901_v43 = vpop.f32.mrf.mxu2 }
 0x181   :  { %v848_v45 = vadd.f32 %v8076_v61, %v847_v42  ;;  %v2902_v46 = vadd.f32 %v2901_v43, %v8242_v28  ;;  %v3422_v47 = vpop.f32.mrf.mxu3 }
 0x182   :  { %v3423_v48 = vadd.f32 %v3422_v47, %v8245_v29  ;;  %v2383_v49 = vpop.f32.mrf.mxu1 }
 0x183   :  { %v1291_v50 = vmax.f32 %v848_v45, 0.0  ;;  %3927 = vst [vmem:[#allocation3 + $0x128] sm:$0xff] %v2902_v46  ;;  %v2384_v51 = vadd.f32 %v2383_v49, %v8231_v20  ;;  %6722 = vmatmul.msk.f32.gmra.mxu0 %vm235_vm0, %v104_v44 }
 0x184   :  { %3928 = vst [vmem:[#allocation3 + $0x130] sm:$0xff] %v3423_v48  ;;  %v1627_v52 = vld [vmem:[#allocation2 + $0xe8] sm:$0xff] }
 0x185   :  { %1460 = vst.msk [vmem:[#allocation2 + $0xf0] sm:$0xff] %vm1429_vm2, %v1291_v50  ;;  %6874 = vmatmul.msk.f32.gmra.mxu1 %vm1429_vm2, %v1627_v52  ;;  %7043 = vmatmul.msk.f32.gmra.mxu2 %vm1429_vm2, %v1627_v52  ;;  %v110_v50 = vld [vmem:[%s12514_s0 + $0x1a0] sm:$0xff] }
 0x186   :  { %3929 = vst [vmem:[#allocation3 + $0x138] sm:$0xff] %v2384_v51  ;;  %7212 = vmatmul.msk.f32.gmra.mxu3 %vm1429_vm2, %v1627_v52 }
 0x188   :  { %v850_v53 = vpop.f32.mrf.mxu0  ;;  %v2904_v54 = vpop.f32.mrf.mxu2 }
 0x189   :  { %v851_v56 = vadd.f32 %v8076_v61, %v850_v53  ;;  %v2905_v57 = vadd.f32 %v2904_v54, %v8242_v28  ;;  %v3425_v58 = vpop.f32.mrf.mxu3 }
 0x18a   :  { %v3426_v59 = vadd.f32 %v3425_v58, %v8245_v29  ;;  %v2386_v60 = vpop.f32.mrf.mxu1 }
 0x18b   :  { %v1292_v62 = vmax.f32 %v851_v56, 0.0  ;;  %3930 = vst [vmem:[#allocation3 + $0x140] sm:$0xff] %v2905_v57  ;;  %v2387_v63 = vadd.f32 %v2386_v60, %v8231_v20  ;;  %6723 = vmatmul.msk.f32.gmra.mxu0 %vm235_vm0, %v105_v55 }
 0x18c   :  { %3931 = vst [vmem:[#allocation3 + $0x148] sm:$0xff] %v3426_v59  ;;  %v1628_v0 = vld [vmem:[#allocation2 + $0xf0] sm:$0xff] }
 0x18d   :  { %1461 = vst.msk [vmem:[#allocation2 + $0xf8] sm:$0xff] %vm1429_vm2, %v1292_v62  ;;  %6875 = vmatmul.msk.f32.gmra.mxu1 %vm1429_vm2, %v1628_v0  ;;  %7044 = vmatmul.msk.f32.gmra.mxu2 %vm1429_vm2, %v1628_v0  ;;  %v111_v62 = vld [vmem:[%s12514_s0 + $0x1a8] sm:$0xff] }
 0x18e   :  { %3932 = vst [vmem:[#allocation3 + $0x150] sm:$0xff] %v2387_v63  ;;  %7213 = vmatmul.msk.f32.gmra.mxu3 %vm1429_vm2, %v1628_v0 }
 0x190   :  { %v853_v1 = vpop.f32.mrf.mxu0  ;;  %v2907_v2 = vpop.f32.mrf.mxu2 }
 0x191   :  { %v854_v4 = vadd.f32 %v8076_v61, %v853_v1  ;;  %v2908_v5 = vadd.f32 %v2907_v2, %v8242_v28  ;;  %v3428_v6 = vpop.f32.mrf.mxu3 }
 0x192   :  { %v3429_v7 = vadd.f32 %v3428_v6, %v8245_v29  ;;  %v2389_v8 = vpop.f32.mrf.mxu1 }
 0x193   :  { %v1293_v9 = vmax.f32 %v854_v4, 0.0  ;;  %3933 = vst [vmem:[#allocation3 + $0x158] sm:$0xff] %v2908_v5  ;;  %v2390_v10 = vadd.f32 %v2389_v8, %v8231_v20  ;;  %6724 = vmatmul.msk.f32.gmra.mxu0 %vm235_vm0, %v106_v3 }
 0x194   :  { %3934 = vst [vmem:[#allocation3 + $0x160] sm:$0xff] %v3429_v7  ;;  %v1629_v11 = vld [vmem:[#allocation2 + $0xf8] sm:$0xff] }
 0x195   :  { %1462 = vst.msk [vmem:[#allocation2 + $0x100] sm:$0xff] %vm1429_vm2, %v1293_v9  ;;  %6876 = vmatmul.msk.f32.gmra.mxu1 %vm1429_vm2, %v1629_v11  ;;  %7045 = vmatmul.msk.f32.gmra.mxu2 %vm1429_vm2, %v1629_v11  ;;  %v112_v9 = vld [vmem:[%s12514_s0 + $0x1b0] sm:$0xff] }
 0x196   :  { %3935 = vst [vmem:[#allocation3 + $0x168] sm:$0xff] %v2390_v10  ;;  %7214 = vmatmul.msk.f32.gmra.mxu3 %vm1429_vm2, %v1629_v11 }
 0x198   :  { %v856_v12 = vpop.f32.mrf.mxu0  ;;  %v2910_v13 = vpop.f32.mrf.mxu2 }
 0x199   :  { %v857_v15 = vadd.f32 %v8076_v61, %v856_v12  ;;  %v2911_v16 = vadd.f32 %v2910_v13, %v8242_v28  ;;  %v3431_v17 = vpop.f32.mrf.mxu3 }
 0x19a   :  { %v3432_v18 = vadd.f32 %v3431_v17, %v8245_v29  ;;  %v2392_v19 = vpop.f32.mrf.mxu1 }
 0x19b   :  { %v1294_v21 = vmax.f32 %v857_v15, 0.0  ;;  %3936 = vst [vmem:[#allocation3 + $0x170] sm:$0xff] %v2911_v16  ;;  %v2393_v22 = vadd.f32 %v2392_v19, %v8231_v20  ;;  %6725 = vmatmul.msk.f32.gmra.mxu0 %vm235_vm0, %v107_v14 }
 0x19c   :  { %3937 = vst [vmem:[#allocation3 + $0x178] sm:$0xff] %v3432_v18  ;;  %v1630_v23 = vld [vmem:[#allocation2 + $0x100] sm:$0xff] }
 0x19d   :  { %1463 = vst.msk [vmem:[#allocation2 + $0x108] sm:$0xff] %vm1429_vm2, %v1294_v21  ;;  %6877 = vmatmul.msk.f32.gmra.mxu1 %vm1429_vm2, %v1630_v23  ;;  %7046 = vmatmul.msk.f32.gmra.mxu2 %vm1429_vm2, %v1630_v23  ;;  %v113_v21 = vld [vmem:[%s12514_s0 + $0x1b8] sm:$0xff] }
 0x19e   :  { %3938 = vst [vmem:[#allocation3 + $0x180] sm:$0xff] %v2393_v22  ;;  %7215 = vmatmul.msk.f32.gmra.mxu3 %vm1429_vm2, %v1630_v23 }
 0x1a0   :  { %v859_v24 = vpop.f32.mrf.mxu0  ;;  %v2913_v25 = vpop.f32.mrf.mxu2 }
 0x1a1   :  { %v860_v27 = vadd.f32 %v8076_v61, %v859_v24  ;;  %v2914_v30 = vadd.f32 %v2913_v25, %v8242_v28  ;;  %v3434_v31 = vpop.f32.mrf.mxu3 }
 0x1a2   :  { %v3435_v32 = vadd.f32 %v3434_v31, %v8245_v29  ;;  %v2395_v33 = vpop.f32.mrf.mxu1 }
 0x1a3   :  { %v1295_v34 = vmax.f32 %v860_v27, 0.0  ;;  %3939 = vst [vmem:[#allocation3 + $0x188] sm:$0xff] %v2914_v30  ;;  %v2396_v35 = vadd.f32 %v2395_v33, %v8231_v20  ;;  %6726 = vmatmul.msk.f32.gmra.mxu0 %vm235_vm0, %v108_v26 }
 0x1a4   :  { %3940 = vst [vmem:[#allocation3 + $0x190] sm:$0xff] %v3435_v32  ;;  %v1631_v36 = vld [vmem:[#allocation2 + $0x108] sm:$0xff] }
 0x1a5   :  { %1464 = vst.msk [vmem:[#allocation2 + $0x110] sm:$0xff] %vm1429_vm2, %v1295_v34  ;;  %6878 = vmatmul.msk.f32.gmra.mxu1 %vm1429_vm2, %v1631_v36  ;;  %7047 = vmatmul.msk.f32.gmra.mxu2 %vm1429_vm2, %v1631_v36  ;;  %v114_v34 = vld [vmem:[%s12514_s0 + $0x1c0] sm:$0xff] }
 0x1a6   :  { %3941 = vst [vmem:[#allocation3 + $0x198] sm:$0xff] %v2396_v35  ;;  %7216 = vmatmul.msk.f32.gmra.mxu3 %vm1429_vm2, %v1631_v36 }
 0x1a8   :  { %v862_v61 = vpop.f32.mrf.mxu0  ;;  %v2916_v37 = vpop.f32.mrf.mxu2 }
 0x1a9   :  { %v863_v40 = vadd.f32 %v8457_v39, %v862_v61  ;;  %v2917_v41 = vadd.f32 %v2916_v37, %v8242_v28  ;;  %v3437_v42 = vpop.f32.mrf.mxu3 }
 0x1aa   :  { %v3438_v43 = vadd.f32 %v3437_v42, %v8245_v29  ;;  %v2398_v44 = vpop.f32.mrf.mxu1 }
 0x1ab   :  { %v1296_v45 = vmax.f32 %v863_v40, 0.0  ;;  %3942 = vst [vmem:[#allocation3 + $0x1a0] sm:$0xff] %v2917_v41  ;;  %v2399_v46 = vadd.f32 %v2398_v44, %v8231_v20  ;;  %6727 = vmatmul.msk.f32.gmra.mxu0 %vm235_vm0, %v109_v38 }
 0x1ac   :  { %3943 = vst [vmem:[#allocation3 + $0x1a8] sm:$0xff] %v3438_v43  ;;  %v1632_v47 = vld [vmem:[#allocation2 + $0x110] sm:$0xff] }
 0x1ad   :  { %1465 = vst.msk [vmem:[#allocation2 + $0x118] sm:$0xff] %vm1429_vm2, %v1296_v45  ;;  %6879 = vmatmul.msk.f32.gmra.mxu1 %vm1429_vm2, %v1632_v47  ;;  %7048 = vmatmul.msk.f32.gmra.mxu2 %vm1429_vm2, %v1632_v47  ;;  %v115_v45 = vld [vmem:[%s12514_s0 + $0x1c8] sm:$0xff] }
 0x1ae   :  { %3944 = vst [vmem:[#allocation3 + $0x1b0] sm:$0xff] %v2399_v46  ;;  %7217 = vmatmul.msk.f32.gmra.mxu3 %vm1429_vm2, %v1632_v47 }
 0x1b0   :  { %v865_v48 = vpop.f32.mrf.mxu0  ;;  %v2919_v49 = vpop.f32.mrf.mxu2 }
 0x1b1   :  { %v866_v51 = vadd.f32 %v8457_v39, %v865_v48  ;;  %v2920_v52 = vadd.f32 %v2919_v49, %v8242_v28  ;;  %v3440_v53 = vpop.f32.mrf.mxu3 }
 0x1b2   :  { %v3441_v54 = vadd.f32 %v3440_v53, %v8245_v29  ;;  %v2401_v55 = vpop.f32.mrf.mxu1 }
 0x1b3   :  { %v1297_v56 = vmax.f32 %v866_v51, 0.0  ;;  %3945 = vst [vmem:[#allocation3 + $0x1b8] sm:$0xff] %v2920_v52  ;;  %v2402_v57 = vadd.f32 %v2401_v55, %v8231_v20  ;;  %6728 = vmatmul.msk.f32.gmra.mxu0 %vm235_vm0, %v110_v50 }
 0x1b4   :  { %3946 = vst [vmem:[#allocation3 + $0x1c0] sm:$0xff] %v3441_v54  ;;  %v1633_v58 = vld [vmem:[#allocation2 + $0x118] sm:$0xff] }
 0x1b5   :  { %1466 = vst.msk [vmem:[#allocation2 + $0x120] sm:$0xff] %vm1429_vm2, %v1297_v56  ;;  %6880 = vmatmul.msk.f32.gmra.mxu1 %vm1429_vm2, %v1633_v58  ;;  %7049 = vmatmul.msk.f32.gmra.mxu2 %vm1429_vm2, %v1633_v58  ;;  %v116_v56 = vld [vmem:[%s12514_s0 + $0x1d0] sm:$0xff] }
 0x1b6   :  { %3947 = vst [vmem:[#allocation3 + $0x1c8] sm:$0xff] %v2402_v57  ;;  %7218 = vmatmul.msk.f32.gmra.mxu3 %vm1429_vm2, %v1633_v58 }
 0x1b8   :  { %v868_v59 = vpop.f32.mrf.mxu0  ;;  %v2922_v60 = vpop.f32.mrf.mxu2 }
 0x1b9   :  { %v869_v63 = vadd.f32 %v8457_v39, %v868_v59  ;;  %v2923_v0 = vadd.f32 %v2922_v60, %v8242_v28  ;;  %v3443_v1 = vpop.f32.mrf.mxu3 }
 0x1ba   :  { %v3444_v2 = vadd.f32 %v3443_v1, %v8245_v29  ;;  %v2404_v3 = vpop.f32.mrf.mxu1 }
 0x1bb   :  { %v1298_v4 = vmax.f32 %v869_v63, 0.0  ;;  %3948 = vst [vmem:[#allocation3 + $0x1d0] sm:$0xff] %v2923_v0  ;;  %v2405_v5 = vadd.f32 %v2404_v3, %v8231_v20  ;;  %6729 = vmatmul.msk.f32.gmra.mxu0 %vm235_vm0, %v111_v62 }
 0x1bc   :  { %3949 = vst [vmem:[#allocation3 + $0x1d8] sm:$0xff] %v3444_v2  ;;  %v1634_v6 = vld [vmem:[#allocation2 + $0x120] sm:$0xff] }
 0x1bd   :  { %1467 = vst.msk [vmem:[#allocation2 + $0x128] sm:$0xff] %vm1429_vm2, %v1298_v4  ;;  %6881 = vmatmul.msk.f32.gmra.mxu1 %vm1429_vm2, %v1634_v6  ;;  %7050 = vmatmul.msk.f32.gmra.mxu2 %vm1429_vm2, %v1634_v6  ;;  %v117_v4 = vld [vmem:[%s12514_s0 + $0x1d8] sm:$0xff] }
 0x1be   :  { %3950 = vst [vmem:[#allocation3 + $0x1e0] sm:$0xff] %v2405_v5  ;;  %7219 = vmatmul.msk.f32.gmra.mxu3 %vm1429_vm2, %v1634_v6 }
 0x1c0   :  { %v871_v7 = vpop.f32.mrf.mxu0  ;;  %v2925_v8 = vpop.f32.mrf.mxu2 }
 0x1c1   :  { %v872_v10 = vadd.f32 %v8457_v39, %v871_v7  ;;  %v2926_v11 = vadd.f32 %v2925_v8, %v8242_v28  ;;  %v3446_v12 = vpop.f32.mrf.mxu3 }
 0x1c2   :  { %v3447_v13 = vadd.f32 %v3446_v12, %v8245_v29  ;;  %v2407_v14 = vpop.f32.mrf.mxu1 }
 0x1c3   :  { %v1299_v15 = vmax.f32 %v872_v10, 0.0  ;;  %3951 = vst [vmem:[#allocation3 + $0x1e8] sm:$0xff] %v2926_v11  ;;  %v2408_v16 = vadd.f32 %v2407_v14, %v8231_v20  ;;  %6730 = vmatmul.msk.f32.gmra.mxu0 %vm235_vm0, %v112_v9 }
 0x1c4   :  { %3952 = vst [vmem:[#allocation3 + $0x1f0] sm:$0xff] %v3447_v13  ;;  %v1635_v17 = vld [vmem:[#allocation2 + $0x128] sm:$0xff] }
 0x1c5   :  { %1468 = vst.msk [vmem:[#allocation2 + $0x130] sm:$0xff] %vm1429_vm2, %v1299_v15  ;;  %6882 = vmatmul.msk.f32.gmra.mxu1 %vm1429_vm2, %v1635_v17  ;;  %7051 = vmatmul.msk.f32.gmra.mxu2 %vm1429_vm2, %v1635_v17  ;;  %v118_v15 = vld [vmem:[%s12514_s0 + $0x1e0] sm:$0xff] }
 0x1c6   :  { %3953 = vst [vmem:[#allocation3 + $0x1f8] sm:$0xff] %v2408_v16  ;;  %7220 = vmatmul.msk.f32.gmra.mxu3 %vm1429_vm2, %v1635_v17 }
 0x1c8   :  { %v874_v18 = vpop.f32.mrf.mxu0  ;;  %v2928_v19 = vpop.f32.mrf.mxu2 }
 0x1c9   :  { %v875_v22 = vadd.f32 %v8457_v39, %v874_v18  ;;  %v2929_v23 = vadd.f32 %v2928_v19, %v8242_v28  ;;  %v3449_v24 = vpop.f32.mrf.mxu3 }
 0x1ca   :  { %v3450_v25 = vadd.f32 %v3449_v24, %v8245_v29  ;;  %v2410_v26 = vpop.f32.mrf.mxu1 }
 0x1cb   :  { %v1300_v27 = vmax.f32 %v875_v22, 0.0  ;;  %3954 = vst [vmem:[#allocation3 + $0x200] sm:$0xff] %v2929_v23  ;;  %v2411_v30 = vadd.f32 %v2410_v26, %v8231_v20  ;;  %6731 = vmatmul.msk.f32.gmra.mxu0 %vm235_vm0, %v113_v21 }
 0x1cc   :  { %3955 = vst [vmem:[#allocation3 + $0x208] sm:$0xff] %v3450_v25  ;;  %v1636_v31 = vld [vmem:[#allocation2 + $0x130] sm:$0xff] }
 0x1cd   :  { %1469 = vst.msk [vmem:[#allocation2 + $0x138] sm:$0xff] %vm1429_vm2, %v1300_v27  ;;  %6883 = vmatmul.msk.f32.gmra.mxu1 %vm1429_vm2, %v1636_v31  ;;  %7052 = vmatmul.msk.f32.gmra.mxu2 %vm1429_vm2, %v1636_v31  ;;  %v119_v27 = vld [vmem:[%s12514_s0 + $0x1e8] sm:$0xff] }
 0x1ce   :  { %3956 = vst [vmem:[#allocation3 + $0x210] sm:$0xff] %v2411_v30  ;;  %7221 = vmatmul.msk.f32.gmra.mxu3 %vm1429_vm2, %v1636_v31 }
 0x1d0   :  { %v877_v32 = vpop.f32.mrf.mxu0  ;;  %v2931_v33 = vpop.f32.mrf.mxu2 }
 0x1d1   :  { %v878_v35 = vadd.f32 %v8457_v39, %v877_v32  ;;  %v2932_v36 = vadd.f32 %v2931_v33, %v8242_v28  ;;  %v3452_v61 = vpop.f32.mrf.mxu3 }
 0x1d2   :  { %v3453_v37 = vadd.f32 %v3452_v61, %v8245_v29  ;;  %v2413_v38 = vpop.f32.mrf.mxu1 }
 0x1d3   :  { %v1301_v40 = vmax.f32 %v878_v35, 0.0  ;;  %3957 = vst [vmem:[#allocation3 + $0x218] sm:$0xff] %v2932_v36  ;;  %v2414_v41 = vadd.f32 %v2413_v38, %v8231_v20  ;;  %6732 = vmatmul.msk.f32.gmra.mxu0 %vm235_vm0, %v114_v34 }
 0x1d4   :  { %3958 = vst [vmem:[#allocation3 + $0x220] sm:$0xff] %v3453_v37  ;;  %v1637_v42 = vld [vmem:[#allocation2 + $0x138] sm:$0xff] }
 0x1d5   :  { %1470 = vst.msk [vmem:[#allocation2 + $0x140] sm:$0xff] %vm1429_vm2, %v1301_v40  ;;  %6884 = vmatmul.msk.f32.gmra.mxu1 %vm1429_vm2, %v1637_v42  ;;  %7053 = vmatmul.msk.f32.gmra.mxu2 %vm1429_vm2, %v1637_v42  ;;  %v120_v40 = vld [vmem:[%s12514_s0 + $0x1f0] sm:$0xff] }
 0x1d6   :  { %3959 = vst [vmem:[#allocation3 + $0x228] sm:$0xff] %v2414_v41  ;;  %7222 = vmatmul.msk.f32.gmra.mxu3 %vm1429_vm2, %v1637_v42 }
 0x1d8   :  { %v880_v43 = vpop.f32.mrf.mxu0  ;;  %v2934_v44 = vpop.f32.mrf.mxu2 }
 0x1d9   :  { %v881_v46 = vadd.f32 %v8457_v39, %v880_v43  ;;  %v2935_v47 = vadd.f32 %v2934_v44, %v8242_v28  ;;  %v3455_v48 = vpop.f32.mrf.mxu3 }
 0x1da   :  { %v3456_v49 = vadd.f32 %v3455_v48, %v8245_v29  ;;  %v2416_v50 = vpop.f32.mrf.mxu1 }
 0x1db   :  { %v1302_v51 = vmax.f32 %v881_v46, 0.0  ;;  %3960 = vst [vmem:[#allocation3 + $0x230] sm:$0xff] %v2935_v47  ;;  %v2417_v52 = vadd.f32 %v2416_v50, %v8231_v20  ;;  %6733 = vmatmul.msk.f32.gmra.mxu0 %vm235_vm0, %v115_v45 }
 0x1dc   :  { %3961 = vst [vmem:[#allocation3 + $0x238] sm:$0xff] %v3456_v49  ;;  %v1638_v53 = vld [vmem:[#allocation2 + $0x140] sm:$0xff] }
 0x1dd   :  { %1471 = vst.msk [vmem:[#allocation2 + $0x148] sm:$0xff] %vm1429_vm2, %v1302_v51  ;;  %6885 = vmatmul.msk.f32.gmra.mxu1 %vm1429_vm2, %v1638_v53  ;;  %7054 = vmatmul.msk.f32.gmra.mxu2 %vm1429_vm2, %v1638_v53  ;;  %v121_v51 = vld [vmem:[%s12514_s0 + $0x1f8] sm:$0xff] }
 0x1de   :  { %3962 = vst [vmem:[#allocation3 + $0x240] sm:$0xff] %v2417_v52  ;;  %7223 = vmatmul.msk.f32.gmra.mxu3 %vm1429_vm2, %v1638_v53 }
 0x1e0   :  { %v883_v54 = vpop.f32.mrf.mxu0  ;;  %v2937_v55 = vpop.f32.mrf.mxu2 }
 0x1e1   :  { %v884_v57 = vadd.f32 %v8457_v39, %v883_v54  ;;  %v2938_v58 = vadd.f32 %v2937_v55, %v8242_v28  ;;  %v3458_v59 = vpop.f32.mrf.mxu3 }
 0x1e2   :  { %v3459_v60 = vadd.f32 %v3458_v59, %v8245_v29  ;;  %v2419_v62 = vpop.f32.mrf.mxu1 }
 0x1e3   :  { %v1303_v63 = vmax.f32 %v884_v57, 0.0  ;;  %3963 = vst [vmem:[#allocation3 + $0x248] sm:$0xff] %v2938_v58  ;;  %v2420_v0 = vadd.f32 %v2419_v62, %v8231_v20  ;;  %6734 = vmatmul.msk.f32.gmra.mxu0 %vm235_vm0, %v116_v56 }
 0x1e4   :  { %3964 = vst [vmem:[#allocation3 + $0x250] sm:$0xff] %v3459_v60  ;;  %v1639_v1 = vld [vmem:[#allocation2 + $0x148] sm:$0xff] }
 0x1e5   :  { %1472 = vst.msk [vmem:[#allocation2 + $0x150] sm:$0xff] %vm1429_vm2, %v1303_v63  ;;  %6886 = vmatmul.msk.f32.gmra.mxu1 %vm1429_vm2, %v1639_v1  ;;  %7055 = vmatmul.msk.f32.gmra.mxu2 %vm1429_vm2, %v1639_v1  ;;  %v122_v63 = vld [vmem:[%s12514_s0 + $0x200] sm:$0xff] }
 0x1e6   :  { %3965 = vst [vmem:[#allocation3 + $0x258] sm:$0xff] %v2420_v0  ;;  %7224 = vmatmul.msk.f32.gmra.mxu3 %vm1429_vm2, %v1639_v1 }
 0x1e8   :  { %v886_v2 = vpop.f32.mrf.mxu0  ;;  %v2940_v3 = vpop.f32.mrf.mxu2 }
 0x1e9   :  { %v887_v5 = vadd.f32 %v8457_v39, %v886_v2  ;;  %v2941_v6 = vadd.f32 %v2940_v3, %v8242_v28  ;;  %v3461_v7 = vpop.f32.mrf.mxu3 }
 0x1ea   :  { %v3462_v8 = vadd.f32 %v3461_v7, %v8245_v29  ;;  %v2422_v9 = vpop.f32.mrf.mxu1 }
 0x1eb   :  { %v1304_v10 = vmax.f32 %v887_v5, 0.0  ;;  %3966 = vst [vmem:[#allocation3 + $0x260] sm:$0xff] %v2941_v6  ;;  %v2423_v11 = vadd.f32 %v2422_v9, %v8231_v20  ;;  %6735 = vmatmul.msk.f32.gmra.mxu0 %vm235_vm0, %v117_v4 }
 0x1ec   :  { %3967 = vst [vmem:[#allocation3 + $0x268] sm:$0xff] %v3462_v8  ;;  %v1640_v12 = vld [vmem:[#allocation2 + $0x150] sm:$0xff] }
 0x1ed   :  { %1473 = vst.msk [vmem:[#allocation2 + $0x158] sm:$0xff] %vm1429_vm2, %v1304_v10  ;;  %6887 = vmatmul.msk.f32.gmra.mxu1 %vm1429_vm2, %v1640_v12  ;;  %7056 = vmatmul.msk.f32.gmra.mxu2 %vm1429_vm2, %v1640_v12  ;;  %v123_v10 = vld [vmem:[%s12514_s0 + $0x208] sm:$0xff] }
 0x1ee   :  { %3968 = vst [vmem:[#allocation3 + $0x270] sm:$0xff] %v2423_v11  ;;  %7225 = vmatmul.msk.f32.gmra.mxu3 %vm1429_vm2, %v1640_v12 }
 0x1f0   :  { %v889_v13 = vpop.f32.mrf.mxu0  ;;  %v2943_v14 = vpop.f32.mrf.mxu2 }
 0x1f1   :  { %v890_v16 = vadd.f32 %v8457_v39, %v889_v13  ;;  %v2944_v17 = vadd.f32 %v2943_v14, %v8242_v28  ;;  %v3464_v18 = vpop.f32.mrf.mxu3 }
 0x1f2   :  { %v3465_v19 = vadd.f32 %v3464_v18, %v8245_v29  ;;  %v2425_v21 = vpop.f32.mrf.mxu1 }
 0x1f3   :  { %v1305_v22 = vmax.f32 %v890_v16, 0.0  ;;  %3969 = vst [vmem:[#allocation3 + $0x278] sm:$0xff] %v2944_v17  ;;  %v2426_v23 = vadd.f32 %v2425_v21, %v8231_v20  ;;  %6736 = vmatmul.msk.f32.gmra.mxu0 %vm235_vm0, %v118_v15 }
 0x1f4   :  { %3970 = vst [vmem:[#allocation3 + $0x280] sm:$0xff] %v3465_v19  ;;  %v1641_v24 = vld [vmem:[#allocation2 + $0x158] sm:$0xff] }
 0x1f5   :  { %1474 = vst.msk [vmem:[#allocation2 + $0x160] sm:$0xff] %vm1429_vm2, %v1305_v22  ;;  %6888 = vmatmul.msk.f32.gmra.mxu1 %vm1429_vm2, %v1641_v24  ;;  %7057 = vmatmul.msk.f32.gmra.mxu2 %vm1429_vm2, %v1641_v24  ;;  %v124_v22 = vld [vmem:[%s12514_s0 + $0x210] sm:$0xff] }
 0x1f6   :  { %3971 = vst [vmem:[#allocation3 + $0x288] sm:$0xff] %v2426_v23  ;;  %7226 = vmatmul.msk.f32.gmra.mxu3 %vm1429_vm2, %v1641_v24 }
 0x1f8   :  { %v892_v25 = vpop.f32.mrf.mxu0  ;;  %v2946_v26 = vpop.f32.mrf.mxu2 }
 0x1f9   :  { %v893_v30 = vadd.f32 %v8457_v39, %v892_v25  ;;  %v2947_v31 = vadd.f32 %v2946_v26, %v8242_v28  ;;  %v3467_v32 = vpop.f32.mrf.mxu3 }
 0x1fa   :  { %v3468_v33 = vadd.f32 %v3467_v32, %v8245_v29  ;;  %v2428_v34 = vpop.f32.mrf.mxu1 }
 0x1fb   :  { %v1306_v35 = vmax.f32 %v893_v30, 0.0  ;;  %3972 = vst [vmem:[#allocation3 + $0x290] sm:$0xff] %v2947_v31  ;;  %v2429_v36 = vadd.f32 %v2428_v34, %v8231_v20  ;;  %6737 = vmatmul.msk.f32.gmra.mxu0 %vm235_vm0, %v119_v27 }
 0x1fc   :  { %3973 = vst [vmem:[#allocation3 + $0x298] sm:$0xff] %v3468_v33  ;;  %v1642_v61 = vld [vmem:[#allocation2 + $0x160] sm:$0xff] }
 0x1fd   :  { %1475 = vst.msk [vmem:[#allocation2 + $0x168] sm:$0xff] %vm1429_vm2, %v1306_v35  ;;  %6889 = vmatmul.msk.f32.gmra.mxu1 %vm1429_vm2, %v1642_v61  ;;  %7058 = vmatmul.msk.f32.gmra.mxu2 %vm1429_vm2, %v1642_v61  ;;  %v125_v35 = vld [vmem:[%s12514_s0 + $0x218] sm:$0xff] }
 0x1fe   :  { %3974 = vst [vmem:[#allocation3 + $0x2a0] sm:$0xff] %v2429_v36  ;;  %7227 = vmatmul.msk.f32.gmra.mxu3 %vm1429_vm2, %v1642_v61 }
 0x200   :  { %v895_v37 = vpop.f32.mrf.mxu0  ;;  %v2949_v38 = vpop.f32.mrf.mxu2 }
 0x201   :  { %v896_v41 = vadd.f32 %v8457_v39, %v895_v37  ;;  %v2950_v42 = vadd.f32 %v2949_v38, %v8242_v28  ;;  %v3470_v43 = vpop.f32.mrf.mxu3 }
 0x202   :  { %v3471_v44 = vadd.f32 %v3470_v43, %v8245_v29  ;;  %v2431_v45 = vpop.f32.mrf.mxu1 }
 0x203   :  { %v1307_v46 = vmax.f32 %v896_v41, 0.0  ;;  %3975 = vst [vmem:[#allocation3 + $0x2a8] sm:$0xff] %v2950_v42  ;;  %v2432_v47 = vadd.f32 %v2431_v45, %v8231_v20  ;;  %6738 = vmatmul.msk.f32.gmra.mxu0 %vm235_vm0, %v120_v40 }
 0x204   :  { %3976 = vst [vmem:[#allocation3 + $0x2b0] sm:$0xff] %v3471_v44  ;;  %v1643_v48 = vld [vmem:[#allocation2 + $0x168] sm:$0xff] }
 0x205   :  { %1476 = vst.msk [vmem:[#allocation2 + $0x170] sm:$0xff] %vm1429_vm2, %v1307_v46  ;;  %6890 = vmatmul.msk.f32.gmra.mxu1 %vm1429_vm2, %v1643_v48  ;;  %7059 = vmatmul.msk.f32.gmra.mxu2 %vm1429_vm2, %v1643_v48  ;;  %v126_v46 = vld [vmem:[%s12514_s0 + $0x220] sm:$0xff] }
 0x206   :  { %3977 = vst [vmem:[#allocation3 + $0x2b8] sm:$0xff] %v2432_v47  ;;  %7228 = vmatmul.msk.f32.gmra.mxu3 %vm1429_vm2, %v1643_v48 }
 0x208   :  { %v898_v49 = vpop.f32.mrf.mxu0  ;;  %v2952_v50 = vpop.f32.mrf.mxu2 }
 0x209   :  { %v899_v52 = vadd.f32 %v8457_v39, %v898_v49  ;;  %v2953_v53 = vadd.f32 %v2952_v50, %v8242_v28  ;;  %v3473_v54 = vpop.f32.mrf.mxu3 }
 0x20a   :  { %v3474_v55 = vadd.f32 %v3473_v54, %v8245_v29  ;;  %v2434_v56 = vpop.f32.mrf.mxu1 }
 0x20b   :  { %v1308_v57 = vmax.f32 %v899_v52, 0.0  ;;  %3978 = vst [vmem:[#allocation3 + $0x2c0] sm:$0xff] %v2953_v53  ;;  %v2435_v58 = vadd.f32 %v2434_v56, %v8231_v20  ;;  %6739 = vmatmul.msk.f32.gmra.mxu0 %vm235_vm0, %v121_v51 }
 0x20c   :  { %3979 = vst [vmem:[#allocation3 + $0x2c8] sm:$0xff] %v3474_v55  ;;  %v1644_v59 = vld [vmem:[#allocation2 + $0x170] sm:$0xff] }
 0x20d   :  { %1477 = vst.msk [vmem:[#allocation2 + $0x178] sm:$0xff] %vm1429_vm2, %v1308_v57  ;;  %6891 = vmatmul.msk.f32.gmra.mxu1 %vm1429_vm2, %v1644_v59  ;;  %7060 = vmatmul.msk.f32.gmra.mxu2 %vm1429_vm2, %v1644_v59  ;;  %v127_v57 = vld [vmem:[%s12514_s0 + $0x228] sm:$0xff] }
 0x20e   :  { %3980 = vst [vmem:[#allocation3 + $0x2d0] sm:$0xff] %v2435_v58  ;;  %7229 = vmatmul.msk.f32.gmra.mxu3 %vm1429_vm2, %v1644_v59 }
 0x210   :  { %v901_v60 = vpop.f32.mrf.mxu0  ;;  %v2955_v62 = vpop.f32.mrf.mxu2 }
 0x211   :  { %v902_v0 = vadd.f32 %v8457_v39, %v901_v60  ;;  %v2956_v1 = vadd.f32 %v2955_v62, %v8242_v28  ;;  %v3476_v2 = vpop.f32.mrf.mxu3 }
 0x212   :  { %v3477_v3 = vadd.f32 %v3476_v2, %v8245_v29  ;;  %v2437_v4 = vpop.f32.mrf.mxu1 }
 0x213   :  { %v1309_v5 = vmax.f32 %v902_v0, 0.0  ;;  %3981 = vst [vmem:[#allocation3 + $0x2d8] sm:$0xff] %v2956_v1  ;;  %v2438_v6 = vadd.f32 %v2437_v4, %v8231_v20  ;;  %6740 = vmatmul.msk.f32.gmra.mxu0 %vm235_vm0, %v122_v63 }
 0x214   :  { %3982 = vst [vmem:[#allocation3 + $0x2e0] sm:$0xff] %v3477_v3  ;;  %v1645_v7 = vld [vmem:[#allocation2 + $0x178] sm:$0xff] }
 0x215   :  { %1478 = vst.msk [vmem:[#allocation2 + $0x180] sm:$0xff] %vm1429_vm2, %v1309_v5  ;;  %6892 = vmatmul.msk.f32.gmra.mxu1 %vm1429_vm2, %v1645_v7  ;;  %7061 = vmatmul.msk.f32.gmra.mxu2 %vm1429_vm2, %v1645_v7  ;;  %v128_v5 = vld [vmem:[%s12514_s0 + $0x230] sm:$0xff] }
 0x216   :  { %3983 = vst [vmem:[#allocation3 + $0x2e8] sm:$0xff] %v2438_v6  ;;  %7230 = vmatmul.msk.f32.gmra.mxu3 %vm1429_vm2, %v1645_v7 }
 0x218   :  { %v904_v8 = vpop.f32.mrf.mxu0  ;;  %v2958_v9 = vpop.f32.mrf.mxu2 }
 0x219   :  { %v905_v11 = vadd.f32 %v8457_v39, %v904_v8  ;;  %v2959_v12 = vadd.f32 %v2958_v9, %v8242_v28  ;;  %v3479_v13 = vpop.f32.mrf.mxu3 }
 0x21a   :  { %v3480_v14 = vadd.f32 %v3479_v13, %v8245_v29  ;;  %v2440_v15 = vpop.f32.mrf.mxu1 }
 0x21b   :  { %v1310_v16 = vmax.f32 %v905_v11, 0.0  ;;  %3984 = vst [vmem:[#allocation3 + $0x2f0] sm:$0xff] %v2959_v12  ;;  %v2441_v17 = vadd.f32 %v2440_v15, %v8231_v20  ;;  %6741 = vmatmul.msk.f32.gmra.mxu0 %vm235_vm0, %v123_v10 }
 0x21c   :  { %3985 = vst [vmem:[#allocation3 + $0x2f8] sm:$0xff] %v3480_v14  ;;  %v1646_v18 = vld [vmem:[#allocation2 + $0x180] sm:$0xff] }
 0x21d   :  { %1479 = vst.msk [vmem:[#allocation2 + $0x188] sm:$0xff] %vm1429_vm2, %v1310_v16  ;;  %6893 = vmatmul.msk.f32.gmra.mxu1 %vm1429_vm2, %v1646_v18  ;;  %7062 = vmatmul.msk.f32.gmra.mxu2 %vm1429_vm2, %v1646_v18  ;;  %v129_v16 = vld [vmem:[%s12514_s0 + $0x238] sm:$0xff] }
 0x21e   :  { %3986 = vst [vmem:[#allocation3 + $0x300] sm:$0xff] %v2441_v17  ;;  %7231 = vmatmul.msk.f32.gmra.mxu3 %vm1429_vm2, %v1646_v18 }
 0x220   :  { %v907_v19 = vpop.f32.mrf.mxu0  ;;  %v2961_v21 = vpop.f32.mrf.mxu2 }
 0x221   :  { %v908_v23 = vadd.f32 %v8457_v39, %v907_v19  ;;  %v2962_v24 = vadd.f32 %v2961_v21, %v8242_v28  ;;  %v3482_v25 = vpop.f32.mrf.mxu3 }
 0x222   :  { %v3483_v26 = vadd.f32 %v3482_v25, %v8245_v29  ;;  %v2443_v27 = vpop.f32.mrf.mxu1 }
 0x223   :  { %v1311_v30 = vmax.f32 %v908_v23, 0.0  ;;  %3987 = vst [vmem:[#allocation3 + $0x308] sm:$0xff] %v2962_v24  ;;  %v2444_v31 = vadd.f32 %v2443_v27, %v8231_v20  ;;  %6742 = vmatmul.msk.f32.gmra.mxu0 %vm235_vm0, %v124_v22 }
 0x224   :  { %3988 = vst [vmem:[#allocation3 + $0x310] sm:$0xff] %v3483_v26  ;;  %v1647_v32 = vld [vmem:[#allocation2 + $0x188] sm:$0xff] }
 0x225   :  { %1480 = vst.msk [vmem:[#allocation2 + $0x190] sm:$0xff] %vm1429_vm2, %v1311_v30  ;;  %6894 = vmatmul.msk.f32.gmra.mxu1 %vm1429_vm2, %v1647_v32  ;;  %7063 = vmatmul.msk.f32.gmra.mxu2 %vm1429_vm2, %v1647_v32  ;;  %v130_v30 = vld [vmem:[%s12514_s0 + $0x240] sm:$0xff] }
 0x226   :  { %3989 = vst [vmem:[#allocation3 + $0x318] sm:$0xff] %v2444_v31  ;;  %7232 = vmatmul.msk.f32.gmra.mxu3 %vm1429_vm2, %v1647_v32 }
 0x228   :  { %v910_v33 = vpop.f32.mrf.mxu0  ;;  %v2964_v34 = vpop.f32.mrf.mxu2 }
 0x229   :  { %v911_v36 = vadd.f32 %v8457_v39, %v910_v33  ;;  %v2965_v61 = vadd.f32 %v2964_v34, %v8242_v28  ;;  %v3485_v37 = vpop.f32.mrf.mxu3 }
 0x22a   :  { %v3486_v38 = vadd.f32 %v3485_v37, %v8245_v29  ;;  %v2446_v40 = vpop.f32.mrf.mxu1 }
 0x22b   :  { %v1312_v41 = vmax.f32 %v911_v36, 0.0  ;;  %3990 = vst [vmem:[#allocation3 + $0x320] sm:$0xff] %v2965_v61  ;;  %v2447_v42 = vadd.f32 %v2446_v40, %v8231_v20  ;;  %6743 = vmatmul.msk.f32.gmra.mxu0 %vm235_vm0, %v125_v35 }
 0x22c   :  { %3991 = vst [vmem:[#allocation3 + $0x328] sm:$0xff] %v3486_v38  ;;  %v1648_v43 = vld [vmem:[#allocation2 + $0x190] sm:$0xff] }
 0x22d   :  { %1481 = vst.msk [vmem:[#allocation2 + $0x198] sm:$0xff] %vm1429_vm2, %v1312_v41  ;;  %6895 = vmatmul.msk.f32.gmra.mxu1 %vm1429_vm2, %v1648_v43  ;;  %7064 = vmatmul.msk.f32.gmra.mxu2 %vm1429_vm2, %v1648_v43  ;;  %v131_v41 = vld [vmem:[%s12514_s0 + $0x248] sm:$0xff] }
 0x22e   :  { %3992 = vst [vmem:[#allocation3 + $0x330] sm:$0xff] %v2447_v42  ;;  %7233 = vmatmul.msk.f32.gmra.mxu3 %vm1429_vm2, %v1648_v43 }
 0x230   :  { %v913_v44 = vpop.f32.mrf.mxu0  ;;  %v2967_v45 = vpop.f32.mrf.mxu2 }
 0x231   :  { %v914_v47 = vadd.f32 %v8457_v39, %v913_v44  ;;  %v2968_v48 = vadd.f32 %v2967_v45, %v8242_v28  ;;  %v3488_v49 = vpop.f32.mrf.mxu3 }
 0x232   :  { %v3489_v50 = vadd.f32 %v3488_v49, %v8245_v29  ;;  %v2449_v51 = vpop.f32.mrf.mxu1 }
 0x233   :  { %v1313_v52 = vmax.f32 %v914_v47, 0.0  ;;  %3993 = vst [vmem:[#allocation3 + $0x338] sm:$0xff] %v2968_v48  ;;  %v2450_v53 = vadd.f32 %v2449_v51, %v8231_v20  ;;  %6744 = vmatmul.msk.f32.gmra.mxu0 %vm235_vm0, %v126_v46 }
 0x234   :  { %3994 = vst [vmem:[#allocation3 + $0x340] sm:$0xff] %v3489_v50  ;;  %v1649_v54 = vld [vmem:[#allocation2 + $0x198] sm:$0xff] }
 0x235   :  { %1482 = vst.msk [vmem:[#allocation2 + $0x1a0] sm:$0xff] %vm1429_vm2, %v1313_v52  ;;  %6896 = vmatmul.msk.f32.gmra.mxu1 %vm1429_vm2, %v1649_v54  ;;  %7065 = vmatmul.msk.f32.gmra.mxu2 %vm1429_vm2, %v1649_v54  ;;  %v132_v52 = vld [vmem:[%s12514_s0 + $0x250] sm:$0xff] }
 0x236   :  { %3995 = vst [vmem:[#allocation3 + $0x348] sm:$0xff] %v2450_v53  ;;  %7234 = vmatmul.msk.f32.gmra.mxu3 %vm1429_vm2, %v1649_v54 }
 0x238   :  { %v916_v55 = vpop.f32.mrf.mxu0  ;;  %v2970_v56 = vpop.f32.mrf.mxu2 }
 0x239   :  { %v917_v58 = vadd.f32 %v8457_v39, %v916_v55  ;;  %v2971_v59 = vadd.f32 %v2970_v56, %v8242_v28  ;;  %v3491_v60 = vpop.f32.mrf.mxu3 }
 0x23a   :  { %v3492_v62 = vadd.f32 %v3491_v60, %v8245_v29  ;;  %v2452_v63 = vpop.f32.mrf.mxu1 }
 0x23b   :  { %v1314_v0 = vmax.f32 %v917_v58, 0.0  ;;  %3996 = vst [vmem:[#allocation3 + $0x350] sm:$0xff] %v2971_v59  ;;  %v2453_v1 = vadd.f32 %v2452_v63, %v8231_v20  ;;  %6745 = vmatmul.msk.f32.gmra.mxu0 %vm235_vm0, %v127_v57 }
 0x23c   :  { %3997 = vst [vmem:[#allocation3 + $0x358] sm:$0xff] %v3492_v62  ;;  %v1650_v2 = vld [vmem:[#allocation2 + $0x1a0] sm:$0xff] }
 0x23d   :  { %1483 = vst.msk [vmem:[#allocation2 + $0x1a8] sm:$0xff] %vm1429_vm2, %v1314_v0  ;;  %6897 = vmatmul.msk.f32.gmra.mxu1 %vm1429_vm2, %v1650_v2  ;;  %7066 = vmatmul.msk.f32.gmra.mxu2 %vm1429_vm2, %v1650_v2  ;;  %v133_v0 = vld [vmem:[%s12514_s0 + $0x258] sm:$0xff] }
 0x23e   :  { %3998 = vst [vmem:[#allocation3 + $0x360] sm:$0xff] %v2453_v1  ;;  %7235 = vmatmul.msk.f32.gmra.mxu3 %vm1429_vm2, %v1650_v2 }
 0x240   :  { %v919_v3 = vpop.f32.mrf.mxu0  ;;  %v2973_v4 = vpop.f32.mrf.mxu2 }
 0x241   :  { %v920_v6 = vadd.f32 %v8457_v39, %v919_v3  ;;  %v2974_v7 = vadd.f32 %v2973_v4, %v8242_v28  ;;  %v3494_v8 = vpop.f32.mrf.mxu3 }
 0x242   :  { %v3495_v9 = vadd.f32 %v3494_v8, %v8245_v29  ;;  %v2455_v10 = vpop.f32.mrf.mxu1 }
 0x243   :  { %v1315_v11 = vmax.f32 %v920_v6, 0.0  ;;  %3999 = vst [vmem:[#allocation3 + $0x368] sm:$0xff] %v2974_v7  ;;  %v2456_v12 = vadd.f32 %v2455_v10, %v8231_v20  ;;  %6746 = vmatmul.msk.f32.gmra.mxu0 %vm235_vm0, %v128_v5 }
 0x244   :  { %4000 = vst [vmem:[#allocation3 + $0x370] sm:$0xff] %v3495_v9  ;;  %v1651_v13 = vld [vmem:[#allocation2 + $0x1a8] sm:$0xff] }
 0x245   :  { %1484 = vst.msk [vmem:[#allocation2 + $0x1b0] sm:$0xff] %vm1429_vm2, %v1315_v11  ;;  %6898 = vmatmul.msk.f32.gmra.mxu1 %vm1429_vm2, %v1651_v13  ;;  %7067 = vmatmul.msk.f32.gmra.mxu2 %vm1429_vm2, %v1651_v13  ;;  %v134_v11 = vld [vmem:[%s12514_s0 + $0x260] sm:$0xff] }
 0x246   :  { %4001 = vst [vmem:[#allocation3 + $0x378] sm:$0xff] %v2456_v12  ;;  %7236 = vmatmul.msk.f32.gmra.mxu3 %vm1429_vm2, %v1651_v13 }
 0x248   :  { %v922_v14 = vpop.f32.mrf.mxu0  ;;  %v2976_v15 = vpop.f32.mrf.mxu2 }
 0x249   :  { %v923_v17 = vadd.f32 %v8457_v39, %v922_v14  ;;  %v2977_v18 = vadd.f32 %v2976_v15, %v8242_v28  ;;  %v3497_v19 = vpop.f32.mrf.mxu3 }
 0x24a   :  { %v3498_v21 = vadd.f32 %v3497_v19, %v8245_v29  ;;  %v2458_v22 = vpop.f32.mrf.mxu1 }
 0x24b   :  { %v1316_v23 = vmax.f32 %v923_v17, 0.0  ;;  %4002 = vst [vmem:[#allocation3 + $0x380] sm:$0xff] %v2977_v18  ;;  %v2459_v24 = vadd.f32 %v2458_v22, %v8231_v20  ;;  %6747 = vmatmul.msk.f32.gmra.mxu0 %vm235_vm0, %v129_v16 }
 0x24c   :  { %4003 = vst [vmem:[#allocation3 + $0x388] sm:$0xff] %v3498_v21  ;;  %v1652_v25 = vld [vmem:[#allocation2 + $0x1b0] sm:$0xff] }
 0x24d   :  { %1485 = vst.msk [vmem:[#allocation2 + $0x1b8] sm:$0xff] %vm1429_vm2, %v1316_v23  ;;  %6899 = vmatmul.msk.f32.gmra.mxu1 %vm1429_vm2, %v1652_v25  ;;  %7068 = vmatmul.msk.f32.gmra.mxu2 %vm1429_vm2, %v1652_v25  ;;  %v135_v23 = vld [vmem:[%s12514_s0 + $0x268] sm:$0xff] }
 0x24e   :  { %4004 = vst [vmem:[#allocation3 + $0x390] sm:$0xff] %v2459_v24  ;;  %7237 = vmatmul.msk.f32.gmra.mxu3 %vm1429_vm2, %v1652_v25 }
 0x250   :  { %v925_v26 = vpop.f32.mrf.mxu0  ;;  %v2979_v27 = vpop.f32.mrf.mxu2 }
 0x251   :  { %v926_v31 = vadd.f32 %v8457_v39, %v925_v26  ;;  %v2980_v32 = vadd.f32 %v2979_v27, %v8242_v28  ;;  %v3500_v33 = vpop.f32.mrf.mxu3 }
 0x252   :  { %v3501_v34 = vadd.f32 %v3500_v33, %v8245_v29  ;;  %v2461_v35 = vpop.f32.mrf.mxu1 }
 0x253   :  { %v1317_v36 = vmax.f32 %v926_v31, 0.0  ;;  %4005 = vst [vmem:[#allocation3 + $0x398] sm:$0xff] %v2980_v32  ;;  %v2462_v61 = vadd.f32 %v2461_v35, %v8231_v20  ;;  %6748 = vmatmul.msk.f32.gmra.mxu0 %vm235_vm0, %v130_v30  ;;  %v136_v35 = vld [vmem:[%s12514_s0 + $0x270] sm:$0xff] }
 0x254   :  { %4006 = vst [vmem:[#allocation3 + $0x3a0] sm:$0xff] %v3501_v34  ;;  %v1653_v37 = vld [vmem:[#allocation2 + $0x1b8] sm:$0xff] }
 0x255   :  { %1486 = vst.msk [vmem:[#allocation2 + $0x1c0] sm:$0xff] %vm1429_vm2, %v1317_v36  ;;  %6900 = vmatmul.msk.f32.gmra.mxu1 %vm1429_vm2, %v1653_v37  ;;  %7069 = vmatmul.msk.f32.gmra.mxu2 %vm1429_vm2, %v1653_v37  ;;  %v8786_v36 = vld [vmem:[%s12513_s2] ss:$0 sm:$0xff] }
 0x256   :  { %4007 = vst [vmem:[#allocation3 + $0x3a8] sm:$0xff] %v2462_v61  ;;  %7238 = vmatmul.msk.f32.gmra.mxu3 %vm1429_vm2, %v1653_v37 }
 0x258   :  { %v928_v38 = vpop.f32.mrf.mxu0  ;;  %v2982_v40 = vpop.f32.mrf.mxu2 }
 0x259   :  { %v929_v42 = vadd.f32 %v8457_v39, %v928_v38  ;;  %v2983_v43 = vadd.f32 %v2982_v40, %v8242_v28  ;;  %v3503_v44 = vpop.f32.mrf.mxu3 }
 0x25a   :  { %v3504_v45 = vadd.f32 %v3503_v44, %v8245_v29  ;;  %v2464_v46 = vpop.f32.mrf.mxu1 }
 0x25b   :  { %v1318_v47 = vmax.f32 %v929_v42, 0.0  ;;  %4008 = vst [vmem:[#allocation3 + $0x3b0] sm:$0xff] %v2983_v43  ;;  %v2465_v48 = vadd.f32 %v2464_v46, %v8231_v20  ;;  %6749 = vmatmul.msk.f32.gmra.mxu0 %vm235_vm0, %v131_v41 }
 0x25c   :  { %4009 = vst [vmem:[#allocation3 + $0x3b8] sm:$0xff] %v3504_v45  ;;  %v1654_v49 = vld [vmem:[#allocation2 + $0x1c0] sm:$0xff] }
 0x25d   :  { %1487 = vst.msk [vmem:[#allocation2 + $0x1c8] sm:$0xff] %vm1429_vm2, %v1318_v47  ;;  %6901 = vmatmul.msk.f32.gmra.mxu1 %vm1429_vm2, %v1654_v49  ;;  %7070 = vmatmul.msk.f32.gmra.mxu2 %vm1429_vm2, %v1654_v49  ;;  %v137_v47 = vld [vmem:[%s12514_s0 + $0x278] sm:$0xff] }
 0x25e   :  { %4010 = vst [vmem:[#allocation3 + $0x3c0] sm:$0xff] %v2465_v48  ;;  %7239 = vmatmul.msk.f32.gmra.mxu3 %vm1429_vm2, %v1654_v49 }
 0x260   :  { %v931_v50 = vpop.f32.mrf.mxu0  ;;  %v2985_v51 = vpop.f32.mrf.mxu2 }
 0x261   :  { %v932_v53 = vadd.f32 %v8457_v39, %v931_v50  ;;  %v2986_v54 = vadd.f32 %v2985_v51, %v8242_v28  ;;  %v3506_v55 = vpop.f32.mrf.mxu3 }
 0x262   :  { %v3507_v56 = vadd.f32 %v3506_v55, %v8245_v29  ;;  %v2467_v57 = vpop.f32.mrf.mxu1 }
 0x263   :  { %v1319_v58 = vmax.f32 %v932_v53, 0.0  ;;  %4011 = vst [vmem:[#allocation3 + $0x3c8] sm:$0xff] %v2986_v54  ;;  %v2468_v59 = vadd.f32 %v2467_v57, %v8231_v20  ;;  %6750 = vmatmul.msk.f32.gmra.mxu0 %vm235_vm0, %v132_v52 }
 0x264   :  { %4012 = vst [vmem:[#allocation3 + $0x3d0] sm:$0xff] %v3507_v56  ;;  %v1655_v60 = vld [vmem:[#allocation2 + $0x1c8] sm:$0xff] }
 0x265   :  { %1488 = vst.msk [vmem:[#allocation2 + $0x1d0] sm:$0xff] %vm1429_vm2, %v1319_v58  ;;  %6902 = vmatmul.msk.f32.gmra.mxu1 %vm1429_vm2, %v1655_v60  ;;  %7071 = vmatmul.msk.f32.gmra.mxu2 %vm1429_vm2, %v1655_v60  ;;  %v138_v58 = vld [vmem:[%s12514_s0 + $0x280] sm:$0xff] }
 0x266   :  { %4013 = vst [vmem:[#allocation3 + $0x3d8] sm:$0xff] %v2468_v59  ;;  %7240 = vmatmul.msk.f32.gmra.mxu3 %vm1429_vm2, %v1655_v60 }
 0x268   :  { %v934_v62 = vpop.f32.mrf.mxu0  ;;  %v2988_v63 = vpop.f32.mrf.mxu2 }
 0x269   :  { %v935_v1 = vadd.f32 %v8457_v39, %v934_v62  ;;  %v2989_v2 = vadd.f32 %v2988_v63, %v8242_v28  ;;  %v3509_v3 = vpop.f32.mrf.mxu3 }
 0x26a   :  { %v3510_v4 = vadd.f32 %v3509_v3, %v8245_v29  ;;  %v2470_v5 = vpop.f32.mrf.mxu1 }
 0x26b   :  { %v1320_v6 = vmax.f32 %v935_v1, 0.0  ;;  %4014 = vst [vmem:[#allocation3 + $0x3e0] sm:$0xff] %v2989_v2  ;;  %v2471_v7 = vadd.f32 %v2470_v5, %v8231_v20  ;;  %6751 = vmatmul.msk.f32.gmra.mxu0 %vm235_vm0, %v133_v0 }
 0x26c   :  { %4015 = vst [vmem:[#allocation3 + $0x3e8] sm:$0xff] %v3510_v4  ;;  %v1656_v8 = vld [vmem:[#allocation2 + $0x1d0] sm:$0xff] }
 0x26d   :  { %1489 = vst.msk [vmem:[#allocation2 + $0x1d8] sm:$0xff] %vm1429_vm2, %v1320_v6  ;;  %6903 = vmatmul.msk.f32.gmra.mxu1 %vm1429_vm2, %v1656_v8  ;;  %7072 = vmatmul.msk.f32.gmra.mxu2 %vm1429_vm2, %v1656_v8  ;;  %v139_v6 = vld [vmem:[%s12514_s0 + $0x288] sm:$0xff] }
 0x26e   :  { %4016 = vst [vmem:[#allocation3 + $0x3f0] sm:$0xff] %v2471_v7  ;;  %7241 = vmatmul.msk.f32.gmra.mxu3 %vm1429_vm2, %v1656_v8 }
 0x270   :  { %v937_v9 = vpop.f32.mrf.mxu0  ;;  %v2991_v10 = vpop.f32.mrf.mxu2 }
 0x271   :  { %v938_v12 = vadd.f32 %v8457_v39, %v937_v9  ;;  %v2992_v13 = vadd.f32 %v2991_v10, %v8242_v28  ;;  %v3512_v14 = vpop.f32.mrf.mxu3 }
 0x272   :  { %v3513_v15 = vadd.f32 %v3512_v14, %v8245_v29  ;;  %v2473_v16 = vpop.f32.mrf.mxu1 }
 0x273   :  { %v1321_v17 = vmax.f32 %v938_v12, 0.0  ;;  %4017 = vst [vmem:[#allocation3 + $0x3f8] sm:$0xff] %v2992_v13  ;;  %v2474_v18 = vadd.f32 %v2473_v16, %v8231_v20  ;;  %6752 = vmatmul.msk.f32.gmra.mxu0 %vm235_vm0, %v134_v11 }
 0x274   :  { %4018 = vst [vmem:[#allocation3 + $0x400] sm:$0xff] %v3513_v15  ;;  %v1657_v19 = vld [vmem:[#allocation2 + $0x1d8] sm:$0xff] }
 0x275   :  { %1490 = vst.msk [vmem:[#allocation2 + $0x1e0] sm:$0xff] %vm1429_vm2, %v1321_v17  ;;  %6904 = vmatmul.msk.f32.gmra.mxu1 %vm1429_vm2, %v1657_v19  ;;  %7073 = vmatmul.msk.f32.gmra.mxu2 %vm1429_vm2, %v1657_v19  ;;  %v140_v17 = vld [vmem:[%s12514_s0 + $0x290] sm:$0xff] }
 0x276   :  { %4019 = vst [vmem:[#allocation3 + $0x408] sm:$0xff] %v2474_v18  ;;  %7242 = vmatmul.msk.f32.gmra.mxu3 %vm1429_vm2, %v1657_v19 }
 0x278   :  { %v940_v21 = vpop.f32.mrf.mxu0  ;;  %v2994_v22 = vpop.f32.mrf.mxu2 }
 0x279   :  { %v941_v24 = vadd.f32 %v8457_v39, %v940_v21  ;;  %v2995_v25 = vadd.f32 %v2994_v22, %v8242_v28  ;;  %v3515_v26 = vpop.f32.mrf.mxu3 }
 0x27a   :  { %v3516_v27 = vadd.f32 %v3515_v26, %v8245_v29  ;;  %v2476_v30 = vpop.f32.mrf.mxu1 }
 0x27b   :  { %v1322_v31 = vmax.f32 %v941_v24, 0.0  ;;  %4020 = vst [vmem:[#allocation3 + $0x410] sm:$0xff] %v2995_v25  ;;  %v2477_v32 = vadd.f32 %v2476_v30, %v8231_v20  ;;  %6753 = vmatmul.msk.f32.gmra.mxu0 %vm235_vm0, %v135_v23 }
 0x27c   :  { %4021 = vst [vmem:[#allocation3 + $0x418] sm:$0xff] %v3516_v27  ;;  %v1658_v33 = vld [vmem:[#allocation2 + $0x1e0] sm:$0xff] }
 0x27d   :  { %1491 = vst.msk [vmem:[#allocation2 + $0x1e8] sm:$0xff] %vm1429_vm2, %v1322_v31  ;;  %6905 = vmatmul.msk.f32.gmra.mxu1 %vm1429_vm2, %v1658_v33  ;;  %7074 = vmatmul.msk.f32.gmra.mxu2 %vm1429_vm2, %v1658_v33  ;;  %v141_v31 = vld [vmem:[%s12514_s0 + $0x298] sm:$0xff] }
 0x27e   :  { %4022 = vst [vmem:[#allocation3 + $0x420] sm:$0xff] %v2477_v32  ;;  %7243 = vmatmul.msk.f32.gmra.mxu3 %vm1429_vm2, %v1658_v33 }
 0x280   :  { %v943_v39 = vpop.f32.mrf.mxu0  ;;  %v2997_v34 = vpop.f32.mrf.mxu2 }
 0x281   :  { %v944_v61 = vadd.f32 %v8786_v36, %v943_v39  ;;  %v2998_v37 = vadd.f32 %v2997_v34, %v8242_v28  ;;  %v3518_v38 = vpop.f32.mrf.mxu3 }
 0x282   :  { %v3519_v40 = vadd.f32 %v3518_v38, %v8245_v29  ;;  %v2479_v41 = vpop.f32.mrf.mxu1 }
 0x283   :  { %v1323_v42 = vmax.f32 %v944_v61, 0.0  ;;  %4023 = vst [vmem:[#allocation3 + $0x428] sm:$0xff] %v2998_v37  ;;  %v2480_v43 = vadd.f32 %v2479_v41, %v8231_v20  ;;  %6754 = vmatmul.msk.f32.gmra.mxu0 %vm235_vm0, %v136_v35 }
 0x284   :  { %4024 = vst [vmem:[#allocation3 + $0x430] sm:$0xff] %v3519_v40  ;;  %v1659_v44 = vld [vmem:[#allocation2 + $0x1e8] sm:$0xff] }
 0x285   :  { %1492 = vst.msk [vmem:[#allocation2 + $0x1f0] sm:$0xff] %vm1429_vm2, %v1323_v42  ;;  %6906 = vmatmul.msk.f32.gmra.mxu1 %vm1429_vm2, %v1659_v44  ;;  %7075 = vmatmul.msk.f32.gmra.mxu2 %vm1429_vm2, %v1659_v44  ;;  %v142_v42 = vld [vmem:[%s12514_s0 + $0x2a0] sm:$0xff] }
 0x286   :  { %4025 = vst [vmem:[#allocation3 + $0x438] sm:$0xff] %v2480_v43  ;;  %7244 = vmatmul.msk.f32.gmra.mxu3 %vm1429_vm2, %v1659_v44 }
 0x288   :  { %v946_v45 = vpop.f32.mrf.mxu0  ;;  %v3000_v46 = vpop.f32.mrf.mxu2 }
 0x289   :  { %v947_v48 = vadd.f32 %v8786_v36, %v946_v45  ;;  %v3001_v49 = vadd.f32 %v3000_v46, %v8242_v28  ;;  %v3521_v50 = vpop.f32.mrf.mxu3 }
 0x28a   :  { %v3522_v51 = vadd.f32 %v3521_v50, %v8245_v29  ;;  %v2482_v52 = vpop.f32.mrf.mxu1 }
 0x28b   :  { %v1324_v53 = vmax.f32 %v947_v48, 0.0  ;;  %4026 = vst [vmem:[#allocation3 + $0x440] sm:$0xff] %v3001_v49  ;;  %v2483_v54 = vadd.f32 %v2482_v52, %v8231_v20  ;;  %6755 = vmatmul.msk.f32.gmra.mxu0 %vm235_vm0, %v137_v47 }
 0x28c   :  { %4027 = vst [vmem:[#allocation3 + $0x448] sm:$0xff] %v3522_v51  ;;  %v1660_v55 = vld [vmem:[#allocation2 + $0x1f0] sm:$0xff] }
 0x28d   :  { %1493 = vst.msk [vmem:[#allocation2 + $0x1f8] sm:$0xff] %vm1429_vm2, %v1324_v53  ;;  %6907 = vmatmul.msk.f32.gmra.mxu1 %vm1429_vm2, %v1660_v55  ;;  %7076 = vmatmul.msk.f32.gmra.mxu2 %vm1429_vm2, %v1660_v55  ;;  %v143_v53 = vld [vmem:[%s12514_s0 + $0x2a8] sm:$0xff] }
 0x28e   :  { %4028 = vst [vmem:[#allocation3 + $0x450] sm:$0xff] %v2483_v54  ;;  %7245 = vmatmul.msk.f32.gmra.mxu3 %vm1429_vm2, %v1660_v55 }
 0x290   :  { %v949_v56 = vpop.f32.mrf.mxu0  ;;  %v3003_v57 = vpop.f32.mrf.mxu2 }
 0x291   :  { %v950_v59 = vadd.f32 %v8786_v36, %v949_v56  ;;  %v3004_v60 = vadd.f32 %v3003_v57, %v8242_v28  ;;  %v3524_v62 = vpop.f32.mrf.mxu3 }
 0x292   :  { %v3525_v63 = vadd.f32 %v3524_v62, %v8245_v29  ;;  %v2485_v0 = vpop.f32.mrf.mxu1 }
 0x293   :  { %v1325_v1 = vmax.f32 %v950_v59, 0.0  ;;  %4029 = vst [vmem:[#allocation3 + $0x458] sm:$0xff] %v3004_v60  ;;  %v2486_v2 = vadd.f32 %v2485_v0, %v8231_v20  ;;  %6756 = vmatmul.msk.f32.gmra.mxu0 %vm235_vm0, %v138_v58 }
 0x294   :  { %4030 = vst [vmem:[#allocation3 + $0x460] sm:$0xff] %v3525_v63  ;;  %v1661_v3 = vld [vmem:[#allocation2 + $0x1f8] sm:$0xff] }
 0x295   :  { %1494 = vst.msk [vmem:[#allocation2 + $0x200] sm:$0xff] %vm1429_vm2, %v1325_v1  ;;  %6908 = vmatmul.msk.f32.gmra.mxu1 %vm1429_vm2, %v1661_v3  ;;  %7077 = vmatmul.msk.f32.gmra.mxu2 %vm1429_vm2, %v1661_v3  ;;  %v144_v1 = vld [vmem:[%s12514_s0 + $0x2b0] sm:$0xff] }
 0x296   :  { %4031 = vst [vmem:[#allocation3 + $0x468] sm:$0xff] %v2486_v2  ;;  %7246 = vmatmul.msk.f32.gmra.mxu3 %vm1429_vm2, %v1661_v3 }
 0x298   :  { %v952_v4 = vpop.f32.mrf.mxu0  ;;  %v3006_v5 = vpop.f32.mrf.mxu2 }
 0x299   :  { %v953_v7 = vadd.f32 %v8786_v36, %v952_v4  ;;  %v3007_v8 = vadd.f32 %v3006_v5, %v8242_v28  ;;  %v3527_v9 = vpop.f32.mrf.mxu3 }
 0x29a   :  { %v3528_v10 = vadd.f32 %v3527_v9, %v8245_v29  ;;  %v2488_v11 = vpop.f32.mrf.mxu1 }
 0x29b   :  { %v1326_v12 = vmax.f32 %v953_v7, 0.0  ;;  %4032 = vst [vmem:[#allocation3 + $0x470] sm:$0xff] %v3007_v8  ;;  %v2489_v13 = vadd.f32 %v2488_v11, %v8231_v20  ;;  %6757 = vmatmul.msk.f32.gmra.mxu0 %vm235_vm0, %v139_v6 }
 0x29c   :  { %4033 = vst [vmem:[#allocation3 + $0x478] sm:$0xff] %v3528_v10  ;;  %v1662_v14 = vld [vmem:[#allocation2 + $0x200] sm:$0xff] }
 0x29d   :  { %1495 = vst.msk [vmem:[#allocation2 + $0x208] sm:$0xff] %vm1429_vm2, %v1326_v12  ;;  %6909 = vmatmul.msk.f32.gmra.mxu1 %vm1429_vm2, %v1662_v14  ;;  %7078 = vmatmul.msk.f32.gmra.mxu2 %vm1429_vm2, %v1662_v14  ;;  %v145_v12 = vld [vmem:[%s12514_s0 + $0x2b8] sm:$0xff] }
 0x29e   :  { %4034 = vst [vmem:[#allocation3 + $0x480] sm:$0xff] %v2489_v13  ;;  %7247 = vmatmul.msk.f32.gmra.mxu3 %vm1429_vm2, %v1662_v14 }
 0x2a0   :  { %v955_v15 = vpop.f32.mrf.mxu0  ;;  %v3009_v16 = vpop.f32.mrf.mxu2 }
 0x2a1   :  { %v956_v18 = vadd.f32 %v8786_v36, %v955_v15  ;;  %v3010_v19 = vadd.f32 %v3009_v16, %v8242_v28  ;;  %v3530_v21 = vpop.f32.mrf.mxu3 }
 0x2a2   :  { %v3531_v22 = vadd.f32 %v3530_v21, %v8245_v29  ;;  %v2491_v23 = vpop.f32.mrf.mxu1 }
 0x2a3   :  { %v1327_v24 = vmax.f32 %v956_v18, 0.0  ;;  %4035 = vst [vmem:[#allocation3 + $0x488] sm:$0xff] %v3010_v19  ;;  %v2492_v25 = vadd.f32 %v2491_v23, %v8231_v20  ;;  %6758 = vmatmul.msk.f32.gmra.mxu0 %vm235_vm0, %v140_v17 }
 0x2a4   :  { %4036 = vst [vmem:[#allocation3 + $0x490] sm:$0xff] %v3531_v22  ;;  %v1663_v26 = vld [vmem:[#allocation2 + $0x208] sm:$0xff] }
 0x2a5   :  { %1496 = vst.msk [vmem:[#allocation2 + $0x210] sm:$0xff] %vm1429_vm2, %v1327_v24  ;;  %6910 = vmatmul.msk.f32.gmra.mxu1 %vm1429_vm2, %v1663_v26  ;;  %7079 = vmatmul.msk.f32.gmra.mxu2 %vm1429_vm2, %v1663_v26  ;;  %v146_v24 = vld [vmem:[%s12514_s0 + $0x2c0] sm:$0xff] }
 0x2a6   :  { %4037 = vst [vmem:[#allocation3 + $0x498] sm:$0xff] %v2492_v25  ;;  %7248 = vmatmul.msk.f32.gmra.mxu3 %vm1429_vm2, %v1663_v26 }
 0x2a8   :  { %v958_v27 = vpop.f32.mrf.mxu0  ;;  %v3012_v30 = vpop.f32.mrf.mxu2 }
 0x2a9   :  { %v959_v32 = vadd.f32 %v8786_v36, %v958_v27  ;;  %v3013_v33 = vadd.f32 %v3012_v30, %v8242_v28  ;;  %v3533_v39 = vpop.f32.mrf.mxu3 }
 0x2aa   :  { %v3534_v34 = vadd.f32 %v3533_v39, %v8245_v29  ;;  %v2494_v35 = vpop.f32.mrf.mxu1 }
 0x2ab   :  { %v1328_v61 = vmax.f32 %v959_v32, 0.0  ;;  %4038 = vst [vmem:[#allocation3 + $0x4a0] sm:$0xff] %v3013_v33  ;;  %v2495_v37 = vadd.f32 %v2494_v35, %v8231_v20  ;;  %6759 = vmatmul.msk.f32.gmra.mxu0 %vm235_vm0, %v141_v31 }
 0x2ac   :  { %4039 = vst [vmem:[#allocation3 + $0x4a8] sm:$0xff] %v3534_v34  ;;  %v1664_v38 = vld [vmem:[#allocation2 + $0x210] sm:$0xff] }
 0x2ad   :  { %1497 = vst.msk [vmem:[#allocation2 + $0x218] sm:$0xff] %vm1429_vm2, %v1328_v61  ;;  %6911 = vmatmul.msk.f32.gmra.mxu1 %vm1429_vm2, %v1664_v38  ;;  %7080 = vmatmul.msk.f32.gmra.mxu2 %vm1429_vm2, %v1664_v38  ;;  %v147_v61 = vld [vmem:[%s12514_s0 + $0x2c8] sm:$0xff] }
 0x2ae   :  { %4040 = vst [vmem:[#allocation3 + $0x4b0] sm:$0xff] %v2495_v37  ;;  %7249 = vmatmul.msk.f32.gmra.mxu3 %vm1429_vm2, %v1664_v38 }
 0x2b0   :  { %v961_v40 = vpop.f32.mrf.mxu0  ;;  %v3015_v41 = vpop.f32.mrf.mxu2 }
 0x2b1   :  { %v962_v43 = vadd.f32 %v8786_v36, %v961_v40  ;;  %v3016_v44 = vadd.f32 %v3015_v41, %v8242_v28  ;;  %v3536_v45 = vpop.f32.mrf.mxu3 }
 0x2b2   :  { %v3537_v46 = vadd.f32 %v3536_v45, %v8245_v29  ;;  %v2497_v47 = vpop.f32.mrf.mxu1 }
 0x2b3   :  { %v1329_v48 = vmax.f32 %v962_v43, 0.0  ;;  %4041 = vst [vmem:[#allocation3 + $0x4b8] sm:$0xff] %v3016_v44  ;;  %v2498_v49 = vadd.f32 %v2497_v47, %v8231_v20  ;;  %6760 = vmatmul.msk.f32.gmra.mxu0 %vm235_vm0, %v142_v42 }
 0x2b4   :  { %4042 = vst [vmem:[#allocation3 + $0x4c0] sm:$0xff] %v3537_v46  ;;  %v1665_v50 = vld [vmem:[#allocation2 + $0x218] sm:$0xff] }
 0x2b5   :  { %1498 = vst.msk [vmem:[#allocation2 + $0x220] sm:$0xff] %vm1429_vm2, %v1329_v48  ;;  %6912 = vmatmul.msk.f32.gmra.mxu1 %vm1429_vm2, %v1665_v50  ;;  %7081 = vmatmul.msk.f32.gmra.mxu2 %vm1429_vm2, %v1665_v50  ;;  %v148_v48 = vld [vmem:[%s12514_s0 + $0x2d0] sm:$0xff] }
 0x2b6   :  { %4043 = vst [vmem:[#allocation3 + $0x4c8] sm:$0xff] %v2498_v49  ;;  %7250 = vmatmul.msk.f32.gmra.mxu3 %vm1429_vm2, %v1665_v50 }
 0x2b8   :  { %v964_v51 = vpop.f32.mrf.mxu0  ;;  %v3018_v52 = vpop.f32.mrf.mxu2 }
 0x2b9   :  { %v965_v54 = vadd.f32 %v8786_v36, %v964_v51  ;;  %v3019_v55 = vadd.f32 %v3018_v52, %v8242_v28  ;;  %v3539_v56 = vpop.f32.mrf.mxu3 }
 0x2ba   :  { %v3540_v57 = vadd.f32 %v3539_v56, %v8245_v29  ;;  %v2500_v58 = vpop.f32.mrf.mxu1 }
 0x2bb   :  { %v1330_v59 = vmax.f32 %v965_v54, 0.0  ;;  %4044 = vst [vmem:[#allocation3 + $0x4d0] sm:$0xff] %v3019_v55  ;;  %v2501_v60 = vadd.f32 %v2500_v58, %v8231_v20  ;;  %6761 = vmatmul.msk.f32.gmra.mxu0 %vm235_vm0, %v143_v53 }
 0x2bc   :  { %4045 = vst [vmem:[#allocation3 + $0x4d8] sm:$0xff] %v3540_v57  ;;  %v1666_v62 = vld [vmem:[#allocation2 + $0x220] sm:$0xff] }
 0x2bd   :  { %1499 = vst.msk [vmem:[#allocation2 + $0x228] sm:$0xff] %vm1429_vm2, %v1330_v59  ;;  %6913 = vmatmul.msk.f32.gmra.mxu1 %vm1429_vm2, %v1666_v62  ;;  %7082 = vmatmul.msk.f32.gmra.mxu2 %vm1429_vm2, %v1666_v62  ;;  %v149_v59 = vld [vmem:[%s12514_s0 + $0x2d8] sm:$0xff] }
 0x2be   :  { %4046 = vst [vmem:[#allocation3 + $0x4e0] sm:$0xff] %v2501_v60  ;;  %7251 = vmatmul.msk.f32.gmra.mxu3 %vm1429_vm2, %v1666_v62 }
 0x2c0   :  { %v967_v63 = vpop.f32.mrf.mxu0  ;;  %v3021_v0 = vpop.f32.mrf.mxu2 }
 0x2c1   :  { %v968_v2 = vadd.f32 %v8786_v36, %v967_v63  ;;  %v3022_v3 = vadd.f32 %v3021_v0, %v8242_v28  ;;  %v3542_v4 = vpop.f32.mrf.mxu3 }
 0x2c2   :  { %v3543_v5 = vadd.f32 %v3542_v4, %v8245_v29  ;;  %v2503_v6 = vpop.f32.mrf.mxu1 }
 0x2c3   :  { %v1331_v7 = vmax.f32 %v968_v2, 0.0  ;;  %4047 = vst [vmem:[#allocation3 + $0x4e8] sm:$0xff] %v3022_v3  ;;  %v2504_v8 = vadd.f32 %v2503_v6, %v8231_v20  ;;  %6762 = vmatmul.msk.f32.gmra.mxu0 %vm235_vm0, %v144_v1 }
 0x2c4   :  { %4048 = vst [vmem:[#allocation3 + $0x4f0] sm:$0xff] %v3543_v5  ;;  %v1667_v9 = vld [vmem:[#allocation2 + $0x228] sm:$0xff] }
 0x2c5   :  { %1500 = vst.msk [vmem:[#allocation2 + $0x230] sm:$0xff] %vm1429_vm2, %v1331_v7  ;;  %6914 = vmatmul.msk.f32.gmra.mxu1 %vm1429_vm2, %v1667_v9  ;;  %7083 = vmatmul.msk.f32.gmra.mxu2 %vm1429_vm2, %v1667_v9  ;;  %v150_v7 = vld [vmem:[%s12514_s0 + $0x2e0] sm:$0xff] }
 0x2c6   :  { %4049 = vst [vmem:[#allocation3 + $0x4f8] sm:$0xff] %v2504_v8  ;;  %7252 = vmatmul.msk.f32.gmra.mxu3 %vm1429_vm2, %v1667_v9 }
 0x2c8   :  { %v970_v10 = vpop.f32.mrf.mxu0  ;;  %v3024_v11 = vpop.f32.mrf.mxu2 }
 0x2c9   :  { %v971_v13 = vadd.f32 %v8786_v36, %v970_v10  ;;  %v3025_v14 = vadd.f32 %v3024_v11, %v8242_v28  ;;  %v3545_v15 = vpop.f32.mrf.mxu3 }
 0x2ca   :  { %v3546_v16 = vadd.f32 %v3545_v15, %v8245_v29  ;;  %v2506_v17 = vpop.f32.mrf.mxu1 }
 0x2cb   :  { %v1332_v18 = vmax.f32 %v971_v13, 0.0  ;;  %4050 = vst [vmem:[#allocation3 + $0x500] sm:$0xff] %v3025_v14  ;;  %v2507_v19 = vadd.f32 %v2506_v17, %v8231_v20  ;;  %6763 = vmatmul.msk.f32.gmra.mxu0 %vm235_vm0, %v145_v12 }
 0x2cc   :  { %4051 = vst [vmem:[#allocation3 + $0x508] sm:$0xff] %v3546_v16  ;;  %v1668_v21 = vld [vmem:[#allocation2 + $0x230] sm:$0xff] }
 0x2cd   :  { %1501 = vst.msk [vmem:[#allocation2 + $0x238] sm:$0xff] %vm1429_vm2, %v1332_v18  ;;  %6915 = vmatmul.msk.f32.gmra.mxu1 %vm1429_vm2, %v1668_v21  ;;  %7084 = vmatmul.msk.f32.gmra.mxu2 %vm1429_vm2, %v1668_v21  ;;  %v151_v18 = vld [vmem:[%s12514_s0 + $0x2e8] sm:$0xff] }
 0x2ce   :  { %4052 = vst [vmem:[#allocation3 + $0x510] sm:$0xff] %v2507_v19  ;;  %7253 = vmatmul.msk.f32.gmra.mxu3 %vm1429_vm2, %v1668_v21 }
 0x2d0   :  { %v973_v22 = vpop.f32.mrf.mxu0  ;;  %v3027_v23 = vpop.f32.mrf.mxu2 }
 0x2d1   :  { %v974_v25 = vadd.f32 %v8786_v36, %v973_v22  ;;  %v3028_v26 = vadd.f32 %v3027_v23, %v8242_v28  ;;  %v3548_v27 = vpop.f32.mrf.mxu3 }
 0x2d2   :  { %v3549_v30 = vadd.f32 %v3548_v27, %v8245_v29  ;;  %v2509_v31 = vpop.f32.mrf.mxu1 }
 0x2d3   :  { %v1333_v32 = vmax.f32 %v974_v25, 0.0  ;;  %4053 = vst [vmem:[#allocation3 + $0x518] sm:$0xff] %v3028_v26  ;;  %v2510_v33 = vadd.f32 %v2509_v31, %v8231_v20  ;;  %6764 = vmatmul.msk.f32.gmra.mxu0 %vm235_vm0, %v146_v24 }
 0x2d4   :  { %4054 = vst [vmem:[#allocation3 + $0x520] sm:$0xff] %v3549_v30  ;;  %v1669_v39 = vld [vmem:[#allocation2 + $0x238] sm:$0xff] }
 0x2d5   :  { %1502 = vst.msk [vmem:[#allocation2 + $0x240] sm:$0xff] %vm1429_vm2, %v1333_v32  ;;  %6916 = vmatmul.msk.f32.gmra.mxu1 %vm1429_vm2, %v1669_v39  ;;  %7085 = vmatmul.msk.f32.gmra.mxu2 %vm1429_vm2, %v1669_v39  ;;  %v152_v32 = vld [vmem:[%s12514_s0 + $0x2f0] sm:$0xff] }
 0x2d6   :  { %4055 = vst [vmem:[#allocation3 + $0x528] sm:$0xff] %v2510_v33  ;;  %7254 = vmatmul.msk.f32.gmra.mxu3 %vm1429_vm2, %v1669_v39 }
 0x2d8   :  { %v976_v34 = vpop.f32.mrf.mxu0  ;;  %v3030_v35 = vpop.f32.mrf.mxu2 }
 0x2d9   :  { %v977_v37 = vadd.f32 %v8786_v36, %v976_v34  ;;  %v3031_v38 = vadd.f32 %v3030_v35, %v8242_v28  ;;  %v3551_v40 = vpop.f32.mrf.mxu3 }
 0x2da   :  { %v3552_v41 = vadd.f32 %v3551_v40, %v8245_v29  ;;  %v2512_v42 = vpop.f32.mrf.mxu1 }
 0x2db   :  { %v1334_v43 = vmax.f32 %v977_v37, 0.0  ;;  %4056 = vst [vmem:[#allocation3 + $0x530] sm:$0xff] %v3031_v38  ;;  %v2513_v44 = vadd.f32 %v2512_v42, %v8231_v20  ;;  %6765 = vmatmul.msk.f32.gmra.mxu0 %vm235_vm0, %v147_v61 }
 0x2dc   :  { %4057 = vst [vmem:[#allocation3 + $0x538] sm:$0xff] %v3552_v41  ;;  %v1670_v45 = vld [vmem:[#allocation2 + $0x240] sm:$0xff] }
 0x2dd   :  { %1503 = vst.msk [vmem:[#allocation2 + $0x248] sm:$0xff] %vm1429_vm2, %v1334_v43  ;;  %6917 = vmatmul.msk.f32.gmra.mxu1 %vm1429_vm2, %v1670_v45  ;;  %7086 = vmatmul.msk.f32.gmra.mxu2 %vm1429_vm2, %v1670_v45  ;;  %v153_v43 = vld [vmem:[%s12514_s0 + $0x2f8] sm:$0xff] }
 0x2de   :  { %4058 = vst [vmem:[#allocation3 + $0x540] sm:$0xff] %v2513_v44  ;;  %7255 = vmatmul.msk.f32.gmra.mxu3 %vm1429_vm2, %v1670_v45 }
 0x2e0   :  { %v979_v46 = vpop.f32.mrf.mxu0  ;;  %v3033_v47 = vpop.f32.mrf.mxu2 }
 0x2e1   :  { %v980_v49 = vadd.f32 %v8786_v36, %v979_v46  ;;  %v3034_v50 = vadd.f32 %v3033_v47, %v8242_v28  ;;  %v3554_v51 = vpop.f32.mrf.mxu3 }
 0x2e2   :  { %v3555_v52 = vadd.f32 %v3554_v51, %v8245_v29  ;;  %v2515_v53 = vpop.f32.mrf.mxu1 }
 0x2e3   :  { %v1335_v54 = vmax.f32 %v980_v49, 0.0  ;;  %4059 = vst [vmem:[#allocation3 + $0x548] sm:$0xff] %v3034_v50  ;;  %v2516_v55 = vadd.f32 %v2515_v53, %v8231_v20  ;;  %6766 = vmatmul.msk.f32.gmra.mxu0 %vm235_vm0, %v148_v48 }
 0x2e4   :  { %4060 = vst [vmem:[#allocation3 + $0x550] sm:$0xff] %v3555_v52  ;;  %v1671_v56 = vld [vmem:[#allocation2 + $0x248] sm:$0xff] }
 0x2e5   :  { %1504 = vst.msk [vmem:[#allocation2 + $0x250] sm:$0xff] %vm1429_vm2, %v1335_v54  ;;  %6918 = vmatmul.msk.f32.gmra.mxu1 %vm1429_vm2, %v1671_v56  ;;  %7087 = vmatmul.msk.f32.gmra.mxu2 %vm1429_vm2, %v1671_v56  ;;  %v154_v54 = vld [vmem:[%s12514_s0 + $0x300] sm:$0xff] }
 0x2e6   :  { %4061 = vst [vmem:[#allocation3 + $0x558] sm:$0xff] %v2516_v55  ;;  %7256 = vmatmul.msk.f32.gmra.mxu3 %vm1429_vm2, %v1671_v56 }
 0x2e8   :  { %v982_v57 = vpop.f32.mrf.mxu0  ;;  %v3036_v58 = vpop.f32.mrf.mxu2 }
 0x2e9   :  { %v983_v60 = vadd.f32 %v8786_v36, %v982_v57  ;;  %v3037_v62 = vadd.f32 %v3036_v58, %v8242_v28  ;;  %v3557_v63 = vpop.f32.mrf.mxu3 }
 0x2ea   :  { %v3558_v0 = vadd.f32 %v3557_v63, %v8245_v29  ;;  %v2518_v1 = vpop.f32.mrf.mxu1 }
 0x2eb   :  { %v1336_v2 = vmax.f32 %v983_v60, 0.0  ;;  %4062 = vst [vmem:[#allocation3 + $0x560] sm:$0xff] %v3037_v62  ;;  %v2519_v3 = vadd.f32 %v2518_v1, %v8231_v20  ;;  %6767 = vmatmul.msk.f32.gmra.mxu0 %vm235_vm0, %v149_v59 }
 0x2ec   :  { %4063 = vst [vmem:[#allocation3 + $0x568] sm:$0xff] %v3558_v0  ;;  %v1672_v4 = vld [vmem:[#allocation2 + $0x250] sm:$0xff] }
 0x2ed   :  { %1505 = vst.msk [vmem:[#allocation2 + $0x258] sm:$0xff] %vm1429_vm2, %v1336_v2  ;;  %6919 = vmatmul.msk.f32.gmra.mxu1 %vm1429_vm2, %v1672_v4  ;;  %7088 = vmatmul.msk.f32.gmra.mxu2 %vm1429_vm2, %v1672_v4  ;;  %v155_v2 = vld [vmem:[%s12514_s0 + $0x308] sm:$0xff] }
 0x2ee   :  { %4064 = vst [vmem:[#allocation3 + $0x570] sm:$0xff] %v2519_v3  ;;  %7257 = vmatmul.msk.f32.gmra.mxu3 %vm1429_vm2, %v1672_v4 }
 0x2f0   :  { %v985_v5 = vpop.f32.mrf.mxu0  ;;  %v3039_v6 = vpop.f32.mrf.mxu2 }
 0x2f1   :  { %v986_v8 = vadd.f32 %v8786_v36, %v985_v5  ;;  %v3040_v9 = vadd.f32 %v3039_v6, %v8242_v28  ;;  %v3560_v10 = vpop.f32.mrf.mxu3 }
 0x2f2   :  { %v3561_v11 = vadd.f32 %v3560_v10, %v8245_v29  ;;  %v2521_v12 = vpop.f32.mrf.mxu1 }
 0x2f3   :  { %v1337_v13 = vmax.f32 %v986_v8, 0.0  ;;  %4065 = vst [vmem:[#allocation3 + $0x578] sm:$0xff] %v3040_v9  ;;  %v2522_v14 = vadd.f32 %v2521_v12, %v8231_v20  ;;  %6768 = vmatmul.msk.f32.gmra.mxu0 %vm235_vm0, %v150_v7 }
 0x2f4   :  { %4066 = vst [vmem:[#allocation3 + $0x580] sm:$0xff] %v3561_v11  ;;  %v1673_v15 = vld [vmem:[#allocation2 + $0x258] sm:$0xff] }
 0x2f5   :  { %1506 = vst.msk [vmem:[#allocation2 + $0x260] sm:$0xff] %vm1429_vm2, %v1337_v13  ;;  %6920 = vmatmul.msk.f32.gmra.mxu1 %vm1429_vm2, %v1673_v15  ;;  %7089 = vmatmul.msk.f32.gmra.mxu2 %vm1429_vm2, %v1673_v15  ;;  %v156_v13 = vld [vmem:[%s12514_s0 + $0x310] sm:$0xff] }
 0x2f6   :  { %4067 = vst [vmem:[#allocation3 + $0x588] sm:$0xff] %v2522_v14  ;;  %7258 = vmatmul.msk.f32.gmra.mxu3 %vm1429_vm2, %v1673_v15 }
 0x2f8   :  { %v988_v16 = vpop.f32.mrf.mxu0  ;;  %v3042_v17 = vpop.f32.mrf.mxu2 }
 0x2f9   :  { %v989_v19 = vadd.f32 %v8786_v36, %v988_v16  ;;  %v3043_v21 = vadd.f32 %v3042_v17, %v8242_v28  ;;  %v3563_v22 = vpop.f32.mrf.mxu3 }
 0x2fa   :  { %v3564_v23 = vadd.f32 %v3563_v22, %v8245_v29  ;;  %v2524_v24 = vpop.f32.mrf.mxu1 }
 0x2fb   :  { %v1338_v25 = vmax.f32 %v989_v19, 0.0  ;;  %4068 = vst [vmem:[#allocation3 + $0x590] sm:$0xff] %v3043_v21  ;;  %v2525_v26 = vadd.f32 %v2524_v24, %v8231_v20  ;;  %6769 = vmatmul.msk.f32.gmra.mxu0 %vm235_vm0, %v151_v18 }
 0x2fc   :  { %4069 = vst [vmem:[#allocation3 + $0x598] sm:$0xff] %v3564_v23  ;;  %v1674_v27 = vld [vmem:[#allocation2 + $0x260] sm:$0xff] }
 0x2fd   :  { %1507 = vst.msk [vmem:[#allocation2 + $0x268] sm:$0xff] %vm1429_vm2, %v1338_v25  ;;  %6921 = vmatmul.msk.f32.gmra.mxu1 %vm1429_vm2, %v1674_v27  ;;  %7090 = vmatmul.msk.f32.gmra.mxu2 %vm1429_vm2, %v1674_v27  ;;  %v157_v25 = vld [vmem:[%s12514_s0 + $0x318] sm:$0xff] }
 0x2fe   :  { %4070 = vst [vmem:[#allocation3 + $0x5a0] sm:$0xff] %v2525_v26  ;;  %7259 = vmatmul.msk.f32.gmra.mxu3 %vm1429_vm2, %v1674_v27 }
 0x300   :  { %v991_v30 = vpop.f32.mrf.mxu0  ;;  %v3045_v31 = vpop.f32.mrf.mxu2 }
 0x301   :  { %v992_v33 = vadd.f32 %v8786_v36, %v991_v30  ;;  %v3046_v39 = vadd.f32 %v3045_v31, %v8242_v28  ;;  %v3566_v34 = vpop.f32.mrf.mxu3 }
 0x302   :  { %v3567_v35 = vadd.f32 %v3566_v34, %v8245_v29  ;;  %v2527_v61 = vpop.f32.mrf.mxu1 }
 0x303   :  { %v1339_v37 = vmax.f32 %v992_v33, 0.0  ;;  %4071 = vst [vmem:[#allocation3 + $0x5a8] sm:$0xff] %v3046_v39  ;;  %v2528_v38 = vadd.f32 %v2527_v61, %v8231_v20  ;;  %6770 = vmatmul.msk.f32.gmra.mxu0 %vm235_vm0, %v152_v32 }
 0x304   :  { %4072 = vst [vmem:[#allocation3 + $0x5b0] sm:$0xff] %v3567_v35  ;;  %v1675_v40 = vld [vmem:[#allocation2 + $0x268] sm:$0xff] }
 0x305   :  { %1508 = vst.msk [vmem:[#allocation2 + $0x270] sm:$0xff] %vm1429_vm2, %v1339_v37  ;;  %6922 = vmatmul.msk.f32.gmra.mxu1 %vm1429_vm2, %v1675_v40  ;;  %7091 = vmatmul.msk.f32.gmra.mxu2 %vm1429_vm2, %v1675_v40  ;;  %v158_v37 = vld [vmem:[%s12514_s0 + $0x320] sm:$0xff] }
 0x306   :  { %4073 = vst [vmem:[#allocation3 + $0x5b8] sm:$0xff] %v2528_v38  ;;  %7260 = vmatmul.msk.f32.gmra.mxu3 %vm1429_vm2, %v1675_v40 }
 0x308   :  { %v994_v41 = vpop.f32.mrf.mxu0  ;;  %v3048_v42 = vpop.f32.mrf.mxu2 }
 0x309   :  { %v995_v44 = vadd.f32 %v8786_v36, %v994_v41  ;;  %v3049_v45 = vadd.f32 %v3048_v42, %v8242_v28  ;;  %v3569_v46 = vpop.f32.mrf.mxu3 }
 0x30a   :  { %v3570_v47 = vadd.f32 %v3569_v46, %v8245_v29  ;;  %v2530_v48 = vpop.f32.mrf.mxu1 }
 0x30b   :  { %v1340_v49 = vmax.f32 %v995_v44, 0.0  ;;  %4074 = vst [vmem:[#allocation3 + $0x5c0] sm:$0xff] %v3049_v45  ;;  %v2531_v50 = vadd.f32 %v2530_v48, %v8231_v20  ;;  %6771 = vmatmul.msk.f32.gmra.mxu0 %vm235_vm0, %v153_v43 }
 0x30c   :  { %4075 = vst [vmem:[#allocation3 + $0x5c8] sm:$0xff] %v3570_v47  ;;  %v1676_v51 = vld [vmem:[#allocation2 + $0x270] sm:$0xff] }
 0x30d   :  { %1509 = vst.msk [vmem:[#allocation2 + $0x278] sm:$0xff] %vm1429_vm2, %v1340_v49  ;;  %6923 = vmatmul.msk.f32.gmra.mxu1 %vm1429_vm2, %v1676_v51  ;;  %7092 = vmatmul.msk.f32.gmra.mxu2 %vm1429_vm2, %v1676_v51  ;;  %v159_v49 = vld [vmem:[%s12514_s0 + $0x328] sm:$0xff] }
 0x30e   :  { %4076 = vst [vmem:[#allocation3 + $0x5d0] sm:$0xff] %v2531_v50  ;;  %7261 = vmatmul.msk.f32.gmra.mxu3 %vm1429_vm2, %v1676_v51 }
 0x310   :  { %v997_v52 = vpop.f32.mrf.mxu0  ;;  %v3051_v53 = vpop.f32.mrf.mxu2 }
 0x311   :  { %v998_v55 = vadd.f32 %v8786_v36, %v997_v52  ;;  %v3052_v56 = vadd.f32 %v3051_v53, %v8242_v28  ;;  %v3572_v57 = vpop.f32.mrf.mxu3 }
 0x312   :  { %v3573_v58 = vadd.f32 %v3572_v57, %v8245_v29  ;;  %v2533_v59 = vpop.f32.mrf.mxu1 }
 0x313   :  { %v1341_v60 = vmax.f32 %v998_v55, 0.0  ;;  %4077 = vst [vmem:[#allocation3 + $0x5d8] sm:$0xff] %v3052_v56  ;;  %v2534_v62 = vadd.f32 %v2533_v59, %v8231_v20  ;;  %6772 = vmatmul.msk.f32.gmra.mxu0 %vm235_vm0, %v154_v54 }
 0x314   :  { %4078 = vst [vmem:[#allocation3 + $0x5e0] sm:$0xff] %v3573_v58  ;;  %v1677_v63 = vld [vmem:[#allocation2 + $0x278] sm:$0xff] }
 0x315   :  { %1510 = vst.msk [vmem:[#allocation2 + $0x280] sm:$0xff] %vm1429_vm2, %v1341_v60  ;;  %6924 = vmatmul.msk.f32.gmra.mxu1 %vm1429_vm2, %v1677_v63  ;;  %7093 = vmatmul.msk.f32.gmra.mxu2 %vm1429_vm2, %v1677_v63  ;;  %v160_v60 = vld [vmem:[%s12514_s0 + $0x330] sm:$0xff] }
 0x316   :  { %4079 = vst [vmem:[#allocation3 + $0x5e8] sm:$0xff] %v2534_v62  ;;  %7262 = vmatmul.msk.f32.gmra.mxu3 %vm1429_vm2, %v1677_v63 }
 0x318   :  { %v1000_v0 = vpop.f32.mrf.mxu0  ;;  %v3054_v1 = vpop.f32.mrf.mxu2 }
 0x319   :  { %v1001_v3 = vadd.f32 %v8786_v36, %v1000_v0  ;;  %v3055_v4 = vadd.f32 %v3054_v1, %v8242_v28  ;;  %v3575_v5 = vpop.f32.mrf.mxu3 }
 0x31a   :  { %v3576_v6 = vadd.f32 %v3575_v5, %v8245_v29  ;;  %v2536_v7 = vpop.f32.mrf.mxu1 }
 0x31b   :  { %v1342_v8 = vmax.f32 %v1001_v3, 0.0  ;;  %4080 = vst [vmem:[#allocation3 + $0x5f0] sm:$0xff] %v3055_v4  ;;  %v2537_v9 = vadd.f32 %v2536_v7, %v8231_v20  ;;  %6773 = vmatmul.msk.f32.gmra.mxu0 %vm235_vm0, %v155_v2 }
 0x31c   :  { %4081 = vst [vmem:[#allocation3 + $0x5f8] sm:$0xff] %v3576_v6  ;;  %v1678_v10 = vld [vmem:[#allocation2 + $0x280] sm:$0xff] }
 0x31d   :  { %1511 = vst.msk [vmem:[#allocation2 + $0x288] sm:$0xff] %vm1429_vm2, %v1342_v8  ;;  %6925 = vmatmul.msk.f32.gmra.mxu1 %vm1429_vm2, %v1678_v10  ;;  %7094 = vmatmul.msk.f32.gmra.mxu2 %vm1429_vm2, %v1678_v10  ;;  %v161_v8 = vld [vmem:[%s12514_s0 + $0x338] sm:$0xff] }
 0x31e   :  { %4082 = vst [vmem:[#allocation3 + $0x600] sm:$0xff] %v2537_v9  ;;  %7263 = vmatmul.msk.f32.gmra.mxu3 %vm1429_vm2, %v1678_v10 }
 0x320   :  { %v1003_v11 = vpop.f32.mrf.mxu0  ;;  %v3057_v12 = vpop.f32.mrf.mxu2 }
 0x321   :  { %v1004_v14 = vadd.f32 %v8786_v36, %v1003_v11  ;;  %v3058_v15 = vadd.f32 %v3057_v12, %v8242_v28  ;;  %v3578_v16 = vpop.f32.mrf.mxu3 }
 0x322   :  { %v3579_v17 = vadd.f32 %v3578_v16, %v8245_v29  ;;  %v2539_v18 = vpop.f32.mrf.mxu1 }
 0x323   :  { %v1343_v19 = vmax.f32 %v1004_v14, 0.0  ;;  %4083 = vst [vmem:[#allocation3 + $0x608] sm:$0xff] %v3058_v15  ;;  %v2540_v21 = vadd.f32 %v2539_v18, %v8231_v20  ;;  %6774 = vmatmul.msk.f32.gmra.mxu0 %vm235_vm0, %v156_v13 }
 0x324   :  { %4084 = vst [vmem:[#allocation3 + $0x610] sm:$0xff] %v3579_v17  ;;  %v1679_v22 = vld [vmem:[#allocation2 + $0x288] sm:$0xff] }
 0x325   :  { %1512 = vst.msk [vmem:[#allocation2 + $0x290] sm:$0xff] %vm1429_vm2, %v1343_v19  ;;  %6926 = vmatmul.msk.f32.gmra.mxu1 %vm1429_vm2, %v1679_v22  ;;  %7095 = vmatmul.msk.f32.gmra.mxu2 %vm1429_vm2, %v1679_v22  ;;  %v162_v19 = vld [vmem:[%s12514_s0 + $0x340] sm:$0xff] }
 0x326   :  { %4085 = vst [vmem:[#allocation3 + $0x618] sm:$0xff] %v2540_v21  ;;  %7264 = vmatmul.msk.f32.gmra.mxu3 %vm1429_vm2, %v1679_v22 }
 0x328   :  { %v1006_v23 = vpop.f32.mrf.mxu0  ;;  %v3060_v24 = vpop.f32.mrf.mxu2 }
 0x329   :  { %v1007_v26 = vadd.f32 %v8786_v36, %v1006_v23  ;;  %v3061_v27 = vadd.f32 %v3060_v24, %v8242_v28  ;;  %v3581_v30 = vpop.f32.mrf.mxu3 }
 0x32a   :  { %v3582_v31 = vadd.f32 %v3581_v30, %v8245_v29  ;;  %v2542_v32 = vpop.f32.mrf.mxu1 }
 0x32b   :  { %v1344_v33 = vmax.f32 %v1007_v26, 0.0  ;;  %4086 = vst [vmem:[#allocation3 + $0x620] sm:$0xff] %v3061_v27  ;;  %v2543_v39 = vadd.f32 %v2542_v32, %v8231_v20  ;;  %6775 = vmatmul.msk.f32.gmra.mxu0 %vm235_vm0, %v157_v25  ;;  %v163_v32 = vld [vmem:[%s12514_s0 + $0x348] sm:$0xff] }
 0x32c   :  { %4087 = vst [vmem:[#allocation3 + $0x628] sm:$0xff] %v3582_v31  ;;  %v1680_v34 = vld [vmem:[#allocation2 + $0x290] sm:$0xff] }
 0x32d   :  { %1513 = vst.msk [vmem:[#allocation2 + $0x298] sm:$0xff] %vm1429_vm2, %v1344_v33  ;;  %6927 = vmatmul.msk.f32.gmra.mxu1 %vm1429_vm2, %v1680_v34  ;;  %7096 = vmatmul.msk.f32.gmra.mxu2 %vm1429_vm2, %v1680_v34  ;;  %v9115_v33 = vld [vmem:[%s12513_s2] ss:$0 sm:$0xff] }
 0x32e   :  { %4088 = vst [vmem:[#allocation3 + $0x630] sm:$0xff] %v2543_v39  ;;  %7265 = vmatmul.msk.f32.gmra.mxu3 %vm1429_vm2, %v1680_v34 }
 0x330   :  { %v1009_v35 = vpop.f32.mrf.mxu0  ;;  %v3063_v61 = vpop.f32.mrf.mxu2 }
 0x331   :  { %v1010_v38 = vadd.f32 %v8786_v36, %v1009_v35  ;;  %v3064_v40 = vadd.f32 %v3063_v61, %v8242_v28  ;;  %v3584_v41 = vpop.f32.mrf.mxu3 }
 0x332   :  { %v3585_v42 = vadd.f32 %v3584_v41, %v8245_v29  ;;  %v2545_v43 = vpop.f32.mrf.mxu1 }
 0x333   :  { %v1345_v44 = vmax.f32 %v1010_v38, 0.0  ;;  %4089 = vst [vmem:[#allocation3 + $0x638] sm:$0xff] %v3064_v40  ;;  %v2546_v45 = vadd.f32 %v2545_v43, %v8231_v20  ;;  %6776 = vmatmul.msk.f32.gmra.mxu0 %vm235_vm0, %v158_v37 }
 0x334   :  { %4090 = vst [vmem:[#allocation3 + $0x640] sm:$0xff] %v3585_v42  ;;  %v1681_v46 = vld [vmem:[#allocation2 + $0x298] sm:$0xff] }
 0x335   :  { %1514 = vst.msk [vmem:[#allocation2 + $0x2a0] sm:$0xff] %vm1429_vm2, %v1345_v44  ;;  %6928 = vmatmul.msk.f32.gmra.mxu1 %vm1429_vm2, %v1681_v46  ;;  %7097 = vmatmul.msk.f32.gmra.mxu2 %vm1429_vm2, %v1681_v46  ;;  %v164_v44 = vld [vmem:[%s12514_s0 + $0x350] sm:$0xff] }
 0x336   :  { %4091 = vst [vmem:[#allocation3 + $0x648] sm:$0xff] %v2546_v45  ;;  %7266 = vmatmul.msk.f32.gmra.mxu3 %vm1429_vm2, %v1681_v46 }
 0x338   :  { %v1012_v47 = vpop.f32.mrf.mxu0  ;;  %v3066_v48 = vpop.f32.mrf.mxu2 }
 0x339   :  { %v1013_v50 = vadd.f32 %v8786_v36, %v1012_v47  ;;  %v3067_v51 = vadd.f32 %v3066_v48, %v8242_v28  ;;  %v3587_v52 = vpop.f32.mrf.mxu3 }
 0x33a   :  { %v3588_v53 = vadd.f32 %v3587_v52, %v8245_v29  ;;  %v2548_v54 = vpop.f32.mrf.mxu1 }
 0x33b   :  { %v1346_v55 = vmax.f32 %v1013_v50, 0.0  ;;  %4092 = vst [vmem:[#allocation3 + $0x650] sm:$0xff] %v3067_v51  ;;  %v2549_v56 = vadd.f32 %v2548_v54, %v8231_v20  ;;  %6777 = vmatmul.msk.f32.gmra.mxu0 %vm235_vm0, %v159_v49 }
 0x33c   :  { %4093 = vst [vmem:[#allocation3 + $0x658] sm:$0xff] %v3588_v53  ;;  %v1682_v57 = vld [vmem:[#allocation2 + $0x2a0] sm:$0xff] }
 0x33d   :  { %1515 = vst.msk [vmem:[#allocation2 + $0x2a8] sm:$0xff] %vm1429_vm2, %v1346_v55  ;;  %6929 = vmatmul.msk.f32.gmra.mxu1 %vm1429_vm2, %v1682_v57  ;;  %7098 = vmatmul.msk.f32.gmra.mxu2 %vm1429_vm2, %v1682_v57  ;;  %v165_v55 = vld [vmem:[%s12514_s0 + $0x358] sm:$0xff] }
 0x33e   :  { %4094 = vst [vmem:[#allocation3 + $0x660] sm:$0xff] %v2549_v56  ;;  %7267 = vmatmul.msk.f32.gmra.mxu3 %vm1429_vm2, %v1682_v57 }
 0x340   :  { %v1015_v58 = vpop.f32.mrf.mxu0  ;;  %v3069_v59 = vpop.f32.mrf.mxu2 }
 0x341   :  { %v1016_v62 = vadd.f32 %v8786_v36, %v1015_v58  ;;  %v3070_v63 = vadd.f32 %v3069_v59, %v8242_v28  ;;  %v3590_v0 = vpop.f32.mrf.mxu3 }
 0x342   :  { %v3591_v1 = vadd.f32 %v3590_v0, %v8245_v29  ;;  %v2551_v2 = vpop.f32.mrf.mxu1 }
 0x343   :  { %v1347_v3 = vmax.f32 %v1016_v62, 0.0  ;;  %4095 = vst [vmem:[#allocation3 + $0x668] sm:$0xff] %v3070_v63  ;;  %v2552_v4 = vadd.f32 %v2551_v2, %v8231_v20  ;;  %6778 = vmatmul.msk.f32.gmra.mxu0 %vm235_vm0, %v160_v60 }
 0x344   :  { %4096 = vst [vmem:[#allocation3 + $0x670] sm:$0xff] %v3591_v1  ;;  %v1683_v5 = vld [vmem:[#allocation2 + $0x2a8] sm:$0xff] }
 0x345   :  { %1516 = vst.msk [vmem:[#allocation2 + $0x2b0] sm:$0xff] %vm1429_vm2, %v1347_v3  ;;  %6930 = vmatmul.msk.f32.gmra.mxu1 %vm1429_vm2, %v1683_v5  ;;  %7099 = vmatmul.msk.f32.gmra.mxu2 %vm1429_vm2, %v1683_v5  ;;  %v166_v3 = vld [vmem:[%s12514_s0 + $0x360] sm:$0xff] }
 0x346   :  { %4097 = vst [vmem:[#allocation3 + $0x678] sm:$0xff] %v2552_v4  ;;  %7268 = vmatmul.msk.f32.gmra.mxu3 %vm1429_vm2, %v1683_v5 }
 0x348   :  { %v1018_v6 = vpop.f32.mrf.mxu0  ;;  %v3072_v7 = vpop.f32.mrf.mxu2 }
 0x349   :  { %v1019_v9 = vadd.f32 %v8786_v36, %v1018_v6  ;;  %v3073_v10 = vadd.f32 %v3072_v7, %v8242_v28  ;;  %v3593_v11 = vpop.f32.mrf.mxu3 }
 0x34a   :  { %v3594_v12 = vadd.f32 %v3593_v11, %v8245_v29  ;;  %v2554_v13 = vpop.f32.mrf.mxu1 }
 0x34b   :  { %v1348_v14 = vmax.f32 %v1019_v9, 0.0  ;;  %4098 = vst [vmem:[#allocation3 + $0x680] sm:$0xff] %v3073_v10  ;;  %v2555_v15 = vadd.f32 %v2554_v13, %v8231_v20  ;;  %6779 = vmatmul.msk.f32.gmra.mxu0 %vm235_vm0, %v161_v8 }
 0x34c   :  { %4099 = vst [vmem:[#allocation3 + $0x688] sm:$0xff] %v3594_v12  ;;  %v1684_v16 = vld [vmem:[#allocation2 + $0x2b0] sm:$0xff] }
 0x34d   :  { %1517 = vst.msk [vmem:[#allocation2 + $0x2b8] sm:$0xff] %vm1429_vm2, %v1348_v14  ;;  %6931 = vmatmul.msk.f32.gmra.mxu1 %vm1429_vm2, %v1684_v16  ;;  %7100 = vmatmul.msk.f32.gmra.mxu2 %vm1429_vm2, %v1684_v16  ;;  %v167_v14 = vld [vmem:[%s12514_s0 + $0x368] sm:$0xff] }
 0x34e   :  { %4100 = vst [vmem:[#allocation3 + $0x690] sm:$0xff] %v2555_v15  ;;  %7269 = vmatmul.msk.f32.gmra.mxu3 %vm1429_vm2, %v1684_v16 }
 0x350   :  { %v1021_v17 = vpop.f32.mrf.mxu0  ;;  %v3075_v18 = vpop.f32.mrf.mxu2 }
 0x351   :  { %v1022_v21 = vadd.f32 %v8786_v36, %v1021_v17  ;;  %v3076_v22 = vadd.f32 %v3075_v18, %v8242_v28  ;;  %v3596_v23 = vpop.f32.mrf.mxu3 }
 0x352   :  { %v3597_v24 = vadd.f32 %v3596_v23, %v8245_v29  ;;  %v2557_v25 = vpop.f32.mrf.mxu1 }
 0x353   :  { %v1349_v26 = vmax.f32 %v1022_v21, 0.0  ;;  %4101 = vst [vmem:[#allocation3 + $0x698] sm:$0xff] %v3076_v22  ;;  %v2558_v27 = vadd.f32 %v2557_v25, %v8231_v20  ;;  %6780 = vmatmul.msk.f32.gmra.mxu0 %vm235_vm0, %v162_v19 }
 0x354   :  { %4102 = vst [vmem:[#allocation3 + $0x6a0] sm:$0xff] %v3597_v24  ;;  %v1685_v30 = vld [vmem:[#allocation2 + $0x2b8] sm:$0xff] }
 0x355   :  { %1518 = vst.msk [vmem:[#allocation2 + $0x2c0] sm:$0xff] %vm1429_vm2, %v1349_v26  ;;  %6932 = vmatmul.msk.f32.gmra.mxu1 %vm1429_vm2, %v1685_v30  ;;  %7101 = vmatmul.msk.f32.gmra.mxu2 %vm1429_vm2, %v1685_v30  ;;  %v168_v26 = vld [vmem:[%s12514_s0 + $0x370] sm:$0xff] }
 0x356   :  { %4103 = vst [vmem:[#allocation3 + $0x6a8] sm:$0xff] %v2558_v27  ;;  %7270 = vmatmul.msk.f32.gmra.mxu3 %vm1429_vm2, %v1685_v30 }
 0x358   :  { %v1024_v36 = vpop.f32.mrf.mxu0  ;;  %v3078_v31 = vpop.f32.mrf.mxu2 }
 0x359   :  { %v1025_v39 = vadd.f32 %v9115_v33, %v1024_v36  ;;  %v3079_v34 = vadd.f32 %v3078_v31, %v8242_v28  ;;  %v3599_v35 = vpop.f32.mrf.mxu3 }
 0x35a   :  { %v3600_v61 = vadd.f32 %v3599_v35, %v8245_v29  ;;  %v2560_v37 = vpop.f32.mrf.mxu1 }
 0x35b   :  { %v1350_v38 = vmax.f32 %v1025_v39, 0.0  ;;  %4104 = vst [vmem:[#allocation3 + $0x6b0] sm:$0xff] %v3079_v34  ;;  %v2561_v40 = vadd.f32 %v2560_v37, %v8231_v20  ;;  %6781 = vmatmul.msk.f32.gmra.mxu0 %vm235_vm0, %v163_v32 }
 0x35c   :  { %4105 = vst [vmem:[#allocation3 + $0x6b8] sm:$0xff] %v3600_v61  ;;  %v1686_v41 = vld [vmem:[#allocation2 + $0x2c0] sm:$0xff] }
 0x35d   :  { %1519 = vst.msk [vmem:[#allocation2 + $0x2c8] sm:$0xff] %vm1429_vm2, %v1350_v38  ;;  %6933 = vmatmul.msk.f32.gmra.mxu1 %vm1429_vm2, %v1686_v41  ;;  %7102 = vmatmul.msk.f32.gmra.mxu2 %vm1429_vm2, %v1686_v41  ;;  %v169_v38 = vld [vmem:[%s12514_s0 + $0x378] sm:$0xff] }
 0x35e   :  { %4106 = vst [vmem:[#allocation3 + $0x6c0] sm:$0xff] %v2561_v40  ;;  %7271 = vmatmul.msk.f32.gmra.mxu3 %vm1429_vm2, %v1686_v41 }
 0x360   :  { %v1027_v42 = vpop.f32.mrf.mxu0  ;;  %v3081_v43 = vpop.f32.mrf.mxu2 }
 0x361   :  { %v1028_v45 = vadd.f32 %v9115_v33, %v1027_v42  ;;  %v3082_v46 = vadd.f32 %v3081_v43, %v8242_v28  ;;  %v3602_v47 = vpop.f32.mrf.mxu3 }
 0x362   :  { %v3603_v48 = vadd.f32 %v3602_v47, %v8245_v29  ;;  %v2563_v49 = vpop.f32.mrf.mxu1 }
 0x363   :  { %v1351_v50 = vmax.f32 %v1028_v45, 0.0  ;;  %4107 = vst [vmem:[#allocation3 + $0x6c8] sm:$0xff] %v3082_v46  ;;  %v2564_v51 = vadd.f32 %v2563_v49, %v8231_v20  ;;  %6782 = vmatmul.msk.f32.gmra.mxu0 %vm235_vm0, %v164_v44 }
 0x364   :  { %4108 = vst [vmem:[#allocation3 + $0x6d0] sm:$0xff] %v3603_v48  ;;  %v1687_v52 = vld [vmem:[#allocation2 + $0x2c8] sm:$0xff] }
 0x365   :  { %1520 = vst.msk [vmem:[#allocation2 + $0x2d0] sm:$0xff] %vm1429_vm2, %v1351_v50  ;;  %6934 = vmatmul.msk.f32.gmra.mxu1 %vm1429_vm2, %v1687_v52  ;;  %7103 = vmatmul.msk.f32.gmra.mxu2 %vm1429_vm2, %v1687_v52  ;;  %v170_v50 = vld [vmem:[%s12514_s0 + $0x380] sm:$0xff] }
 0x366   :  { %4109 = vst [vmem:[#allocation3 + $0x6d8] sm:$0xff] %v2564_v51  ;;  %7272 = vmatmul.msk.f32.gmra.mxu3 %vm1429_vm2, %v1687_v52 }
 0x368   :  { %v1030_v53 = vpop.f32.mrf.mxu0  ;;  %v3084_v54 = vpop.f32.mrf.mxu2 }
 0x369   :  { %v1031_v56 = vadd.f32 %v9115_v33, %v1030_v53  ;;  %v3085_v57 = vadd.f32 %v3084_v54, %v8242_v28  ;;  %v3605_v58 = vpop.f32.mrf.mxu3 }
 0x36a   :  { %v3606_v59 = vadd.f32 %v3605_v58, %v8245_v29  ;;  %v2566_v60 = vpop.f32.mrf.mxu1 }
 0x36b   :  { %v1352_v62 = vmax.f32 %v1031_v56, 0.0  ;;  %4110 = vst [vmem:[#allocation3 + $0x6e0] sm:$0xff] %v3085_v57  ;;  %v2567_v63 = vadd.f32 %v2566_v60, %v8231_v20  ;;  %6783 = vmatmul.msk.f32.gmra.mxu0 %vm235_vm0, %v165_v55 }
 0x36c   :  { %4111 = vst [vmem:[#allocation3 + $0x6e8] sm:$0xff] %v3606_v59  ;;  %v1688_v0 = vld [vmem:[#allocation2 + $0x2d0] sm:$0xff] }
 0x36d   :  { %1521 = vst.msk [vmem:[#allocation2 + $0x2d8] sm:$0xff] %vm1429_vm2, %v1352_v62  ;;  %6935 = vmatmul.msk.f32.gmra.mxu1 %vm1429_vm2, %v1688_v0  ;;  %7104 = vmatmul.msk.f32.gmra.mxu2 %vm1429_vm2, %v1688_v0  ;;  %v171_v62 = vld [vmem:[%s12514_s0 + $0x388] sm:$0xff] }
 0x36e   :  { %4112 = vst [vmem:[#allocation3 + $0x6f0] sm:$0xff] %v2567_v63  ;;  %7273 = vmatmul.msk.f32.gmra.mxu3 %vm1429_vm2, %v1688_v0 }
 0x370   :  { %v1033_v1 = vpop.f32.mrf.mxu0  ;;  %v3087_v2 = vpop.f32.mrf.mxu2 }
 0x371   :  { %v1034_v4 = vadd.f32 %v9115_v33, %v1033_v1  ;;  %v3088_v5 = vadd.f32 %v3087_v2, %v8242_v28  ;;  %v3608_v6 = vpop.f32.mrf.mxu3 }
 0x372   :  { %v3609_v7 = vadd.f32 %v3608_v6, %v8245_v29  ;;  %v2569_v8 = vpop.f32.mrf.mxu1 }
 0x373   :  { %v1353_v9 = vmax.f32 %v1034_v4, 0.0  ;;  %4113 = vst [vmem:[#allocation3 + $0x6f8] sm:$0xff] %v3088_v5  ;;  %v2570_v10 = vadd.f32 %v2569_v8, %v8231_v20  ;;  %6784 = vmatmul.msk.f32.gmra.mxu0 %vm235_vm0, %v166_v3 }
 0x374   :  { %4114 = vst [vmem:[#allocation3 + $0x700] sm:$0xff] %v3609_v7  ;;  %v1689_v11 = vld [vmem:[#allocation2 + $0x2d8] sm:$0xff] }
 0x375   :  { %1522 = vst.msk [vmem:[#allocation2 + $0x2e0] sm:$0xff] %vm1429_vm2, %v1353_v9  ;;  %6936 = vmatmul.msk.f32.gmra.mxu1 %vm1429_vm2, %v1689_v11  ;;  %7105 = vmatmul.msk.f32.gmra.mxu2 %vm1429_vm2, %v1689_v11  ;;  %v172_v9 = vld [vmem:[%s12514_s0 + $0x390] sm:$0xff] }
 0x376   :  { %4115 = vst [vmem:[#allocation3 + $0x708] sm:$0xff] %v2570_v10  ;;  %7274 = vmatmul.msk.f32.gmra.mxu3 %vm1429_vm2, %v1689_v11 }
 0x378   :  { %v1036_v12 = vpop.f32.mrf.mxu0  ;;  %v3090_v13 = vpop.f32.mrf.mxu2 }
 0x379   :  { %v1037_v15 = vadd.f32 %v9115_v33, %v1036_v12  ;;  %v3091_v16 = vadd.f32 %v3090_v13, %v8242_v28  ;;  %v3611_v17 = vpop.f32.mrf.mxu3 }
 0x37a   :  { %v3612_v18 = vadd.f32 %v3611_v17, %v8245_v29  ;;  %v2572_v19 = vpop.f32.mrf.mxu1 }
 0x37b   :  { %v1354_v21 = vmax.f32 %v1037_v15, 0.0  ;;  %4116 = vst [vmem:[#allocation3 + $0x710] sm:$0xff] %v3091_v16  ;;  %v2573_v22 = vadd.f32 %v2572_v19, %v8231_v20  ;;  %6785 = vmatmul.msk.f32.gmra.mxu0 %vm235_vm0, %v167_v14 }
 0x37c   :  { %4117 = vst [vmem:[#allocation3 + $0x718] sm:$0xff] %v3612_v18  ;;  %v1690_v23 = vld [vmem:[#allocation2 + $0x2e0] sm:$0xff] }
 0x37d   :  { %1523 = vst.msk [vmem:[#allocation2 + $0x2e8] sm:$0xff] %vm1429_vm2, %v1354_v21  ;;  %6937 = vmatmul.msk.f32.gmra.mxu1 %vm1429_vm2, %v1690_v23  ;;  %7106 = vmatmul.msk.f32.gmra.mxu2 %vm1429_vm2, %v1690_v23  ;;  %v173_v21 = vld [vmem:[%s12514_s0 + $0x398] sm:$0xff] }
 0x37e   :  { %4118 = vst [vmem:[#allocation3 + $0x720] sm:$0xff] %v2573_v22  ;;  %7275 = vmatmul.msk.f32.gmra.mxu3 %vm1429_vm2, %v1690_v23 }
 0x380   :  { %v1039_v24 = vpop.f32.mrf.mxu0  ;;  %v3093_v25 = vpop.f32.mrf.mxu2 }
 0x381   :  { %v1040_v27 = vadd.f32 %v9115_v33, %v1039_v24  ;;  %v3094_v30 = vadd.f32 %v3093_v25, %v8242_v28  ;;  %v3614_v36 = vpop.f32.mrf.mxu3 }
 0x382   :  { %v3615_v31 = vadd.f32 %v3614_v36, %v8245_v29  ;;  %v2575_v32 = vpop.f32.mrf.mxu1 }
 0x383   :  { %v1355_v39 = vmax.f32 %v1040_v27, 0.0  ;;  %4119 = vst [vmem:[#allocation3 + $0x728] sm:$0xff] %v3094_v30  ;;  %v2576_v34 = vadd.f32 %v2575_v32, %v8231_v20  ;;  %6786 = vmatmul.msk.f32.gmra.mxu0 %vm235_vm0, %v168_v26 }
 0x384   :  { %4120 = vst [vmem:[#allocation3 + $0x730] sm:$0xff] %v3615_v31  ;;  %v1691_v35 = vld [vmem:[#allocation2 + $0x2e8] sm:$0xff] }
 0x385   :  { %1524 = vst.msk [vmem:[#allocation2 + $0x2f0] sm:$0xff] %vm1429_vm2, %v1355_v39  ;;  %6938 = vmatmul.msk.f32.gmra.mxu1 %vm1429_vm2, %v1691_v35  ;;  %7107 = vmatmul.msk.f32.gmra.mxu2 %vm1429_vm2, %v1691_v35  ;;  %v174_v39 = vld [vmem:[%s12514_s0 + $0x3a0] sm:$0xff] }
 0x386   :  { %4121 = vst [vmem:[#allocation3 + $0x738] sm:$0xff] %v2576_v34  ;;  %7276 = vmatmul.msk.f32.gmra.mxu3 %vm1429_vm2, %v1691_v35 }
 0x388   :  { %v1042_v61 = vpop.f32.mrf.mxu0  ;;  %v3096_v37 = vpop.f32.mrf.mxu2 }
 0x389   :  { %v1043_v40 = vadd.f32 %v9115_v33, %v1042_v61  ;;  %v3097_v41 = vadd.f32 %v3096_v37, %v8242_v28  ;;  %v3617_v42 = vpop.f32.mrf.mxu3 }
 0x38a   :  { %v3618_v43 = vadd.f32 %v3617_v42, %v8245_v29  ;;  %v2578_v44 = vpop.f32.mrf.mxu1 }
 0x38b   :  { %v1356_v45 = vmax.f32 %v1043_v40, 0.0  ;;  %4122 = vst [vmem:[#allocation3 + $0x740] sm:$0xff] %v3097_v41  ;;  %v2579_v46 = vadd.f32 %v2578_v44, %v8231_v20  ;;  %6787 = vmatmul.msk.f32.gmra.mxu0 %vm235_vm0, %v169_v38 }
 0x38c   :  { %4123 = vst [vmem:[#allocation3 + $0x748] sm:$0xff] %v3618_v43  ;;  %v1692_v47 = vld [vmem:[#allocation2 + $0x2f0] sm:$0xff] }
 0x38d   :  { %1525 = vst.msk [vmem:[#allocation2 + $0x2f8] sm:$0xff] %vm1429_vm2, %v1356_v45  ;;  %6939 = vmatmul.msk.f32.gmra.mxu1 %vm1429_vm2, %v1692_v47  ;;  %7108 = vmatmul.msk.f32.gmra.mxu2 %vm1429_vm2, %v1692_v47  ;;  %v175_v45 = vld [vmem:[%s12514_s0 + $0x3a8] sm:$0xff] }
 0x38e   :  { %4124 = vst [vmem:[#allocation3 + $0x750] sm:$0xff] %v2579_v46  ;;  %7277 = vmatmul.msk.f32.gmra.mxu3 %vm1429_vm2, %v1692_v47 }
 0x390   :  { %v1045_v48 = vpop.f32.mrf.mxu0  ;;  %v3099_v49 = vpop.f32.mrf.mxu2 }
 0x391   :  { %v1046_v51 = vadd.f32 %v9115_v33, %v1045_v48  ;;  %v3100_v52 = vadd.f32 %v3099_v49, %v8242_v28  ;;  %v3620_v53 = vpop.f32.mrf.mxu3 }
 0x392   :  { %v3621_v54 = vadd.f32 %v3620_v53, %v8245_v29  ;;  %v2581_v55 = vpop.f32.mrf.mxu1 }
 0x393   :  { %v1357_v56 = vmax.f32 %v1046_v51, 0.0  ;;  %4125 = vst [vmem:[#allocation3 + $0x758] sm:$0xff] %v3100_v52  ;;  %v2582_v57 = vadd.f32 %v2581_v55, %v8231_v20  ;;  %6788 = vmatmul.msk.f32.gmra.mxu0 %vm235_vm0, %v170_v50 }
 0x394   :  { %4126 = vst [vmem:[#allocation3 + $0x760] sm:$0xff] %v3621_v54  ;;  %v1693_v58 = vld [vmem:[#allocation2 + $0x2f8] sm:$0xff] }
 0x395   :  { %1526 = vst.msk [vmem:[#allocation2 + $0x300] sm:$0xff] %vm1429_vm2, %v1357_v56  ;;  %6940 = vmatmul.msk.f32.gmra.mxu1 %vm1429_vm2, %v1693_v58  ;;  %7109 = vmatmul.msk.f32.gmra.mxu2 %vm1429_vm2, %v1693_v58  ;;  %v176_v56 = vld [vmem:[%s12514_s0 + $0x3b0] sm:$0xff] }
 0x396   :  { %4127 = vst [vmem:[#allocation3 + $0x768] sm:$0xff] %v2582_v57  ;;  %7278 = vmatmul.msk.f32.gmra.mxu3 %vm1429_vm2, %v1693_v58 }
 0x398   :  { %v1048_v59 = vpop.f32.mrf.mxu0  ;;  %v3102_v60 = vpop.f32.mrf.mxu2 }
 0x399   :  { %v1049_v63 = vadd.f32 %v9115_v33, %v1048_v59  ;;  %v3103_v0 = vadd.f32 %v3102_v60, %v8242_v28  ;;  %v3623_v1 = vpop.f32.mrf.mxu3 }
 0x39a   :  { %v3624_v2 = vadd.f32 %v3623_v1, %v8245_v29  ;;  %v2584_v3 = vpop.f32.mrf.mxu1 }
 0x39b   :  { %v1358_v4 = vmax.f32 %v1049_v63, 0.0  ;;  %4128 = vst [vmem:[#allocation3 + $0x770] sm:$0xff] %v3103_v0  ;;  %v2585_v5 = vadd.f32 %v2584_v3, %v8231_v20  ;;  %6789 = vmatmul.msk.f32.gmra.mxu0 %vm235_vm0, %v171_v62 }
 0x39c   :  { %4129 = vst [vmem:[#allocation3 + $0x778] sm:$0xff] %v3624_v2  ;;  %v1694_v6 = vld [vmem:[#allocation2 + $0x300] sm:$0xff] }
 0x39d   :  { %1527 = vst.msk [vmem:[#allocation2 + $0x308] sm:$0xff] %vm1429_vm2, %v1358_v4  ;;  %6941 = vmatmul.msk.f32.gmra.mxu1 %vm1429_vm2, %v1694_v6  ;;  %7110 = vmatmul.msk.f32.gmra.mxu2 %vm1429_vm2, %v1694_v6  ;;  %v177_v4 = vld [vmem:[%s12514_s0 + $0x3b8] sm:$0xff] }
 0x39e   :  { %4130 = vst [vmem:[#allocation3 + $0x780] sm:$0xff] %v2585_v5  ;;  %7279 = vmatmul.msk.f32.gmra.mxu3 %vm1429_vm2, %v1694_v6 }
 0x3a0   :  { %v1051_v7 = vpop.f32.mrf.mxu0  ;;  %v3105_v8 = vpop.f32.mrf.mxu2 }
 0x3a1   :  { %v1052_v10 = vadd.f32 %v9115_v33, %v1051_v7  ;;  %v3106_v11 = vadd.f32 %v3105_v8, %v8242_v28  ;;  %v3626_v12 = vpop.f32.mrf.mxu3 }
 0x3a2   :  { %v3627_v13 = vadd.f32 %v3626_v12, %v8245_v29  ;;  %v2587_v14 = vpop.f32.mrf.mxu1 }
 0x3a3   :  { %v1359_v15 = vmax.f32 %v1052_v10, 0.0  ;;  %4131 = vst [vmem:[#allocation3 + $0x788] sm:$0xff] %v3106_v11  ;;  %v2588_v16 = vadd.f32 %v2587_v14, %v8231_v20  ;;  %6790 = vmatmul.msk.f32.gmra.mxu0 %vm235_vm0, %v172_v9 }
 0x3a4   :  { %4132 = vst [vmem:[#allocation3 + $0x790] sm:$0xff] %v3627_v13  ;;  %v1695_v17 = vld [vmem:[#allocation2 + $0x308] sm:$0xff] }
 0x3a5   :  { %1528 = vst.msk [vmem:[#allocation2 + $0x310] sm:$0xff] %vm1429_vm2, %v1359_v15  ;;  %6942 = vmatmul.msk.f32.gmra.mxu1 %vm1429_vm2, %v1695_v17  ;;  %7111 = vmatmul.msk.f32.gmra.mxu2 %vm1429_vm2, %v1695_v17  ;;  %v178_v15 = vld [vmem:[%s12514_s0 + $0x3c0] sm:$0xff] }
 0x3a6   :  { %4133 = vst [vmem:[#allocation3 + $0x798] sm:$0xff] %v2588_v16  ;;  %7280 = vmatmul.msk.f32.gmra.mxu3 %vm1429_vm2, %v1695_v17 }
 0x3a8   :  { %v1054_v18 = vpop.f32.mrf.mxu0  ;;  %v3108_v19 = vpop.f32.mrf.mxu2 }
 0x3a9   :  { %v1055_v22 = vadd.f32 %v9115_v33, %v1054_v18  ;;  %v3109_v23 = vadd.f32 %v3108_v19, %v8242_v28  ;;  %v3629_v24 = vpop.f32.mrf.mxu3 }
 0x3aa   :  { %v3630_v25 = vadd.f32 %v3629_v24, %v8245_v29  ;;  %v2590_v26 = vpop.f32.mrf.mxu1 }
 0x3ab   :  { %v1360_v27 = vmax.f32 %v1055_v22, 0.0  ;;  %4134 = vst [vmem:[#allocation3 + $0x7a0] sm:$0xff] %v3109_v23  ;;  %v2591_v30 = vadd.f32 %v2590_v26, %v8231_v20  ;;  %6791 = vmatmul.msk.f32.gmra.mxu0 %vm235_vm0, %v173_v21 }
 0x3ac   :  { %4135 = vst [vmem:[#allocation3 + $0x7a8] sm:$0xff] %v3630_v25  ;;  %v1696_v36 = vld [vmem:[#allocation2 + $0x310] sm:$0xff] }
 0x3ad   :  { %1529 = vst.msk [vmem:[#allocation2 + $0x318] sm:$0xff] %vm1429_vm2, %v1360_v27  ;;  %6943 = vmatmul.msk.f32.gmra.mxu1 %vm1429_vm2, %v1696_v36  ;;  %7112 = vmatmul.msk.f32.gmra.mxu2 %vm1429_vm2, %v1696_v36  ;;  %v179_v27 = vld [vmem:[%s12514_s0 + $0x3c8] sm:$0xff] }
 0x3ae   :  { %4136 = vst [vmem:[#allocation3 + $0x7b0] sm:$0xff] %v2591_v30  ;;  %7281 = vmatmul.msk.f32.gmra.mxu3 %vm1429_vm2, %v1696_v36 }
 0x3b0   :  { %v1057_v31 = vpop.f32.mrf.mxu0  ;;  %v3111_v32 = vpop.f32.mrf.mxu2 }
 0x3b1   :  { %v1058_v34 = vadd.f32 %v9115_v33, %v1057_v31  ;;  %v3112_v35 = vadd.f32 %v3111_v32, %v8242_v28  ;;  %v3632_v61 = vpop.f32.mrf.mxu3 }
 0x3b2   :  { %v3633_v37 = vadd.f32 %v3632_v61, %v8245_v29  ;;  %v2593_v38 = vpop.f32.mrf.mxu1 }
 0x3b3   :  { %v1361_v40 = vmax.f32 %v1058_v34, 0.0  ;;  %4137 = vst [vmem:[#allocation3 + $0x7b8] sm:$0xff] %v3112_v35  ;;  %v2594_v41 = vadd.f32 %v2593_v38, %v8231_v20  ;;  %6792 = vmatmul.msk.f32.gmra.mxu0 %vm235_vm0, %v174_v39 }
 0x3b4   :  { %4138 = vst [vmem:[#allocation3 + $0x7c0] sm:$0xff] %v3633_v37  ;;  %v1697_v42 = vld [vmem:[#allocation2 + $0x318] sm:$0xff] }
 0x3b5   :  { %1530 = vst.msk [vmem:[#allocation2 + $0x320] sm:$0xff] %vm1429_vm2, %v1361_v40  ;;  %6944 = vmatmul.msk.f32.gmra.mxu1 %vm1429_vm2, %v1697_v42  ;;  %7113 = vmatmul.msk.f32.gmra.mxu2 %vm1429_vm2, %v1697_v42  ;;  %v180_v40 = vld [vmem:[%s12514_s0 + $0x3d0] sm:$0xff] }
 0x3b6   :  { %4139 = vst [vmem:[#allocation3 + $0x7c8] sm:$0xff] %v2594_v41  ;;  %7282 = vmatmul.msk.f32.gmra.mxu3 %vm1429_vm2, %v1697_v42 }
 0x3b8   :  { %v1060_v43 = vpop.f32.mrf.mxu0  ;;  %v3114_v44 = vpop.f32.mrf.mxu2 }
 0x3b9   :  { %v1061_v46 = vadd.f32 %v9115_v33, %v1060_v43  ;;  %v3115_v47 = vadd.f32 %v3114_v44, %v8242_v28  ;;  %v3635_v48 = vpop.f32.mrf.mxu3 }
 0x3ba   :  { %v3636_v49 = vadd.f32 %v3635_v48, %v8245_v29  ;;  %v2596_v50 = vpop.f32.mrf.mxu1 }
 0x3bb   :  { %v1362_v51 = vmax.f32 %v1061_v46, 0.0  ;;  %4140 = vst [vmem:[#allocation3 + $0x7d0] sm:$0xff] %v3115_v47  ;;  %v2597_v52 = vadd.f32 %v2596_v50, %v8231_v20  ;;  %6793 = vmatmul.msk.f32.gmra.mxu0 %vm235_vm0, %v175_v45 }
 0x3bc   :  { %4141 = vst [vmem:[#allocation3 + $0x7d8] sm:$0xff] %v3636_v49  ;;  %v1698_v53 = vld [vmem:[#allocation2 + $0x320] sm:$0xff] }
 0x3bd   :  { %1531 = vst.msk [vmem:[#allocation2 + $0x328] sm:$0xff] %vm1429_vm2, %v1362_v51  ;;  %6945 = vmatmul.msk.f32.gmra.mxu1 %vm1429_vm2, %v1698_v53  ;;  %7114 = vmatmul.msk.f32.gmra.mxu2 %vm1429_vm2, %v1698_v53  ;;  %v181_v51 = vld [vmem:[%s12514_s0 + $0x3d8] sm:$0xff] }
 0x3be   :  { %4142 = vst [vmem:[#allocation3 + $0x7e0] sm:$0xff] %v2597_v52  ;;  %7283 = vmatmul.msk.f32.gmra.mxu3 %vm1429_vm2, %v1698_v53 }
 0x3c0   :  { %v1063_v54 = vpop.f32.mrf.mxu0  ;;  %v3117_v55 = vpop.f32.mrf.mxu2 }
 0x3c1   :  { %v1064_v57 = vadd.f32 %v9115_v33, %v1063_v54  ;;  %v3118_v58 = vadd.f32 %v3117_v55, %v8242_v28  ;;  %v3638_v59 = vpop.f32.mrf.mxu3 }
 0x3c2   :  { %v3639_v60 = vadd.f32 %v3638_v59, %v8245_v29  ;;  %v2599_v62 = vpop.f32.mrf.mxu1 }
 0x3c3   :  { %v1363_v63 = vmax.f32 %v1064_v57, 0.0  ;;  %4143 = vst [vmem:[#allocation3 + $0x7e8] sm:$0xff] %v3118_v58  ;;  %v2600_v0 = vadd.f32 %v2599_v62, %v8231_v20  ;;  %6794 = vmatmul.msk.f32.gmra.mxu0 %vm235_vm0, %v176_v56 }
 0x3c4   :  { %4144 = vst [vmem:[#allocation3 + $0x7f0] sm:$0xff] %v3639_v60  ;;  %v1699_v1 = vld [vmem:[#allocation2 + $0x328] sm:$0xff] }
 0x3c5   :  { %1532 = vst.msk [vmem:[#allocation2 + $0x330] sm:$0xff] %vm1429_vm2, %v1363_v63  ;;  %6946 = vmatmul.msk.f32.gmra.mxu1 %vm1429_vm2, %v1699_v1  ;;  %7115 = vmatmul.msk.f32.gmra.mxu2 %vm1429_vm2, %v1699_v1  ;;  %v182_v63 = vld [vmem:[%s12514_s0 + $0x3e0] sm:$0xff] }
 0x3c6   :  { %4145 = vst [vmem:[#allocation3 + $0x7f8] sm:$0xff] %v2600_v0  ;;  %7284 = vmatmul.msk.f32.gmra.mxu3 %vm1429_vm2, %v1699_v1 }
 0x3c8   :  { %v1066_v2 = vpop.f32.mrf.mxu0  ;;  %v3120_v3 = vpop.f32.mrf.mxu2 }
 0x3c9   :  { %v1067_v5 = vadd.f32 %v9115_v33, %v1066_v2  ;;  %v3121_v6 = vadd.f32 %v3120_v3, %v8242_v28  ;;  %v3641_v7 = vpop.f32.mrf.mxu3 }
 0x3ca   :  { %v3642_v8 = vadd.f32 %v3641_v7, %v8245_v29  ;;  %v2602_v9 = vpop.f32.mrf.mxu1 }
 0x3cb   :  { %v1364_v10 = vmax.f32 %v1067_v5, 0.0  ;;  %4146 = vst [vmem:[#allocation3 + $0x800] sm:$0xff] %v3121_v6  ;;  %v2603_v11 = vadd.f32 %v2602_v9, %v8231_v20  ;;  %6795 = vmatmul.msk.f32.gmra.mxu0 %vm235_vm0, %v177_v4 }
 0x3cc   :  { %4147 = vst [vmem:[#allocation3 + $0x808] sm:$0xff] %v3642_v8  ;;  %v1700_v12 = vld [vmem:[#allocation2 + $0x330] sm:$0xff] }
 0x3cd   :  { %1533 = vst.msk [vmem:[#allocation2 + $0x338] sm:$0xff] %vm1429_vm2, %v1364_v10  ;;  %6947 = vmatmul.msk.f32.gmra.mxu1 %vm1429_vm2, %v1700_v12  ;;  %7116 = vmatmul.msk.f32.gmra.mxu2 %vm1429_vm2, %v1700_v12  ;;  %v183_v10 = vld [vmem:[%s12514_s0 + $0x3e8] sm:$0xff] }
 0x3ce   :  { %4148 = vst [vmem:[#allocation3 + $0x810] sm:$0xff] %v2603_v11  ;;  %7285 = vmatmul.msk.f32.gmra.mxu3 %vm1429_vm2, %v1700_v12 }
 0x3d0   :  { %v1069_v13 = vpop.f32.mrf.mxu0  ;;  %v3123_v14 = vpop.f32.mrf.mxu2 }
 0x3d1   :  { %v1070_v16 = vadd.f32 %v9115_v33, %v1069_v13  ;;  %v3124_v17 = vadd.f32 %v3123_v14, %v8242_v28  ;;  %v3644_v18 = vpop.f32.mrf.mxu3 }
 0x3d2   :  { %v3645_v19 = vadd.f32 %v3644_v18, %v8245_v29  ;;  %v2605_v21 = vpop.f32.mrf.mxu1 }
 0x3d3   :  { %v1365_v22 = vmax.f32 %v1070_v16, 0.0  ;;  %4149 = vst [vmem:[#allocation3 + $0x818] sm:$0xff] %v3124_v17  ;;  %v2606_v23 = vadd.f32 %v2605_v21, %v8231_v20  ;;  %6796 = vmatmul.msk.f32.gmra.mxu0 %vm235_vm0, %v178_v15 }
 0x3d4   :  { %4150 = vst [vmem:[#allocation3 + $0x820] sm:$0xff] %v3645_v19  ;;  %v1701_v24 = vld [vmem:[#allocation2 + $0x338] sm:$0xff] }
 0x3d5   :  { %1534 = vst.msk [vmem:[#allocation2 + $0x340] sm:$0xff] %vm1429_vm2, %v1365_v22  ;;  %6948 = vmatmul.msk.f32.gmra.mxu1 %vm1429_vm2, %v1701_v24  ;;  %7117 = vmatmul.msk.f32.gmra.mxu2 %vm1429_vm2, %v1701_v24  ;;  %v184_v22 = vld [vmem:[%s12514_s0 + $0x3f0] sm:$0xff] }
 0x3d6   :  { %4151 = vst [vmem:[#allocation3 + $0x828] sm:$0xff] %v2606_v23  ;;  %7286 = vmatmul.msk.f32.gmra.mxu3 %vm1429_vm2, %v1701_v24 }
 0x3d8   :  { %v1072_v25 = vpop.f32.mrf.mxu0  ;;  %v3126_v26 = vpop.f32.mrf.mxu2 }
 0x3d9   :  { %v1073_v30 = vadd.f32 %v9115_v33, %v1072_v25  ;;  %v3127_v36 = vadd.f32 %v3126_v26, %v8242_v28  ;;  %v3647_v31 = vpop.f32.mrf.mxu3 }
 0x3da   :  { %v3648_v32 = vadd.f32 %v3647_v31, %v8245_v29  ;;  %v2608_v39 = vpop.f32.mrf.mxu1 }
 0x3db   :  { %v1366_v34 = vmax.f32 %v1073_v30, 0.0  ;;  %4152 = vst [vmem:[#allocation3 + $0x830] sm:$0xff] %v3127_v36  ;;  %v2609_v35 = vadd.f32 %v2608_v39, %v8231_v20  ;;  %6797 = vmatmul.msk.f32.gmra.mxu0 %vm235_vm0, %v179_v27 }
 0x3dc   :  { %4153 = vst [vmem:[#allocation3 + $0x838] sm:$0xff] %v3648_v32  ;;  %v1702_v61 = vld [vmem:[#allocation2 + $0x340] sm:$0xff] }
 0x3dd   :  { %1535 = vst.msk [vmem:[#allocation2 + $0x348] sm:$0xff] %vm1429_vm2, %v1366_v34  ;;  %6949 = vmatmul.msk.f32.gmra.mxu1 %vm1429_vm2, %v1702_v61  ;;  %7118 = vmatmul.msk.f32.gmra.mxu2 %vm1429_vm2, %v1702_v61  ;;  %v185_v34 = vld [vmem:[%s12514_s0 + $0x3f8] sm:$0xff] }
 0x3de   :  { %4154 = vst [vmem:[#allocation3 + $0x840] sm:$0xff] %v2609_v35  ;;  %7287 = vmatmul.msk.f32.gmra.mxu3 %vm1429_vm2, %v1702_v61 }
 0x3e0   :  { %v1075_v37 = vpop.f32.mrf.mxu0  ;;  %v3129_v38 = vpop.f32.mrf.mxu2 }
 0x3e1   :  { %v1076_v41 = vadd.f32 %v9115_v33, %v1075_v37  ;;  %v3130_v42 = vadd.f32 %v3129_v38, %v8242_v28  ;;  %v3650_v43 = vpop.f32.mrf.mxu3 }
 0x3e2   :  { %v3651_v44 = vadd.f32 %v3650_v43, %v8245_v29  ;;  %v2611_v45 = vpop.f32.mrf.mxu1 }
 0x3e3   :  { %v1367_v46 = vmax.f32 %v1076_v41, 0.0  ;;  %4155 = vst [vmem:[#allocation3 + $0x848] sm:$0xff] %v3130_v42  ;;  %v2612_v47 = vadd.f32 %v2611_v45, %v8231_v20  ;;  %6798 = vmatmul.msk.f32.gmra.mxu0 %vm235_vm0, %v180_v40 }
 0x3e4   :  { %4156 = vst [vmem:[#allocation3 + $0x850] sm:$0xff] %v3651_v44  ;;  %v1703_v48 = vld [vmem:[#allocation2 + $0x348] sm:$0xff] }
 0x3e5   :  { %1536 = vst.msk [vmem:[#allocation2 + $0x350] sm:$0xff] %vm1429_vm2, %v1367_v46  ;;  %6950 = vmatmul.msk.f32.gmra.mxu1 %vm1429_vm2, %v1703_v48  ;;  %7119 = vmatmul.msk.f32.gmra.mxu2 %vm1429_vm2, %v1703_v48  ;;  %v186_v46 = vld [vmem:[%s12514_s0 + $0x400] sm:$0xff] }
 0x3e6   :  { %4157 = vst [vmem:[#allocation3 + $0x858] sm:$0xff] %v2612_v47  ;;  %7288 = vmatmul.msk.f32.gmra.mxu3 %vm1429_vm2, %v1703_v48 }
 0x3e8   :  { %v1078_v49 = vpop.f32.mrf.mxu0  ;;  %v3132_v50 = vpop.f32.mrf.mxu2 }
 0x3e9   :  { %v1079_v52 = vadd.f32 %v9115_v33, %v1078_v49  ;;  %v3133_v53 = vadd.f32 %v3132_v50, %v8242_v28  ;;  %v3653_v54 = vpop.f32.mrf.mxu3 }
 0x3ea   :  { %v3654_v55 = vadd.f32 %v3653_v54, %v8245_v29  ;;  %v2614_v56 = vpop.f32.mrf.mxu1 }
 0x3eb   :  { %v1368_v57 = vmax.f32 %v1079_v52, 0.0  ;;  %4158 = vst [vmem:[#allocation3 + $0x860] sm:$0xff] %v3133_v53  ;;  %v2615_v58 = vadd.f32 %v2614_v56, %v8231_v20  ;;  %6799 = vmatmul.msk.f32.gmra.mxu0 %vm235_vm0, %v181_v51 }
 0x3ec   :  { %4159 = vst [vmem:[#allocation3 + $0x868] sm:$0xff] %v3654_v55  ;;  %v1704_v59 = vld [vmem:[#allocation2 + $0x350] sm:$0xff] }
 0x3ed   :  { %1537 = vst.msk [vmem:[#allocation2 + $0x358] sm:$0xff] %vm1429_vm2, %v1368_v57  ;;  %6951 = vmatmul.msk.f32.gmra.mxu1 %vm1429_vm2, %v1704_v59  ;;  %7120 = vmatmul.msk.f32.gmra.mxu2 %vm1429_vm2, %v1704_v59  ;;  %v187_v57 = vld [vmem:[%s12514_s0 + $0x408] sm:$0xff] }
 0x3ee   :  { %4160 = vst [vmem:[#allocation3 + $0x870] sm:$0xff] %v2615_v58  ;;  %7289 = vmatmul.msk.f32.gmra.mxu3 %vm1429_vm2, %v1704_v59 }
 0x3f0   :  { %v1081_v60 = vpop.f32.mrf.mxu0  ;;  %v3135_v62 = vpop.f32.mrf.mxu2 }
 0x3f1   :  { %v1082_v0 = vadd.f32 %v9115_v33, %v1081_v60  ;;  %v3136_v1 = vadd.f32 %v3135_v62, %v8242_v28  ;;  %v3656_v2 = vpop.f32.mrf.mxu3 }
 0x3f2   :  { %v3657_v3 = vadd.f32 %v3656_v2, %v8245_v29  ;;  %v2617_v4 = vpop.f32.mrf.mxu1 }
 0x3f3   :  { %v1369_v5 = vmax.f32 %v1082_v0, 0.0  ;;  %4161 = vst [vmem:[#allocation3 + $0x878] sm:$0xff] %v3136_v1  ;;  %v2618_v6 = vadd.f32 %v2617_v4, %v8231_v20  ;;  %6800 = vmatmul.msk.f32.gmra.mxu0 %vm235_vm0, %v182_v63 }
 0x3f4   :  { %4162 = vst [vmem:[#allocation3 + $0x880] sm:$0xff] %v3657_v3  ;;  %v1705_v7 = vld [vmem:[#allocation2 + $0x358] sm:$0xff] }
 0x3f5   :  { %1538 = vst.msk [vmem:[#allocation2 + $0x360] sm:$0xff] %vm1429_vm2, %v1369_v5  ;;  %6952 = vmatmul.msk.f32.gmra.mxu1 %vm1429_vm2, %v1705_v7  ;;  %7121 = vmatmul.msk.f32.gmra.mxu2 %vm1429_vm2, %v1705_v7  ;;  %v188_v5 = vld [vmem:[%s12514_s0 + $0x410] sm:$0xff] }
 0x3f6   :  { %4163 = vst [vmem:[#allocation3 + $0x888] sm:$0xff] %v2618_v6  ;;  %7290 = vmatmul.msk.f32.gmra.mxu3 %vm1429_vm2, %v1705_v7 }
 0x3f8   :  { %v1084_v8 = vpop.f32.mrf.mxu0  ;;  %v3138_v9 = vpop.f32.mrf.mxu2 }
 0x3f9   :  { %v1085_v11 = vadd.f32 %v9115_v33, %v1084_v8  ;;  %v3139_v12 = vadd.f32 %v3138_v9, %v8242_v28  ;;  %v3659_v13 = vpop.f32.mrf.mxu3 }
 0x3fa   :  { %v3660_v14 = vadd.f32 %v3659_v13, %v8245_v29  ;;  %v2620_v15 = vpop.f32.mrf.mxu1 }
 0x3fb   :  { %v1370_v16 = vmax.f32 %v1085_v11, 0.0  ;;  %4164 = vst [vmem:[#allocation3 + $0x890] sm:$0xff] %v3139_v12  ;;  %v2621_v17 = vadd.f32 %v2620_v15, %v8231_v20  ;;  %6801 = vmatmul.msk.f32.gmra.mxu0 %vm235_vm0, %v183_v10 }
 0x3fc   :  { %4165 = vst [vmem:[#allocation3 + $0x898] sm:$0xff] %v3660_v14  ;;  %v1706_v18 = vld [vmem:[#allocation2 + $0x360] sm:$0xff] }
 0x3fd   :  { %1539 = vst.msk [vmem:[#allocation2 + $0x368] sm:$0xff] %vm1429_vm2, %v1370_v16  ;;  %6953 = vmatmul.msk.f32.gmra.mxu1 %vm1429_vm2, %v1706_v18  ;;  %7122 = vmatmul.msk.f32.gmra.mxu2 %vm1429_vm2, %v1706_v18  ;;  %v189_v16 = vld [vmem:[%s12514_s0 + $0x418] sm:$0xff] }
 0x3fe   :  { %4166 = vst [vmem:[#allocation3 + $0x8a0] sm:$0xff] %v2621_v17  ;;  %7291 = vmatmul.msk.f32.gmra.mxu3 %vm1429_vm2, %v1706_v18 }
 0x400   :  { %v1087_v19 = vpop.f32.mrf.mxu0  ;;  %v3141_v21 = vpop.f32.mrf.mxu2 }
 0x401   :  { %v1088_v23 = vadd.f32 %v9115_v33, %v1087_v19  ;;  %v3142_v24 = vadd.f32 %v3141_v21, %v8242_v28  ;;  %v3662_v25 = vpop.f32.mrf.mxu3 }
 0x402   :  { %v3663_v26 = vadd.f32 %v3662_v25, %v8245_v29  ;;  %v2623_v27 = vpop.f32.mrf.mxu1 }
 0x403   :  { %v1371_v30 = vmax.f32 %v1088_v23, 0.0  ;;  %4167 = vst [vmem:[#allocation3 + $0x8a8] sm:$0xff] %v3142_v24  ;;  %v2624_v36 = vadd.f32 %v2623_v27, %v8231_v20  ;;  %6802 = vmatmul.msk.f32.gmra.mxu0 %vm235_vm0, %v184_v22  ;;  %v190_v27 = vld [vmem:[%s12514_s0 + $0x420] sm:$0xff] }
 0x404   :  { %4168 = vst [vmem:[#allocation3 + $0x8b0] sm:$0xff] %v3663_v26  ;;  %v1707_v31 = vld [vmem:[#allocation2 + $0x368] sm:$0xff] }
 0x405   :  { %1540 = vst.msk [vmem:[#allocation2 + $0x370] sm:$0xff] %vm1429_vm2, %v1371_v30  ;;  %6954 = vmatmul.msk.f32.gmra.mxu1 %vm1429_vm2, %v1707_v31  ;;  %7123 = vmatmul.msk.f32.gmra.mxu2 %vm1429_vm2, %v1707_v31  ;;  %v9444_v30 = vld [vmem:[%s12513_s2] ss:$0 sm:$0xff] }
 0x406   :  { %4169 = vst [vmem:[#allocation3 + $0x8b8] sm:$0xff] %v2624_v36  ;;  %7292 = vmatmul.msk.f32.gmra.mxu3 %vm1429_vm2, %v1707_v31 }
 0x408   :  { %v1090_v32 = vpop.f32.mrf.mxu0  ;;  %v3144_v39 = vpop.f32.mrf.mxu2 }
 0x409   :  { %v1091_v35 = vadd.f32 %v9115_v33, %v1090_v32  ;;  %v3145_v61 = vadd.f32 %v3144_v39, %v8242_v28  ;;  %v3665_v37 = vpop.f32.mrf.mxu3 }
 0x40a   :  { %v3666_v38 = vadd.f32 %v3665_v37, %v8245_v29  ;;  %v2626_v40 = vpop.f32.mrf.mxu1 }
 0x40b   :  { %v1372_v41 = vmax.f32 %v1091_v35, 0.0  ;;  %4170 = vst [vmem:[#allocation3 + $0x8c0] sm:$0xff] %v3145_v61  ;;  %v2627_v42 = vadd.f32 %v2626_v40, %v8231_v20  ;;  %6803 = vmatmul.msk.f32.gmra.mxu0 %vm235_vm0, %v185_v34 }
 0x40c   :  { %4171 = vst [vmem:[#allocation3 + $0x8c8] sm:$0xff] %v3666_v38  ;;  %v1708_v43 = vld [vmem:[#allocation2 + $0x370] sm:$0xff] }
 0x40d   :  { %1541 = vst.msk [vmem:[#allocation2 + $0x378] sm:$0xff] %vm1429_vm2, %v1372_v41  ;;  %6955 = vmatmul.msk.f32.gmra.mxu1 %vm1429_vm2, %v1708_v43  ;;  %7124 = vmatmul.msk.f32.gmra.mxu2 %vm1429_vm2, %v1708_v43  ;;  %v191_v41 = vld [vmem:[%s12514_s0 + $0x428] sm:$0xff] }
 0x40e   :  { %4172 = vst [vmem:[#allocation3 + $0x8d0] sm:$0xff] %v2627_v42  ;;  %7293 = vmatmul.msk.f32.gmra.mxu3 %vm1429_vm2, %v1708_v43 }
 0x410   :  { %v1093_v44 = vpop.f32.mrf.mxu0  ;;  %v3147_v45 = vpop.f32.mrf.mxu2 }
 0x411   :  { %v1094_v47 = vadd.f32 %v9115_v33, %v1093_v44  ;;  %v3148_v48 = vadd.f32 %v3147_v45, %v8242_v28  ;;  %v3668_v49 = vpop.f32.mrf.mxu3 }
 0x412   :  { %v3669_v50 = vadd.f32 %v3668_v49, %v8245_v29  ;;  %v2629_v51 = vpop.f32.mrf.mxu1 }
 0x413   :  { %v1373_v52 = vmax.f32 %v1094_v47, 0.0  ;;  %4173 = vst [vmem:[#allocation3 + $0x8d8] sm:$0xff] %v3148_v48  ;;  %v2630_v53 = vadd.f32 %v2629_v51, %v8231_v20  ;;  %6804 = vmatmul.msk.f32.gmra.mxu0 %vm235_vm0, %v186_v46 }
 0x414   :  { %4174 = vst [vmem:[#allocation3 + $0x8e0] sm:$0xff] %v3669_v50  ;;  %v1709_v54 = vld [vmem:[#allocation2 + $0x378] sm:$0xff] }
 0x415   :  { %1542 = vst.msk [vmem:[#allocation2 + $0x380] sm:$0xff] %vm1429_vm2, %v1373_v52  ;;  %6956 = vmatmul.msk.f32.gmra.mxu1 %vm1429_vm2, %v1709_v54  ;;  %7125 = vmatmul.msk.f32.gmra.mxu2 %vm1429_vm2, %v1709_v54  ;;  %v192_v52 = vld [vmem:[%s12514_s0 + $0x430] sm:$0xff] }
 0x416   :  { %4175 = vst [vmem:[#allocation3 + $0x8e8] sm:$0xff] %v2630_v53  ;;  %7294 = vmatmul.msk.f32.gmra.mxu3 %vm1429_vm2, %v1709_v54 }
 0x418   :  { %v1096_v55 = vpop.f32.mrf.mxu0  ;;  %v3150_v56 = vpop.f32.mrf.mxu2 }
 0x419   :  { %v1097_v58 = vadd.f32 %v9115_v33, %v1096_v55  ;;  %v3151_v59 = vadd.f32 %v3150_v56, %v8242_v28  ;;  %v3671_v60 = vpop.f32.mrf.mxu3 }
 0x41a   :  { %v3672_v62 = vadd.f32 %v3671_v60, %v8245_v29  ;;  %v2632_v63 = vpop.f32.mrf.mxu1 }
 0x41b   :  { %v1374_v0 = vmax.f32 %v1097_v58, 0.0  ;;  %4176 = vst [vmem:[#allocation3 + $0x8f0] sm:$0xff] %v3151_v59  ;;  %v2633_v1 = vadd.f32 %v2632_v63, %v8231_v20  ;;  %6805 = vmatmul.msk.f32.gmra.mxu0 %vm235_vm0, %v187_v57 }
 0x41c   :  { %4177 = vst [vmem:[#allocation3 + $0x8f8] sm:$0xff] %v3672_v62  ;;  %v1710_v2 = vld [vmem:[#allocation2 + $0x380] sm:$0xff] }
 0x41d   :  { %1543 = vst.msk [vmem:[#allocation2 + $0x388] sm:$0xff] %vm1429_vm2, %v1374_v0  ;;  %6957 = vmatmul.msk.f32.gmra.mxu1 %vm1429_vm2, %v1710_v2  ;;  %7126 = vmatmul.msk.f32.gmra.mxu2 %vm1429_vm2, %v1710_v2  ;;  %v193_v0 = vld [vmem:[%s12514_s0 + $0x438] sm:$0xff] }
 0x41e   :  { %4178 = vst [vmem:[#allocation3 + $0x900] sm:$0xff] %v2633_v1  ;;  %7295 = vmatmul.msk.f32.gmra.mxu3 %vm1429_vm2, %v1710_v2 }
 0x420   :  { %v1099_v3 = vpop.f32.mrf.mxu0  ;;  %v3153_v4 = vpop.f32.mrf.mxu2 }
 0x421   :  { %v1100_v6 = vadd.f32 %v9115_v33, %v1099_v3  ;;  %v3154_v7 = vadd.f32 %v3153_v4, %v8242_v28  ;;  %v3674_v8 = vpop.f32.mrf.mxu3 }
 0x422   :  { %v3675_v9 = vadd.f32 %v3674_v8, %v8245_v29  ;;  %v2635_v10 = vpop.f32.mrf.mxu1 }
 0x423   :  { %v1375_v11 = vmax.f32 %v1100_v6, 0.0  ;;  %4179 = vst [vmem:[#allocation3 + $0x908] sm:$0xff] %v3154_v7  ;;  %v2636_v12 = vadd.f32 %v2635_v10, %v8231_v20  ;;  %6806 = vmatmul.msk.f32.gmra.mxu0 %vm235_vm0, %v188_v5 }
 0x424   :  { %4180 = vst [vmem:[#allocation3 + $0x910] sm:$0xff] %v3675_v9  ;;  %v1711_v13 = vld [vmem:[#allocation2 + $0x388] sm:$0xff] }
 0x425   :  { %1544 = vst.msk [vmem:[#allocation2 + $0x390] sm:$0xff] %vm1429_vm2, %v1375_v11  ;;  %6958 = vmatmul.msk.f32.gmra.mxu1 %vm1429_vm2, %v1711_v13  ;;  %7127 = vmatmul.msk.f32.gmra.mxu2 %vm1429_vm2, %v1711_v13  ;;  %v194_v11 = vld [vmem:[%s12514_s0 + $0x440] sm:$0xff] }
 0x426   :  { %4181 = vst [vmem:[#allocation3 + $0x918] sm:$0xff] %v2636_v12  ;;  %7296 = vmatmul.msk.f32.gmra.mxu3 %vm1429_vm2, %v1711_v13 }
 0x428   :  { %v1102_v14 = vpop.f32.mrf.mxu0  ;;  %v3156_v15 = vpop.f32.mrf.mxu2 }
 0x429   :  { %v1103_v17 = vadd.f32 %v9115_v33, %v1102_v14  ;;  %v3157_v18 = vadd.f32 %v3156_v15, %v8242_v28  ;;  %v3677_v19 = vpop.f32.mrf.mxu3 }
 0x42a   :  { %v3678_v21 = vadd.f32 %v3677_v19, %v8245_v29  ;;  %v2638_v22 = vpop.f32.mrf.mxu1 }
 0x42b   :  { %v1376_v23 = vmax.f32 %v1103_v17, 0.0  ;;  %4182 = vst [vmem:[#allocation3 + $0x920] sm:$0xff] %v3157_v18  ;;  %v2639_v24 = vadd.f32 %v2638_v22, %v8231_v20  ;;  %6807 = vmatmul.msk.f32.gmra.mxu0 %vm235_vm0, %v189_v16 }
 0x42c   :  { %4183 = vst [vmem:[#allocation3 + $0x928] sm:$0xff] %v3678_v21  ;;  %v1712_v25 = vld [vmem:[#allocation2 + $0x390] sm:$0xff] }
 0x42d   :  { %1545 = vst.msk [vmem:[#allocation2 + $0x398] sm:$0xff] %vm1429_vm2, %v1376_v23  ;;  %6959 = vmatmul.msk.f32.gmra.mxu1 %vm1429_vm2, %v1712_v25  ;;  %7128 = vmatmul.msk.f32.gmra.mxu2 %vm1429_vm2, %v1712_v25  ;;  %v195_v23 = vld [vmem:[%s12514_s0 + $0x448] sm:$0xff] }
 0x42e   :  { %4184 = vst [vmem:[#allocation3 + $0x930] sm:$0xff] %v2639_v24  ;;  %7297 = vmatmul.msk.f32.gmra.mxu3 %vm1429_vm2, %v1712_v25 }
 0x430   :  { %v1105_v33 = vpop.f32.mrf.mxu0  ;;  %v3159_v26 = vpop.f32.mrf.mxu2 }
 0x431   :  { %v1106_v36 = vadd.f32 %v9444_v30, %v1105_v33  ;;  %v3160_v31 = vadd.f32 %v3159_v26, %v8242_v28  ;;  %v3680_v32 = vpop.f32.mrf.mxu3 }
 0x432   :  { %v3681_v39 = vadd.f32 %v3680_v32, %v8245_v29  ;;  %v2641_v34 = vpop.f32.mrf.mxu1 }
 0x433   :  { %v1377_v35 = vmax.f32 %v1106_v36, 0.0  ;;  %4185 = vst [vmem:[#allocation3 + $0x938] sm:$0xff] %v3160_v31  ;;  %v2642_v61 = vadd.f32 %v2641_v34, %v8231_v20  ;;  %6808 = vmatmul.msk.f32.gmra.mxu0 %vm235_vm0, %v190_v27 }
 0x434   :  { %4186 = vst [vmem:[#allocation3 + $0x940] sm:$0xff] %v3681_v39  ;;  %v1713_v37 = vld [vmem:[#allocation2 + $0x398] sm:$0xff] }
 0x435   :  { %1546 = vst.msk [vmem:[#allocation2 + $0x3a0] sm:$0xff] %vm1429_vm2, %v1377_v35  ;;  %6960 = vmatmul.msk.f32.gmra.mxu1 %vm1429_vm2, %v1713_v37  ;;  %7129 = vmatmul.msk.f32.gmra.mxu2 %vm1429_vm2, %v1713_v37  ;;  %v196_v35 = vld [vmem:[%s12514_s0 + $0x450] sm:$0xff] }
 0x436   :  { %4187 = vst [vmem:[#allocation3 + $0x948] sm:$0xff] %v2642_v61  ;;  %7298 = vmatmul.msk.f32.gmra.mxu3 %vm1429_vm2, %v1713_v37 }
 0x438   :  { %v1108_v38 = vpop.f32.mrf.mxu0  ;;  %v3162_v40 = vpop.f32.mrf.mxu2 }
 0x439   :  { %v1109_v42 = vadd.f32 %v9444_v30, %v1108_v38  ;;  %v3163_v43 = vadd.f32 %v3162_v40, %v8242_v28  ;;  %v3683_v44 = vpop.f32.mrf.mxu3 }
 0x43a   :  { %v3684_v45 = vadd.f32 %v3683_v44, %v8245_v29  ;;  %v2644_v46 = vpop.f32.mrf.mxu1 }
 0x43b   :  { %v1378_v47 = vmax.f32 %v1109_v42, 0.0  ;;  %4188 = vst [vmem:[#allocation3 + $0x950] sm:$0xff] %v3163_v43  ;;  %v2645_v48 = vadd.f32 %v2644_v46, %v8231_v20  ;;  %6809 = vmatmul.msk.f32.gmra.mxu0 %vm235_vm0, %v191_v41 }
 0x43c   :  { %4189 = vst [vmem:[#allocation3 + $0x958] sm:$0xff] %v3684_v45  ;;  %v1714_v49 = vld [vmem:[#allocation2 + $0x3a0] sm:$0xff] }
 0x43d   :  { %1547 = vst.msk [vmem:[#allocation2 + $0x3a8] sm:$0xff] %vm1429_vm2, %v1378_v47  ;;  %6961 = vmatmul.msk.f32.gmra.mxu1 %vm1429_vm2, %v1714_v49  ;;  %7130 = vmatmul.msk.f32.gmra.mxu2 %vm1429_vm2, %v1714_v49  ;;  %v197_v47 = vld [vmem:[%s12514_s0 + $0x458] sm:$0xff] }
 0x43e   :  { %4190 = vst [vmem:[#allocation3 + $0x960] sm:$0xff] %v2645_v48  ;;  %7299 = vmatmul.msk.f32.gmra.mxu3 %vm1429_vm2, %v1714_v49 }
 0x440   :  { %v1111_v50 = vpop.f32.mrf.mxu0  ;;  %v3165_v51 = vpop.f32.mrf.mxu2 }
 0x441   :  { %v1112_v53 = vadd.f32 %v9444_v30, %v1111_v50  ;;  %v3166_v54 = vadd.f32 %v3165_v51, %v8242_v28  ;;  %v3686_v55 = vpop.f32.mrf.mxu3 }
 0x442   :  { %v3687_v56 = vadd.f32 %v3686_v55, %v8245_v29  ;;  %v2647_v57 = vpop.f32.mrf.mxu1 }
 0x443   :  { %v1379_v58 = vmax.f32 %v1112_v53, 0.0  ;;  %4191 = vst [vmem:[#allocation3 + $0x968] sm:$0xff] %v3166_v54  ;;  %v2648_v59 = vadd.f32 %v2647_v57, %v8231_v20  ;;  %6810 = vmatmul.msk.f32.gmra.mxu0 %vm235_vm0, %v192_v52 }
 0x444   :  { %4192 = vst [vmem:[#allocation3 + $0x970] sm:$0xff] %v3687_v56  ;;  %v1715_v60 = vld [vmem:[#allocation2 + $0x3a8] sm:$0xff] }
 0x445   :  { %1548 = vst.msk [vmem:[#allocation2 + $0x3b0] sm:$0xff] %vm1429_vm2, %v1379_v58  ;;  %6962 = vmatmul.msk.f32.gmra.mxu1 %vm1429_vm2, %v1715_v60  ;;  %7131 = vmatmul.msk.f32.gmra.mxu2 %vm1429_vm2, %v1715_v60  ;;  %v198_v58 = vld [vmem:[%s12514_s0 + $0x460] sm:$0xff] }
 0x446   :  { %4193 = vst [vmem:[#allocation3 + $0x978] sm:$0xff] %v2648_v59  ;;  %7300 = vmatmul.msk.f32.gmra.mxu3 %vm1429_vm2, %v1715_v60 }
 0x448   :  { %v1114_v62 = vpop.f32.mrf.mxu0  ;;  %v3168_v63 = vpop.f32.mrf.mxu2 }
 0x449   :  { %v1115_v1 = vadd.f32 %v9444_v30, %v1114_v62  ;;  %v3169_v2 = vadd.f32 %v3168_v63, %v8242_v28  ;;  %v3689_v3 = vpop.f32.mrf.mxu3 }
 0x44a   :  { %v3690_v4 = vadd.f32 %v3689_v3, %v8245_v29  ;;  %v2650_v5 = vpop.f32.mrf.mxu1 }
 0x44b   :  { %v1380_v6 = vmax.f32 %v1115_v1, 0.0  ;;  %4194 = vst [vmem:[#allocation3 + $0x980] sm:$0xff] %v3169_v2  ;;  %v2651_v7 = vadd.f32 %v2650_v5, %v8231_v20  ;;  %6811 = vmatmul.msk.f32.gmra.mxu0 %vm235_vm0, %v193_v0 }
 0x44c   :  { %4195 = vst [vmem:[#allocation3 + $0x988] sm:$0xff] %v3690_v4  ;;  %v1716_v8 = vld [vmem:[#allocation2 + $0x3b0] sm:$0xff] }
 0x44d   :  { %1549 = vst.msk [vmem:[#allocation2 + $0x3b8] sm:$0xff] %vm1429_vm2, %v1380_v6  ;;  %6963 = vmatmul.msk.f32.gmra.mxu1 %vm1429_vm2, %v1716_v8  ;;  %7132 = vmatmul.msk.f32.gmra.mxu2 %vm1429_vm2, %v1716_v8  ;;  %v199_v6 = vld [vmem:[%s12514_s0 + $0x468] sm:$0xff] }
 0x44e   :  { %4196 = vst [vmem:[#allocation3 + $0x990] sm:$0xff] %v2651_v7  ;;  %7301 = vmatmul.msk.f32.gmra.mxu3 %vm1429_vm2, %v1716_v8 }
 0x450   :  { %v1117_v9 = vpop.f32.mrf.mxu0  ;;  %v3171_v10 = vpop.f32.mrf.mxu2 }
 0x451   :  { %v1118_v12 = vadd.f32 %v9444_v30, %v1117_v9  ;;  %v3172_v13 = vadd.f32 %v3171_v10, %v8242_v28  ;;  %v3692_v14 = vpop.f32.mrf.mxu3 }
 0x452   :  { %v3693_v15 = vadd.f32 %v3692_v14, %v8245_v29  ;;  %v2653_v16 = vpop.f32.mrf.mxu1 }
 0x453   :  { %v1381_v17 = vmax.f32 %v1118_v12, 0.0  ;;  %4197 = vst [vmem:[#allocation3 + $0x998] sm:$0xff] %v3172_v13  ;;  %v2654_v18 = vadd.f32 %v2653_v16, %v8231_v20  ;;  %6812 = vmatmul.msk.f32.gmra.mxu0 %vm235_vm0, %v194_v11 }
 0x454   :  { %4198 = vst [vmem:[#allocation3 + $0x9a0] sm:$0xff] %v3693_v15  ;;  %v1717_v19 = vld [vmem:[#allocation2 + $0x3b8] sm:$0xff] }
 0x455   :  { %1550 = vst.msk [vmem:[#allocation2 + $0x3c0] sm:$0xff] %vm1429_vm2, %v1381_v17  ;;  %6964 = vmatmul.msk.f32.gmra.mxu1 %vm1429_vm2, %v1717_v19  ;;  %7133 = vmatmul.msk.f32.gmra.mxu2 %vm1429_vm2, %v1717_v19  ;;  %v200_v17 = vld [vmem:[%s12514_s0 + $0x470] sm:$0xff] }
 0x456   :  { %4199 = vst [vmem:[#allocation3 + $0x9a8] sm:$0xff] %v2654_v18  ;;  %7302 = vmatmul.msk.f32.gmra.mxu3 %vm1429_vm2, %v1717_v19 }
 0x458   :  { %v1120_v21 = vpop.f32.mrf.mxu0  ;;  %v3174_v22 = vpop.f32.mrf.mxu2 }
 0x459   :  { %v1121_v24 = vadd.f32 %v9444_v30, %v1120_v21  ;;  %v3175_v25 = vadd.f32 %v3174_v22, %v8242_v28  ;;  %v3695_v33 = vpop.f32.mrf.mxu3 }
 0x45a   :  { %v3696_v26 = vadd.f32 %v3695_v33, %v8245_v29  ;;  %v2656_v27 = vpop.f32.mrf.mxu1 }
 0x45b   :  { %v1382_v36 = vmax.f32 %v1121_v24, 0.0  ;;  %4200 = vst [vmem:[#allocation3 + $0x9b0] sm:$0xff] %v3175_v25  ;;  %v2657_v31 = vadd.f32 %v2656_v27, %v8231_v20  ;;  %6813 = vmatmul.msk.f32.gmra.mxu0 %vm235_vm0, %v195_v23 }
 0x45c   :  { %4201 = vst [vmem:[#allocation3 + $0x9b8] sm:$0xff] %v3696_v26  ;;  %v1718_v32 = vld [vmem:[#allocation2 + $0x3c0] sm:$0xff] }
 0x45d   :  { %1551 = vst.msk [vmem:[#allocation2 + $0x3c8] sm:$0xff] %vm1429_vm2, %v1382_v36  ;;  %6965 = vmatmul.msk.f32.gmra.mxu1 %vm1429_vm2, %v1718_v32  ;;  %7134 = vmatmul.msk.f32.gmra.mxu2 %vm1429_vm2, %v1718_v32  ;;  %v201_v36 = vld [vmem:[%s12514_s0 + $0x478] sm:$0xff] }
 0x45e   :  { %4202 = vst [vmem:[#allocation3 + $0x9c0] sm:$0xff] %v2657_v31  ;;  %7303 = vmatmul.msk.f32.gmra.mxu3 %vm1429_vm2, %v1718_v32 }
 0x460   :  { %v1123_v39 = vpop.f32.mrf.mxu0  ;;  %v3177_v34 = vpop.f32.mrf.mxu2 }
 0x461   :  { %v1124_v61 = vadd.f32 %v9444_v30, %v1123_v39  ;;  %v3178_v37 = vadd.f32 %v3177_v34, %v8242_v28  ;;  %v3698_v38 = vpop.f32.mrf.mxu3 }
 0x462   :  { %v3699_v40 = vadd.f32 %v3698_v38, %v8245_v29  ;;  %v2659_v41 = vpop.f32.mrf.mxu1 }
 0x463   :  { %v1383_v42 = vmax.f32 %v1124_v61, 0.0  ;;  %4203 = vst [vmem:[#allocation3 + $0x9c8] sm:$0xff] %v3178_v37  ;;  %v2660_v43 = vadd.f32 %v2659_v41, %v8231_v20  ;;  %6814 = vmatmul.msk.f32.gmra.mxu0 %vm235_vm0, %v196_v35 }
 0x464   :  { %4204 = vst [vmem:[#allocation3 + $0x9d0] sm:$0xff] %v3699_v40  ;;  %v1719_v44 = vld [vmem:[#allocation2 + $0x3c8] sm:$0xff] }
 0x465   :  { %1552 = vst.msk [vmem:[#allocation2 + $0x3d0] sm:$0xff] %vm1429_vm2, %v1383_v42  ;;  %6966 = vmatmul.msk.f32.gmra.mxu1 %vm1429_vm2, %v1719_v44  ;;  %7135 = vmatmul.msk.f32.gmra.mxu2 %vm1429_vm2, %v1719_v44  ;;  %v202_v42 = vld [vmem:[%s12514_s0 + $0x480] sm:$0xff] }
 0x466   :  { %4205 = vst [vmem:[#allocation3 + $0x9d8] sm:$0xff] %v2660_v43  ;;  %7304 = vmatmul.msk.f32.gmra.mxu3 %vm1429_vm2, %v1719_v44 }
 0x468   :  { %v1126_v45 = vpop.f32.mrf.mxu0  ;;  %v3180_v46 = vpop.f32.mrf.mxu2 }
 0x469   :  { %v1127_v48 = vadd.f32 %v9444_v30, %v1126_v45  ;;  %v3181_v49 = vadd.f32 %v3180_v46, %v8242_v28  ;;  %v3701_v50 = vpop.f32.mrf.mxu3 }
 0x46a   :  { %v3702_v51 = vadd.f32 %v3701_v50, %v8245_v29  ;;  %v2662_v52 = vpop.f32.mrf.mxu1 }
 0x46b   :  { %v1384_v53 = vmax.f32 %v1127_v48, 0.0  ;;  %4206 = vst [vmem:[#allocation3 + $0x9e0] sm:$0xff] %v3181_v49  ;;  %v2663_v54 = vadd.f32 %v2662_v52, %v8231_v20  ;;  %6815 = vmatmul.msk.f32.gmra.mxu0 %vm235_vm0, %v197_v47 }
 0x46c   :  { %4207 = vst [vmem:[#allocation3 + $0x9e8] sm:$0xff] %v3702_v51  ;;  %v1720_v55 = vld [vmem:[#allocation2 + $0x3d0] sm:$0xff] }
 0x46d   :  { %1553 = vst.msk [vmem:[#allocation2 + $0x3d8] sm:$0xff] %vm1429_vm2, %v1384_v53  ;;  %6967 = vmatmul.msk.f32.gmra.mxu1 %vm1429_vm2, %v1720_v55  ;;  %7136 = vmatmul.msk.f32.gmra.mxu2 %vm1429_vm2, %v1720_v55  ;;  %v203_v53 = vld [vmem:[%s12514_s0 + $0x488] sm:$0xff] }
 0x46e   :  { %4208 = vst [vmem:[#allocation3 + $0x9f0] sm:$0xff] %v2663_v54  ;;  %7305 = vmatmul.msk.f32.gmra.mxu3 %vm1429_vm2, %v1720_v55 }
 0x470   :  { %v1129_v56 = vpop.f32.mrf.mxu0  ;;  %v3183_v57 = vpop.f32.mrf.mxu2 }
 0x471   :  { %v1130_v59 = vadd.f32 %v9444_v30, %v1129_v56  ;;  %v3184_v60 = vadd.f32 %v3183_v57, %v8242_v28  ;;  %v3704_v62 = vpop.f32.mrf.mxu3 }
 0x472   :  { %v3705_v63 = vadd.f32 %v3704_v62, %v8245_v29  ;;  %v2665_v0 = vpop.f32.mrf.mxu1 }
 0x473   :  { %v1385_v1 = vmax.f32 %v1130_v59, 0.0  ;;  %4209 = vst [vmem:[#allocation3 + $0x9f8] sm:$0xff] %v3184_v60  ;;  %v2666_v2 = vadd.f32 %v2665_v0, %v8231_v20  ;;  %6816 = vmatmul.msk.f32.gmra.mxu0 %vm235_vm0, %v198_v58 }
 0x474   :  { %4210 = vst [vmem:[#allocation3 + $0xa00] sm:$0xff] %v3705_v63  ;;  %v1721_v3 = vld [vmem:[#allocation2 + $0x3d8] sm:$0xff] }
 0x475   :  { %1554 = vst.msk [vmem:[#allocation2 + $0x3e0] sm:$0xff] %vm1429_vm2, %v1385_v1  ;;  %6968 = vmatmul.msk.f32.gmra.mxu1 %vm1429_vm2, %v1721_v3  ;;  %7137 = vmatmul.msk.f32.gmra.mxu2 %vm1429_vm2, %v1721_v3  ;;  %v204_v1 = vld [vmem:[%s12514_s0 + $0x490] sm:$0xff] }
 0x476   :  { %4211 = vst [vmem:[#allocation3 + $0xa08] sm:$0xff] %v2666_v2  ;;  %7306 = vmatmul.msk.f32.gmra.mxu3 %vm1429_vm2, %v1721_v3 }
 0x478   :  { %v1132_v4 = vpop.f32.mrf.mxu0  ;;  %v3186_v5 = vpop.f32.mrf.mxu2 }
 0x479   :  { %v1133_v7 = vadd.f32 %v9444_v30, %v1132_v4  ;;  %v3187_v8 = vadd.f32 %v3186_v5, %v8242_v28  ;;  %v3707_v9 = vpop.f32.mrf.mxu3 }
 0x47a   :  { %v3708_v10 = vadd.f32 %v3707_v9, %v8245_v29  ;;  %v2668_v11 = vpop.f32.mrf.mxu1 }
 0x47b   :  { %v1386_v12 = vmax.f32 %v1133_v7, 0.0  ;;  %4212 = vst [vmem:[#allocation3 + $0xa10] sm:$0xff] %v3187_v8  ;;  %v2669_v13 = vadd.f32 %v2668_v11, %v8231_v20  ;;  %6817 = vmatmul.msk.f32.gmra.mxu0 %vm235_vm0, %v199_v6 }
 0x47c   :  { %4213 = vst [vmem:[#allocation3 + $0xa18] sm:$0xff] %v3708_v10  ;;  %v1722_v14 = vld [vmem:[#allocation2 + $0x3e0] sm:$0xff] }
 0x47d   :  { %1555 = vst.msk [vmem:[#allocation2 + $0x3e8] sm:$0xff] %vm1429_vm2, %v1386_v12  ;;  %6969 = vmatmul.msk.f32.gmra.mxu1 %vm1429_vm2, %v1722_v14  ;;  %7138 = vmatmul.msk.f32.gmra.mxu2 %vm1429_vm2, %v1722_v14  ;;  %v205_v12 = vld [vmem:[%s12514_s0 + $0x498] sm:$0xff] }
 0x47e   :  { %4214 = vst [vmem:[#allocation3 + $0xa20] sm:$0xff] %v2669_v13  ;;  %7307 = vmatmul.msk.f32.gmra.mxu3 %vm1429_vm2, %v1722_v14 }
 0x480   :  { %v1135_v15 = vpop.f32.mrf.mxu0  ;;  %v3189_v16 = vpop.f32.mrf.mxu2 }
 0x481   :  { %v1136_v18 = vadd.f32 %v9444_v30, %v1135_v15  ;;  %v3190_v19 = vadd.f32 %v3189_v16, %v8242_v28  ;;  %v3710_v21 = vpop.f32.mrf.mxu3 }
 0x482   :  { %v3711_v22 = vadd.f32 %v3710_v21, %v8245_v29  ;;  %v2671_v23 = vpop.f32.mrf.mxu1 }
 0x483   :  { %v1387_v24 = vmax.f32 %v1136_v18, 0.0  ;;  %4215 = vst [vmem:[#allocation3 + $0xa28] sm:$0xff] %v3190_v19  ;;  %v2672_v25 = vadd.f32 %v2671_v23, %v8231_v20  ;;  %6818 = vmatmul.msk.f32.gmra.mxu0 %vm235_vm0, %v200_v17 }
 0x484   :  { %4216 = vst [vmem:[#allocation3 + $0xa30] sm:$0xff] %v3711_v22  ;;  %v1723_v33 = vld [vmem:[#allocation2 + $0x3e8] sm:$0xff] }
 0x485   :  { %1556 = vst.msk [vmem:[#allocation2 + $0x3f0] sm:$0xff] %vm1429_vm2, %v1387_v24  ;;  %6970 = vmatmul.msk.f32.gmra.mxu1 %vm1429_vm2, %v1723_v33  ;;  %7139 = vmatmul.msk.f32.gmra.mxu2 %vm1429_vm2, %v1723_v33  ;;  %v206_v24 = vld [vmem:[%s12514_s0 + $0x4a0] sm:$0xff] }
 0x486   :  { %4217 = vst [vmem:[#allocation3 + $0xa38] sm:$0xff] %v2672_v25  ;;  %7308 = vmatmul.msk.f32.gmra.mxu3 %vm1429_vm2, %v1723_v33 }
 0x488   :  { %v1138_v26 = vpop.f32.mrf.mxu0  ;;  %v3192_v27 = vpop.f32.mrf.mxu2 }
 0x489   :  { %v1139_v31 = vadd.f32 %v9444_v30, %v1138_v26  ;;  %v3193_v32 = vadd.f32 %v3192_v27, %v8242_v28  ;;  %v3713_v39 = vpop.f32.mrf.mxu3 }
 0x48a   :  { %v3714_v34 = vadd.f32 %v3713_v39, %v8245_v29  ;;  %v2674_v35 = vpop.f32.mrf.mxu1 }
 0x48b   :  { %v1388_v61 = vmax.f32 %v1139_v31, 0.0  ;;  %4218 = vst [vmem:[#allocation3 + $0xa40] sm:$0xff] %v3193_v32  ;;  %v2675_v37 = vadd.f32 %v2674_v35, %v8231_v20  ;;  %6819 = vmatmul.msk.f32.gmra.mxu0 %vm235_vm0, %v201_v36 }
 0x48c   :  { %4219 = vst [vmem:[#allocation3 + $0xa48] sm:$0xff] %v3714_v34  ;;  %v1724_v38 = vld [vmem:[#allocation2 + $0x3f0] sm:$0xff] }
 0x48d   :  { %1557 = vst.msk [vmem:[#allocation2 + $0x3f8] sm:$0xff] %vm1429_vm2, %v1388_v61  ;;  %6971 = vmatmul.msk.f32.gmra.mxu1 %vm1429_vm2, %v1724_v38  ;;  %7140 = vmatmul.msk.f32.gmra.mxu2 %vm1429_vm2, %v1724_v38  ;;  %v207_v61 = vld [vmem:[%s12514_s0 + $0x4a8] sm:$0xff] }
 0x48e   :  { %4220 = vst [vmem:[#allocation3 + $0xa50] sm:$0xff] %v2675_v37  ;;  %7309 = vmatmul.msk.f32.gmra.mxu3 %vm1429_vm2, %v1724_v38 }
 0x490   :  { %v1141_v40 = vpop.f32.mrf.mxu0  ;;  %v3195_v41 = vpop.f32.mrf.mxu2 }
 0x491   :  { %v1142_v43 = vadd.f32 %v9444_v30, %v1141_v40  ;;  %v3196_v44 = vadd.f32 %v3195_v41, %v8242_v28  ;;  %v3716_v45 = vpop.f32.mrf.mxu3 }
 0x492   :  { %v3717_v46 = vadd.f32 %v3716_v45, %v8245_v29  ;;  %v2677_v47 = vpop.f32.mrf.mxu1 }
 0x493   :  { %v1389_v48 = vmax.f32 %v1142_v43, 0.0  ;;  %4221 = vst [vmem:[#allocation3 + $0xa58] sm:$0xff] %v3196_v44  ;;  %v2678_v49 = vadd.f32 %v2677_v47, %v8231_v20  ;;  %6820 = vmatmul.msk.f32.gmra.mxu0 %vm235_vm0, %v202_v42 }
 0x494   :  { %4222 = vst [vmem:[#allocation3 + $0xa60] sm:$0xff] %v3717_v46  ;;  %v1725_v50 = vld [vmem:[#allocation2 + $0x3f8] sm:$0xff] }
 0x495   :  { %1558 = vst.msk [vmem:[#allocation2 + $0x400] sm:$0xff] %vm1429_vm2, %v1389_v48  ;;  %6972 = vmatmul.msk.f32.gmra.mxu1 %vm1429_vm2, %v1725_v50  ;;  %7141 = vmatmul.msk.f32.gmra.mxu2 %vm1429_vm2, %v1725_v50  ;;  %v208_v48 = vld [vmem:[%s12514_s0 + $0x4b0] sm:$0xff] }
 0x496   :  { %4223 = vst [vmem:[#allocation3 + $0xa68] sm:$0xff] %v2678_v49  ;;  %7310 = vmatmul.msk.f32.gmra.mxu3 %vm1429_vm2, %v1725_v50 }
 0x498   :  { %v1144_v51 = vpop.f32.mrf.mxu0  ;;  %v3198_v52 = vpop.f32.mrf.mxu2 }
 0x499   :  { %v1145_v54 = vadd.f32 %v9444_v30, %v1144_v51  ;;  %v3199_v55 = vadd.f32 %v3198_v52, %v8242_v28  ;;  %v3719_v56 = vpop.f32.mrf.mxu3 }
 0x49a   :  { %v3720_v57 = vadd.f32 %v3719_v56, %v8245_v29  ;;  %v2680_v58 = vpop.f32.mrf.mxu1 }
 0x49b   :  { %v1390_v59 = vmax.f32 %v1145_v54, 0.0  ;;  %4224 = vst [vmem:[#allocation3 + $0xa70] sm:$0xff] %v3199_v55  ;;  %v2681_v60 = vadd.f32 %v2680_v58, %v8231_v20  ;;  %6821 = vmatmul.msk.f32.gmra.mxu0 %vm235_vm0, %v203_v53 }
 0x49c   :  { %4225 = vst [vmem:[#allocation3 + $0xa78] sm:$0xff] %v3720_v57  ;;  %v1726_v62 = vld [vmem:[#allocation2 + $0x400] sm:$0xff] }
 0x49d   :  { %1559 = vst.msk [vmem:[#allocation2 + $0x408] sm:$0xff] %vm1429_vm2, %v1390_v59  ;;  %6973 = vmatmul.msk.f32.gmra.mxu1 %vm1429_vm2, %v1726_v62  ;;  %7142 = vmatmul.msk.f32.gmra.mxu2 %vm1429_vm2, %v1726_v62  ;;  %v209_v59 = vld [vmem:[%s12514_s0 + $0x4b8] sm:$0xff] }
 0x49e   :  { %4226 = vst [vmem:[#allocation3 + $0xa80] sm:$0xff] %v2681_v60  ;;  %7311 = vmatmul.msk.f32.gmra.mxu3 %vm1429_vm2, %v1726_v62 }
 0x4a0   :  { %v1147_v63 = vpop.f32.mrf.mxu0  ;;  %v3201_v0 = vpop.f32.mrf.mxu2 }
 0x4a1   :  { %v1148_v2 = vadd.f32 %v9444_v30, %v1147_v63  ;;  %v3202_v3 = vadd.f32 %v3201_v0, %v8242_v28  ;;  %v3722_v4 = vpop.f32.mrf.mxu3 }
 0x4a2   :  { %v3723_v5 = vadd.f32 %v3722_v4, %v8245_v29  ;;  %v2683_v6 = vpop.f32.mrf.mxu1 }
 0x4a3   :  { %v1391_v7 = vmax.f32 %v1148_v2, 0.0  ;;  %4227 = vst [vmem:[#allocation3 + $0xa88] sm:$0xff] %v3202_v3  ;;  %v2684_v8 = vadd.f32 %v2683_v6, %v8231_v20  ;;  %6822 = vmatmul.msk.f32.gmra.mxu0 %vm235_vm0, %v204_v1 }
 0x4a4   :  { %4228 = vst [vmem:[#allocation3 + $0xa90] sm:$0xff] %v3723_v5  ;;  %v1727_v9 = vld [vmem:[#allocation2 + $0x408] sm:$0xff] }
 0x4a5   :  { %1560 = vst.msk [vmem:[#allocation2 + $0x410] sm:$0xff] %vm1429_vm2, %v1391_v7  ;;  %6974 = vmatmul.msk.f32.gmra.mxu1 %vm1429_vm2, %v1727_v9  ;;  %7143 = vmatmul.msk.f32.gmra.mxu2 %vm1429_vm2, %v1727_v9  ;;  %v210_v7 = vld [vmem:[%s12514_s0 + $0x4c0] sm:$0xff] }
 0x4a6   :  { %4229 = vst [vmem:[#allocation3 + $0xa98] sm:$0xff] %v2684_v8  ;;  %7312 = vmatmul.msk.f32.gmra.mxu3 %vm1429_vm2, %v1727_v9 }
 0x4a8   :  { %v1150_v10 = vpop.f32.mrf.mxu0  ;;  %v3204_v11 = vpop.f32.mrf.mxu2 }
 0x4a9   :  { %v1151_v13 = vadd.f32 %v9444_v30, %v1150_v10  ;;  %v3205_v14 = vadd.f32 %v3204_v11, %v8242_v28  ;;  %v3725_v15 = vpop.f32.mrf.mxu3 }
 0x4aa   :  { %v3726_v16 = vadd.f32 %v3725_v15, %v8245_v29  ;;  %v2686_v17 = vpop.f32.mrf.mxu1 }
 0x4ab   :  { %v1392_v18 = vmax.f32 %v1151_v13, 0.0  ;;  %4230 = vst [vmem:[#allocation3 + $0xaa0] sm:$0xff] %v3205_v14  ;;  %v2687_v19 = vadd.f32 %v2686_v17, %v8231_v20  ;;  %6823 = vmatmul.msk.f32.gmra.mxu0 %vm235_vm0, %v205_v12 }
 0x4ac   :  { %4231 = vst [vmem:[#allocation3 + $0xaa8] sm:$0xff] %v3726_v16  ;;  %v1728_v21 = vld [vmem:[#allocation2 + $0x410] sm:$0xff] }
 0x4ad   :  { %1561 = vst.msk [vmem:[#allocation2 + $0x418] sm:$0xff] %vm1429_vm2, %v1392_v18  ;;  %6975 = vmatmul.msk.f32.gmra.mxu1 %vm1429_vm2, %v1728_v21  ;;  %7144 = vmatmul.msk.f32.gmra.mxu2 %vm1429_vm2, %v1728_v21  ;;  %v211_v18 = vld [vmem:[%s12514_s0 + $0x4c8] sm:$0xff] }
 0x4ae   :  { %4232 = vst [vmem:[#allocation3 + $0xab0] sm:$0xff] %v2687_v19  ;;  %7313 = vmatmul.msk.f32.gmra.mxu3 %vm1429_vm2, %v1728_v21 }
 0x4b0   :  { %v1153_v22 = vpop.f32.mrf.mxu0  ;;  %v3207_v23 = vpop.f32.mrf.mxu2 }
 0x4b1   :  { %v1154_v25 = vadd.f32 %v9444_v30, %v1153_v22  ;;  %v3208_v33 = vadd.f32 %v3207_v23, %v8242_v28  ;;  %v3728_v26 = vpop.f32.mrf.mxu3 }
 0x4b2   :  { %v3729_v27 = vadd.f32 %v3728_v26, %v8245_v29  ;;  %v2689_v36 = vpop.f32.mrf.mxu1 }
 0x4b3   :  { %v1393_v31 = vmax.f32 %v1154_v25, 0.0  ;;  %4233 = vst [vmem:[#allocation3 + $0xab8] sm:$0xff] %v3208_v33  ;;  %v2690_v32 = vadd.f32 %v2689_v36, %v8231_v20  ;;  %6824 = vmatmul.msk.f32.gmra.mxu0 %vm235_vm0, %v206_v24 }
 0x4b4   :  { %4234 = vst [vmem:[#allocation3 + $0xac0] sm:$0xff] %v3729_v27  ;;  %v1729_v39 = vld [vmem:[#allocation2 + $0x418] sm:$0xff] }
 0x4b5   :  { %1562 = vst.msk [vmem:[#allocation2 + $0x420] sm:$0xff] %vm1429_vm2, %v1393_v31  ;;  %6976 = vmatmul.msk.f32.gmra.mxu1 %vm1429_vm2, %v1729_v39  ;;  %7145 = vmatmul.msk.f32.gmra.mxu2 %vm1429_vm2, %v1729_v39  ;;  %v212_v31 = vld [vmem:[%s12514_s0 + $0x4d0] sm:$0xff] }
 0x4b6   :  { %4235 = vst [vmem:[#allocation3 + $0xac8] sm:$0xff] %v2690_v32  ;;  %7314 = vmatmul.msk.f32.gmra.mxu3 %vm1429_vm2, %v1729_v39 }
 0x4b8   :  { %v1156_v34 = vpop.f32.mrf.mxu0  ;;  %v3210_v35 = vpop.f32.mrf.mxu2 }
 0x4b9   :  { %v1157_v37 = vadd.f32 %v9444_v30, %v1156_v34  ;;  %v3211_v38 = vadd.f32 %v3210_v35, %v8242_v28  ;;  %v3731_v40 = vpop.f32.mrf.mxu3 }
 0x4ba   :  { %v3732_v41 = vadd.f32 %v3731_v40, %v8245_v29  ;;  %v2692_v42 = vpop.f32.mrf.mxu1 }
 0x4bb   :  { %v1394_v43 = vmax.f32 %v1157_v37, 0.0  ;;  %4236 = vst [vmem:[#allocation3 + $0xad0] sm:$0xff] %v3211_v38  ;;  %v2693_v44 = vadd.f32 %v2692_v42, %v8231_v20  ;;  %6825 = vmatmul.msk.f32.gmra.mxu0 %vm235_vm0, %v207_v61 }
 0x4bc   :  { %4237 = vst [vmem:[#allocation3 + $0xad8] sm:$0xff] %v3732_v41  ;;  %v1730_v45 = vld [vmem:[#allocation2 + $0x420] sm:$0xff] }
 0x4bd   :  { %1563 = vst.msk [vmem:[#allocation2 + $0x428] sm:$0xff] %vm1429_vm2, %v1394_v43  ;;  %6977 = vmatmul.msk.f32.gmra.mxu1 %vm1429_vm2, %v1730_v45  ;;  %7146 = vmatmul.msk.f32.gmra.mxu2 %vm1429_vm2, %v1730_v45  ;;  %v213_v43 = vld [vmem:[%s12514_s0 + $0x4d8] sm:$0xff] }
 0x4be   :  { %4238 = vst [vmem:[#allocation3 + $0xae0] sm:$0xff] %v2693_v44  ;;  %7315 = vmatmul.msk.f32.gmra.mxu3 %vm1429_vm2, %v1730_v45 }
 0x4c0   :  { %v1159_v46 = vpop.f32.mrf.mxu0  ;;  %v3213_v47 = vpop.f32.mrf.mxu2 }
 0x4c1   :  { %v1160_v49 = vadd.f32 %v9444_v30, %v1159_v46  ;;  %v3214_v50 = vadd.f32 %v3213_v47, %v8242_v28  ;;  %v3734_v51 = vpop.f32.mrf.mxu3 }
 0x4c2   :  { %v3735_v52 = vadd.f32 %v3734_v51, %v8245_v29  ;;  %v2695_v53 = vpop.f32.mrf.mxu1 }
 0x4c3   :  { %v1395_v54 = vmax.f32 %v1160_v49, 0.0  ;;  %4239 = vst [vmem:[#allocation3 + $0xae8] sm:$0xff] %v3214_v50  ;;  %v2696_v55 = vadd.f32 %v2695_v53, %v8231_v20  ;;  %6826 = vmatmul.msk.f32.gmra.mxu0 %vm235_vm0, %v208_v48 }
 0x4c4   :  { %4240 = vst [vmem:[#allocation3 + $0xaf0] sm:$0xff] %v3735_v52  ;;  %v1731_v56 = vld [vmem:[#allocation2 + $0x428] sm:$0xff] }
 0x4c5   :  { %1564 = vst.msk [vmem:[#allocation2 + $0x430] sm:$0xff] %vm1429_vm2, %v1395_v54  ;;  %6978 = vmatmul.msk.f32.gmra.mxu1 %vm1429_vm2, %v1731_v56  ;;  %7147 = vmatmul.msk.f32.gmra.mxu2 %vm1429_vm2, %v1731_v56  ;;  %v214_v54 = vld [vmem:[%s12514_s0 + $0x4e0] sm:$0xff] }
 0x4c6   :  { %4241 = vst [vmem:[#allocation3 + $0xaf8] sm:$0xff] %v2696_v55  ;;  %7316 = vmatmul.msk.f32.gmra.mxu3 %vm1429_vm2, %v1731_v56 }
 0x4c8   :  { %v1162_v57 = vpop.f32.mrf.mxu0  ;;  %v3216_v58 = vpop.f32.mrf.mxu2 }
 0x4c9   :  { %v1163_v60 = vadd.f32 %v9444_v30, %v1162_v57  ;;  %v3217_v62 = vadd.f32 %v3216_v58, %v8242_v28  ;;  %v3737_v63 = vpop.f32.mrf.mxu3 }
 0x4ca   :  { %v3738_v0 = vadd.f32 %v3737_v63, %v8245_v29  ;;  %v2698_v1 = vpop.f32.mrf.mxu1 }
 0x4cb   :  { %v1396_v2 = vmax.f32 %v1163_v60, 0.0  ;;  %4242 = vst [vmem:[#allocation3 + $0xb00] sm:$0xff] %v3217_v62  ;;  %v2699_v3 = vadd.f32 %v2698_v1, %v8231_v20  ;;  %6827 = vmatmul.msk.f32.gmra.mxu0 %vm235_vm0, %v209_v59 }
 0x4cc   :  { %4243 = vst [vmem:[#allocation3 + $0xb08] sm:$0xff] %v3738_v0  ;;  %v1732_v4 = vld [vmem:[#allocation2 + $0x430] sm:$0xff] }
 0x4cd   :  { %1565 = vst.msk [vmem:[#allocation2 + $0x438] sm:$0xff] %vm1429_vm2, %v1396_v2  ;;  %6979 = vmatmul.msk.f32.gmra.mxu1 %vm1429_vm2, %v1732_v4  ;;  %7148 = vmatmul.msk.f32.gmra.mxu2 %vm1429_vm2, %v1732_v4  ;;  %v215_v2 = vld [vmem:[%s12514_s0 + $0x4e8] sm:$0xff] }
 0x4ce   :  { %4244 = vst [vmem:[#allocation3 + $0xb10] sm:$0xff] %v2699_v3  ;;  %7317 = vmatmul.msk.f32.gmra.mxu3 %vm1429_vm2, %v1732_v4 }
 0x4d0   :  { %v1165_v5 = vpop.f32.mrf.mxu0  ;;  %v3219_v6 = vpop.f32.mrf.mxu2 }
 0x4d1   :  { %v1166_v8 = vadd.f32 %v9444_v30, %v1165_v5  ;;  %v3220_v9 = vadd.f32 %v3219_v6, %v8242_v28  ;;  %v3740_v10 = vpop.f32.mrf.mxu3 }
 0x4d2   :  { %v3741_v11 = vadd.f32 %v3740_v10, %v8245_v29  ;;  %v2701_v12 = vpop.f32.mrf.mxu1 }
 0x4d3   :  { %v1397_v13 = vmax.f32 %v1166_v8, 0.0  ;;  %4245 = vst [vmem:[#allocation3 + $0xb18] sm:$0xff] %v3220_v9  ;;  %v2702_v14 = vadd.f32 %v2701_v12, %v8231_v20  ;;  %6828 = vmatmul.msk.f32.gmra.mxu0 %vm235_vm0, %v210_v7 }
 0x4d4   :  { %4246 = vst [vmem:[#allocation3 + $0xb20] sm:$0xff] %v3741_v11  ;;  %v1733_v15 = vld [vmem:[#allocation2 + $0x438] sm:$0xff] }
 0x4d5   :  { %1566 = vst.msk [vmem:[#allocation2 + $0x440] sm:$0xff] %vm1429_vm2, %v1397_v13  ;;  %6980 = vmatmul.msk.f32.gmra.mxu1 %vm1429_vm2, %v1733_v15  ;;  %7149 = vmatmul.msk.f32.gmra.mxu2 %vm1429_vm2, %v1733_v15  ;;  %v216_v13 = vld [vmem:[%s12514_s0 + $0x4f0] sm:$0xff] }
 0x4d6   :  { %4247 = vst [vmem:[#allocation3 + $0xb28] sm:$0xff] %v2702_v14  ;;  %7318 = vmatmul.msk.f32.gmra.mxu3 %vm1429_vm2, %v1733_v15 }
 0x4d8   :  { %v1168_v16 = vpop.f32.mrf.mxu0  ;;  %v3222_v17 = vpop.f32.mrf.mxu2 }
 0x4d9   :  { %v1169_v19 = vadd.f32 %v9444_v30, %v1168_v16  ;;  %v3223_v21 = vadd.f32 %v3222_v17, %v8242_v28  ;;  %v3743_v22 = vpop.f32.mrf.mxu3 }
 0x4da   :  { %v3744_v23 = vadd.f32 %v3743_v22, %v8245_v29  ;;  %v2704_v24 = vpop.f32.mrf.mxu1 }
 0x4db   :  { %v1398_v25 = vmax.f32 %v1169_v19, 0.0  ;;  %4248 = vst [vmem:[#allocation3 + $0xb30] sm:$0xff] %v3223_v21  ;;  %v2705_v33 = vadd.f32 %v2704_v24, %v8231_v20  ;;  %6829 = vmatmul.msk.f32.gmra.mxu0 %vm235_vm0, %v211_v18  ;;  %v217_v24 = vld [vmem:[%s12514_s0 + $0x4f8] sm:$0xff] }
 0x4dc   :  { %4249 = vst [vmem:[#allocation3 + $0xb38] sm:$0xff] %v3744_v23  ;;  %v1734_v26 = vld [vmem:[#allocation2 + $0x440] sm:$0xff] }
 0x4dd   :  { %1567 = vst.msk [vmem:[#allocation2 + $0x448] sm:$0xff] %vm1429_vm2, %v1398_v25  ;;  %6981 = vmatmul.msk.f32.gmra.mxu1 %vm1429_vm2, %v1734_v26  ;;  %7150 = vmatmul.msk.f32.gmra.mxu2 %vm1429_vm2, %v1734_v26  ;;  %v9773_v25 = vld [vmem:[%s12513_s2] ss:$0 sm:$0xff] }
 0x4de   :  { %4250 = vst [vmem:[#allocation3 + $0xb40] sm:$0xff] %v2705_v33  ;;  %7319 = vmatmul.msk.f32.gmra.mxu3 %vm1429_vm2, %v1734_v26 }
 0x4e0   :  { %v1171_v27 = vpop.f32.mrf.mxu0  ;;  %v3225_v36 = vpop.f32.mrf.mxu2 }
 0x4e1   :  { %v1172_v32 = vadd.f32 %v9444_v30, %v1171_v27  ;;  %v3226_v39 = vadd.f32 %v3225_v36, %v8242_v28  ;;  %v3746_v34 = vpop.f32.mrf.mxu3 }
 0x4e2   :  { %v3747_v35 = vadd.f32 %v3746_v34, %v8245_v29  ;;  %v2707_v61 = vpop.f32.mrf.mxu1 }
 0x4e3   :  { %v1399_v37 = vmax.f32 %v1172_v32, 0.0  ;;  %4251 = vst [vmem:[#allocation3 + $0xb48] sm:$0xff] %v3226_v39  ;;  %v2708_v38 = vadd.f32 %v2707_v61, %v8231_v20  ;;  %6830 = vmatmul.msk.f32.gmra.mxu0 %vm235_vm0, %v212_v31 }
 0x4e4   :  { %4252 = vst [vmem:[#allocation3 + $0xb50] sm:$0xff] %v3747_v35  ;;  %v1735_v40 = vld [vmem:[#allocation2 + $0x448] sm:$0xff] }
 0x4e5   :  { %1568 = vst.msk [vmem:[#allocation2 + $0x450] sm:$0xff] %vm1429_vm2, %v1399_v37  ;;  %6982 = vmatmul.msk.f32.gmra.mxu1 %vm1429_vm2, %v1735_v40  ;;  %7151 = vmatmul.msk.f32.gmra.mxu2 %vm1429_vm2, %v1735_v40  ;;  %v218_v37 = vld [vmem:[%s12514_s0 + $0x500] sm:$0xff] }
 0x4e6   :  { %4253 = vst [vmem:[#allocation3 + $0xb58] sm:$0xff] %v2708_v38  ;;  %7320 = vmatmul.msk.f32.gmra.mxu3 %vm1429_vm2, %v1735_v40 }
 0x4e8   :  { %v1174_v41 = vpop.f32.mrf.mxu0  ;;  %v3228_v42 = vpop.f32.mrf.mxu2 }
 0x4e9   :  { %v1175_v44 = vadd.f32 %v9444_v30, %v1174_v41  ;;  %v3229_v45 = vadd.f32 %v3228_v42, %v8242_v28  ;;  %v3749_v46 = vpop.f32.mrf.mxu3 }
 0x4ea   :  { %v3750_v47 = vadd.f32 %v3749_v46, %v8245_v29  ;;  %v2710_v48 = vpop.f32.mrf.mxu1 }
 0x4eb   :  { %v1400_v49 = vmax.f32 %v1175_v44, 0.0  ;;  %4254 = vst [vmem:[#allocation3 + $0xb60] sm:$0xff] %v3229_v45  ;;  %v2711_v50 = vadd.f32 %v2710_v48, %v8231_v20  ;;  %6831 = vmatmul.msk.f32.gmra.mxu0 %vm235_vm0, %v213_v43 }
 0x4ec   :  { %4255 = vst [vmem:[#allocation3 + $0xb68] sm:$0xff] %v3750_v47  ;;  %v1736_v51 = vld [vmem:[#allocation2 + $0x450] sm:$0xff] }
 0x4ed   :  { %1569 = vst.msk [vmem:[#allocation2 + $0x458] sm:$0xff] %vm1429_vm2, %v1400_v49  ;;  %6983 = vmatmul.msk.f32.gmra.mxu1 %vm1429_vm2, %v1736_v51  ;;  %7152 = vmatmul.msk.f32.gmra.mxu2 %vm1429_vm2, %v1736_v51  ;;  %v219_v49 = vld [vmem:[%s12514_s0 + $0x508] sm:$0xff] }
 0x4ee   :  { %4256 = vst [vmem:[#allocation3 + $0xb70] sm:$0xff] %v2711_v50  ;;  %7321 = vmatmul.msk.f32.gmra.mxu3 %vm1429_vm2, %v1736_v51 }
 0x4f0   :  { %v1177_v52 = vpop.f32.mrf.mxu0  ;;  %v3231_v53 = vpop.f32.mrf.mxu2 }
 0x4f1   :  { %v1178_v55 = vadd.f32 %v9444_v30, %v1177_v52  ;;  %v3232_v56 = vadd.f32 %v3231_v53, %v8242_v28  ;;  %v3752_v57 = vpop.f32.mrf.mxu3 }
 0x4f2   :  { %v3753_v58 = vadd.f32 %v3752_v57, %v8245_v29  ;;  %v2713_v59 = vpop.f32.mrf.mxu1 }
 0x4f3   :  { %v1401_v60 = vmax.f32 %v1178_v55, 0.0  ;;  %4257 = vst [vmem:[#allocation3 + $0xb78] sm:$0xff] %v3232_v56  ;;  %v2714_v62 = vadd.f32 %v2713_v59, %v8231_v20  ;;  %6832 = vmatmul.msk.f32.gmra.mxu0 %vm235_vm0, %v214_v54 }
 0x4f4   :  { %4258 = vst [vmem:[#allocation3 + $0xb80] sm:$0xff] %v3753_v58  ;;  %v1737_v63 = vld [vmem:[#allocation2 + $0x458] sm:$0xff] }
 0x4f5   :  { %1570 = vst.msk [vmem:[#allocation2 + $0x460] sm:$0xff] %vm1429_vm2, %v1401_v60  ;;  %6984 = vmatmul.msk.f32.gmra.mxu1 %vm1429_vm2, %v1737_v63  ;;  %7153 = vmatmul.msk.f32.gmra.mxu2 %vm1429_vm2, %v1737_v63  ;;  %v220_v60 = vld [vmem:[%s12514_s0 + $0x510] sm:$0xff] }
 0x4f6   :  { %4259 = vst [vmem:[#allocation3 + $0xb88] sm:$0xff] %v2714_v62  ;;  %7322 = vmatmul.msk.f32.gmra.mxu3 %vm1429_vm2, %v1737_v63 }
 0x4f8   :  { %v1180_v0 = vpop.f32.mrf.mxu0  ;;  %v3234_v1 = vpop.f32.mrf.mxu2 }
 0x4f9   :  { %v1181_v3 = vadd.f32 %v9444_v30, %v1180_v0  ;;  %v3235_v4 = vadd.f32 %v3234_v1, %v8242_v28  ;;  %v3755_v5 = vpop.f32.mrf.mxu3 }
 0x4fa   :  { %v3756_v6 = vadd.f32 %v3755_v5, %v8245_v29  ;;  %v2716_v7 = vpop.f32.mrf.mxu1 }
 0x4fb   :  { %v1402_v8 = vmax.f32 %v1181_v3, 0.0  ;;  %4260 = vst [vmem:[#allocation3 + $0xb90] sm:$0xff] %v3235_v4  ;;  %v2717_v9 = vadd.f32 %v2716_v7, %v8231_v20  ;;  %6833 = vmatmul.msk.f32.gmra.mxu0 %vm235_vm0, %v215_v2 }
 0x4fc   :  { %4261 = vst [vmem:[#allocation3 + $0xb98] sm:$0xff] %v3756_v6  ;;  %v1738_v10 = vld [vmem:[#allocation2 + $0x460] sm:$0xff] }
 0x4fd   :  { %1571 = vst.msk [vmem:[#allocation2 + $0x468] sm:$0xff] %vm1429_vm2, %v1402_v8  ;;  %6985 = vmatmul.msk.f32.gmra.mxu1 %vm1429_vm2, %v1738_v10  ;;  %7154 = vmatmul.msk.f32.gmra.mxu2 %vm1429_vm2, %v1738_v10  ;;  %v221_v8 = vld [vmem:[%s12514_s0 + $0x518] sm:$0xff] }
 0x4fe   :  { %4262 = vst [vmem:[#allocation3 + $0xba0] sm:$0xff] %v2717_v9  ;;  %7323 = vmatmul.msk.f32.gmra.mxu3 %vm1429_vm2, %v1738_v10 }
 0x500   :  { %v1183_v11 = vpop.f32.mrf.mxu0  ;;  %v3237_v12 = vpop.f32.mrf.mxu2 }
 0x501   :  { %v1184_v14 = vadd.f32 %v9444_v30, %v1183_v11  ;;  %v3238_v15 = vadd.f32 %v3237_v12, %v8242_v28  ;;  %v3758_v16 = vpop.f32.mrf.mxu3 }
 0x502   :  { %v3759_v17 = vadd.f32 %v3758_v16, %v8245_v29  ;;  %v2719_v18 = vpop.f32.mrf.mxu1 }
 0x503   :  { %v1403_v19 = vmax.f32 %v1184_v14, 0.0  ;;  %4263 = vst [vmem:[#allocation3 + $0xba8] sm:$0xff] %v3238_v15  ;;  %v2720_v21 = vadd.f32 %v2719_v18, %v8231_v20  ;;  %6834 = vmatmul.msk.f32.gmra.mxu0 %vm235_vm0, %v216_v13 }
 0x504   :  { %4264 = vst [vmem:[#allocation3 + $0xbb0] sm:$0xff] %v3759_v17  ;;  %v1739_v22 = vld [vmem:[#allocation2 + $0x468] sm:$0xff] }
 0x505   :  { %1572 = vst.msk [vmem:[#allocation2 + $0x470] sm:$0xff] %vm1429_vm2, %v1403_v19  ;;  %6986 = vmatmul.msk.f32.gmra.mxu1 %vm1429_vm2, %v1739_v22  ;;  %7155 = vmatmul.msk.f32.gmra.mxu2 %vm1429_vm2, %v1739_v22  ;;  %v222_v19 = vld [vmem:[%s12514_s0 + $0x520] sm:$0xff] }
 0x506   :  { %4265 = vst [vmem:[#allocation3 + $0xbb8] sm:$0xff] %v2720_v21  ;;  %7324 = vmatmul.msk.f32.gmra.mxu3 %vm1429_vm2, %v1739_v22 }
 0x508   :  { %v1186_v30 = vpop.f32.mrf.mxu0  ;;  %v3240_v23 = vpop.f32.mrf.mxu2 }
 0x509   :  { %v1187_v33 = vadd.f32 %v9773_v25, %v1186_v30  ;;  %v3241_v26 = vadd.f32 %v3240_v23, %v8242_v28  ;;  %v3761_v27 = vpop.f32.mrf.mxu3 }
 0x50a   :  { %v3762_v36 = vadd.f32 %v3761_v27, %v8245_v29  ;;  %v2722_v31 = vpop.f32.mrf.mxu1 }
 0x50b   :  { %v1404_v32 = vmax.f32 %v1187_v33, 0.0  ;;  %4266 = vst [vmem:[#allocation3 + $0xbc0] sm:$0xff] %v3241_v26  ;;  %v2723_v39 = vadd.f32 %v2722_v31, %v8231_v20  ;;  %6835 = vmatmul.msk.f32.gmra.mxu0 %vm235_vm0, %v217_v24 }
 0x50c   :  { %4267 = vst [vmem:[#allocation3 + $0xbc8] sm:$0xff] %v3762_v36  ;;  %v1740_v34 = vld [vmem:[#allocation2 + $0x470] sm:$0xff] }
 0x50d   :  { %1573 = vst.msk [vmem:[#allocation2 + $0x478] sm:$0xff] %vm1429_vm2, %v1404_v32  ;;  %6987 = vmatmul.msk.f32.gmra.mxu1 %vm1429_vm2, %v1740_v34  ;;  %7156 = vmatmul.msk.f32.gmra.mxu2 %vm1429_vm2, %v1740_v34  ;;  %v223_v32 = vld [vmem:[%s12514_s0 + $0x528] sm:$0xff] }
 0x50e   :  { %4268 = vst [vmem:[#allocation3 + $0xbd0] sm:$0xff] %v2723_v39  ;;  %7325 = vmatmul.msk.f32.gmra.mxu3 %vm1429_vm2, %v1740_v34 }
 0x510   :  { %v1189_v35 = vpop.f32.mrf.mxu0  ;;  %v3243_v61 = vpop.f32.mrf.mxu2 }
 0x511   :  { %v1190_v38 = vadd.f32 %v9773_v25, %v1189_v35  ;;  %v3244_v40 = vadd.f32 %v3243_v61, %v8242_v28  ;;  %v3764_v41 = vpop.f32.mrf.mxu3 }
 0x512   :  { %v3765_v42 = vadd.f32 %v3764_v41, %v8245_v29  ;;  %v2725_v43 = vpop.f32.mrf.mxu1 }
 0x513   :  { %v1405_v44 = vmax.f32 %v1190_v38, 0.0  ;;  %4269 = vst [vmem:[#allocation3 + $0xbd8] sm:$0xff] %v3244_v40  ;;  %v2726_v45 = vadd.f32 %v2725_v43, %v8231_v20  ;;  %6836 = vmatmul.msk.f32.gmra.mxu0 %vm235_vm0, %v218_v37 }
 0x514   :  { %4270 = vst [vmem:[#allocation3 + $0xbe0] sm:$0xff] %v3765_v42  ;;  %v1741_v46 = vld [vmem:[#allocation2 + $0x478] sm:$0xff] }
 0x515   :  { %1574 = vst.msk [vmem:[#allocation2 + $0x480] sm:$0xff] %vm1429_vm2, %v1405_v44  ;;  %6988 = vmatmul.msk.f32.gmra.mxu1 %vm1429_vm2, %v1741_v46  ;;  %7157 = vmatmul.msk.f32.gmra.mxu2 %vm1429_vm2, %v1741_v46  ;;  %v224_v44 = vld [vmem:[%s12514_s0 + $0x530] sm:$0xff] }
 0x516   :  { %4271 = vst [vmem:[#allocation3 + $0xbe8] sm:$0xff] %v2726_v45  ;;  %7326 = vmatmul.msk.f32.gmra.mxu3 %vm1429_vm2, %v1741_v46 }
 0x518   :  { %v1192_v47 = vpop.f32.mrf.mxu0  ;;  %v3246_v48 = vpop.f32.mrf.mxu2 }
 0x519   :  { %v1193_v50 = vadd.f32 %v9773_v25, %v1192_v47  ;;  %v3247_v51 = vadd.f32 %v3246_v48, %v8242_v28  ;;  %v3767_v52 = vpop.f32.mrf.mxu3 }
 0x51a   :  { %v3768_v53 = vadd.f32 %v3767_v52, %v8245_v29  ;;  %v2728_v54 = vpop.f32.mrf.mxu1 }
 0x51b   :  { %v1406_v55 = vmax.f32 %v1193_v50, 0.0  ;;  %4272 = vst [vmem:[#allocation3 + $0xbf0] sm:$0xff] %v3247_v51  ;;  %v2729_v56 = vadd.f32 %v2728_v54, %v8231_v20  ;;  %6837 = vmatmul.msk.f32.gmra.mxu0 %vm235_vm0, %v219_v49 }
 0x51c   :  { %4273 = vst [vmem:[#allocation3 + $0xbf8] sm:$0xff] %v3768_v53  ;;  %v1742_v57 = vld [vmem:[#allocation2 + $0x480] sm:$0xff] }
 0x51d   :  { %1575 = vst.msk [vmem:[#allocation2 + $0x488] sm:$0xff] %vm1429_vm2, %v1406_v55  ;;  %6989 = vmatmul.msk.f32.gmra.mxu1 %vm1429_vm2, %v1742_v57  ;;  %7158 = vmatmul.msk.f32.gmra.mxu2 %vm1429_vm2, %v1742_v57  ;;  %v225_v55 = vld [vmem:[%s12514_s0 + $0x538] sm:$0xff] }
 0x51e   :  { %4274 = vst [vmem:[#allocation3 + $0xc00] sm:$0xff] %v2729_v56  ;;  %7327 = vmatmul.msk.f32.gmra.mxu3 %vm1429_vm2, %v1742_v57 }
 0x520   :  { %v1195_v58 = vpop.f32.mrf.mxu0  ;;  %v3249_v59 = vpop.f32.mrf.mxu2 }
 0x521   :  { %v1196_v62 = vadd.f32 %v9773_v25, %v1195_v58  ;;  %v3250_v63 = vadd.f32 %v3249_v59, %v8242_v28  ;;  %v3770_v0 = vpop.f32.mrf.mxu3 }
 0x522   :  { %v3771_v1 = vadd.f32 %v3770_v0, %v8245_v29  ;;  %v2731_v2 = vpop.f32.mrf.mxu1 }
 0x523   :  { %v1407_v3 = vmax.f32 %v1196_v62, 0.0  ;;  %4275 = vst [vmem:[#allocation3 + $0xc08] sm:$0xff] %v3250_v63  ;;  %v2732_v4 = vadd.f32 %v2731_v2, %v8231_v20  ;;  %6838 = vmatmul.msk.f32.gmra.mxu0 %vm235_vm0, %v220_v60 }
 0x524   :  { %4276 = vst [vmem:[#allocation3 + $0xc10] sm:$0xff] %v3771_v1  ;;  %v1743_v5 = vld [vmem:[#allocation2 + $0x488] sm:$0xff] }
 0x525   :  { %1576 = vst.msk [vmem:[#allocation2 + $0x490] sm:$0xff] %vm1429_vm2, %v1407_v3  ;;  %6990 = vmatmul.msk.f32.gmra.mxu1 %vm1429_vm2, %v1743_v5  ;;  %7159 = vmatmul.msk.f32.gmra.mxu2 %vm1429_vm2, %v1743_v5 }
 0x526   :  { %4277 = vst [vmem:[#allocation3 + $0xc18] sm:$0xff] %v2732_v4  ;;  %7328 = vmatmul.msk.f32.gmra.mxu3 %vm1429_vm2, %v1743_v5 }
 0x528   :  { %v1198_v6 = vpop.f32.mrf.mxu0  ;;  %v3252_v7 = vpop.f32.mrf.mxu2 }
 0x529   :  { %v1199_v9 = vadd.f32 %v9773_v25, %v1198_v6  ;;  %v3253_v10 = vadd.f32 %v3252_v7, %v8242_v28  ;;  %v3773_v11 = vpop.f32.mrf.mxu3 }
 0x52a   :  { %v3774_v12 = vadd.f32 %v3773_v11, %v8245_v29  ;;  %v2734_v13 = vpop.f32.mrf.mxu1 }
 0x52b   :  { %v1408_v14 = vmax.f32 %v1199_v9, 0.0  ;;  %4278 = vst [vmem:[#allocation3 + $0xc20] sm:$0xff] %v3253_v10  ;;  %v2735_v15 = vadd.f32 %v2734_v13, %v8231_v20  ;;  %6839 = vmatmul.msk.f32.gmra.mxu0 %vm235_vm0, %v221_v8 }
 0x52c   :  { %4279 = vst [vmem:[#allocation3 + $0xc28] sm:$0xff] %v3774_v12  ;;  %v1744_v16 = vld [vmem:[#allocation2 + $0x490] sm:$0xff] }
 0x52d   :  { %1577 = vst.msk [vmem:[#allocation2 + $0x498] sm:$0xff] %vm1429_vm2, %v1408_v14  ;;  %6991 = vmatmul.msk.f32.gmra.mxu1 %vm1429_vm2, %v1744_v16  ;;  %7160 = vmatmul.msk.f32.gmra.mxu2 %vm1429_vm2, %v1744_v16 }
 0x52e   :  { %4280 = vst [vmem:[#allocation3 + $0xc30] sm:$0xff] %v2735_v15  ;;  %7329 = vmatmul.msk.f32.gmra.mxu3 %vm1429_vm2, %v1744_v16 }
 0x530   :  { %v1201_v17 = vpop.f32.mrf.mxu0  ;;  %v3255_v18 = vpop.f32.mrf.mxu2 }
 0x531   :  { %v1202_v21 = vadd.f32 %v9773_v25, %v1201_v17  ;;  %v3256_v22 = vadd.f32 %v3255_v18, %v8242_v28  ;;  %v3776_v30 = vpop.f32.mrf.mxu3 }
 0x532   :  { %v3777_v23 = vadd.f32 %v3776_v30, %v8245_v29  ;;  %v2737_v24 = vpop.f32.mrf.mxu1 }
 0x533   :  { %v1409_v33 = vmax.f32 %v1202_v21, 0.0  ;;  %4281 = vst [vmem:[#allocation3 + $0xc38] sm:$0xff] %v3256_v22  ;;  %v2738_v26 = vadd.f32 %v2737_v24, %v8231_v20  ;;  %6840 = vmatmul.msk.f32.gmra.mxu0 %vm235_vm0, %v222_v19 }
 0x534   :  { %4282 = vst [vmem:[#allocation3 + $0xc40] sm:$0xff] %v3777_v23  ;;  %v1745_v27 = vld [vmem:[#allocation2 + $0x498] sm:$0xff] }
 0x535   :  { %1578 = vst.msk [vmem:[#allocation2 + $0x4a0] sm:$0xff] %vm1429_vm2, %v1409_v33  ;;  %6992 = vmatmul.msk.f32.gmra.mxu1 %vm1429_vm2, %v1745_v27  ;;  %7161 = vmatmul.msk.f32.gmra.mxu2 %vm1429_vm2, %v1745_v27 }
 0x536   :  { %4283 = vst [vmem:[#allocation3 + $0xc48] sm:$0xff] %v2738_v26  ;;  %7330 = vmatmul.msk.f32.gmra.mxu3 %vm1429_vm2, %v1745_v27 }
 0x538   :  { %v1204_v36 = vpop.f32.mrf.mxu0  ;;  %v3258_v31 = vpop.f32.mrf.mxu2 }
 0x539   :  { %v1205_v39 = vadd.f32 %v9773_v25, %v1204_v36  ;;  %v3259_v34 = vadd.f32 %v3258_v31, %v8242_v28  ;;  %v3779_v35 = vpop.f32.mrf.mxu3 }
 0x53a   :  { %v3780_v61 = vadd.f32 %v3779_v35, %v8245_v29  ;;  %v2740_v37 = vpop.f32.mrf.mxu1 }
 0x53b   :  { %v1410_v38 = vmax.f32 %v1205_v39, 0.0  ;;  %4284 = vst [vmem:[#allocation3 + $0xc50] sm:$0xff] %v3259_v34  ;;  %v2741_v40 = vadd.f32 %v2740_v37, %v8231_v20  ;;  %6841 = vmatmul.msk.f32.gmra.mxu0 %vm235_vm0, %v223_v32 }
 0x53c   :  { %4285 = vst [vmem:[#allocation3 + $0xc58] sm:$0xff] %v3780_v61  ;;  %v1746_v41 = vld [vmem:[#allocation2 + $0x4a0] sm:$0xff] }
 0x53d   :  { %1579 = vst.msk [vmem:[#allocation2 + $0x4a8] sm:$0xff] %vm1429_vm2, %v1410_v38  ;;  %6993 = vmatmul.msk.f32.gmra.mxu1 %vm1429_vm2, %v1746_v41  ;;  %7162 = vmatmul.msk.f32.gmra.mxu2 %vm1429_vm2, %v1746_v41 }
 0x53e   :  { %4286 = vst [vmem:[#allocation3 + $0xc60] sm:$0xff] %v2741_v40  ;;  %7331 = vmatmul.msk.f32.gmra.mxu3 %vm1429_vm2, %v1746_v41 }
 0x540   :  { %v1207_v42 = vpop.f32.mrf.mxu0  ;;  %v3261_v43 = vpop.f32.mrf.mxu2 }
 0x541   :  { %v1208_v45 = vadd.f32 %v9773_v25, %v1207_v42  ;;  %v3262_v46 = vadd.f32 %v3261_v43, %v8242_v28  ;;  %v3782_v47 = vpop.f32.mrf.mxu3 }
 0x542   :  { %v3783_v48 = vadd.f32 %v3782_v47, %v8245_v29  ;;  %v2743_v49 = vpop.f32.mrf.mxu1 }
 0x543   :  { %v1411_v50 = vmax.f32 %v1208_v45, 0.0  ;;  %4287 = vst [vmem:[#allocation3 + $0xc68] sm:$0xff] %v3262_v46  ;;  %v2744_v51 = vadd.f32 %v2743_v49, %v8231_v20  ;;  %6842 = vmatmul.msk.f32.gmra.mxu0 %vm235_vm0, %v224_v44 }
 0x544   :  { %4288 = vst [vmem:[#allocation3 + $0xc70] sm:$0xff] %v3783_v48  ;;  %v1747_v52 = vld [vmem:[#allocation2 + $0x4a8] sm:$0xff] }
 0x545   :  { %1580 = vst.msk [vmem:[#allocation2 + $0x4b0] sm:$0xff] %vm1429_vm2, %v1411_v50  ;;  %6994 = vmatmul.msk.f32.gmra.mxu1 %vm1429_vm2, %v1747_v52  ;;  %7163 = vmatmul.msk.f32.gmra.mxu2 %vm1429_vm2, %v1747_v52 }
 0x546   :  { %4289 = vst [vmem:[#allocation3 + $0xc78] sm:$0xff] %v2744_v51  ;;  %7332 = vmatmul.msk.f32.gmra.mxu3 %vm1429_vm2, %v1747_v52 }
 0x548   :  { %v1210_v53 = vpop.f32.mrf.mxu0  ;;  %v3264_v54 = vpop.f32.mrf.mxu2 }
 0x549   :  { %v1211_v56 = vadd.f32 %v9773_v25, %v1210_v53  ;;  %v3265_v57 = vadd.f32 %v3264_v54, %v8242_v28  ;;  %v3785_v58 = vpop.f32.mrf.mxu3 }
 0x54a   :  { %v3786_v59 = vadd.f32 %v3785_v58, %v8245_v29  ;;  %v2746_v60 = vpop.f32.mrf.mxu1 }
 0x54b   :  { %v1412_v62 = vmax.f32 %v1211_v56, 0.0  ;;  %4290 = vst [vmem:[#allocation3 + $0xc80] sm:$0xff] %v3265_v57  ;;  %v2747_v63 = vadd.f32 %v2746_v60, %v8231_v20  ;;  %6843 = vmatmul.msk.f32.gmra.mxu0 %vm235_vm0, %v225_v55 }
 0x54c   :  { %4291 = vst [vmem:[#allocation3 + $0xc88] sm:$0xff] %v3786_v59  ;;  %v1748_v0 = vld [vmem:[#allocation2 + $0x4b0] sm:$0xff] }
 0x54d   :  { %1581 = vst.msk [vmem:[#allocation2 + $0x4b8] sm:$0xff] %vm1429_vm2, %v1412_v62  ;;  %6995 = vmatmul.msk.f32.gmra.mxu1 %vm1429_vm2, %v1748_v0  ;;  %7164 = vmatmul.msk.f32.gmra.mxu2 %vm1429_vm2, %v1748_v0 }
 0x54e   :  { %4292 = vst [vmem:[#allocation3 + $0xc90] sm:$0xff] %v2747_v63  ;;  %7333 = vmatmul.msk.f32.gmra.mxu3 %vm1429_vm2, %v1748_v0 }
 0x550   :  { %v1213_v1 = vpop.f32.mrf.mxu0  ;;  %v3267_v2 = vpop.f32.mrf.mxu2 }
 0x551   :  { %v1214_v3 = vadd.f32 %v9773_v25, %v1213_v1  ;;  %v3268_v4 = vadd.f32 %v3267_v2, %v8242_v28  ;;  %v3788_v5 = vpop.f32.mrf.mxu3 }
 0x552   :  { %v3789_v6 = vadd.f32 %v3788_v5, %v8245_v29  ;;  %v2749_v7 = vpop.f32.mrf.mxu1 }
 0x553   :  { %v1413_v8 = vmax.f32 %v1214_v3, 0.0  ;;  %4293 = vst [vmem:[#allocation3 + $0xc98] sm:$0xff] %v3268_v4  ;;  %v2750_v9 = vadd.f32 %v2749_v7, %v8231_v20 }
 0x554   :  { %4294 = vst [vmem:[#allocation3 + $0xca0] sm:$0xff] %v3789_v6  ;;  %v1749_v10 = vld [vmem:[#allocation2 + $0x4b8] sm:$0xff] }
 0x555   :  { %1582 = vst.msk [vmem:[#allocation2 + $0x4c0] sm:$0xff] %vm1429_vm2, %v1413_v8  ;;  %6996 = vmatmul.msk.f32.gmra.mxu1 %vm1429_vm2, %v1749_v10  ;;  %7165 = vmatmul.msk.f32.gmra.mxu2 %vm1429_vm2, %v1749_v10 }
 0x556   :  { %4295 = vst [vmem:[#allocation3 + $0xca8] sm:$0xff] %v2750_v9  ;;  %7334 = vmatmul.msk.f32.gmra.mxu3 %vm1429_vm2, %v1749_v10 }
 0x558   :  { %v1216_v11 = vpop.f32.mrf.mxu0  ;;  %v3270_v12 = vpop.f32.mrf.mxu2 }
 0x559   :  { %v1217_v13 = vadd.f32 %v9773_v25, %v1216_v11  ;;  %v3271_v14 = vadd.f32 %v3270_v12, %v8242_v28  ;;  %v3791_v15 = vpop.f32.mrf.mxu3 }
 0x55a   :  { %v3792_v16 = vadd.f32 %v3791_v15, %v8245_v29  ;;  %v2752_v17 = vpop.f32.mrf.mxu1 }
 0x55b   :  { %v1414_v18 = vmax.f32 %v1217_v13, 0.0  ;;  %4296 = vst [vmem:[#allocation3 + $0xcb0] sm:$0xff] %v3271_v14  ;;  %v2753_v19 = vadd.f32 %v2752_v17, %v8231_v20 }
 0x55c   :  { %4297 = vst [vmem:[#allocation3 + $0xcb8] sm:$0xff] %v3792_v16  ;;  %v1750_v21 = vld [vmem:[#allocation2 + $0x4c0] sm:$0xff] }
 0x55d   :  { %1583 = vst.msk [vmem:[#allocation2 + $0x4c8] sm:$0xff] %vm1429_vm2, %v1414_v18  ;;  %6997 = vmatmul.msk.f32.gmra.mxu1 %vm1429_vm2, %v1750_v21  ;;  %7166 = vmatmul.msk.f32.gmra.mxu2 %vm1429_vm2, %v1750_v21 }
 0x55e   :  { %4298 = vst [vmem:[#allocation3 + $0xcc0] sm:$0xff] %v2753_v19  ;;  %7335 = vmatmul.msk.f32.gmra.mxu3 %vm1429_vm2, %v1750_v21 }
 0x560   :  { %v1219_v22 = vpop.f32.mrf.mxu0  ;;  %v3273_v30 = vpop.f32.mrf.mxu2 }
 0x561   :  { %v1220_v23 = vadd.f32 %v9773_v25, %v1219_v22  ;;  %v3274_v24 = vadd.f32 %v3273_v30, %v8242_v28  ;;  %v3794_v33 = vpop.f32.mrf.mxu3 }
 0x562   :  { %v3795_v26 = vadd.f32 %v3794_v33, %v8245_v29  ;;  %v2755_v27 = vpop.f32.mrf.mxu1 }
 0x563   :  { %v1415_v36 = vmax.f32 %v1220_v23, 0.0  ;;  %4299 = vst [vmem:[#allocation3 + $0xcc8] sm:$0xff] %v3274_v24  ;;  %v2756_v31 = vadd.f32 %v2755_v27, %v8231_v20 }
 0x564   :  { %4300 = vst [vmem:[#allocation3 + $0xcd0] sm:$0xff] %v3795_v26  ;;  %v1751_v32 = vld [vmem:[#allocation2 + $0x4c8] sm:$0xff] }
 0x565   :  { %1584 = vst.msk [vmem:[#allocation2 + $0x4d0] sm:$0xff] %vm1429_vm2, %v1415_v36  ;;  %6998 = vmatmul.msk.f32.gmra.mxu1 %vm1429_vm2, %v1751_v32  ;;  %7167 = vmatmul.msk.f32.gmra.mxu2 %vm1429_vm2, %v1751_v32 }
 0x566   :  { %4301 = vst [vmem:[#allocation3 + $0xcd8] sm:$0xff] %v2756_v31  ;;  %7336 = vmatmul.msk.f32.gmra.mxu3 %vm1429_vm2, %v1751_v32 }
 0x568   :  { %v1222_v39 = vpop.f32.mrf.mxu0  ;;  %v3276_v34 = vpop.f32.mrf.mxu2 }
 0x569   :  { %v1223_v35 = vadd.f32 %v9773_v25, %v1222_v39  ;;  %v3277_v61 = vadd.f32 %v3276_v34, %v8242_v28  ;;  %v3797_v37 = vpop.f32.mrf.mxu3 }
 0x56a   :  { %v3798_v38 = vadd.f32 %v3797_v37, %v8245_v29  ;;  %v2758_v40 = vpop.f32.mrf.mxu1 }
 0x56b   :  { %v1416_v41 = vmax.f32 %v1223_v35, 0.0  ;;  %4302 = vst [vmem:[#allocation3 + $0xce0] sm:$0xff] %v3277_v61  ;;  %v2759_v42 = vadd.f32 %v2758_v40, %v8231_v20 }
 0x56c   :  { %4303 = vst [vmem:[#allocation3 + $0xce8] sm:$0xff] %v3798_v38  ;;  %v1752_v43 = vld [vmem:[#allocation2 + $0x4d0] sm:$0xff] }
 0x56d   :  { %1585 = vst.msk [vmem:[#allocation2 + $0x4d8] sm:$0xff] %vm1429_vm2, %v1416_v41  ;;  %6999 = vmatmul.msk.f32.gmra.mxu1 %vm1429_vm2, %v1752_v43  ;;  %7168 = vmatmul.msk.f32.gmra.mxu2 %vm1429_vm2, %v1752_v43 }
 0x56e   :  { %4304 = vst [vmem:[#allocation3 + $0xcf0] sm:$0xff] %v2759_v42  ;;  %7337 = vmatmul.msk.f32.gmra.mxu3 %vm1429_vm2, %v1752_v43 }
 0x570   :  { %v1225_v44 = vpop.f32.mrf.mxu0  ;;  %v3279_v45 = vpop.f32.mrf.mxu2 }
 0x571   :  { %v1226_v46 = vadd.f32 %v9773_v25, %v1225_v44  ;;  %v3280_v47 = vadd.f32 %v3279_v45, %v8242_v28  ;;  %v3800_v48 = vpop.f32.mrf.mxu3 }
 0x572   :  { %v3801_v49 = vadd.f32 %v3800_v48, %v8245_v29  ;;  %v2761_v50 = vpop.f32.mrf.mxu1 }
 0x573   :  { %v1417_v51 = vmax.f32 %v1226_v46, 0.0  ;;  %4305 = vst [vmem:[#allocation3 + $0xcf8] sm:$0xff] %v3280_v47  ;;  %v2762_v52 = vadd.f32 %v2761_v50, %v8231_v20 }
 0x574   :  { %4306 = vst [vmem:[#allocation3 + $0xd00] sm:$0xff] %v3801_v49  ;;  %v1753_v53 = vld [vmem:[#allocation2 + $0x4d8] sm:$0xff] }
 0x575   :  { %1586 = vst.msk [vmem:[#allocation2 + $0x4e0] sm:$0xff] %vm1429_vm2, %v1417_v51  ;;  %7000 = vmatmul.msk.f32.gmra.mxu1 %vm1429_vm2, %v1753_v53  ;;  %7169 = vmatmul.msk.f32.gmra.mxu2 %vm1429_vm2, %v1753_v53 }
 0x576   :  { %4307 = vst [vmem:[#allocation3 + $0xd08] sm:$0xff] %v2762_v52  ;;  %7338 = vmatmul.msk.f32.gmra.mxu3 %vm1429_vm2, %v1753_v53 }
 0x578   :  { %v1228_v54 = vpop.f32.mrf.mxu0  ;;  %v3282_v55 = vpop.f32.mrf.mxu2 }
 0x579   :  { %v1229_v56 = vadd.f32 %v9773_v25, %v1228_v54  ;;  %v3283_v57 = vadd.f32 %v3282_v55, %v8242_v28  ;;  %v3803_v58 = vpop.f32.mrf.mxu3 }
 0x57a   :  { %v3804_v59 = vadd.f32 %v3803_v58, %v8245_v29  ;;  %v2764_v60 = vpop.f32.mrf.mxu1 }
 0x57b   :  { %v1418_v62 = vmax.f32 %v1229_v56, 0.0  ;;  %4308 = vst [vmem:[#allocation3 + $0xd10] sm:$0xff] %v3283_v57  ;;  %v2765_v63 = vadd.f32 %v2764_v60, %v8231_v20 }
 0x57c   :  { %4309 = vst [vmem:[#allocation3 + $0xd18] sm:$0xff] %v3804_v59  ;;  %v1754_v0 = vld [vmem:[#allocation2 + $0x4e0] sm:$0xff] }
 0x57d   :  { %1587 = vst.msk [vmem:[#allocation2 + $0x4e8] sm:$0xff] %vm1429_vm2, %v1418_v62  ;;  %7001 = vmatmul.msk.f32.gmra.mxu1 %vm1429_vm2, %v1754_v0  ;;  %7170 = vmatmul.msk.f32.gmra.mxu2 %vm1429_vm2, %v1754_v0 }
 0x57e   :  { %4310 = vst [vmem:[#allocation3 + $0xd20] sm:$0xff] %v2765_v63  ;;  %7339 = vmatmul.msk.f32.gmra.mxu3 %vm1429_vm2, %v1754_v0 }
 0x580   :  { %v1231_v1 = vpop.f32.mrf.mxu0  ;;  %v3285_v2 = vpop.f32.mrf.mxu2 }
 0x581   :  { %v1232_v3 = vadd.f32 %v9773_v25, %v1231_v1  ;;  %v3286_v4 = vadd.f32 %v3285_v2, %v8242_v28  ;;  %v3806_v5 = vpop.f32.mrf.mxu3 }
 0x582   :  { %v3807_v6 = vadd.f32 %v3806_v5, %v8245_v29  ;;  %v2767_v7 = vpop.f32.mrf.mxu1 }
 0x583   :  { %v1419_v8 = vmax.f32 %v1232_v3, 0.0  ;;  %4311 = vst [vmem:[#allocation3 + $0xd28] sm:$0xff] %v3286_v4  ;;  %v2768_v9 = vadd.f32 %v2767_v7, %v8231_v20 }
 0x584   :  { %4312 = vst [vmem:[#allocation3 + $0xd30] sm:$0xff] %v3807_v6  ;;  %v1755_v10 = vld [vmem:[#allocation2 + $0x4e8] sm:$0xff] }
 0x585   :  { %1588 = vst.msk [vmem:[#allocation2 + $0x4f0] sm:$0xff] %vm1429_vm2, %v1419_v8  ;;  %7002 = vmatmul.msk.f32.gmra.mxu1 %vm1429_vm2, %v1755_v10  ;;  %7171 = vmatmul.msk.f32.gmra.mxu2 %vm1429_vm2, %v1755_v10 }
 0x586   :  { %4313 = vst [vmem:[#allocation3 + $0xd38] sm:$0xff] %v2768_v9  ;;  %7340 = vmatmul.msk.f32.gmra.mxu3 %vm1429_vm2, %v1755_v10 }
 0x588   :  { %v1234_v11 = vpop.f32.mrf.mxu0  ;;  %v3288_v12 = vpop.f32.mrf.mxu2 }
 0x589   :  { %v1235_v13 = vadd.f32 %v9773_v25, %v1234_v11  ;;  %v3289_v14 = vadd.f32 %v3288_v12, %v8242_v28  ;;  %v3809_v15 = vpop.f32.mrf.mxu3 }
 0x58a   :  { %v3810_v16 = vadd.f32 %v3809_v15, %v8245_v29  ;;  %v2770_v17 = vpop.f32.mrf.mxu1 }
 0x58b   :  { %v1420_v18 = vmax.f32 %v1235_v13, 0.0  ;;  %4314 = vst [vmem:[#allocation3 + $0xd40] sm:$0xff] %v3289_v14  ;;  %v2771_v19 = vadd.f32 %v2770_v17, %v8231_v20 }
 0x58c   :  { %4315 = vst [vmem:[#allocation3 + $0xd48] sm:$0xff] %v3810_v16  ;;  %v1756_v21 = vld [vmem:[#allocation2 + $0x4f0] sm:$0xff] }
 0x58d   :  { %1589 = vst.msk [vmem:[#allocation2 + $0x4f8] sm:$0xff] %vm1429_vm2, %v1420_v18  ;;  %7003 = vmatmul.msk.f32.gmra.mxu1 %vm1429_vm2, %v1756_v21  ;;  %7172 = vmatmul.msk.f32.gmra.mxu2 %vm1429_vm2, %v1756_v21 }
 0x58e   :  { %4316 = vst [vmem:[#allocation3 + $0xd50] sm:$0xff] %v2771_v19  ;;  %7341 = vmatmul.msk.f32.gmra.mxu3 %vm1429_vm2, %v1756_v21 }
 0x590   :  { %v1237_v22 = vpop.f32.mrf.mxu0  ;;  %v3291_v30 = vpop.f32.mrf.mxu2 }
 0x591   :  { %v1238_v23 = vadd.f32 %v9773_v25, %v1237_v22  ;;  %v3292_v24 = vadd.f32 %v3291_v30, %v8242_v28  ;;  %v3812_v33 = vpop.f32.mrf.mxu3 }
 0x592   :  { %v3813_v26 = vadd.f32 %v3812_v33, %v8245_v29  ;;  %v2773_v27 = vpop.f32.mrf.mxu1 }
 0x593   :  { %v1421_v36 = vmax.f32 %v1238_v23, 0.0  ;;  %4317 = vst [vmem:[#allocation3 + $0xd58] sm:$0xff] %v3292_v24  ;;  %v2774_v31 = vadd.f32 %v2773_v27, %v8231_v20 }
 0x594   :  { %4318 = vst [vmem:[#allocation3 + $0xd60] sm:$0xff] %v3813_v26  ;;  %v1757_v32 = vld [vmem:[#allocation2 + $0x4f8] sm:$0xff] }
 0x595   :  { %1590 = vst.msk [vmem:[#allocation2 + $0x500] sm:$0xff] %vm1429_vm2, %v1421_v36  ;;  %7004 = vmatmul.msk.f32.gmra.mxu1 %vm1429_vm2, %v1757_v32  ;;  %7173 = vmatmul.msk.f32.gmra.mxu2 %vm1429_vm2, %v1757_v32 }
 0x596   :  { %4319 = vst [vmem:[#allocation3 + $0xd68] sm:$0xff] %v2774_v31  ;;  %7342 = vmatmul.msk.f32.gmra.mxu3 %vm1429_vm2, %v1757_v32 }
 0x598   :  { %v1240_v39 = vpop.f32.mrf.mxu0  ;;  %v3294_v34 = vpop.f32.mrf.mxu2 }
 0x599   :  { %v1241_v35 = vadd.f32 %v9773_v25, %v1240_v39  ;;  %v3295_v61 = vadd.f32 %v3294_v34, %v8242_v28  ;;  %v3815_v37 = vpop.f32.mrf.mxu3 }
 0x59a   :  { %v3816_v38 = vadd.f32 %v3815_v37, %v8245_v29  ;;  %v2776_v40 = vpop.f32.mrf.mxu1 }
 0x59b   :  { %v1422_v41 = vmax.f32 %v1241_v35, 0.0  ;;  %4320 = vst [vmem:[#allocation3 + $0xd70] sm:$0xff] %v3295_v61  ;;  %v2777_v42 = vadd.f32 %v2776_v40, %v8231_v20 }
 0x59c   :  { %4321 = vst [vmem:[#allocation3 + $0xd78] sm:$0xff] %v3816_v38  ;;  %v1758_v43 = vld [vmem:[#allocation2 + $0x500] sm:$0xff] }
 0x59d   :  { %1591 = vst.msk [vmem:[#allocation2 + $0x508] sm:$0xff] %vm1429_vm2, %v1422_v41  ;;  %7005 = vmatmul.msk.f32.gmra.mxu1 %vm1429_vm2, %v1758_v43  ;;  %7174 = vmatmul.msk.f32.gmra.mxu2 %vm1429_vm2, %v1758_v43 }
 0x59e   :  { %4322 = vst [vmem:[#allocation3 + $0xd80] sm:$0xff] %v2777_v42  ;;  %7343 = vmatmul.msk.f32.gmra.mxu3 %vm1429_vm2, %v1758_v43 }
 0x5a0   :  { %v1243_v44 = vpop.f32.mrf.mxu0  ;;  %v3297_v45 = vpop.f32.mrf.mxu2 }
 0x5a1   :  { %v1244_v46 = vadd.f32 %v9773_v25, %v1243_v44  ;;  %v3298_v47 = vadd.f32 %v3297_v45, %v8242_v28  ;;  %v3818_v48 = vpop.f32.mrf.mxu3 }
 0x5a2   :  { %v3819_v49 = vadd.f32 %v3818_v48, %v8245_v29  ;;  %v2779_v50 = vpop.f32.mrf.mxu1 }
 0x5a3   :  { %v1423_v51 = vmax.f32 %v1244_v46, 0.0  ;;  %4323 = vst [vmem:[#allocation3 + $0xd88] sm:$0xff] %v3298_v47  ;;  %v2780_v52 = vadd.f32 %v2779_v50, %v8231_v20 }
 0x5a4   :  { %4324 = vst [vmem:[#allocation3 + $0xd90] sm:$0xff] %v3819_v49  ;;  %v1759_v53 = vld [vmem:[#allocation2 + $0x508] sm:$0xff] }
 0x5a5   :  { %1592 = vst.msk [vmem:[#allocation2 + $0x510] sm:$0xff] %vm1429_vm2, %v1423_v51  ;;  %7006 = vmatmul.msk.f32.gmra.mxu1 %vm1429_vm2, %v1759_v53  ;;  %7175 = vmatmul.msk.f32.gmra.mxu2 %vm1429_vm2, %v1759_v53 }
 0x5a6   :  { %4325 = vst [vmem:[#allocation3 + $0xd98] sm:$0xff] %v2780_v52  ;;  %7344 = vmatmul.msk.f32.gmra.mxu3 %vm1429_vm2, %v1759_v53 }
 0x5a8   :  { %v1246_v54 = vpop.f32.mrf.mxu0  ;;  %v3300_v55 = vpop.f32.mrf.mxu2 }
 0x5a9   :  { %v1247_v56 = vadd.f32 %v9773_v25, %v1246_v54  ;;  %v3301_v57 = vadd.f32 %v3300_v55, %v8242_v28  ;;  %v3821_v58 = vpop.f32.mrf.mxu3 }
 0x5aa   :  { %v3822_v59 = vadd.f32 %v3821_v58, %v8245_v29  ;;  %v2782_v60 = vpop.f32.mrf.mxu1 }
 0x5ab   :  { %v1424_v62 = vmax.f32 %v1247_v56, 0.0  ;;  %4326 = vst [vmem:[#allocation3 + $0xda0] sm:$0xff] %v3301_v57  ;;  %v2783_v63 = vadd.f32 %v2782_v60, %v8231_v20 }
 0x5ac   :  { %4327 = vst [vmem:[#allocation3 + $0xda8] sm:$0xff] %v3822_v59  ;;  %v1760_v0 = vld [vmem:[#allocation2 + $0x510] sm:$0xff] }
 0x5ad   :  { %1593 = vst.msk [vmem:[#allocation2 + $0x518] sm:$0xff] %vm1429_vm2, %v1424_v62  ;;  %7007 = vmatmul.msk.f32.gmra.mxu1 %vm1429_vm2, %v1760_v0  ;;  %7176 = vmatmul.msk.f32.gmra.mxu2 %vm1429_vm2, %v1760_v0 }
 0x5ae   :  { %4328 = vst [vmem:[#allocation3 + $0xdb0] sm:$0xff] %v2783_v63  ;;  %7345 = vmatmul.msk.f32.gmra.mxu3 %vm1429_vm2, %v1760_v0 }
 0x5b0   :  { %v1249_v1 = vpop.f32.mrf.mxu0  ;;  %v3303_v2 = vpop.f32.mrf.mxu2 }
 0x5b1   :  { %v1250_v3 = vadd.f32 %v9773_v25, %v1249_v1  ;;  %v3304_v4 = vadd.f32 %v3303_v2, %v8242_v28  ;;  %v3824_v5 = vpop.f32.mrf.mxu3 }
 0x5b2   :  { %v3825_v6 = vadd.f32 %v3824_v5, %v8245_v29  ;;  %v2785_v7 = vpop.f32.mrf.mxu1 }
 0x5b3   :  { %v1425_v8 = vmax.f32 %v1250_v3, 0.0  ;;  %4329 = vst [vmem:[#allocation3 + $0xdb8] sm:$0xff] %v3304_v4  ;;  %v2786_v9 = vadd.f32 %v2785_v7, %v8231_v20 }
 0x5b4   :  { %4330 = vst [vmem:[#allocation3 + $0xdc0] sm:$0xff] %v3825_v6  ;;  %v1761_v10 = vld [vmem:[#allocation2 + $0x518] sm:$0xff] }
 0x5b5   :  { %1594 = vst.msk [vmem:[#allocation2 + $0x520] sm:$0xff] %vm1429_vm2, %v1425_v8  ;;  %7008 = vmatmul.msk.f32.gmra.mxu1 %vm1429_vm2, %v1761_v10  ;;  %7177 = vmatmul.msk.f32.gmra.mxu2 %vm1429_vm2, %v1761_v10 }
 0x5b6   :  { %4331 = vst [vmem:[#allocation3 + $0xdc8] sm:$0xff] %v2786_v9  ;;  %7346 = vmatmul.msk.f32.gmra.mxu3 %vm1429_vm2, %v1761_v10 }
 0x5b8   :  { %v1252_v11 = vpop.f32.mrf.mxu0  ;;  %v3306_v12 = vpop.f32.mrf.mxu2 }
 0x5b9   :  { %v1253_v13 = vadd.f32 %v9773_v25, %v1252_v11  ;;  %v3307_v14 = vadd.f32 %v3306_v12, %v8242_v28  ;;  %v3827_v15 = vpop.f32.mrf.mxu3 }
 0x5ba   :  { %v3828_v16 = vadd.f32 %v3827_v15, %v8245_v29  ;;  %v2788_v17 = vpop.f32.mrf.mxu1 }
 0x5bb   :  { %v1426_v18 = vmax.f32 %v1253_v13, 0.0  ;;  %4332 = vst [vmem:[#allocation3 + $0xdd0] sm:$0xff] %v3307_v14  ;;  %v2789_v19 = vadd.f32 %v2788_v17, %v8231_v20 }
 0x5bc   :  { %4333 = vst [vmem:[#allocation3 + $0xdd8] sm:$0xff] %v3828_v16  ;;  %v1762_v21 = vld [vmem:[#allocation2 + $0x520] sm:$0xff] }
 0x5bd   :  { %1595 = vst.msk [vmem:[#allocation2 + $0x528] sm:$0xff] %vm1429_vm2, %v1426_v18  ;;  %7009 = vmatmul.msk.f32.gmra.mxu1 %vm1429_vm2, %v1762_v21  ;;  %7178 = vmatmul.msk.f32.gmra.mxu2 %vm1429_vm2, %v1762_v21 }
 0x5be   :  { %4334 = vst [vmem:[#allocation3 + $0xde0] sm:$0xff] %v2789_v19  ;;  %7347 = vmatmul.msk.f32.gmra.mxu3 %vm1429_vm2, %v1762_v21 }
 0x5c0   :  { %v1255_v22 = vpop.f32.mrf.mxu0  ;;  %v3309_v30 = vpop.f32.mrf.mxu2 }
 0x5c1   :  { %v1256_v23 = vadd.f32 %v9773_v25, %v1255_v22  ;;  %v3310_v24 = vadd.f32 %v3309_v30, %v8242_v28  ;;  %v3830_v33 = vpop.f32.mrf.mxu3 }
 0x5c2   :  { %v3831_v26 = vadd.f32 %v3830_v33, %v8245_v29  ;;  %v2791_v27 = vpop.f32.mrf.mxu1 }
 0x5c3   :  { %v1427_v36 = vmax.f32 %v1256_v23, 0.0  ;;  %4335 = vst [vmem:[#allocation3 + $0xde8] sm:$0xff] %v3310_v24  ;;  %v2792_v31 = vadd.f32 %v2791_v27, %v8231_v20 }
 0x5c4   :  { %4336 = vst [vmem:[#allocation3 + $0xdf0] sm:$0xff] %v3831_v26  ;;  %v1763_v32 = vld [vmem:[#allocation2 + $0x528] sm:$0xff] }
 0x5c5   :  { %1596 = vst.msk [vmem:[#allocation2 + $0x530] sm:$0xff] %vm1429_vm2, %v1427_v36  ;;  %7010 = vmatmul.msk.f32.gmra.mxu1 %vm1429_vm2, %v1763_v32  ;;  %7179 = vmatmul.msk.f32.gmra.mxu2 %vm1429_vm2, %v1763_v32 }
 0x5c6   :  { %4337 = vst [vmem:[#allocation3 + $0xdf8] sm:$0xff] %v2792_v31  ;;  %7348 = vmatmul.msk.f32.gmra.mxu3 %vm1429_vm2, %v1763_v32 }
 0x5c8   :  { %v1258_v39 = vpop.f32.mrf.mxu0  ;;  %v3312_v34 = vpop.f32.mrf.mxu2 }
 0x5c9   :  { %v1259_v35 = vadd.f32 %v9773_v25, %v1258_v39  ;;  %v3313_v61 = vadd.f32 %v3312_v34, %v8242_v28  ;;  %v3833_v37 = vpop.f32.mrf.mxu3 }
 0x5ca   :  { %v3834_v38 = vadd.f32 %v3833_v37, %v8245_v29  ;;  %v2794_v40 = vpop.f32.mrf.mxu1 }
 0x5cb   :  { %v1428_v41 = vmax.f32 %v1259_v35, 0.0  ;;  %4338 = vst [vmem:[#allocation3 + $0xe00] sm:$0xff] %v3313_v61  ;;  %v2795_v42 = vadd.f32 %v2794_v40, %v8231_v20 }
 0x5cc   :  { %4339 = vst [vmem:[#allocation3 + $0xe08] sm:$0xff] %v3834_v38  ;;  %v1764_v43 = vld [vmem:[#allocation2 + $0x530] sm:$0xff] }
 0x5cd   :  { %1597 = vst.msk [vmem:[#allocation2 + $0x538] sm:$0xff] %vm1429_vm2, %v1428_v41  ;;  %7011 = vmatmul.msk.f32.gmra.mxu1 %vm1429_vm2, %v1764_v43  ;;  %7180 = vmatmul.msk.f32.gmra.mxu2 %vm1429_vm2, %v1764_v43 }
 0x5ce   :  { %4340 = vst [vmem:[#allocation3 + $0xe10] sm:$0xff] %v2795_v42  ;;  %7349 = vmatmul.msk.f32.gmra.mxu3 %vm1429_vm2, %v1764_v43 }
 0x5d0   :  { %v3315_v25 = vpop.f32.mrf.mxu2 }
 0x5d1   :  { %v3316_v44 = vadd.f32 %v3315_v25, %v8242_v28  ;;  %v3836_v45 = vpop.f32.mrf.mxu3 }
 0x5d2   :  { %v3837_v46 = vadd.f32 %v3836_v45, %v8245_v29  ;;  %v2797_v47 = vpop.f32.mrf.mxu1 }
 0x5d3   :  { %4341 = vst [vmem:[#allocation3 + $0xe18] sm:$0xff] %v3316_v44  ;;  %v2798_v48 = vadd.f32 %v2797_v47, %v8231_v20 }
 0x5d4   :  { %4342 = vst [vmem:[#allocation3 + $0xe20] sm:$0xff] %v3837_v46  ;;  %v1765_v49 = vld [vmem:[#allocation2 + $0x538] sm:$0xff] }
 0x5d5   :  { %4343 = vst [vmem:[#allocation3 + $0xe28] sm:$0xff] %v2798_v48  ;;  %7012 = vmatmul.msk.f32.gmra.mxu1 %vm1429_vm2, %v1765_v49  ;;  %7181 = vmatmul.msk.f32.gmra.mxu2 %vm1429_vm2, %v1765_v49 }
 0x5d6   :  { %7350 = vmatmul.msk.f32.gmra.mxu3 %vm1429_vm2, %v1765_v49 }
 0x5d8   :  { %v3318_v50 = vpop.f32.mrf.mxu2 }
 0x5d9   :  { %v3319_v51 = vadd.f32 %v3318_v50, %v8242_v28  ;;  %v3839_v52 = vpop.f32.mrf.mxu3 }
 0x5da   :  { %v3840_v53 = vadd.f32 %v3839_v52, %v8245_v29  ;;  %v2800_v54 = vpop.f32.mrf.mxu1 }
 0x5db   :  { %4344 = vst [vmem:[#allocation3 + $0xe30] sm:$0xff] %v3319_v51  ;;  %v2801_v55 = vadd.f32 %v2800_v54, %v8231_v20 }
 0x5dc   :  { %4345 = vst [vmem:[#allocation3 + $0xe38] sm:$0xff] %v3840_v53 }
 0x5dd   :  { %4346 = vst [vmem:[#allocation3 + $0xe40] sm:$0xff] %v2801_v55 }
 0x5e0   :  { %v3321_v56 = vpop.f32.mrf.mxu2 }
 0x5e1   :  { %v3322_v57 = vadd.f32 %v3321_v56, %v8242_v28  ;;  %v3842_v58 = vpop.f32.mrf.mxu3 }
 0x5e2   :  { %v3843_v59 = vadd.f32 %v3842_v58, %v8245_v29  ;;  %v2803_v60 = vpop.f32.mrf.mxu1 }
 0x5e3   :  { %4347 = vst [vmem:[#allocation3 + $0xe48] sm:$0xff] %v3322_v57  ;;  %v2804_v62 = vadd.f32 %v2803_v60, %v8231_v20 }
 0x5e4   :  { %4348 = vst [vmem:[#allocation3 + $0xe50] sm:$0xff] %v3843_v59 }
 0x5e5   :  { %4349 = vst [vmem:[#allocation3 + $0xe58] sm:$0xff] %v2804_v62 }
 0x5e8   :  { %v3324_v63 = vpop.f32.mrf.mxu2 }
 0x5e9   :  { %v3325_v0 = vadd.f32 %v3324_v63, %v8242_v28  ;;  %v3845_v1 = vpop.f32.mrf.mxu3 }
 0x5ea   :  { %v3846_v2 = vadd.f32 %v3845_v1, %v8245_v29  ;;  %v2806_v3 = vpop.f32.mrf.mxu1 }
 0x5eb   :  { %4350 = vst [vmem:[#allocation3 + $0xe60] sm:$0xff] %v3325_v0  ;;  %v2807_v4 = vadd.f32 %v2806_v3, %v8231_v20 }
 0x5ec   :  { %4351 = vst [vmem:[#allocation3 + $0xe68] sm:$0xff] %v3846_v2 }
 0x5ed   :  { %4352 = vst [vmem:[#allocation3 + $0xe70] sm:$0xff] %v2807_v4 }
 0x5f0   :  { %v3327_v5 = vpop.f32.mrf.mxu2 }
 0x5f1   :  { %v3328_v6 = vadd.f32 %v3327_v5, %v8242_v28  ;;  %v3848_v7 = vpop.f32.mrf.mxu3 }
 0x5f2   :  { %v3849_v8 = vadd.f32 %v3848_v7, %v8245_v29  ;;  %v2809_v9 = vpop.f32.mrf.mxu1 }
 0x5f3   :  { %4353 = vst [vmem:[#allocation3 + $0xe78] sm:$0xff] %v3328_v6  ;;  %v2810_v10 = vadd.f32 %v2809_v9, %v8231_v20 }
 0x5f4   :  { %4354 = vst [vmem:[#allocation3 + $0xe80] sm:$0xff] %v3849_v8 }
 0x5f5   :  { %4355 = vst [vmem:[#allocation3 + $0xe88] sm:$0xff] %v2810_v10 }
 0x5f8   :  { %v3330_v11 = vpop.f32.mrf.mxu2 }
 0x5f9   :  { %v3331_v12 = vadd.f32 %v3330_v11, %v8242_v28  ;;  %v3851_v13 = vpop.f32.mrf.mxu3 }
 0x5fa   :  { %v3852_v14 = vadd.f32 %v3851_v13, %v8245_v29  ;;  %v2812_v15 = vpop.f32.mrf.mxu1 }
 0x5fb   :  { %4356 = vst [vmem:[#allocation3 + $0xe90] sm:$0xff] %v3331_v12  ;;  %v2813_v16 = vadd.f32 %v2812_v15, %v8231_v20 }
 0x5fc   :  { %4357 = vst [vmem:[#allocation3 + $0xe98] sm:$0xff] %v3852_v14 }
 0x5fd   :  { %4358 = vst [vmem:[#allocation3 + $0xea0] sm:$0xff] %v2813_v16 }
 0x600   :  { %v3333_v17 = vpop.f32.mrf.mxu2 }
 0x601   :  { %v3334_v18 = vadd.f32 %v3333_v17, %v8242_v28  ;;  %v3854_v19 = vpop.f32.mrf.mxu3 }
 0x602   :  { %v3855_v21 = vadd.f32 %v3854_v19, %v8245_v29  ;;  %v2815_v22 = vpop.f32.mrf.mxu1 }
 0x603   :  { %4359 = vst [vmem:[#allocation3 + $0xea8] sm:$0xff] %v3334_v18  ;;  %v2816_v30 = vadd.f32 %v2815_v22, %v8231_v20 }
 0x604   :  { %4360 = vst [vmem:[#allocation3 + $0xeb0] sm:$0xff] %v3855_v21 }
 0x605   :  { %4361 = vst [vmem:[#allocation3 + $0xeb8] sm:$0xff] %v2816_v30 }
 0x608   :  { %v3336_v23 = vpop.f32.mrf.mxu2 }
 0x609   :  { %v3337_v24 = vadd.f32 %v3336_v23, %v8242_v28  ;;  %v3857_v33 = vpop.f32.mrf.mxu3 }
 0x60a   :  { %v3858_v26 = vadd.f32 %v3857_v33, %v8245_v29  ;;  %v2818_v27 = vpop.f32.mrf.mxu1 }
 0x60b   :  { %4362 = vst [vmem:[#allocation3 + $0xec0] sm:$0xff] %v3337_v24  ;;  %v2819_v36 = vadd.f32 %v2818_v27, %v8231_v20 }
 0x60c   :  { %4363 = vst [vmem:[#allocation3 + $0xec8] sm:$0xff] %v3858_v26  ;;  %v10064_v26 = vmov 0.0  }
 0x60d   :  { %4364 = vst [vmem:[#allocation3 + $0xed0] sm:$0xff] %v2819_v36 }
 0x610   :  { %v3339_v31 = vpop.f32.mrf.mxu2 }
 0x611   :  { %v3340_v32 = vadd.f32 %v3339_v31, %v8242_v28  ;;  %v3860_v39 = vpop.f32.mrf.mxu3 }
 0x612   :  { %v3861_v34 = vadd.f32 %v3860_v39, %v8245_v29  ;;  %v2821_v35 = vpop.f32.mrf.mxu1 }
 0x613   :  { %4365 = vst [vmem:[#allocation3 + $0xed8] sm:$0xff] %v3340_v32  ;;  %v2822_v61 = vadd.f32 %v2821_v35, %v8231_v20 }
 0x614   :  { %4366 = vst [vmem:[#allocation3 + $0xee0] sm:$0xff] %v3861_v34 }
 0x615   :  { %4367 = vst [vmem:[#allocation3 + $0xee8] sm:$0xff] %v2822_v61 }
 0x618   :  { %v3342_v37 = vpop.f32.mrf.mxu2 }
 0x619   :  { %v3343_v38 = vadd.f32 %v3342_v37, %v8242_v28  ;;  %v3863_v40 = vpop.f32.mrf.mxu3 }
 0x61a   :  { %v3864_v41 = vadd.f32 %v3863_v40, %v8245_v29  ;;  %v2824_v42 = vpop.f32.mrf.mxu1 }
 0x61b   :  { %4368 = vst [vmem:[#allocation3 + $0xef0] sm:$0xff] %v3343_v38  ;;  %v2825_v43 = vadd.f32 %v2824_v42, %v8231_v20 }
 0x61c   :  { %4369 = vst [vmem:[#allocation3 + $0xef8] sm:$0xff] %v3864_v41 }
 0x61d   :  { %4370 = vst [vmem:[#allocation3 + $0xf00] sm:$0xff] %v2825_v43 }
 0x620   :  { %v3345_v25 = vpop.f32.mrf.mxu2 }
 0x621   :  { %v3346_v44 = vadd.f32 %v3345_v25, %v8242_v28  ;;  %v3866_v45 = vpop.f32.mrf.mxu3 }
 0x622   :  { %v3867_v46 = vadd.f32 %v3866_v45, %v8245_v29  ;;  %v2827_v47 = vpop.f32.mrf.mxu1 }
 0x623   :  { %4371 = vst [vmem:[#allocation3 + $0xf08] sm:$0xff] %v3346_v44  ;;  %v2828_v48 = vadd.f32 %v2827_v47, %v8231_v20 }
 0x624   :  { %4372 = vst [vmem:[#allocation3 + $0xf10] sm:$0xff] %v3867_v46 }
 0x625   :  { %4373 = vst [vmem:[#allocation3 + $0xf18] sm:$0xff] %v2828_v48 }
 0x628   :  { %v3348_v49 = vpop.f32.mrf.mxu2 }
 0x629   :  { %v3349_v50 = vadd.f32 %v3348_v49, %v8242_v28  ;;  %v3869_v51 = vpop.f32.mrf.mxu3 }
 0x62a   :  { %v3870_v52 = vadd.f32 %v3869_v51, %v8245_v29  ;;  %v2830_v53 = vpop.f32.mrf.mxu1 }
 0x62b   :  { %4374 = vst [vmem:[#allocation3 + $0xf20] sm:$0xff] %v3349_v50  ;;  %v2831_v54 = vadd.f32 %v2830_v53, %v8231_v20 }
 0x62c   :  { %4375 = vst [vmem:[#allocation3 + $0xf28] sm:$0xff] %v3870_v52 }
 0x62d   :  { %4376 = vst [vmem:[#allocation3 + $0xf30] sm:$0xff] %v2831_v54 }
 0x630   :  { %v3351_v55 = vpop.f32.mrf.mxu2 }
 0x631   :  { %v3352_v56 = vadd.f32 %v3351_v55, %v8242_v28  ;;  %v3872_v57 = vpop.f32.mrf.mxu3 }
 0x632   :  { %v3873_v58 = vadd.f32 %v3872_v57, %v8245_v29  ;;  %v2833_v59 = vpop.f32.mrf.mxu1 }
 0x633   :  { %4377 = vst [vmem:[#allocation3 + $0xf38] sm:$0xff] %v3352_v56  ;;  %v2834_v60 = vadd.f32 %v2833_v59, %v8231_v20 }
 0x634   :  { %4378 = vst [vmem:[#allocation3 + $0xf40] sm:$0xff] %v3873_v58 }
 0x635   :  { %4379 = vst [vmem:[#allocation3 + $0xf48] sm:$0xff] %v2834_v60 }
 0x638   :  { %v3354_v62 = vpop.f32.mrf.mxu2 }
 0x639   :  { %v3355_v63 = vadd.f32 %v3354_v62, %v8242_v28  ;;  %v3875_v0 = vpop.f32.mrf.mxu3 }
 0x63a   :  { %v3876_v1 = vadd.f32 %v3875_v0, %v8245_v29  ;;  %v2836_v2 = vpop.f32.mrf.mxu1 }
 0x63b   :  { %4380 = vst [vmem:[#allocation3 + $0xf50] sm:$0xff] %v3355_v63  ;;  %v2837_v3 = vadd.f32 %v2836_v2, %v8231_v20 }
 0x63c   :  { %4381 = vst [vmem:[#allocation3 + $0xf58] sm:$0xff] %v3876_v1 }
 0x63d   :  { %4382 = vst [vmem:[#allocation3 + $0xf60] sm:$0xff] %v2837_v3 }
 0x640   :  { %v3357_v4 = vpop.f32.mrf.mxu2 }
 0x641   :  { %v3358_v5 = vadd.f32 %v3357_v4, %v8242_v28  ;;  %v3878_v6 = vpop.f32.mrf.mxu3 }
 0x642   :  { %v3879_v7 = vadd.f32 %v3878_v6, %v8245_v29  ;;  %v2839_v8 = vpop.f32.mrf.mxu1 }
 0x643   :  { %4383 = vst [vmem:[#allocation3 + $0xf68] sm:$0xff] %v3358_v5  ;;  %v2840_v9 = vadd.f32 %v2839_v8, %v8231_v20 }
 0x644   :  { %4384 = vst [vmem:[#allocation3 + $0xf70] sm:$0xff] %v3879_v7 }
 0x645   :  { %4385 = vst [vmem:[#allocation3 + $0xf78] sm:$0xff] %v2840_v9 }
 0x648   :  { %v3360_v10 = vpop.f32.mrf.mxu2 }
 0x649   :  { %v3361_v11 = vadd.f32 %v3360_v10, %v8242_v28  ;;  %v3881_v12 = vpop.f32.mrf.mxu3 }
 0x64a   :  { %v3882_v13 = vadd.f32 %v3881_v12, %v8245_v29  ;;  %v2842_v14 = vpop.f32.mrf.mxu1 }
 0x64b   :  { %4386 = vst [vmem:[#allocation3 + $0xf80] sm:$0xff] %v3361_v11  ;;  %v2843_v15 = vadd.f32 %v2842_v14, %v8231_v20 }
 0x64c   :  { %4387 = vst [vmem:[#allocation3 + $0xf88] sm:$0xff] %v3882_v13 }
 0x64d   :  { %4388 = vst [vmem:[#allocation3 + $0xf90] sm:$0xff] %v2843_v15 }
 0x650   :  { %v3363_v16 = vpop.f32.mrf.mxu2 }
 0x651   :  { %v3364_v17 = vadd.f32 %v3363_v16, %v8242_v28  ;;  %v3884_v18 = vpop.f32.mrf.mxu3 }
 0x652   :  { %v3885_v19 = vadd.f32 %v3884_v18, %v8245_v29  ;;  %v2845_v21 = vpop.f32.mrf.mxu1 }
 0x653   :  { %4389 = vst [vmem:[#allocation3 + $0xf98] sm:$0xff] %v3364_v17  ;;  %v2846_v22 = vadd.f32 %v2845_v21, %v8231_v20 }
 0x654   :  { %4390 = vst [vmem:[#allocation3 + $0xfa0] sm:$0xff] %v3885_v19 }
 0x655   :  { %4391 = vst [vmem:[#allocation3 + $0xfa8] sm:$0xff] %v2846_v22 }
 0x658   :  { %v3366_v30 = vpop.f32.mrf.mxu2 }
 0x659   :  { %v3367_v23 = vadd.f32 %v3366_v30, %v8242_v28  ;;  %v3887_v24 = vpop.f32.mrf.mxu3 }
 0x65a   :  { %v3888_v33 = vadd.f32 %v3887_v24, %v8245_v29 }
 0x65b   :  { %4392 = vst [vmem:[#allocation3 + $0xfb0] sm:$0xff] %v3367_v23 }
 0x65c   :  { %4393 = vst [vmem:[#allocation3 + $0xfb8] sm:$0xff] %v3888_v33 }
 0x65d LB: > { %s12724_s2 = sld [smem:[#allocation75_spill]]  ;;  %s7351_s24 = sshll.u32 %s7775_s1, 3  ;;  %v4458_v11 = vld [vmem:[%s12501_s6] sm:$0x7]  ;;  %s7775_s1 = sphi %s10066_s1, %s4399_s1   ;;  %v7771_v26 = vphi %v10064_v26, %v12728_v26  }
 0x65e   : > { %s4402_s25 = sshra.s32 %s7351_s24, 3  ;;  %v4460_v12 = vperm.slane %v4458_v11, 0  ;;  %v4461_v13 = vperm.slane %v4458_v11, 1  ;;  %s4399_s1 = sadd.s32 1, %s7775_s1  }
 0x65f   : > { %s7454_s26 = smul.u32 24, %s4402_s25  ;;  %p4396_p0 = scmp.ge.s32.totalorder %s4399_s1, 168  }
 0x660   :  { %s7778_s22 = smov (%p4396_p0), 112   ;;  %s7779_s5 = smov (%p4396_p0), 50  }
 0x661   : > { %s10225_s29 = scalar_lea.vmem [#allocation3], %s7454_s26  ;;  %s7780_s24 = smov (%p4396_p0), 63  }
 0x663   : > { %v4455_v20 = vld [vmem:[%s12724_s2 + $0x168] sm:$0xff]  ;;  %v4456_v28 = vld [vmem:[%s12724_s2 + $0x170] sm:$0xff]  ;;  %v4453_v27 = vld [vmem:[%s12724_s2 + $0x158] sm:$0xff] }
 0x664   : > { %v4452_v29 = vld [vmem:[%s12724_s2 + $0x150] sm:$0xff]  ;;  %4466 = vmatpush.msra.mxu0 %v4455_v20  ;;  %4486 = vmatpush.msra.mxu1 %v4456_v28  ;;  %v4449_v36 = vld [vmem:[%s12724_s2 + $0x138] sm:$0xff]  ;;  %v4450_v31 = vld [vmem:[%s12724_s2 + $0x140] sm:$0xff] }
 0x665   : > { %v4446_v32 = vld [vmem:[%s12724_s2 + $0x120] sm:$0xff]  ;;  %v4447_v39 = vld [vmem:[%s12724_s2 + $0x128] sm:$0xff]  ;;  %v4444_v35 = vld [vmem:[%s12724_s2 + $0x110] sm:$0xff] }
 0x666   : > { %4467 = vmatpush.msra.mxu0 %v4452_v29  ;;  %4487 = vmatpush.msra.mxu1 %v4453_v27  ;;  %v4443_v34 = vld [vmem:[%s12724_s2 + $0x108] sm:$0xff]  ;;  %v4440_v61 = vld [vmem:[%s12724_s2 + $0xf0] sm:$0xff]  ;;  %v4441_v37 = vld [vmem:[%s12724_s2 + $0xf8] sm:$0xff] }
 0x667   : > { %v4457_v38 = vld [vmem:[%s12724_s2 + $0x178] sm:$0xff]  ;;  %v4454_v40 = vld [vmem:[%s12724_s2 + $0x160] sm:$0xff]  ;;  %v4451_v43 = vld [vmem:[%s12724_s2 + $0x148] sm:$0xff] }
 0x668   : > { %4468 = vmatpush.msra.mxu0 %v4449_v36  ;;  %4488 = vmatpush.msra.mxu1 %v4450_v31  ;;  %v4437_v41 = vld [vmem:[%s12724_s2 + $0xd8] sm:$0xff]  ;;  %v4438_v42 = vld [vmem:[%s12724_s2 + $0xe0] sm:$0xff]  ;;  %v4435_v44 = vld [vmem:[%s12724_s2 + $0xc8] sm:$0xff] }
 0x669   : > { %4506 = vmatpush.msra.mxu2 %v4457_v38  ;;  %v4434_v25 = vld [vmem:[%s12724_s2 + $0xc0] sm:$0xff]  ;;  %v4448_v45 = vld [vmem:[%s12724_s2 + $0x130] sm:$0xff]  ;;  %v4431_v46 = vld [vmem:[%s12724_s2 + $0xa8] sm:$0xff] }
 0x66a   : > { %4469 = vmatpush.msra.mxu0 %v4446_v32  ;;  %4489 = vmatpush.msra.mxu1 %v4447_v39  ;;  %v4432_v47 = vld [vmem:[%s12724_s2 + $0xb0] sm:$0xff]  ;;  %v4445_v48 = vld [vmem:[%s12724_s2 + $0x118] sm:$0xff]  ;;  %v4442_v51 = vld [vmem:[%s12724_s2 + $0x100] sm:$0xff]  ;;  %v4462_v32 = vperm.slane %v4458_v11, 2 }
 0x66b   : > { %4507 = vmatpush.msra.mxu2 %v4454_v40  ;;  %v4428_v49 = vld [vmem:[%s12724_s2 + $0x90] sm:$0xff]  ;;  %v4429_v50 = vld [vmem:[%s12724_s2 + $0x98] sm:$0xff]  ;;  %v4426_v53 = vld [vmem:[%s12724_s2 + $0x80] sm:$0xff] }
 0x66c   : > { %4470 = vmatpush.msra.mxu0 %v4443_v34  ;;  %4490 = vmatpush.msra.mxu1 %v4444_v35  ;;  %v4425_v52 = vld [vmem:[%s12724_s2 + $0x78] sm:$0xff]  ;;  %v4439_v54 = vld [vmem:[%s12724_s2 + $0xe8] sm:$0xff]  ;;  %v4422_v55 = vld [vmem:[%s12724_s2 + $0x60] sm:$0xff] }
 0x66d   : > { %4508 = vmatpush.msra.mxu2 %v4451_v43  ;;  %v4423_v56 = vld [vmem:[%s12724_s2 + $0x68] sm:$0xff]  ;;  %v4436_v57 = vld [vmem:[%s12724_s2 + $0xd0] sm:$0xff]  ;;  %v4433_v60 = vld [vmem:[%s12724_s2 + $0xb8] sm:$0xff] }
 0x66e   : > { %4471 = vmatpush.msra.mxu0 %v4440_v61  ;;  %4491 = vmatpush.msra.mxu1 %v4441_v37  ;;  %v4419_v58 = vld [vmem:[%s12724_s2 + $0x48] sm:$0xff]  ;;  %v4420_v59 = vld [vmem:[%s12724_s2 + $0x50] sm:$0xff]  ;;  %v4417_v63 = vld [vmem:[%s12724_s2 + $0x38] sm:$0xff] }
 0x66f   : > { %4509 = vmatpush.msra.mxu2 %v4448_v45  ;;  %v4416_v62 = vld [vmem:[%s12724_s2 + $0x30] sm:$0xff]  ;;  %v4430_v0 = vld [vmem:[%s12724_s2 + $0xa0] sm:$0xff]  ;;  %v4413_v1 = vld [vmem:[%s12724_s2 + $0x18] sm:$0xff] }
 0x670   : > { %4472 = vmatpush.msra.mxu0 %v4437_v41  ;;  %4492 = vmatpush.msra.mxu1 %v4438_v42  ;;  %v4414_v2 = vld [vmem:[%s12724_s2 + $0x20] sm:$0xff]  ;;  %v4427_v3 = vld [vmem:[%s12724_s2 + $0x88] sm:$0xff]  ;;  %v4424_v6 = vld [vmem:[%s12724_s2 + $0x70] sm:$0xff] }
 0x671   : > { %4510 = vmatpush.msra.mxu2 %v4445_v48  ;;  %v4410_v4 = vld [vmem:[%s12724_s2] sm:$0xff]  ;;  %v4411_v5 = vld [vmem:[%s12724_s2 + $0x8] sm:$0xff]  ;;  %v4421_v7 = vld [vmem:[%s12724_s2 + $0x58] sm:$0xff] }
 0x672   : > { %4473 = vmatpush.msra.mxu0 %v4434_v25  ;;  %4493 = vmatpush.msra.mxu1 %v4435_v44  ;;  %v4418_v8 = vld [vmem:[%s12724_s2 + $0x40] sm:$0xff]  ;;  %v4415_v9 = vld [vmem:[%s12724_s2 + $0x28] sm:$0xff]  ;;  %v4412_v10 = vld [vmem:[%s12724_s2 + $0x10] sm:$0xff] }
 0x673   : > { %4511 = vmatpush.msra.mxu2 %v4442_v51  ;;  %v4407_v14 = vld [vmem:[%s10225_s29] sm:$0xff]  ;;  %v4408_v16 = vld [vmem:[%s10225_s29 + $0x8] sm:$0xff]  ;;  %v4409_v44 = vld [vmem:[%s10225_s29 + $0x10] sm:$0xff] }
 0x674   : > { %4474 = vmatpush.msra.mxu0 %v4431_v46  ;;  %4494 = vmatpush.msra.mxu1 %v4432_v47  ;;  %v10336_v11 = vld [vmem:[%s12502_s7 + $0x90] sm:$0xff] (%p4396_p0) }
 0x675   : > { %4512 = vmatpush.msra.mxu2 %v4439_v54 }
 0x676   : > { %4475 = vmatpush.msra.mxu0 %v4428_v49  ;;  %4495 = vmatpush.msra.mxu1 %v4429_v50 }
 0x677   : > { %4513 = vmatpush.msra.mxu2 %v4436_v57 }
 0x678   : > { %4476 = vmatpush.msra.mxu0 %v4425_v52  ;;  %4496 = vmatpush.msra.mxu1 %v4426_v53 }
 0x679   : > { %4514 = vmatpush.msra.mxu2 %v4433_v60  ;;  %v10247_v60 = vld [vmem:[%s12503_s8 + $0x168] sm:$0xff] (%p4396_p0) }
 0x67a   : > { %4477 = vmatpush.msra.mxu0 %v4422_v55  ;;  %4497 = vmatpush.msra.mxu1 %v4423_v56 }
 0x67b   : > { %4515 = vmatpush.msra.mxu2 %v4430_v0  ;;  %4762 = vmatpush.msra.mxu3 (%p4396_p0), %v10247_v60  ;;  %v10270_v0 = vld [vmem:[%s12503_s8 + $0x138] sm:$0xff] (%p4396_p0) }
 0x67c   : > { %4478 = vmatpush.msra.mxu0 %v4419_v58  ;;  %4498 = vmatpush.msra.mxu1 %v4420_v59  ;;  %v10242_v59 = vld [vmem:[%s12502_s7 + $0x120] sm:$0xf] (%p4396_p0) }
 0x67d   : > { %4516 = vmatpush.msra.mxu2 %v4427_v3  ;;  %12729 = vst [vmem:[#allocation6_spill] sm:$0xff] (%p4396_p0), %v10242_v59  ;;  %v10287_v3 = vld [vmem:[%s12502_s7 + $0x128] sm:$0xf] (%p4396_p0) }
 0x67e   : > { %4479 = vmatpush.msra.mxu0 %v4416_v62  ;;  %4499 = vmatpush.msra.mxu1 %v4417_v63  ;;  %v10260_v62 = vld [vmem:[%s12503_s8 + $0x150] sm:$0xff] (%p4396_p0)  ;;  %12731 = vst [vmem:[#allocation8_spill] sm:$0xff] (%p4396_p0), %v10287_v3 }
 0x67f   : > { %4517 = vmatpush.msra.mxu2 %v4424_v6  ;;  %v10265_v63 = vld [vmem:[%s12502_s7 + $0xf0] sm:$0xff] (%p4396_p0)  ;;  %4763 = vmatpush.msra.mxu3 (%p4396_p0), %v10260_v62  ;;  %v10304_v6 = vld [vmem:[%s12503_s8 + $0x108] sm:$0xff] (%p4396_p0) }
 0x680   : > { %4480 = vmatpush.msra.mxu0 %v4413_v1  ;;  %4500 = vmatpush.msra.mxu1 %v4414_v2  ;;  %v10277_v1 = vld [vmem:[%s12502_s7 + $0xd8] sm:$0xff] (%p4396_p0)  ;;  %v10282_v2 = vld [vmem:[%s12503_s8 + $0x120] sm:$0xff] (%p4396_p0) }
 0x681   : > { %4518 = vmatpush.msra.mxu2 %v4421_v7  ;;  %4764 = vmatpush.msra.mxu3 (%p4396_p0), %v10270_v0  ;;  %v10313_v7 = vld [vmem:[%s12502_s7 + $0xf8] sm:$0xff] (%p4396_p0) }
 0x682   : > { %4481 = vmatpush.msra.mxu0 %v4410_v4  ;;  %4501 = vmatpush.msra.mxu1 %v4411_v5  ;;  %v10294_v4 = vld [vmem:[%s12502_s7 + $0x110] sm:$0xff] (%p4396_p0)  ;;  %v10299_v5 = vld [vmem:[%s12502_s7 + $0xc0] sm:$0xff] (%p4396_p0)  ;;  %12733 = vst [vmem:[#allocation10_spill] sm:$0xff] (%p4396_p0), %v10313_v7 }
 0x683   : > { %4482 = vmatmul.f32.vlgmr.msra.gmra.mxu0 %v7771_v26  ;;  %4502 = vmatmul.f32.vlgmr.msra.gmra.mxu1 %v7771_v26  ;;  %12732 = vst [vmem:[#allocation9_spill] sm:$0xff] (%p4396_p0), %v10294_v4 }
 0x684   : > { %4519 = vmatpush.msra.mxu2 %v4418_v8  ;;  %7355 = vmatpush.msk.msra.mxu0 (%p4396_p0), %vm2317_vm1, %v10242_v59  ;;  %v10318_v8 = vld [vmem:[%s12502_s7 + $0xa8] sm:$0xff] (%p4396_p0) }
 0x685   :  { %7358 = vmatpush.msk.msra.mxu1 (%p4396_p0), %vm2317_vm1, %v10287_v3  ;;  %4765 = vmatpush.msra.mxu3 (%p4396_p0), %v10282_v2 }
 0x686   : > { %4520 = vmatpush.msra.mxu2 %v4415_v9  ;;  %v10323_v9 = vld [vmem:[%s12503_s8 + $0xf0] sm:$0xff] (%p4396_p0) }
 0x687   :  { %4664 = vmatpush.msra.mxu1 (%p4396_p0), %v10294_v4  ;;  %4766 = vmatpush.msra.mxu3 (%p4396_p0), %v10304_v6 }
 0x688   : > { %4521 = vmatpush.msra.mxu2 %v4412_v10  ;;  %v10331_v10 = vld [vmem:[%s12502_s7 + $0xe0] sm:$0xff] (%p4396_p0) }
 0x689   : > { %4522 = vmatmul.f32.vlgmr.msra.gmra.mxu2 %v7771_v26  ;;  %12734 = vst [vmem:[#allocation11_spill] sm:$0xff] (%p4396_p0), %v10331_v10  ;;  %4665 = vmatpush.msra.mxu1 (%p4396_p0), %v10313_v7 }
 0x68a   :  { %4767 = vmatpush.msra.mxu3 (%p4396_p0), %v10323_v9 }
 0x68b   :  { %4666 = vmatpush.msra.mxu1 (%p4396_p0), %v10331_v10 }
 0x700   : > { %v4483_v15 = vpop.f32.mrf.mxu0  ;;  %v4503_v17 = vpop.f32.mrf.mxu1 }
 0x701   : > { %v4484_v18 = vadd.f32 %v4483_v15, %v4460_v12  ;;  %v4504_v19 = vadd.f32 %v4503_v17, %v4461_v13  ;;  %v10341_v12 = vld [vmem:[%s12503_s8 + $0xd8] sm:$0xff] (%p4396_p0)  ;;  %v10349_v13 = vld [vmem:[%s12502_s7 + $0xc8] sm:$0xff] (%p4396_p0)  ;;  %v10359_v15 = vld [vmem:[%s12503_s8 + $0xc0] sm:$0xff] (%p4396_p0) }
 0x702   :  { %12735 = vst [vmem:[#allocation12_spill] sm:$0xff] (%p4396_p0), %v10349_v13  ;;  %4768 = vmatpush.msra.mxu3 (%p4396_p0), %v10341_v12  ;;  %v10372_v17 = vld [vmem:[%s12502_s7 + $0x60] sm:$0xff] (%p4396_p0)  ;;  %4667 = vmatpush.msra.mxu1 (%p4396_p0), %v10349_v13 }
 0x703   : > { %v4526_v21 = vadd.f32 %v4484_v18, %v4407_v14  ;;  %v4527_v22 = vadd.f32 %v4504_v19, %v4408_v16  ;;  %v10354_v14 = vld [vmem:[%s12502_s7 + $0x78] sm:$0xff] (%p4396_p0)  ;;  %v10367_v16 = vld [vmem:[%s12502_s7 + $0xb0] sm:$0xff] (%p4396_p0)  ;;  %v10377_v18 = vld [vmem:[%s12503_s8 + $0xa8] sm:$0xff] (%p4396_p0) }
 0x704   :  { %12736 = vst [vmem:[#allocation13_spill] sm:$0xff] (%p4396_p0), %v10367_v16  ;;  %4769 = vmatpush.msra.mxu3 (%p4396_p0), %v10359_v15  ;;  %v10385_v19 = vld [vmem:[%s12502_s7 + $0x98] sm:$0xff] (%p4396_p0)  ;;  %4668 = vmatpush.msra.mxu1 (%p4396_p0), %v10367_v16 }
 0x705   : > { %v7353_v30 = vmul.f32 -1.442695, %v4526_v21  ;;  %v7354_v23 = vmul.f32 -1.442695, %v4527_v22  ;;  %12737 = vst [vmem:[#allocation14_spill] sm:$0xff] (%p4396_p0), %v10385_v19  ;;  %v10390_v21 = vld [vmem:[%s12502_s7 + $0x48] sm:$0xff] (%p4396_p0) }
 0x706   :  { %v10395_v22 = vld [vmem:[%s12503_s8 + $0x90] sm:$0xff] (%p4396_p0)  ;;  %4770 = vmatpush.msra.mxu3 (%p4396_p0), %v10377_v18  ;;  %4669 = vmatpush.msra.mxu1 (%p4396_p0), %v10385_v19 }
 0x707   : > { %7481 = vpow2.f32 %v7353_v30  ;;  %v10403_v30 = vld [vmem:[%s12502_s7 + $0x80] sm:$0xff] (%p4396_p0) }
 0x708   : > { %7483 = vpow2.f32 %v7354_v23  ;;  %12738 = vst [vmem:[#allocation15_spill] sm:$0xff] (%p4396_p0), %v10403_v30  ;;  %v10408_v23 = vld [vmem:[%s12502_s7 + $0x130] sm:$0xf] (%p4396_p0)  ;;  %4771 = vmatpush.msra.mxu3 (%p4396_p0), %v10395_v22  ;;  %4670 = vmatpush.msra.mxu1 (%p4396_p0), %v10403_v30 }
 0x709   :  { %12739 = vst [vmem:[#allocation16_spill] sm:$0xff] (%p4396_p0), %v10408_v23  ;;  %7361 = vmatpush.msk.msra.mxu2 (%p4396_p0), %vm2317_vm1, %v10408_v23  ;;  %v10696_v23 = vld [vmem:[%s12502_s7 + $0x28] sm:$0xff] (%p4396_p0) }
 0x70a   :  { %12766 = vst [vmem:[#allocation42_spill] sm:$0xff] (%p4396_p0), %v10696_v23 }
 0x70c   : > { %v4523_v35 = vpop.f32.mrf.mxu2 }
 0x70d   : > { %v7482_v24 = vpop.eup %7481  ;;  %v4524_v41 = vadd.f32 %v4523_v35, %v4462_v32  ;;  %v10462_v32 = vld [vmem:[%s12502_s7 + $0xe8] sm:$0xff] (%p4396_p0)  ;;  %v10481_v35 = vld [vmem:[%s12503_s8 + $0x170] sm:$0xff] (%p4396_p0) }
 0x70e   : > { %v7484_v33 = vpop.eup %7483  ;;  %v4534_v20 = vadd.f32 1.0, %v7482_v24  ;;  %v10413_v24 = vld [vmem:[%s12502_s7 + $0x30] sm:$0xff] (%p4396_p0)  ;;  %12744 = vst [vmem:[#allocation21_spill] sm:$0xff] (%p4396_p0), %v10462_v32 }
 0x70f   : > { %v4535_v28 = vadd.f32 1.0, %v7484_v33  ;;  %v10418_v33 = vld [vmem:[%s12503_s8 + $0x78] sm:$0xff] (%p4396_p0) }
 0x710   : > { %7485 = vrcp.f32 %v4534_v20  ;;  %v4547_v61 = vand.u32 2147483648, %v4534_v20  ;;  %v4545_v38 = vand.u32 2147483647, %v4534_v20  ;;  %vm4541_vm4 = vweird.f32 %v4534_v20  ;;  %4772 = vmatpush.msra.mxu3 (%p4396_p0), %v10418_v33 }
 0x711   : > { %7487 = vrcp.f32 %v4535_v28  ;;  %vm4556_vm7 = vweird.f32 %v4535_v28  ;;  %v4562_v47 = vand.u32 2147483648, %v4535_v28  ;;  %v4560_v49 = vand.u32 2147483647, %v4535_v28 }
 0x712   : > { %v4548_v43 = vor.u32 1.1754944e-38, %v4547_v61  ;;  %vm4546_vm6 = vcmp.eq.f32.partialorder %v4545_v38, 8.507059e+37  ;;  %v10486_v61 = vld [vmem:[%s12502_s7 + $0x38] sm:$0xff] (%p4396_p0)  ;;  %v10494_v38 = vld [vmem:[#allocation2 + $0xb0] sm:$0xff] (%p4396_p0) }
 0x713   : > { %v4563_v52 = vor.u32 1.1754944e-38, %v4562_v47  ;;  %vm4561_vm10 = vcmp.eq.f32.partialorder %v4560_v49, 8.507059e+37  ;;  %12746 = vst [vmem:[#allocation23_spill] sm:$0xff] (%p4396_p0), %v10486_v61  ;;  %v10550_v47 = vld [vmem:[%s12503_s8 + $0x128] sm:$0xff] (%p4396_p0)  ;;  %v10563_v49 = vld [vmem:[%s12502_s7 + $0xb8] sm:$0xff] (%p4396_p0) }
 0x714   :  { %12753 = vst [vmem:[#allocation30_spill] sm:$0xff] (%p4396_p0), %v10563_v49 }
 0x716   : > { %v7486_v29 = vpop.eup %7485 }
 0x717   : > { %v7488_v27 = vpop.eup %7487  ;;  %v4537_v36 = vmul.f32 %v7486_v29, %v4534_v20  ;;  %vm4542_vm3 = vweird.f32 %v7486_v29  ;;  %v10426_v20 = vld [vmem:[%s12502_s7 + $0x118] sm:$0xff] (%p4396_p0) }
 0x718   : > { %v4552_v31 = vmul.f32 %v7488_v27, %v4535_v28  ;;  %vm4543_vm5 = vmor %vm4541_vm4, %vm4542_vm3  ;;  %vm4557_vm8 = vweird.f32 %v7488_v27  ;;  %12740 = vst [vmem:[#allocation17_spill] sm:$0xff] (%p4396_p0), %v10426_v20  ;;  %v10433_v28 = vld [vmem:[%s12502_s7 + $0x68] sm:$0xff] (%p4396_p0)  ;;  %4687 = vmatpush.msra.mxu2 (%p4396_p0), %v10426_v20  ;;  %v10676_v20 = vld [vmem:[%s12502_s7 + $0x40] sm:$0xff] (%p4396_p0) }
 0x719   : > { %v4538_v39 = vsub.f32 1.0, %v4537_v36  ;;  %vm4558_vm9 = vmor %vm4556_vm7, %vm4557_vm8  ;;  %12741 = vst [vmem:[#allocation18_spill] sm:$0xff] (%p4396_p0), %v10433_v28  ;;  %v10448_v36 = vld [vmem:[%s12503_s8 + $0x60] sm:$0xff] (%p4396_p0)  ;;  %4671 = vmatpush.msra.mxu1 (%p4396_p0), %v10433_v28 }
 0x71a   : > { %v4553_v34 = vsub.f32 1.0, %v4552_v31  ;;  %v10457_v31 = vld [vmem:[%s12502_s7 + $0x50] sm:$0xff] (%p4396_p0)  ;;  %4773 = vmatpush.msra.mxu3 (%p4396_p0), %v10448_v36  ;;  %12764 = vst [vmem:[#allocation40_spill] sm:$0xff] (%p4396_p0), %v10676_v20 }
 0x71b   : > { %v4539_v37 = vmul.f32 %v7486_v29, %v4538_v39  ;;  %12743 = vst [vmem:[#allocation20_spill] sm:$0xff] (%p4396_p0), %v10457_v31  ;;  %v10467_v39 = vld [vmem:[%s12502_s7] sm:$0xff] (%p4396_p0)  ;;  %4672 = vmatpush.msra.mxu1 (%p4396_p0), %v10457_v31 }
 0x71c   : > { %v4554_v40 = vmul.f32 %v7488_v27, %v4553_v34  ;;  %v10472_v34 = vld [vmem:[%s12503_s8 + $0x48] sm:$0xff] (%p4396_p0) }
 0x71d   : > { %v4540_v42 = vadd.f32 %v7486_v29, %v4539_v37  ;;  %12745 = vst [vmem:[#allocation22_spill] sm:$0xff] (%p4396_p0), %v10472_v34  ;;  %v10491_v37 = vld [vmem:[%s12503_s8 + $0x30] sm:$0xff] (%p4396_p0)  ;;  %4774 = vmatpush.msra.mxu3 (%p4396_p0), %v10472_v34  ;;  %4673 = vmatpush.msra.mxu1 (%p4396_p0), %v10486_v61 }
 0x71e   : > { %v4555_v46 = vadd.f32 %v7488_v27, %v4554_v40  ;;  %12747 = vst [vmem:[#allocation24_spill] sm:$0xff] (%p4396_p0), %v10491_v37  ;;  %v10502_v40 = vld [vmem:[%s12503_s8 + $0x158] sm:$0xff] (%p4396_p0)  ;;  %v10721_v34 = vld [vmem:[%s12503_s8 + $0x50] sm:$0xff] (%p4396_p0) }
 0x71f   : > { %v4544_v25 = vsel %vm4543_vm5, %v7486_v29, %v4540_v42  ;;  %v10438_v29 = vld [vmem:[%s12502_s7 + $0x100] sm:$0xff] (%p4396_p0)  ;;  %v10513_v42 = vld [vmem:[%s12503_s8 + $0x18] sm:$0xff] (%p4396_p0)  ;;  %4775 = vmatpush.msra.mxu3 (%p4396_p0), %v10491_v37  ;;  %v10702_v37 = vld [vmem:[%s12503_s8 + $0x68] sm:$0xff] (%p4396_p0) }
 0x720   : > { %v4549_v45 = vsel %vm4546_vm6, %v4548_v43, %v4544_v25  ;;  %v4559_v51 = vsel %vm4558_vm9, %v7488_v27, %v4555_v46  ;;  %12742 = vst [vmem:[#allocation19_spill] sm:$0xff] (%p4396_p0), %v10438_v29  ;;  %v10443_v27 = vld [vmem:[%s12502_s7 + $0x18] sm:$0xff] (%p4396_p0)  ;;  %4688 = vmatpush.msra.mxu2 (%p4396_p0), %v10438_v29  ;;  %v10519_v43 = vld [vmem:[%s12502_s7 + $0xd0] sm:$0xff] (%p4396_p0)  ;;  %v10525_v25 = vld [vmem:[%s12503_s8 + $0x140] sm:$0xff] (%p4396_p0) }
 0x721   : > { %v4566_v48 = vmul.f32 %v4549_v45, %v4524_v41  ;;  %v4564_v53 = vsel %vm4561_vm10, %v4563_v52, %v4559_v51  ;;  %v10507_v41 = vld [vmem:[%s12502_s7 + $0x20] sm:$0xff] (%p4396_p0)  ;;  %12749 = vst [vmem:[#allocation26_spill] sm:$0xff] (%p4396_p0), %v10513_v42  ;;  %v10544_v46 = vld [vmem:[%s12503_s8 + $0x178] sm:$0xff] (%p4396_p0)  ;;  %4776 = vmatpush.msra.mxu3 (%p4396_p0), %v10513_v42  ;;  %v12519_v51 = vmov (%p4396_p0), 0.0   ;;  %v10577_v52 = vld [vmem:[%s12503_s8 + $0x148] sm:$0xff] (%p4396_p0) }
 0x722   : > { %v4569_v54 = vsub.f32 1.0, %v4564_v53  ;;  %v4571_v57 = vmul.f32 %v7771_v26, %v4564_v53  ;;  %4689 = vmatpush.msra.mxu2 (%p4396_p0), %v10462_v32  ;;  %12748 = vst [vmem:[#allocation25_spill] sm:$0xff] (%p4396_p0), %v10507_v41  ;;  %v10538_v45 = vld [vmem:[%s12503_s8] sm:$0xff] (%p4396_p0)  ;;  %4674 = vmatpush.msra.mxu1 (%p4396_p0), %v10507_v41  ;;  %v10579_v53 = vld [vmem:[#allocation2 + $0xb8] sm:$0xff] (%p4396_p0)  ;;  %v10644_v32 = vld [vmem:[%s12503_s8 + $0xb0] sm:$0xff] (%p4396_p0) }
 0x723   : > { %v4567_v50 = vadd.f32 %v4566_v48, %v4409_v44  ;;  %12750 = vst [vmem:[#allocation27_spill] sm:$0xff] (%p4396_p0), %v10519_v43  ;;  %v10530_v44 = vld [vmem:[%s12502_s7 + $0x8] sm:$0xff] (%p4396_p0)  ;;  %v10558_v48 = vld [vmem:[%s12503_s8 + $0x160] sm:$0xff] (%p4396_p0)  ;;  %4777 = vmatpush.msra.mxu3 (%p4396_p0), %v10538_v45  ;;  %v10658_v29 = vld [vmem:[%s12502_s7 + $0x58] sm:$0xff] (%p4396_p0) }
 0x724   :  { %12751 = vst [vmem:[#allocation28_spill] sm:$0xff] (%p4396_p0), %v10530_v44  ;;  %4690 = vmatpush.msra.mxu2 (%p4396_p0), %v10519_v43  ;;  %4675 = vmatpush.msra.mxu1 (%p4396_p0), %v10530_v44  ;;  %v10633_v43 = vld [vmem:[%s12503_s8 + $0x100] sm:$0xff] (%p4396_p0) }
 0x725   : > { %7489 = vtanh.f32 %v4567_v50  ;;  %12752 = vst [vmem:[#allocation29_spill] sm:$0xff] (%p4396_p0), %v10538_v45  ;;  %v10569_v50 = vld [vmem:[%s12503_s8 + $0x110] sm:$0xff] (%p4396_p0)  ;;  %4778 = vmatmul.f32.vlgmr.msra.gmra.mxu3 (%p4396_p0), %v12519_v51  ;;  %7359 = vmatmul.msk.f32.vlgmr.msra.gmra.mxu1 (%p4396_p0), %vm1429_vm2, %v10494_v38  ;;  %v10612_v51 = vld [vmem:[%s12502_s7 + $0x88] sm:$0xff] (%p4396_p0)  ;;  %v10663_v45 = vld [vmem:[%s12503_s8 + $0x98] sm:$0xff] (%p4396_p0) }
 0x726   :  { %4808 = vmatpush.msrb.mxu1 (%p4396_p0), %v10544_v46  ;;  %4691 = vmatpush.msra.mxu2 (%p4396_p0), %v10563_v49  ;;  %12756 = vst [vmem:[#allocation33_spill] sm:$0xff] (%p4396_p0), %v10612_v51  ;;  %v10624_v49 = vld [vmem:[%s12503_s8 + $0xc8] sm:$0xff] (%p4396_p0)  ;;  %v10683_v42 = vld [vmem:[%s12503_s8 + $0x80] sm:$0xff] (%p4396_p0) }
 0x727   :  { %7371 = vmatpush.msk.msrb.mxu3 (%p4396_p0), %vm2317_vm1, %v10287_v3  ;;  %12758 = vst [vmem:[#allocation35_spill] sm:$0xff] (%p4396_p0), %v10633_v43  ;;  %v12760_v3 = vmov (%p4396_p0), 0.0  }
 0x728   :  { %4809 = vmatpush.msrb.mxu1 (%p4396_p0), %v10558_v48  ;;  %12762 = vst [vmem:[#allocation38_spill] sm:$0xff] (%p4396_p0), %v10658_v29 }
 0x729   :  { %4960 = vmatpush.msrb.mxu3 (%p4396_p0), %v10294_v4  ;;  %v10671_v4 = vld [vmem:[%s12503_s8 + $0xd0] sm:$0xff] (%p4396_p0) }
 0x72a   :  { %4810 = vmatpush.msrb.mxu1 (%p4396_p0), %v10577_v52  ;;  %12763 = vst [vmem:[#allocation39_spill] sm:$0xff] (%p4396_p0), %v10671_v4 }
 0x72b   : > { %v7490_v55 = vpop.eup %7489  ;;  %4961 = vmatpush.msrb.mxu3 (%p4396_p0), %v10313_v7  ;;  %v10715_v7 = vld [vmem:[%s12502_s7 + $0x10] sm:$0xff] (%p4396_p0) }
 0x72c   : > { %v4570_v56 = vmul.f32 %v7490_v55, %v4569_v54  ;;  %v10584_v54 = vld [vmem:[%s12503_s8 + $0xf8] sm:$0xff] (%p4396_p0)  ;;  %v10591_v55 = vld [vmem:[%s12502_s7 + $0xa0] sm:$0xff] (%p4396_p0)  ;;  %12768 = vst [vmem:[#allocation44_spill] sm:$0xff] (%p4396_p0), %v10715_v7 }
 0x72d   :  { %4398 = sbr.rel (!%p4396_p0) target bundleno = 1629 (0x65d), region = 96  ;;  %12754 = vst [vmem:[#allocation31_spill] sm:$0xff] (%p4396_p0), %v10591_v55  ;;  %4692 = vmatpush.msra.mxu2 (%p4396_p0), %v10591_v55  ;;  %v10639_v55 = vld [vmem:[%s12502_s7 + $0x70] sm:$0xff] (%p4396_p0)  ;;  %4781 = vmatmul.f32.gmra.mxu3 (%p4396_p0), %v12760_v3 }
 0x72e   : > { %v10231_v26 = vadd.f32 %v4571_v57, %v4570_v56   ;;  %v10597_v56 = vld [vmem:[%s12503_s8 + $0x130] sm:$0xff] (%p4396_p0)  ;;  %v10604_v57 = vld [vmem:[%s12503_s8 + $0xe0] sm:$0xff] (%p4396_p0)  ;;  %12759 = vst [vmem:[#allocation36_spill] sm:$0xff] (%p4396_p0), %v10639_v55  ;;  %7360 = vmatmul.msk.f32.gmra.mxu1 (%p4396_p0), %vm1429_vm2, %v10579_v53  ;;  %4962 = vmatpush.msrb.mxu3 (%p4396_p0), %v10331_v10  ;;  %v10735_v10 = vld [vmem:[%s12503_s8 + $0x38] sm:$0xff] (%p4396_p0) }
 0x72f   :  { %12755 = vst [vmem:[#allocation32_spill] sm:$0xff] (%p4396_p0), %v10597_v56  ;;  %4811 = vmatpush.msrb.mxu1 (%p4396_p0), %v10597_v56  ;;  %4693 = vmatpush.msra.mxu2 (%p4396_p0), %v10612_v51  ;;  %v10653_v51 = vld [vmem:[%s12503_s8 + $0xe8] sm:$0xff] (%p4396_p0) }
 0x730   : > { %12725 = vst [vmem:[#allocation5_spill] sm:$0xff] %v10231_v26  ;;  %v12727_v58 = vmov %v10231_v26  ;;  %4963 = vmatpush.msrb.mxu3 (%p4396_p0), %v10349_v13  ;;  %v10750_v13 = vld [vmem:[%s12503_s8 + $0x20] sm:$0xff] (%p4396_p0) }
 0x731   : > { %v12728_v26 = vmov %v12727_v58  ;;  %v10618_v58 = vld [vmem:[%s12503_s8 + $0x118] sm:$0xff] (%p4396_p0)  ;;  %12761 = vst [vmem:[#allocation37_spill] sm:$0xff] (%p4396_p0), %v10653_v51  ;;  %4694 = vmatpush.msra.mxu2 (%p4396_p0), %v10639_v55 }
 0x732   :  { %v10252_v26 = vld [vmem:[%s12502_s7 + $0x108] sm:$0xff]  ;;  %12757 = vst [vmem:[#allocation34_spill] sm:$0xff] %v10618_v58  ;;  %4812 = vmatpush.msrb.mxu1 %v10618_v58  ;;  %v10691_v55 = vld [vmem:[%s12503_s8 + $0xb8] sm:$0xff]  ;;  %4964 = vmatpush.msrb.mxu3 %v10367_v16  ;;  %v10773_v16 = vld [vmem:[%s12503_s8 + $0x40] sm:$0xff] }
 0x733   :  { %12730 = vst [vmem:[#allocation7_spill] sm:$0xff] %v10252_v26  ;;  %4641 = vmatpush.msra.mxu0 %v10252_v26  ;;  %4695 = vmatpush.msra.mxu2 %v10658_v29  ;;  %v10710_v29 = vld [vmem:[%s12503_s8 + $0xa0] sm:$0xff] }
 0x734   :  { %4813 = vmatpush.msrb.mxu1 %v10633_v43  ;;  %12765 = vst [vmem:[#allocation41_spill] sm:$0xff] %v10691_v55  ;;  %4965 = vmatpush.msrb.mxu3 %v10385_v19 }
 0x735   :  { %4642 = vmatpush.msra.mxu0 %v10265_v63  ;;  %4696 = vmatpush.msra.mxu2 %v10676_v20  ;;  %12767 = vst [vmem:[#allocation43_spill] sm:$0xff] %v10710_v29  ;;  %v10729_v20 = vld [vmem:[%s12503_s8 + $0x88] sm:$0xff] }
 0x736   :  { %4814 = vmatpush.msrb.mxu1 %v10653_v51  ;;  %12769 = vst [vmem:[#allocation45_spill] sm:$0xff] %v10729_v20  ;;  %4966 = vmatpush.msrb.mxu3 %v10403_v30 }
 0x737   :  { %4643 = vmatpush.msra.mxu0 %v10277_v1  ;;  %4697 = vmatpush.msra.mxu2 %v10696_v23  ;;  %12770 = vst [vmem:[#allocation46_spill] sm:$0xff] %v10735_v10  ;;  %v10743_v23 = vld [vmem:[%s12503_s8 + $0x70] sm:$0xff] }
 0x738   :  { %4815 = vmatpush.msrb.mxu1 %v10671_v4  ;;  %12771 = vst [vmem:[#allocation47_spill] sm:$0xff] %v10743_v23  ;;  %4967 = vmatpush.msrb.mxu3 %v10433_v28 }
 0x739   :  { %4644 = vmatpush.msra.mxu0 %v10299_v5  ;;  %4698 = vmatpush.msra.mxu2 %v10715_v7  ;;  %12772 = vst [vmem:[#allocation48_spill] sm:$0xff] %v10750_v13  ;;  %v10758_v7 = vld [vmem:[%s12503_s8 + $0x58] sm:$0xff] }
 0x73a   :  { %4816 = vmatpush.msrb.mxu1 %v10691_v55  ;;  %7362 = vmatmul.msk.f32.vlgmr.msra.gmra.mxu2 %vm1429_vm2, %v10494_v38  ;;  %12773 = vst [vmem:[#allocation49_spill] sm:$0xff] %v10758_v7 }
 0x73b   :  { %4645 = vmatpush.msra.mxu0 %v10318_v8  ;;  %7368 = vmatpush.msk.msrb.mxu2 %vm2317_vm1, %v10242_v59  ;;  %12775 = vst [vmem:[#allocation51_spill] sm:$0xff] %v10773_v16  ;;  %v10782_v59 = vld [vmem:[%s12503_s8 + $0x28] sm:$0xff] }
 0x73c   :  { %4817 = vmatpush.msrb.mxu1 %v10710_v29  ;;  %12776 = vst [vmem:[#allocation52_spill] sm:$0xff] %v10782_v59  ;;  %4968 = vmatpush.msrb.mxu3 %v10457_v31 }
 0x73d   :  { %4646 = vmatpush.msra.mxu0 %v10336_v11  ;;  %4937 = vmatpush.msrb.mxu2 %v10252_v26  ;;  %v10790_v26 = vld [vmem:[%s12503_s8 + $0x10] sm:$0xff] }
 0x73e   :  { %4818 = vmatpush.msrb.mxu1 %v10729_v20  ;;  %12777 = vst [vmem:[#allocation53_spill] sm:$0xff] %v10790_v26  ;;  %4969 = vmatpush.msrb.mxu3 %v10486_v61 }
 0x73f   :  { %4647 = vmatpush.msra.mxu0 %v10354_v14  ;;  %4938 = vmatpush.msrb.mxu2 %v10265_v63 }
 0x740   :  { %4819 = vmatpush.msrb.mxu1 %v10743_v23  ;;  %4970 = vmatpush.msrb.mxu3 %v10507_v41 }
 0x741   :  { %4648 = vmatpush.msra.mxu0 %v10372_v17  ;;  %4939 = vmatpush.msrb.mxu2 %v10277_v1 }
 0x742   :  { %4820 = vmatpush.msrb.mxu1 %v10758_v7  ;;  %7363 = vmatmul.msk.f32.gmra.mxu2 %vm1429_vm2, %v10579_v53 }
 0x743   :  { %4649 = vmatpush.msra.mxu0 %v10390_v21  ;;  %4940 = vmatpush.msrb.mxu2 %v10299_v5 }
 0x744   :  { %4821 = vmatpush.msrb.mxu1 %v10773_v16  ;;  %4971 = vmatpush.msrb.mxu3 %v10530_v44 }
 0x745   :  { %4650 = vmatpush.msra.mxu0 %v10413_v24  ;;  %4941 = vmatpush.msrb.mxu2 %v10318_v8 }
 0x746   :  { %4822 = vmatpush.msrb.mxu1 %v10782_v59  ;;  %5048 = vmatpush.msra.mxu3 %v10544_v46 }
 0x747   :  { %4651 = vmatpush.msra.mxu0 %v10443_v27  ;;  %4942 = vmatpush.msrb.mxu2 %v10336_v11 }
 0x748   :  { %4823 = vmatpush.msrb.mxu1 %v10790_v26  ;;  %5049 = vmatpush.msra.mxu3 %v10558_v48 }
 0x749   :  { %4652 = vmatpush.msra.mxu0 %v10467_v39  ;;  %4824 = vmatmul.f32.vlgmr.msrb.gmra.mxu1 %v12760_v3 }
 0x74a   :  { %7356 = vmatmul.msk.f32.vlgmr.msra.gmra.mxu0 %vm1429_vm2, %v10494_v38  ;;  %v10765_v38 = vld [vmem:[%s12503_s8 + $0x8] sm:$0xff]  ;;  %5025 = vmatpush.msra.mxu1 %v10481_v35 }
 0x74b   :  { %4785 = vmatpush.msrb.mxu0 %v10481_v35  ;;  %12774 = vst [vmem:[#allocation50_spill] sm:$0xff] %v10765_v38  ;;  %5050 = vmatpush.msra.mxu3 %v10577_v52 }
 0x74c   :  { %5026 = vmatpush.msra.mxu1 %v10502_v40  ;;  %4943 = vmatpush.msrb.mxu2 %v10354_v14 }
 0x74d   :  { %4786 = vmatpush.msrb.mxu0 %v10502_v40  ;;  %5051 = vmatpush.msra.mxu3 %v10597_v56  ;;  %v12788_v56 = vld [vmem:[#allocation9_spill] sm:$0xff] }
 0x74e   :  { %5027 = vmatpush.msra.mxu1 %v10525_v25  ;;  %4944 = vmatpush.msrb.mxu2 %v10372_v17 }
 0x74f   :  { %4787 = vmatpush.msrb.mxu0 %v10525_v25  ;;  %5052 = vmatpush.msra.mxu3 %v10618_v58  ;;  %v12785_v58 = vld [vmem:[#allocation21_spill] sm:$0xff] }
 0x750   :  { %5028 = vmatpush.msra.mxu1 %v10550_v47  ;;  %4945 = vmatpush.msrb.mxu2 %v10390_v21 }
 0x751   :  { %4788 = vmatpush.msrb.mxu0 %v10550_v47  ;;  %4827 = vmatmul.f32.gmra.mxu1 %v12760_v3 }
 0x752   :  { %7357 = vmatmul.msk.f32.gmra.mxu0 %vm1429_vm2, %v10579_v53  ;;  %5029 = vmatpush.msra.mxu1 %v10569_v50  ;;  %v12779_v53 = vld [vmem:[#allocation24_spill] sm:$0xff] }
 0x753   :  { %4789 = vmatpush.msrb.mxu0 %v10569_v50  ;;  %5053 = vmatpush.msra.mxu3 %v10633_v43  ;;  %v12784_v43 = vld [vmem:[#allocation19_spill] sm:$0xff] }
 0x754   :  { %5030 = vmatpush.msra.mxu1 %v10584_v54  ;;  %4946 = vmatpush.msrb.mxu2 %v10413_v24 }
 0x755   :  { %4790 = vmatpush.msrb.mxu0 %v10584_v54  ;;  %5054 = vmatpush.msra.mxu3 %v10653_v51  ;;  %v12782_v51 = vld [vmem:[#allocation17_spill] sm:$0xff] }
 0x756   :  { %5031 = vmatpush.msra.mxu1 %v10604_v57  ;;  %4947 = vmatpush.msrb.mxu2 %v10443_v27 }
 0x757   :  { %4791 = vmatpush.msrb.mxu0 %v10604_v57  ;;  %5055 = vmatpush.msra.mxu3 %v10671_v4  ;;  %v12780_v4 = vld [vmem:[#allocation16_spill] sm:$0xff] }
 0x758   :  { %5032 = vmatpush.msra.mxu1 %v10624_v49  ;;  %4948 = vmatpush.msrb.mxu2 %v10467_v39 }
 0x759   :  { %4792 = vmatpush.msrb.mxu0 %v10624_v49  ;;  %5056 = vmatpush.msra.mxu3 %v10691_v55  ;;  %v12781_v55 = vld [vmem:[#allocation26_spill] sm:$0xff] }
 0x75a   :  { %5033 = vmatpush.msra.mxu1 %v10644_v32  ;;  %7374 = vmatpush.msk.msra.mxu2 %vm2317_vm1, %v12780_v4 }
 0x75b   :  { %4793 = vmatpush.msrb.mxu0 %v10644_v32  ;;  %5057 = vmatpush.msra.mxu3 %v10710_v29  ;;  %v12783_v29 = vld [vmem:[#allocation29_spill] sm:$0xff] }
 0x75c   :  { %5034 = vmatpush.msra.mxu1 %v10663_v45  ;;  %4983 = vmatpush.msra.mxu2 %v12782_v51 }
 0x75d   :  { %4794 = vmatpush.msrb.mxu0 %v10663_v45  ;;  %5058 = vmatpush.msra.mxu3 %v10729_v20  ;;  %v12786_v20 = vld [vmem:[#allocation8_spill] sm:$0xff] }
 0x75e   :  { %5035 = vmatpush.msra.mxu1 %v10683_v42  ;;  %4984 = vmatpush.msra.mxu2 %v12784_v43 }
 0x75f   :  { %4795 = vmatpush.msrb.mxu0 %v10683_v42  ;;  %5059 = vmatpush.msra.mxu3 %v10743_v23  ;;  %v12787_v23 = vld [vmem:[#allocation27_spill] sm:$0xff] }
 0x760   :  { %5036 = vmatpush.msra.mxu1 %v10702_v37  ;;  %4985 = vmatpush.msra.mxu2 %v12785_v58 }
 0x761   :  { %4796 = vmatpush.msrb.mxu0 %v10702_v37  ;;  %5060 = vmatpush.msra.mxu3 %v10758_v7  ;;  %v12789_v7 = vld [vmem:[#allocation30_spill] sm:$0xff] }
 0x762   :  { %5037 = vmatpush.msra.mxu1 %v10721_v34  ;;  %4986 = vmatpush.msra.mxu2 %v12787_v23 }
 0x763   :  { %4797 = vmatpush.msrb.mxu0 %v10721_v34  ;;  %5061 = vmatpush.msra.mxu3 %v10773_v16  ;;  %v12791_v16 = vld [vmem:[#allocation31_spill] sm:$0xff] }
 0x764   :  { %5038 = vmatpush.msra.mxu1 %v10735_v10  ;;  %4987 = vmatpush.msra.mxu2 %v12789_v7 }
 0x765   :  { %4798 = vmatpush.msrb.mxu0 %v10735_v10  ;;  %5062 = vmatpush.msra.mxu3 %v10782_v59  ;;  %v12793_v10 = vld [vmem:[#allocation33_spill] sm:$0xff]  ;;  %v12794_v59 = vld [vmem:[#allocation12_spill] sm:$0xff] }
 0x766   :  { %5039 = vmatpush.msra.mxu1 %v10750_v13  ;;  %4988 = vmatpush.msra.mxu2 %v12791_v16 }
 0x767   :  { %4799 = vmatpush.msrb.mxu0 %v10750_v13  ;;  %v12790_v13 = vld [vmem:[#allocation10_spill] sm:$0xff]  ;;  %5063 = vmatpush.msra.mxu3 %v10790_v26 }
 0x768   :  { %5040 = vmatpush.msra.mxu1 %v10765_v38  ;;  %4989 = vmatpush.msra.mxu2 %v12793_v10  ;;  %v12797_v26 = vld [vmem:[#allocation38_spill] sm:$0xff] }
 0x769   :  { %4800 = vmatpush.msrb.mxu0 %v10765_v38  ;;  %v12792_v38 = vld [vmem:[#allocation11_spill] sm:$0xff] }
 0x76a   :  { %4801 = vmatmul.f32.vlgmr.msrb.gmra.mxu0 %v12760_v3  ;;  %7387 = vmatpush.msk.msrb.mxu1 %vm2317_vm1, %v12780_v4  ;;  %v12795_v4 = vld [vmem:[#allocation36_spill] sm:$0xff] }
 0x76b   :  { %5002 = vmatpush.msra.mxu0 %v10247_v60  ;;  %4990 = vmatpush.msra.mxu2 %v12795_v4 }
 0x76c   :  { %5223 = vmatpush.msrb.mxu1 %v12782_v51  ;;  %v12798_v51 = vld [vmem:[#allocation40_spill] sm:$0xff] }
 0x76d   :  { %5003 = vmatpush.msra.mxu0 %v10260_v62  ;;  %4991 = vmatpush.msra.mxu2 %v12797_v26 }
 0x76e   :  { %5224 = vmatpush.msrb.mxu1 %v12784_v43  ;;  %v12799_v43 = vld [vmem:[#allocation42_spill] sm:$0xff] }
 0x76f   :  { %5004 = vmatpush.msra.mxu0 %v10270_v0  ;;  %4992 = vmatpush.msra.mxu2 %v12798_v51 }
 0x770   :  { %5225 = vmatpush.msrb.mxu1 %v12785_v58  ;;  %v12800_v58 = vld [vmem:[#allocation44_spill] sm:$0xff] }
 0x771   :  { %5005 = vmatpush.msra.mxu0 %v10282_v2  ;;  %4993 = vmatpush.msra.mxu2 %v12799_v43 }
 0x772   :  { %4804 = vmatmul.f32.gmra.mxu0 %v12760_v3  ;;  %v12778_v3 = vld [vmem:[#allocation22_spill] sm:$0xff]  ;;  %5226 = vmatpush.msrb.mxu1 %v12787_v23 }
 0x773   :  { %5006 = vmatpush.msra.mxu0 %v10304_v6  ;;  %4994 = vmatpush.msra.mxu2 %v12800_v58 }
 0x774   :  { %5227 = vmatpush.msrb.mxu1 %v12789_v7 }
 0x775   :  { %5007 = vmatpush.msra.mxu0 %v10323_v9 }
 0x776   :  { %5228 = vmatpush.msrb.mxu1 %v12791_v16 }
 0x777   :  { %5008 = vmatpush.msra.mxu0 %v10341_v12 }
 0x778   :  { %5229 = vmatpush.msrb.mxu1 %v12793_v10  ;;  %v10907_v10 = vld [vmem:[%s12504_s9] sm:$0x7] }
 0x779   :  { %5009 = vmatpush.msra.mxu0 %v10359_v15  ;;  %v10915_v16 = vperm.slane %v10907_v10, 0 }
 0x77a   :  { %5230 = vmatpush.msrb.mxu1 %v12795_v4 }
 0x77b   :  { %5010 = vmatpush.msra.mxu0 %v10377_v18  ;;  %12801 = vst [vmem:[#allocation22_spill] sm:$0xff] %v10915_v16 }
 0x77c   :  { %5231 = vmatpush.msrb.mxu1 %v12797_v26  ;;  %v10912_v26 = vld [vmem:[%s12505_s10] sm:$0x7] }
 0x77d   :  { %5011 = vmatpush.msra.mxu0 %v10395_v22 }
 0x77e   :  { %5232 = vmatpush.msrb.mxu1 %v12798_v51  ;;  %v10918_v51 = vperm.slane %v10912_v26, 0 }
 0x77f   :  { %5012 = vmatpush.msra.mxu0 %v10418_v33 }
 0x780   :  { %5233 = vmatpush.msrb.mxu1 %v12799_v43  ;;  %12802 = vst [vmem:[#allocation24_spill] sm:$0xff] %v10918_v51 }
 0x781   :  { %5013 = vmatpush.msra.mxu0 %v10448_v36 }
 0x782   :  { %5234 = vmatpush.msrb.mxu1 %v12800_v58 }
 0x783   :  { %5014 = vmatpush.msra.mxu0 %v12778_v3 }
 0x785   :  { %5015 = vmatpush.msra.mxu0 %v12779_v53 }
 0x787   :  { %5016 = vmatpush.msra.mxu0 %v12781_v55 }
 0x789   :  { %5017 = vmatpush.msra.mxu0 %v12783_v29 }
 0x78b   :  { %7384 = vmatpush.msk.msrb.mxu0 %vm2317_vm1, %v12786_v20 }
 0x78d   :  { %5200 = vmatpush.msrb.mxu0 %v12788_v56  ;;  %v12796_v56 = vld [vmem:[#allocation13_spill] sm:$0xff] }
 0x78f   :  { %5201 = vmatpush.msrb.mxu0 %v12790_v13 }
 0x791   :  { %5202 = vmatpush.msrb.mxu0 %v12792_v38 }
 0x793   :  { %5203 = vmatpush.msrb.mxu0 %v12794_v59 }
 0x795   :  { %5204 = vmatpush.msrb.mxu0 %v12796_v56 }
 0x797   :  { %5205 = vmatpush.msrb.mxu0 %v10385_v19 }
 0x799   :  { %5206 = vmatpush.msrb.mxu0 %v10403_v30  ;;  %v4925_v30 = vld [vmem:[#allocation2 + $0x170] sm:$0xff] }
 0x79a   :  { %7372 = vmatmul.msk.f32.vlgmr.msrb.gmra.mxu3 %vm1429_vm2, %v4925_v30  ;;  %7369 = vmatmul.msk.f32.vlgmr.msrb.gmra.mxu2 %vm1429_vm2, %v4925_v30 }
 0x79b   :  { %5207 = vmatpush.msrb.mxu0 %v10433_v28  ;;  %5242 = vmatpush.msrb.mxu3 %v10247_v60  ;;  %v10940_v60 = vperm.slane %v10912_v26, 1 }
 0x79d   :  { %5208 = vmatpush.msrb.mxu0 %v10457_v31  ;;  %5243 = vmatpush.msrb.mxu3 %v10260_v62  ;;  %12806 = vst [vmem:[#allocation29_spill] sm:$0xff] %v10940_v60 }
 0x79f   :  { %5209 = vmatpush.msrb.mxu0 %v10486_v61  ;;  %5244 = vmatpush.msrb.mxu3 %v10270_v0 }
 0x7a1   :  { %5210 = vmatpush.msrb.mxu0 %v10507_v41  ;;  %5245 = vmatpush.msrb.mxu3 %v10282_v2 }
 0x7a2   :  { %v4677_v19 = vpop.f32.mrf.mxu1 }
 0x7a3   :  { %5211 = vmatpush.msrb.mxu0 %v10530_v44  ;;  %5246 = vmatpush.msrb.mxu3 %v10304_v6 }
 0x7a5   :  { %5247 = vmatpush.msrb.mxu3 %v10323_v9 }
 0x7a7   :  { %5248 = vmatpush.msrb.mxu3 %v10341_v12 }
 0x7a8   :  { %v4779_v58 = vpop.f32.mrf.mxu3 }
 0x7a9   :  { %v4780_v7 = vadd.f32 %v4779_v58, %v10918_v51  ;;  %5249 = vmatpush.msrb.mxu3 %v10359_v15 }
 0x7ab   :  { %5250 = vmatpush.msrb.mxu3 %v10377_v18 }
 0x7ad   :  { %5251 = vmatpush.msrb.mxu3 %v10395_v22 }
 0x7af   :  { %5252 = vmatpush.msrb.mxu3 %v10418_v33  ;;  %v10988_v33 = vperm.slane %v10907_v10, 2 }
 0x7b0   :  { %v4782_v31 = vpop.f32.mrf.mxu3 }
 0x7b1   :  { %v4783_v28 = vadd.f32 %v4782_v31, %v10918_v51  ;;  %v10934_v31 = vperm.slane %v10907_v10, 1  ;;  %5253 = vmatpush.msrb.mxu3 %v10448_v36 }
 0x7b3   :  { %12805 = vst [vmem:[#allocation26_spill] sm:$0xff] %v10934_v31  ;;  %v4678_v62 = vadd.f32 %v4677_v19, %v10934_v31  ;;  %5254 = vmatpush.msrb.mxu3 %v12778_v3 }
 0x7b5   :  { %5255 = vmatpush.msrb.mxu3 %v12779_v53 }
 0x7b7   :  { %5256 = vmatpush.msrb.mxu3 %v12781_v55 }
 0x7b9   :  { %5257 = vmatpush.msrb.mxu3 %v12783_v29 }
 0x7c7   :  { %v4654_v4 = vpop.f32.mrf.mxu0 }
 0x7c8   :  { %v4655_v43 = vadd.f32 %v4654_v4, %v10915_v16  ;;  %v12803_v4 = vld [vmem:[#allocation6_spill] sm:$0xff] }
 0x7c9   :  { %7381 = vmatpush.msk.msrb.mxu2 %vm2317_vm1, %v12803_v4 }
 0x7ca   :  { %v4831_v23 = vadd.f32 %v4780_v7, %v4655_v43  ;;  %v4680_v43 = vpop.f32.mrf.mxu1 }
 0x7cb   :  { %v4681_v9 = vadd.f32 %v4680_v43, %v10934_v31 }
 0x7cc   :  { %v7364_v41 = vmul.f32 -1.442695, %v4831_v23  ;;  %v12804_v23 = vld [vmem:[#allocation7_spill] sm:$0xff] }
 0x7cd   :  { %5177 = vmatpush.msrb.mxu2 %v12804_v23 }
 0x7ce   :  { %7492 = vpow2.f32 %v7364_v41 }
 0x7cf   :  { %v4657_v44 = vpop.f32.mrf.mxu0  ;;  %5178 = vmatpush.msrb.mxu2 %v10265_v63 }
 0x7d0   :  { %v4658_v61 = vadd.f32 %v4657_v44, %v10915_v16 }
 0x7d1   :  { %5179 = vmatpush.msrb.mxu2 %v10277_v1 }
 0x7d2   :  { %v4833_v56 = vadd.f32 %v4783_v28, %v4658_v61  ;;  %v4926_v28 = vld [vmem:[#allocation2 + $0x178] sm:$0xff] }
 0x7d3   :  { %7373 = vmatmul.msk.f32.gmra.mxu3 %vm1429_vm2, %v4926_v28  ;;  %7370 = vmatmul.msk.f32.gmra.mxu2 %vm1429_vm2, %v4926_v28 }
 0x7d4   :  { %v7493_v58 = vpop.eup %7492  ;;  %v7366_v7 = vmul.f32 -1.442695, %v4833_v56  ;;  %5180 = vmatpush.msrb.mxu2 %v10299_v5 }
 0x7d5   :  { %v10931_v41 = vadd.f32 1.0, %v7493_v58 }
 0x7d6   :  { %7494 = vpow2.f32 %v7366_v7  ;;  %5181 = vmatpush.msrb.mxu2 %v10318_v8 }
 0x7d7   :  { %7496 = vrcp.f32 %v10931_v41  ;;  %v4862_v43 = vand.u32 2147483648, %v10931_v41  ;;  %vm4856_vm12 = vweird.f32 %v10931_v41  ;;  %v4860_v18 = vand.u32 2147483647, %v10931_v41 }
 0x7d8   :  { %5182 = vmatpush.msrb.mxu2 %v10336_v11 }
 0x7d9   :  { %vm4861_vm14 = vcmp.eq.f32.partialorder %v4860_v18, 8.507059e+37 }
 0x7da   :  { %5183 = vmatpush.msrb.mxu2 %v10354_v14 }
 0x7db   :  { %7375 = vmatmul.msk.f32.vlgmr.msra.gmra.mxu2 %vm1429_vm2, %v4925_v30  ;;  %v10969_v30 = vperm.slane %v10912_v26, 2 }
 0x7dc   :  { %v7495_v44 = vpop.eup %7494  ;;  %5184 = vmatpush.msrb.mxu2 %v10372_v17 }
 0x7dd   :  { %v7497_v2 = vpop.eup %7496  ;;  %v10952_v56 = vadd.f32 1.0, %v7495_v44 }
 0x7de   :  { %v4852_v58 = vmul.f32 %v7497_v2, %v10931_v41  ;;  %vm4857_vm11 = vweird.f32 %v7497_v2  ;;  %5185 = vmatpush.msrb.mxu2 %v10390_v21  ;;  %v4863_v41 = vor.u32 1.1754944e-38, %v4862_v43 }
 0x7df   :  { %7498 = vrcp.f32 %v10952_v56  ;;  %vm10977_vm13 = vmor %vm4856_vm12, %vm4857_vm11  ;;  %v4892_v10 = vand.u32 2147483648, %v10952_v56  ;;  %vm4886_vm0 = vweird.f32 %v10952_v56 }
 0x7e0   :  { %v4853_v7 = vsub.f32 1.0, %v4852_v58  ;;  %5186 = vmatpush.msrb.mxu2 %v10413_v24 }
 0x7e2   :  { %5187 = vmatpush.msrb.mxu2 %v10443_v27 }
 0x7e3   :  { %7376 = vmatmul.msk.f32.gmra.mxu2 %vm1429_vm2, %v4926_v28 }
 0x7e4   :  { %5188 = vmatpush.msrb.mxu2 %v10467_v39 }
 0x7e5   :  { %v7499_v15 = vpop.eup %7498 }
 0x7e6   :  { %v4882_v58 = vmul.f32 %v7499_v15, %v10952_v56  ;;  %5265 = vmatpush.msra.mxu2 %v10481_v35  ;;  %vm4887_vm15 = vweird.f32 %v7499_v15 }
 0x7e7   :  { %v4802_v61 = vpop.f32.mrf.mxu0  ;;  %vm4888_vm3 = vmor %vm4886_vm0, %vm4887_vm15 }
 0x7e8   :  { %v4803_v0 = vadd.f32 %v4802_v61, %v10940_v60  ;;  %v4854_v61 = vmul.f32 %v7497_v2, %v4853_v7  ;;  %5266 = vmatpush.msra.mxu2 %v10502_v40 }
 0x7ea   :  { %v4832_v19 = vadd.f32 %v4803_v0, %v4678_v62  ;;  %v4855_v0 = vadd.f32 %v7497_v2, %v4854_v61  ;;  %v4700_v61 = vpop.f32.mrf.mxu2  ;;  %5267 = vmatpush.msra.mxu2 %v10525_v25 }
 0x7ec   :  { %v7365_v6 = vmul.f32 -1.442695, %v4832_v19  ;;  %v4825_v19 = vpop.f32.mrf.mxu1  ;;  %v4859_v26 = vsel %vm10977_vm13, %v7497_v2, %v4855_v0  ;;  %v4701_v0 = vadd.f32 %v4700_v61, %v10988_v33  ;;  %5268 = vmatpush.msra.mxu2 %v10550_v47 }
 0x7ed   :  { %v4864_v2 = vsel %vm4861_vm14, %v4863_v41, %v4859_v26 }
 0x7ee   :  { %7500 = vpow2.f32 %v7365_v6  ;;  %5269 = vmatpush.msra.mxu2 %v10569_v50 }
 0x7ef   :  { %v4805_v62 = vpop.f32.mrf.mxu0 }
 0x7f0   :  { %v4806_v12 = vadd.f32 %v4805_v62, %v10940_v60  ;;  %v4883_v62 = vsub.f32 1.0, %v4882_v58  ;;  %5270 = vmatpush.msra.mxu2 %v10584_v54 }
 0x7f2   :  { %v4834_v44 = vadd.f32 %v4806_v12, %v4681_v9  ;;  %v4826_v12 = vadd.f32 %v4825_v19, %v10969_v30  ;;  %v4890_v19 = vand.u32 2147483647, %v10952_v56  ;;  %5271 = vmatpush.msra.mxu2 %v10604_v57 }
 0x7f4   :  { %v7501_v6 = vpop.eup %7500  ;;  %v7367_v22 = vmul.f32 -1.442695, %v4834_v44  ;;  %v4884_v44 = vmul.f32 %v7499_v15, %v4883_v62  ;;  %v4911_v28 = vmul.f32 %v4864_v2, %v4826_v12  ;;  %v4828_v43 = vpop.f32.mrf.mxu1  ;;  %vm4891_vm4 = vcmp.eq.f32.partialorder %v4890_v19, 8.507059e+37  ;;  %5272 = vmatpush.msra.mxu2 %v10624_v49 }
 0x7f5   :  { %v10981_v9 = vadd.f32 1.0, %v7501_v6  ;;  %v4829_v56 = vadd.f32 %v4828_v43, %v10969_v30  ;;  %v4703_v62 = vpop.f32.mrf.mxu2 }
 0x7f6   :  { %7502 = vpow2.f32 %v7367_v22  ;;  %v4885_v36 = vadd.f32 %v7499_v15, %v4884_v44  ;;  %v4893_v22 = vor.u32 1.1754944e-38, %v4892_v10  ;;  %v4913_v7 = vadd.f32 %v4911_v28, %v4701_v0  ;;  %5273 = vmatpush.msra.mxu2 %v10644_v32 }
 0x7f7   :  { %7504 = vrcp.f32 %v10981_v9  ;;  %v4877_v41 = vand.u32 2147483648, %v10981_v9  ;;  %v4875_v29 = vand.u32 2147483647, %v10981_v9  ;;  %v4704_v12 = vadd.f32 %v4703_v62, %v10988_v33 }
 0x7f8   :  { %v4889_v58 = vsel %vm4888_vm3, %v7499_v15, %v4885_v36  ;;  %vm4871_vm6 = vweird.f32 %v10981_v9  ;;  %5274 = vmatpush.msra.mxu2 %v10663_v45 }
 0x7f9   :  { %v4894_v26 = vsel %vm4891_vm4, %v4893_v22, %v4889_v58  ;;  %v4878_v36 = vor.u32 1.1754944e-38, %v4877_v41  ;;  %vm4876_vm8 = vcmp.eq.f32.partialorder %v4875_v29, 8.507059e+37 }
 0x7fa   :  { %v4912_v61 = vmul.f32 %v4894_v26, %v4829_v56  ;;  %5275 = vmatpush.msra.mxu2 %v10683_v42 }
 0x7fc   :  { %v7503_v3 = vpop.eup %7502  ;;  %v4914_v0 = vadd.f32 %v4912_v61, %v4704_v12  ;;  %5276 = vmatpush.msra.mxu2 %v10702_v37 }
 0x7fd   :  { %v7505_v18 = vpop.eup %7504  ;;  %v4850_v53 = vadd.f32 1.0, %v7503_v3 }
 0x7fe   :  { %v4867_v6 = vmul.f32 %v7505_v18, %v10981_v9  ;;  %vm4872_vm5 = vweird.f32 %v7505_v18  ;;  %5277 = vmatpush.msra.mxu2 %v10721_v34 }
 0x7ff   :  { %7506 = vrcp.f32 %v4850_v53  ;;  %vm4873_vm7 = vmor %vm4871_vm6, %vm4872_vm5  ;;  %v4907_v22 = vand.u32 2147483648, %v4850_v53  ;;  %vm4901_vm10 = vweird.f32 %v4850_v53 }
 0x800   :  { %v4868_v55 = vsub.f32 1.0, %v4867_v6  ;;  %7508 = vtanh.f32 %v4913_v7  ;;  %v4905_v6 = vand.u32 2147483647, %v4850_v53 }
 0x801   :  { %7510 = vtanh.f32 %v4914_v0  ;;  %v4908_v26 = vor.u32 1.1754944e-38, %v4907_v22  ;;  %v12829_v0 = vld [vmem:[#allocation51_spill] sm:$0xff] }
 0x802   :  { %v4869_v15 = vmul.f32 %v7505_v18, %v4868_v55  ;;  %vm4906_vm12 = vcmp.eq.f32.partialorder %v4905_v6, 8.507059e+37 }
 0x804   :  { %v4870_v44 = vadd.f32 %v7505_v18, %v4869_v15 }
 0x805   :  { %v7507_v2 = vpop.eup %7506 }
 0x806   :  { %v4897_v10 = vmul.f32 %v7507_v2, %v4850_v53  ;;  %v4874_v28 = vsel %vm4873_vm7, %v7505_v18, %v4870_v44  ;;  %v7509_v58 = vpop.eup %7508  ;;  %vm4902_vm9 = vweird.f32 %v7507_v2  ;;  %v12810_v44 = vld [vmem:[#allocation46_spill] sm:$0xff] }
 0x807   :  { %v4879_v19 = vsel %vm4876_vm8, %v4878_v36, %v4874_v28  ;;  %vm4903_vm11 = vmor %vm4901_vm10, %vm4902_vm9  ;;  %v7511_v53 = vpop.eup %7510  ;;  %5278 = vmatpush.msra.mxu2 %v12810_v44  ;;  %v12820_v36 = vld [vmem:[#allocation14_spill] sm:$0xff]  ;;  %v12827_v28 = vld [vmem:[#allocation49_spill] sm:$0xff] }
 0x808   :  { %v4898_v3 = vsub.f32 1.0, %v4897_v10  ;;  %v4917_v43 = vsub.f32 1.0, %v4879_v19  ;;  %v4921_v7 = vmul.f32 0.0, %v4879_v19  ;;  %v12825_v10 = vld [vmem:[#allocation47_spill] sm:$0xff]  ;;  %v12831_v19 = vld [vmem:[#allocation52_spill] sm:$0xff] }
 0x80a   :  { %v4919_v9 = vmul.f32 %v7509_v58, %v4917_v43  ;;  %v4899_v56 = vmul.f32 %v7507_v2, %v4898_v3  ;;  %v12833_v3 = vld [vmem:[#allocation53_spill] sm:$0xff] }
 0x80c   :  { %v11018_v18 = vadd.f32 %v4921_v7, %v4919_v9  ;;  %v4900_v55 = vadd.f32 %v7507_v2, %v4899_v56  ;;  %v5165_v56 = vld [vmem:[#allocation2 + $0x230] sm:$0xff] }
 0x80d   :  { %7382 = vmatmul.msk.f32.vlgmr.msrb.gmra.mxu2 %vm1429_vm2, %v5165_v56 }
 0x80e   :  { %5018 = vmatmul.f32.vlgmr.msra.gmra.mxu0 %v11018_v18  ;;  %5041 = vmatmul.f32.vlgmr.msra.gmra.mxu1 %v11018_v18  ;;  %v4904_v62 = vsel %vm4903_vm11, %v7507_v2, %v4900_v55  ;;  %v12818_v2 = vld [vmem:[#allocation13_spill] sm:$0xff] }
 0x80f   :  { %5064 = vmatmul.f32.vlgmr.msra.gmra.mxu3 %v11018_v18  ;;  %v4909_v41 = vsel %vm4906_vm12, %v4908_v26, %v4904_v62  ;;  %5288 = vmatpush.msra.mxu0 %v10544_v46  ;;  %v12809_v46 = vld [vmem:[#allocation9_spill] sm:$0xff] }
 0x810   :  { %v4918_v15 = vsub.f32 1.0, %v4909_v41  ;;  %7394 = vmatpush.msk.msra.mxu1 %vm2317_vm1, %v12803_v4  ;;  %7397 = vmatpush.msk.msra.mxu3 %vm2317_vm1, %v12786_v20  ;;  %v4922_v61 = vmul.f32 0.0, %v4909_v41  ;;  %v12812_v20 = vld [vmem:[#allocation34_spill] sm:$0xff]  ;;  %v12814_v4 = vld [vmem:[#allocation35_spill] sm:$0xff] }
 0x811   :  { %5289 = vmatpush.msra.mxu0 %v10558_v48  ;;  %v12811_v48 = vld [vmem:[#allocation32_spill] sm:$0xff] }
 0x812   :  { %v4920_v29 = vmul.f32 %v7511_v53, %v4918_v15  ;;  %5417 = vmatpush.msra.mxu1 %v12804_v23  ;;  %5440 = vmatpush.msra.mxu3 %v12809_v46  ;;  %v12817_v23 = vld [vmem:[#allocation39_spill] sm:$0xff]  ;;  %v11089_v15 = vld [vmem:[%s12503_s8 + $0x168] sm:$0xff]  ;;  %v12835_v53 = vld [vmem:[#allocation16_spill] sm:$0xff] }
 0x813   :  { %5290 = vmatpush.msra.mxu0 %v10577_v52  ;;  %v12813_v52 = vld [vmem:[#allocation48_spill] sm:$0xff]  ;;  %12834 = vst [vmem:[#allocation8_spill] sm:$0xff] %v11089_v15  ;;  %v11100_v46 = vld [vmem:[%s12503_s8 + $0x150] sm:$0xff] }
 0x814   :  { %v11035_v12 = vadd.f32 %v4922_v61, %v4920_v29  ;;  %5418 = vmatpush.msra.mxu1 %v10265_v63  ;;  %5441 = vmatpush.msra.mxu3 %v12790_v13  ;;  %v12815_v63 = vld [vmem:[#allocation50_spill] sm:$0xff]  ;;  %v12816_v13 = vld [vmem:[#allocation37_spill] sm:$0xff]  ;;  %12836 = vst [vmem:[#allocation10_spill] sm:$0xff] %v11100_v46 }
 0x815   :  { %5291 = vmatpush.msra.mxu0 %v12811_v48  ;;  %5279 = vmatpush.msra.mxu2 %v12813_v52  ;;  %v12837_v48 = vld [vmem:[#allocation17_spill] sm:$0xff] }
 0x816   :  { %5021 = vmatmul.f32.gmra.mxu0 %v11035_v12  ;;  %5044 = vmatmul.f32.gmra.mxu1 %v11035_v12 }
 0x817   :  { %5067 = vmatmul.f32.gmra.mxu3 %v11035_v12  ;;  %5292 = vmatpush.msra.mxu0 %v12812_v20 }
 0x818   :  { %5419 = vmatpush.msra.mxu1 %v10277_v1  ;;  %5442 = vmatpush.msra.mxu3 %v12792_v38  ;;  %v12819_v1 = vld [vmem:[#allocation41_spill] sm:$0xff]  ;;  %v12821_v38 = vld [vmem:[#allocation43_spill] sm:$0xff] }
 0x819   :  { %5293 = vmatpush.msra.mxu0 %v12814_v4  ;;  %5280 = vmatpush.msra.mxu2 %v12815_v63 }
 0x81a   :  { %5420 = vmatpush.msra.mxu1 %v10299_v5  ;;  %5443 = vmatpush.msra.mxu3 %v12794_v59  ;;  %v12822_v5 = vld [vmem:[#allocation15_spill] sm:$0xff]  ;;  %v12823_v59 = vld [vmem:[#allocation45_spill] sm:$0xff] }
 0x81b   :  { %5294 = vmatpush.msra.mxu0 %v12816_v13  ;;  %7400 = vmatpush.msk.msrb.mxu2 %vm2317_vm1, %v12835_v53  ;;  %v11197_v53 = vld [vmem:[%s12503_s8 + $0x78] sm:$0xff] }
 0x81c   :  { %5421 = vmatpush.msra.mxu1 %v10318_v8  ;;  %5444 = vmatpush.msra.mxu3 %v12818_v2  ;;  %v12824_v8 = vld [vmem:[#allocation18_spill] sm:$0xff]  ;;  %v12839_v2 = vld [vmem:[#allocation19_spill] sm:$0xff]  ;;  %12854 = vst [vmem:[#allocation48_spill] sm:$0xff] %v11197_v53 }
 0x81d   :  { %5295 = vmatpush.msra.mxu0 %v12817_v23  ;;  %v4950_v43 = vpop.f32.mrf.mxu2  ;;  %5463 = vmatpush.msrb.mxu2 %v12837_v48  ;;  %v11110_v23 = vld [vmem:[%s12503_s8 + $0x138] sm:$0xff]  ;;  %v12857_v48 = vld [vmem:[#allocation42_spill] sm:$0xff] }
 0x81e   :  { %5422 = vmatpush.msra.mxu1 %v10336_v11  ;;  %5445 = vmatpush.msra.mxu3 %v12820_v36  ;;  %v12826_v11 = vld [vmem:[#allocation20_spill] sm:$0xff]  ;;  %v4951_v6 = vadd.f32 %v4950_v43, %v10915_v16  ;;  %12838 = vst [vmem:[#allocation11_spill] sm:$0xff] %v11110_v23 }
 0x81f   :  { %5296 = vmatpush.msra.mxu0 %v12819_v1  ;;  %7388 = vmatmul.msk.f32.vlgmr.msrb.gmra.mxu1 %vm1429_vm2, %v5165_v56  ;;  %v5166_v1 = vld [vmem:[#allocation2 + $0x238] sm:$0xff] }
 0x820   :  { %5423 = vmatpush.msra.mxu1 %v10354_v14  ;;  %5446 = vmatpush.msra.mxu3 %v12822_v5  ;;  %v12828_v14 = vld [vmem:[#allocation23_spill] sm:$0xff] }
 0x821   :  { %5297 = vmatpush.msra.mxu0 %v12821_v38  ;;  %5464 = vmatpush.msrb.mxu2 %v12839_v2 }
 0x822   :  { %5424 = vmatpush.msra.mxu1 %v10372_v17  ;;  %5447 = vmatpush.msra.mxu3 %v12824_v8  ;;  %v12830_v17 = vld [vmem:[#allocation25_spill] sm:$0xff] }
 0x823   :  { %5298 = vmatpush.msra.mxu0 %v12823_v59  ;;  %7383 = vmatmul.msk.f32.gmra.mxu2 %vm1429_vm2, %v5166_v1  ;;  %v11122_v59 = vld [vmem:[%s12503_s8 + $0x120] sm:$0xff] }
 0x824   :  { %5425 = vmatpush.msra.mxu1 %v10390_v21  ;;  %5448 = vmatpush.msra.mxu3 %v12826_v11  ;;  %v12832_v21 = vld [vmem:[#allocation28_spill] sm:$0xff]  ;;  %12840 = vst [vmem:[#allocation12_spill] sm:$0xff] %v11122_v59 }
 0x825   :  { %5299 = vmatpush.msra.mxu0 %v12825_v10 }
 0x826   :  { %5426 = vmatpush.msra.mxu1 %v10413_v24  ;;  %5449 = vmatpush.msra.mxu3 %v12828_v14  ;;  %v4973_v24 = vpop.f32.mrf.mxu3  ;;  %v12843_v14 = vld [vmem:[#allocation27_spill] sm:$0xff] }
 0x827   :  { %5300 = vmatpush.msra.mxu0 %v12827_v28  ;;  %v4974_v58 = vadd.f32 %v4973_v24, %v10934_v31  ;;  %7389 = vmatmul.msk.f32.gmra.mxu1 %vm1429_vm2, %v5166_v1 }
 0x828   :  { %5427 = vmatpush.msra.mxu1 %v10443_v27  ;;  %5450 = vmatpush.msra.mxu3 %v12830_v17  ;;  %v11152_v17 = vld [vmem:[%s12503_s8 + $0xd8] sm:$0xff] }
 0x829   :  { %5301 = vmatpush.msra.mxu0 %v12829_v0  ;;  %v12845_v0 = vld [vmem:[#allocation30_spill] sm:$0xff]  ;;  %12846 = vst [vmem:[#allocation9_spill] sm:$0xff] %v11152_v17 }
 0x82a   :  { %5428 = vmatpush.msra.mxu1 %v10467_v39  ;;  %5451 = vmatpush.msra.mxu3 %v12832_v21  ;;  %v11160_v21 = vld [vmem:[%s12503_s8 + $0xc0] sm:$0xff] }
 0x82b   :  { %5302 = vmatpush.msra.mxu0 %v12831_v19  ;;  %12848 = vst [vmem:[#allocation46_spill] sm:$0xff] %v11160_v21 }
 0x82c   :  { %7385 = vmatmul.msk.f32.vlgmr.msrb.gmra.mxu0 %vm1429_vm2, %v5165_v56  ;;  %5482 = vmatpush.msrb.mxu1 %v11089_v15  ;;  %v11186_v56 = vld [vmem:[%s12503_s8 + $0x90] sm:$0xff] }
 0x82d   :  { %5303 = vmatpush.msra.mxu0 %v12833_v3  ;;  %12852 = vst [vmem:[#allocation34_spill] sm:$0xff] %v11186_v56 }
 0x82e   :  { %5483 = vmatpush.msrb.mxu1 %v11100_v46 }
 0x82f   :  { %5505 = vmatpush.msrb.mxu0 %v10481_v35 }
 0x830   :  { %5484 = vmatpush.msrb.mxu1 %v11110_v23 }
 0x831   :  { %5506 = vmatpush.msrb.mxu0 %v10502_v40 }
 0x832   :  { %5485 = vmatpush.msrb.mxu1 %v11122_v59 }
 0x833   :  { %5507 = vmatpush.msrb.mxu0 %v10525_v25 }
 0x834   :  { %7386 = vmatmul.msk.f32.gmra.mxu0 %vm1429_vm2, %v5166_v1  ;;  %v11218_v1 = vld [vmem:[%s12503_s8 + $0x48] sm:$0xff] }
 0x835   :  { %5508 = vmatpush.msrb.mxu0 %v10550_v47  ;;  %v12841_v47 = vld [vmem:[#allocation21_spill] sm:$0xff]  ;;  %12858 = vst [vmem:[#allocation50_spill] sm:$0xff] %v11218_v1 }
 0x836   :  { %5465 = vmatpush.msrb.mxu2 %v12841_v47 }
 0x837   :  { %5509 = vmatpush.msrb.mxu0 %v10569_v50  ;;  %v11134_v50 = vld [vmem:[%s12503_s8 + $0x108] sm:$0xff] }
 0x838   :  { %12842 = vst [vmem:[#allocation6_spill] sm:$0xff] %v11134_v50  ;;  %5486 = vmatpush.msrb.mxu1 %v11134_v50  ;;  %5466 = vmatpush.msrb.mxu2 %v12843_v14 }
 0x839   :  { %5510 = vmatpush.msrb.mxu0 %v10584_v54  ;;  %v11144_v54 = vld [vmem:[%s12503_s8 + $0xf0] sm:$0xff] }
 0x83a   :  { %12844 = vst [vmem:[#allocation7_spill] sm:$0xff] %v11144_v54  ;;  %5487 = vmatpush.msrb.mxu1 %v11144_v54  ;;  %5467 = vmatpush.msrb.mxu2 %v12845_v0 }
 0x83b   :  { %5511 = vmatpush.msrb.mxu0 %v10604_v57  ;;  %v12847_v57 = vld [vmem:[#allocation31_spill] sm:$0xff] }
 0x83c   :  { %5488 = vmatpush.msrb.mxu1 %v11152_v17  ;;  %5468 = vmatpush.msrb.mxu2 %v12847_v57 }
 0x83d   :  { %5512 = vmatpush.msrb.mxu0 %v10624_v49  ;;  %v12849_v49 = vld [vmem:[#allocation33_spill] sm:$0xff] }
 0x83e   :  { %5489 = vmatpush.msrb.mxu1 %v11160_v21  ;;  %5469 = vmatpush.msrb.mxu2 %v12849_v49 }
 0x83f   :  { %5513 = vmatpush.msrb.mxu0 %v10644_v32  ;;  %v11173_v32 = vld [vmem:[%s12503_s8 + $0xa8] sm:$0xff] }
 0x840   :  { %12850 = vst [vmem:[#allocation32_spill] sm:$0xff] %v11173_v32  ;;  %5490 = vmatpush.msrb.mxu1 %v11173_v32 }
 0x841   :  { %5514 = vmatpush.msrb.mxu0 %v10663_v45 }
 0x842   :  { %5491 = vmatpush.msrb.mxu1 %v11186_v56 }
 0x843   :  { %5515 = vmatpush.msrb.mxu0 %v10683_v42 }
 0x844   :  { %5492 = vmatpush.msrb.mxu1 %v11197_v53 }
 0x845   :  { %5516 = vmatpush.msrb.mxu0 %v10702_v37 }
 0x847   :  { %5517 = vmatpush.msrb.mxu0 %v10721_v34 }
 0x849   :  { %5518 = vmatpush.msrb.mxu0 %v12810_v44 }
 0x84b   :  { %5519 = vmatpush.msrb.mxu0 %v12813_v52 }
 0x84d   :  { %5520 = vmatpush.msrb.mxu0 %v12815_v63 }
 0x856   :  { %v4953_v26 = vpop.f32.mrf.mxu2  ;;  %v4976_v29 = vpop.f32.mrf.mxu3 }
 0x857   :  { %v4977_v61 = vadd.f32 %v4976_v29, %v10934_v31  ;;  %v4954_v35 = vadd.f32 %v4953_v26, %v10915_v16  ;;  %v12855_v29 = vld [vmem:[#allocation40_spill] sm:$0xff] }
 0x88b   :  { %v5019_v22 = vpop.f32.mrf.mxu0  ;;  %v5042_v27 = vpop.f32.mrf.mxu1 }
 0x88c   :  { %v5020_v9 = vadd.f32 %v5019_v22, %v10918_v51  ;;  %v5043_v7 = vadd.f32 %v5042_v27, %v10940_v60 }
 0x88e   :  { %v5071_v39 = vadd.f32 %v5020_v9, %v4951_v6  ;;  %v5072_v55 = vadd.f32 %v5043_v7, %v4974_v58  ;;  %v12851_v6 = vld [vmem:[#allocation36_spill] sm:$0xff]  ;;  %v4996_v7 = vpop.f32.mrf.mxu2 }
 0x88f   :  { %5470 = vmatpush.msrb.mxu2 %v12851_v6 }
 0x890   :  { %v7377_v62 = vmul.f32 -1.442695, %v5071_v39  ;;  %v7378_v41 = vmul.f32 -1.442695, %v5072_v55  ;;  %v12853_v39 = vld [vmem:[#allocation38_spill] sm:$0xff] }
 0x891   :  { %5471 = vmatpush.msrb.mxu2 %v12853_v39 }
 0x892   :  { %7512 = vpow2.f32 %v7377_v62  ;;  %v5065_v26 = vpop.f32.mrf.mxu3 }
 0x893   :  { %7514 = vpow2.f32 %v7378_v41  ;;  %v5022_v20 = vpop.f32.mrf.mxu0  ;;  %v5045_v4 = vpop.f32.mrf.mxu1  ;;  %5472 = vmatpush.msrb.mxu2 %v12855_v29  ;;  %v5066_v34 = vadd.f32 %v5065_v26, %v10969_v30 }
 0x894   :  { %v5023_v40 = vadd.f32 %v5022_v20, %v10918_v51  ;;  %v5046_v13 = vadd.f32 %v5045_v4, %v10940_v60 }
 0x895   :  { %5473 = vmatpush.msrb.mxu2 %v12857_v48 }
 0x896   :  { %v5073_v36 = vadd.f32 %v5023_v40, %v4954_v35  ;;  %v5074_v38 = vadd.f32 %v5046_v13, %v4977_v61  ;;  %v11207_v35 = vld [vmem:[%s12503_s8 + $0x60] sm:$0xff]  ;;  %v4997_v40 = vadd.f32 %v4996_v7, %v10988_v33  ;;  %v4999_v49 = vpop.f32.mrf.mxu2 }
 0x897   :  { %12856 = vst [vmem:[#allocation35_spill] sm:$0xff] %v11207_v35  ;;  %5493 = vmatpush.msrb.mxu1 %v11207_v35  ;;  %v5000_v39 = vadd.f32 %v4999_v49, %v10988_v33  ;;  %v11343_v49 = vld [vmem:[%s12503_s8 + $0x118] sm:$0xff] }
 0x898   :  { %v7513_v25 = vpop.eup %7512  ;;  %v7379_v5 = vmul.f32 -1.442695, %v5073_v36  ;;  %v7380_v11 = vmul.f32 -1.442695, %v5074_v38  ;;  %v12859_v36 = vld [vmem:[#allocation44_spill] sm:$0xff] }
 0x899   :  { %v7515_v8 = vpop.eup %7514  ;;  %v11126_v10 = vadd.f32 1.0, %v7513_v25  ;;  %5494 = vmatpush.msrb.mxu1 %v11218_v1  ;;  %5474 = vmatpush.msrb.mxu2 %v12859_v36 }
 0x89a   :  { %v11129_v28 = vadd.f32 1.0, %v7515_v8  ;;  %7516 = vpow2.f32 %v7379_v5 }
 0x89b   :  { %7518 = vrcp.f32 %v11126_v10  ;;  %v5102_v62 = vand.u32 2147483648, %v11126_v10  ;;  %v5100_v41 = vand.u32 2147483647, %v11126_v10  ;;  %vm5096_vm14 = vweird.f32 %v11126_v10 }
 0x89c   :  { %7520 = vrcp.f32 %v11129_v28  ;;  %v5117_v8 = vand.u32 2147483648, %v11129_v28  ;;  %vm5111_vm4 = vweird.f32 %v11129_v28  ;;  %v5115_v52 = vand.u32 2147483647, %v11129_v28 }
 0x89d   :  { %7522 = vpow2.f32 %v7380_v11  ;;  %v5103_v4 = vor.u32 1.1754944e-38, %v5102_v62  ;;  %vm5101_vm0 = vcmp.eq.f32.partialorder %v5100_v41, 8.507059e+37 }
 0x89e   :  { %vm5116_vm9 = vcmp.eq.f32.partialorder %v5115_v52, 8.507059e+37  ;;  %v11314_v52 = vld [vmem:[%s12503_s8 + $0x148] sm:$0xff] }
 0x8a0   :  { %v7517_v19 = vpop.eup %7516 }
 0x8a1   :  { %v7519_v3 = vpop.eup %7518  ;;  %v11164_v43 = vadd.f32 1.0, %v7517_v19 }
 0x8a2   :  { %v11167_v24 = vpop.eup %7520  ;;  %v5092_v58 = vmul.f32 %v7519_v3, %v11126_v10  ;;  %vm5097_vm13 = vweird.f32 %v7519_v3  ;;  %v11229_v10 = vld [vmem:[%s12503_s8 + $0x30] sm:$0xff] }
 0x8a3   :  { %v7523_v22 = vpop.eup %7522  ;;  %v5107_v27 = vmul.f32 %v11167_v24, %v11129_v28  ;;  %7524 = vrcp.f32 %v11164_v43  ;;  %vm5098_vm15 = vmor %vm5096_vm14, %vm5097_vm13  ;;  %vm5112_vm3 = vweird.f32 %v11167_v24  ;;  %12860 = vst [vmem:[#allocation37_spill] sm:$0xff] %v11229_v10  ;;  %5495 = vmatpush.msrb.mxu1 %v11229_v10  ;;  %v5132_v14 = vand.u32 2147483648, %v11164_v43  ;;  %v5068_v28 = vpop.f32.mrf.mxu3 }
 0x8a4   :  { %v5093_v45 = vsub.f32 1.0, %v5092_v58  ;;  %v11181_v9 = vadd.f32 1.0, %v7523_v22  ;;  %v5130_v57 = vand.u32 2147483647, %v11164_v43  ;;  %vm11240_vm6 = vmor %vm5111_vm4, %vm5112_vm3  ;;  %v11247_v58 = vld [vmem:[%s12503_s8 + $0x18] sm:$0xff]  ;;  %vm5126_vm7 = vweird.f32 %v11164_v43 }
 0x8a5   :  { %v5108_v55 = vsub.f32 1.0, %v5107_v27  ;;  %12863 = vst [vmem:[#allocation39_spill] sm:$0xff] %v11247_v58  ;;  %5496 = vmatpush.msrb.mxu1 %v11247_v58  ;;  %v5118_v27 = vor.u32 1.1754944e-38, %v5117_v8  ;;  %v5133_v7 = vor.u32 1.1754944e-38, %v5132_v14  ;;  %v11308_v14 = vld [vmem:[%s12502_s7 + $0x118] sm:$0xff] }
 0x8a6   :  { %v5094_v42 = vmul.f32 %v7519_v3, %v5093_v45  ;;  %7526 = vrcp.f32 %v11181_v9  ;;  %v11257_v45 = vld [vmem:[%s12503_s8] sm:$0xff]  ;;  %vm5131_vm10 = vcmp.eq.f32.partialorder %v5130_v57, 8.507059e+37  ;;  %v5147_v29 = vand.u32 2147483648, %v11181_v9  ;;  %12866 = vst [vmem:[#allocation14_spill] sm:$0xff] %v11308_v14 }
 0x8a7   :  { %v5109_v61 = vmul.f32 %v11167_v24, %v5108_v55  ;;  %12864 = vst [vmem:[#allocation13_spill] sm:$0xff] %v11257_v45  ;;  %5497 = vmatpush.msrb.mxu1 %v11257_v45  ;;  %vm5141_vm12 = vweird.f32 %v11181_v9  ;;  %v11328_v57 = vld [vmem:[%s12502_s7 + $0x100] sm:$0xff] }
 0x8a8   :  { %v5095_v37 = vadd.f32 %v7519_v3, %v5094_v42  ;;  %12867 = vst [vmem:[#allocation43_spill] sm:$0xff] %v11328_v57 }
 0x8a9   :  { %v7525_v20 = vpop.eup %7524  ;;  %v5110_v25 = vadd.f32 %v11167_v24, %v5109_v61 }
 0x8aa   :  { %v5099_v13 = vsel %vm5098_vm15, %v7519_v3, %v5095_v37  ;;  %v5122_v2 = vmul.f32 %v7525_v20, %v11164_v43  ;;  %vm5127_vm5 = vweird.f32 %v7525_v20  ;;  %v5145_v37 = vand.u32 2147483647, %v11181_v9  ;;  %v11349_v3 = vld [vmem:[%s12502_s7 + $0xd8] sm:$0xff] }
 0x8ab   :  { %v5104_v38 = vsel %vm5101_vm0, %v5103_v4, %v5099_v13  ;;  %v5114_v6 = vsel %vm11240_vm6, %v11167_v24, %v5110_v25  ;;  %vm5128_vm8 = vmor %vm5126_vm7, %vm5127_vm5  ;;  %v5069_v24 = vadd.f32 %v5068_v28, %v10969_v30  ;;  %v5148_v13 = vor.u32 1.1754944e-38, %v5147_v29  ;;  %v11288_v25 = vld [vmem:[%s12502_s7 + $0x130] sm:$0xf]  ;;  %v11361_v28 = vld [vmem:[%s12503_s8 + $0x100] sm:$0xff] }
 0x8ac   :  { %v7527_v44 = vpop.eup %7526  ;;  %v5151_v5 = vmul.f32 %v5104_v38, %v5066_v34  ;;  %v5123_v47 = vsub.f32 1.0, %v5122_v2  ;;  %v5119_v43 = vsel %vm5116_vm9, %v5118_v27, %v5114_v6  ;;  %vm5146_vm14 = vcmp.eq.f32.partialorder %v5145_v37, 8.507059e+37  ;;  %v11281_v38 = vld [vmem:[%s12502_s7 + $0x120] sm:$0xf]  ;;  %12865 = vst [vmem:[#allocation41_spill] sm:$0xff] %v11288_v25  ;;  %v11379_v27 = vld [vmem:[%s12503_s8 + $0xe8] sm:$0xff] }
 0x8ad   :  { %v5137_v11 = vmul.f32 %v7527_v44, %v11181_v9  ;;  %vm5142_vm11 = vweird.f32 %v7527_v44  ;;  %v5157_v61 = vsub.f32 1.0, %v5119_v43  ;;  %v5161_v34 = vmul.f32 %v5119_v43, %v11018_v18  ;;  %v11275_v9 = vld [vmem:[%s12503_s8 + $0x178] sm:$0xff]  ;;  %v11367_v6 = vld [vmem:[%s12502_s7 + $0xc0] sm:$0xff]  ;;  %v11451_v37 = vld [vmem:[%s12503_s8 + $0x88] sm:$0xff] }
 0x8ae   :  { %v5124_v0 = vmul.f32 %v7525_v20, %v5123_v47  ;;  %v5153_v19 = vadd.f32 %v5151_v5, %v4997_v40  ;;  %vm5143_vm13 = vmor %vm5141_vm12, %vm5142_vm11  ;;  %v11295_v5 = vld [vmem:[%s12503_s8 + $0x160] sm:$0xff]  ;;  %v11415_v43 = vld [vmem:[%s12503_s8 + $0xb8] sm:$0xff] }
 0x8af   :  { %v5138_v63 = vsub.f32 1.0, %v5137_v11  ;;  %v11302_v11 = vld [vmem:[%s12502_s7 + $0x108] sm:$0xff]  ;;  %v11439_v29 = vld [vmem:[%s12502_s7 + $0x60] sm:$0xff] }
 0x8b0   :  { %v5125_v22 = vadd.f32 %v7525_v20, %v5124_v0  ;;  %7528 = vtanh.f32 %v5153_v19  ;;  %v11322_v0 = vld [vmem:[%s12502_s7 + $0xf0] sm:$0xff] }
 0x8b1   :  { %v5139_v55 = vmul.f32 %v7527_v44, %v5138_v63  ;;  %v11334_v19 = vld [vmem:[%s12503_s8 + $0x130] sm:$0xff]  ;;  %v11355_v63 = vld [vmem:[%s12502_s7 + $0xe8] sm:$0xff] }
 0x8b2   :  { %v5129_v26 = vsel %vm5128_vm8, %v7525_v20, %v5125_v22  ;;  %12868 = vst [vmem:[#allocation15_spill] sm:$0xff] %v11355_v63  ;;  %v11373_v22 = vld [vmem:[%s12502_s7 + $0xd0] sm:$0xff] }
 0x8b3   :  { %v5134_v62 = vsel %vm5131_vm10, %v5133_v7, %v5129_v26  ;;  %v5140_v42 = vadd.f32 %v7527_v44, %v5139_v55  ;;  %12869 = vst [vmem:[#allocation45_spill] sm:$0xff] %v11373_v22  ;;  %v11385_v7 = vld [vmem:[%s12502_s7 + $0xa8] sm:$0xff]  ;;  %v11397_v55 = vld [vmem:[%s12503_s8 + $0xd0] sm:$0xff]  ;;  %v11409_v26 = vld [vmem:[%s12502_s7 + $0xa0] sm:$0xff] }
 0x8b4   :  { %v5152_v41 = vmul.f32 %v5134_v62, %v5069_v24  ;;  %v11403_v24 = vld [vmem:[%s12502_s7 + $0x90] sm:$0xff]  ;;  %12871 = vst [vmem:[#allocation47_spill] sm:$0xff] %v11409_v26  ;;  %v11421_v62 = vld [vmem:[%s12502_s7 + $0x78] sm:$0xff] }
 0x8b5   :  { %v5144_v20 = vsel %vm5143_vm13, %v7527_v44, %v5140_v42  ;;  %v11427_v42 = vld [vmem:[%s12502_s7 + $0x88] sm:$0xff] }
 0x8b6   :  { %v7529_v48 = vpop.eup %7528  ;;  %v5154_v4 = vadd.f32 %v5152_v41, %v5000_v39  ;;  %v5149_v36 = vsel %vm5146_vm14, %v5148_v13, %v5144_v20  ;;  %v11391_v39 = vld [vmem:[%s12502_s7 + $0xb8] sm:$0xff]  ;;  %12872 = vst [vmem:[#allocation20_spill] sm:$0xff] %v11427_v42  ;;  %v11433_v41 = vld [vmem:[%s12503_s8 + $0xa0] sm:$0xff] }
 0x8b7   :  { %v5159_v40 = vmul.f32 %v7529_v48, %v5157_v61  ;;  %v5158_v18 = vsub.f32 1.0, %v5149_v36  ;;  %v5162_v8 = vmul.f32 %v5149_v36, %v11035_v12  ;;  %12870 = vst [vmem:[#allocation18_spill] sm:$0xff] %v11391_v39  ;;  %v11445_v61 = vld [vmem:[%s12502_s7 + $0x70] sm:$0xff]  ;;  %v11457_v48 = vld [vmem:[%s12502_s7 + $0x48] sm:$0xff]  ;;  %v11481_v20 = vld [vmem:[%s12502_s7 + $0x40] sm:$0xff] }
 0x8b8   :  { %7530 = vtanh.f32 %v5154_v4  ;;  %12873 = vst [vmem:[#allocation49_spill] sm:$0xff] %v11445_v61  ;;  %v11463_v4 = vld [vmem:[%s12502_s7 + $0x58] sm:$0xff] }
 0x8b9   :  { %v11267_v2 = vadd.f32 %v5161_v34, %v5159_v40  ;;  %12874 = vst [vmem:[#allocation23_spill] sm:$0xff] %v11463_v4  ;;  %v11469_v40 = vld [vmem:[%s12503_s8 + $0x70] sm:$0xff]  ;;  %v11487_v13 = vld [vmem:[%s12503_s8 + $0x58] sm:$0xff] }
 0x8ba   :  { %v11475_v34 = vld [vmem:[%s12502_s7 + $0x30] sm:$0xff]  ;;  %12875 = vst [vmem:[#allocation51_spill] sm:$0xff] %v11481_v20  ;;  %v11493_v36 = vld [vmem:[%s12502_s7 + $0x18] sm:$0xff] }
 0x8bb   :  { %5258 = vmatmul.f32.vlgmr.msrb.gmra.mxu3 %v11267_v2  ;;  %5281 = vmatmul.f32.vlgmr.msra.gmra.mxu2 %v11267_v2  ;;  %12876 = vst [vmem:[#allocation25_spill] sm:$0xff] %v11487_v13 }
 0x8bc   :  { %5304 = vmatmul.f32.vlgmr.msra.gmra.mxu0 %v11267_v2  ;;  %5528 = vmatpush.msrb.mxu3 %v11275_v9  ;;  %12877 = vst [vmem:[#allocation52_spill] sm:$0xff] %v11493_v36 }
 0x8bd   :  { %7407 = vmatpush.msk.msra.mxu2 %vm2317_vm1, %v11281_v38  ;;  %7413 = vmatpush.msk.msra.mxu0 %vm2317_vm1, %v11288_v25 }
 0x8be   :  { %v7531_v44 = vpop.eup %7530  ;;  %5529 = vmatpush.msrb.mxu3 %v11295_v5 }
 0x8bf   :  { %v5160_v47 = vmul.f32 %v7531_v44, %v5158_v18  ;;  %5657 = vmatpush.msra.mxu2 %v11302_v11  ;;  %5703 = vmatpush.msra.mxu0 %v11308_v14  ;;  %v11499_v18 = vld [vmem:[%s12502_s7 + $0x28] sm:$0xff]  ;;  %v11505_v44 = vld [vmem:[%s12503_s8 + $0x40] sm:$0xff] }
 0x8c0   :  { %5530 = vmatpush.msrb.mxu3 %v11314_v52  ;;  %12878 = vst [vmem:[#allocation28_spill] sm:$0xff] %v11499_v18 }
 0x8c1   :  { %v11317_v12 = vadd.f32 %v5162_v8, %v5160_v47  ;;  %5658 = vmatpush.msra.mxu2 %v11322_v0  ;;  %5704 = vmatpush.msra.mxu0 %v11328_v57  ;;  %12879 = vst [vmem:[#allocation53_spill] sm:$0xff] %v11505_v44  ;;  %v11511_v47 = vld [vmem:[%s12502_s7] sm:$0xff]  ;;  %v11517_v8 = vld [vmem:[%s12502_s7 + $0x10] sm:$0xff] }
 0x8c2   :  { %5531 = vmatpush.msrb.mxu3 %v11334_v19  ;;  %12880 = vst [vmem:[#allocation16_spill] sm:$0xff] %v11511_v47 }
 0x8c3   :  { %5261 = vmatmul.f32.gmra.mxu3 %v11317_v12  ;;  %5284 = vmatmul.f32.gmra.mxu2 %v11317_v12  ;;  %12881 = vst [vmem:[#allocation17_spill] sm:$0xff] %v11517_v8 }
 0x8c4   :  { %5307 = vmatmul.f32.gmra.mxu0 %v11317_v12  ;;  %5532 = vmatpush.msrb.mxu3 %v11343_v49 }
 0x8c5   :  { %5659 = vmatpush.msra.mxu2 %v11349_v3  ;;  %5705 = vmatpush.msra.mxu0 %v11355_v63 }
 0x8c6   :  { %5533 = vmatpush.msrb.mxu3 %v11361_v28 }
 0x8c7   :  { %5660 = vmatpush.msra.mxu2 %v11367_v6  ;;  %5706 = vmatpush.msra.mxu0 %v11373_v22 }
 0x8c8   :  { %5534 = vmatpush.msrb.mxu3 %v11379_v27 }
 0x8c9   :  { %5661 = vmatpush.msra.mxu2 %v11385_v7  ;;  %5707 = vmatpush.msra.mxu0 %v11391_v39 }
 0x8ca   :  { %5535 = vmatpush.msrb.mxu3 %v11397_v55 }
 0x8cb   :  { %5662 = vmatpush.msra.mxu2 %v11403_v24  ;;  %5708 = vmatpush.msra.mxu0 %v11409_v26 }
 0x8cc   :  { %5536 = vmatpush.msrb.mxu3 %v11415_v43 }
 0x8cd   :  { %5663 = vmatpush.msra.mxu2 %v11421_v62  ;;  %5709 = vmatpush.msra.mxu0 %v11427_v42  ;;  %v5213_v42 = vpop.f32.mrf.mxu0 }
 0x8ce   :  { %5537 = vmatpush.msrb.mxu3 %v11433_v41  ;;  %v5214_v26 = vadd.f32 %v5213_v42, %v10934_v31  ;;  %v11542_v42 = vld [vmem:[%s12502_s7 + $0x128] sm:$0xf] }
 0x8cf   :  { %5664 = vmatpush.msra.mxu2 %v11439_v29  ;;  %5710 = vmatpush.msra.mxu0 %v11445_v61  ;;  %12884 = vst [vmem:[#allocation27_spill] sm:$0xff] %v11542_v42 }
 0x8d0   :  { %5538 = vmatpush.msrb.mxu3 %v11451_v37 }
 0x8d1   :  { %5665 = vmatpush.msra.mxu2 %v11457_v48  ;;  %5711 = vmatpush.msra.mxu0 %v11463_v4  ;;  %v5190_v4 = vpop.f32.mrf.mxu2 }
 0x8d2   :  { %5539 = vmatpush.msrb.mxu3 %v11469_v40  ;;  %v5191_v22 = vadd.f32 %v5190_v4, %v10915_v16 }
 0x8d3   :  { %5666 = vmatpush.msra.mxu2 %v11475_v34  ;;  %5712 = vmatpush.msra.mxu0 %v11481_v20  ;;  %v11529_v20 = vld [vmem:[%s12503_s8 + $0x10] sm:$0xff] }
 0x8d4   :  { %5540 = vmatpush.msrb.mxu3 %v11487_v13  ;;  %12883 = vst [vmem:[#allocation21_spill] sm:$0xff] %v11529_v20 }
 0x8d5   :  { %5667 = vmatpush.msra.mxu2 %v11493_v36  ;;  %5713 = vmatpush.msra.mxu0 %v11499_v18  ;;  %v11523_v18 = vld [vmem:[%s12503_s8 + $0x28] sm:$0xff] }
 0x8d6   :  { %5541 = vmatpush.msrb.mxu3 %v11505_v44  ;;  %12882 = vst [vmem:[#allocation19_spill] sm:$0xff] %v11523_v18 }
 0x8d7   :  { %5668 = vmatpush.msra.mxu2 %v11511_v47  ;;  %5714 = vmatpush.msra.mxu0 %v11517_v8 }
 0x8d8   :  { %5542 = vmatpush.msrb.mxu3 %v11523_v18  ;;  %v5405_v18 = vld [vmem:[#allocation2 + $0x2f0] sm:$0xff] }
 0x8d9   :  { %v5193_v61 = vpop.f32.mrf.mxu2  ;;  %7395 = vmatmul.msk.f32.vlgmr.msra.gmra.mxu1 %vm1429_vm2, %v5405_v18  ;;  %7398 = vmatmul.msk.f32.vlgmr.msra.gmra.mxu3 %vm1429_vm2, %v5405_v18 }
 0x8da   :  { %5543 = vmatpush.msrb.mxu3 %v11529_v20  ;;  %7401 = vmatmul.msk.f32.vlgmr.msrb.gmra.mxu2 %vm1429_vm2, %v5405_v18  ;;  %v5194_v4 = vadd.f32 %v5193_v61, %v10915_v16 }
 0x8db   :  { %7410 = vmatpush.msk.msra.mxu1 %vm2317_vm1, %v11542_v42 }
 0x8dc   :  { %5722 = vmatpush.msra.mxu3 %v11089_v15 }
 0x8de   :  { %5723 = vmatpush.msra.mxu3 %v11100_v46 }
 0x8e0   :  { %5724 = vmatpush.msra.mxu3 %v11110_v23 }
 0x8e2   :  { %5725 = vmatpush.msra.mxu3 %v11122_v59 }
 0x8e4   :  { %5726 = vmatpush.msra.mxu3 %v11134_v50  ;;  %v11653_v50 = vld [vmem:[%s12502_s7 + $0x68] sm:$0xff] }
 0x8e5   :  { %12899 = vst [vmem:[#allocation60_spill] sm:$0xff] %v11653_v50 }
 0x8e6   :  { %5727 = vmatpush.msra.mxu3 %v11144_v54 }
 0x8e8   :  { %5728 = vmatpush.msra.mxu3 %v11152_v17  ;;  %v11662_v17 = vld [vmem:[%s12503_s8 + $0xc8] sm:$0xff] }
 0x8e9   :  { %12900 = vst [vmem:[#allocation61_spill] sm:$0xff] %v11662_v17 }
 0x8ea   :  { %5729 = vmatpush.msra.mxu3 %v11160_v21 }
 0x8ec   :  { %5730 = vmatpush.msra.mxu3 %v11173_v32  ;;  %v5236_v32 = vpop.f32.mrf.mxu1 }
 0x8ee   :  { %5731 = vmatpush.msra.mxu3 %v11186_v56 }
 0x8f0   :  { %5732 = vmatpush.msra.mxu3 %v11197_v53 }
 0x8f2   :  { %5733 = vmatpush.msra.mxu3 %v11207_v35 }
 0x8f4   :  { %5734 = vmatpush.msra.mxu3 %v11218_v1 }
 0x8f6   :  { %5735 = vmatpush.msra.mxu3 %v11229_v10  ;;  %v5239_v10 = vpop.f32.mrf.mxu1 }
 0x8f8   :  { %5736 = vmatpush.msra.mxu3 %v11247_v58 }
 0x8fa   :  { %5737 = vmatpush.msra.mxu3 %v11257_v45 }
 0x93e   :  { %v5259_v8 = vpop.f32.mrf.mxu3  ;;  %v5282_v39 = vpop.f32.mrf.mxu2 }
 0x93f   :  { %v5260_v63 = vadd.f32 %v5259_v8, %v10918_v51  ;;  %v5283_v57 = vadd.f32 %v5282_v39, %v10940_v60  ;;  %v5216_v39 = vpop.f32.mrf.mxu0  ;;  %v11580_v8 = vld [vmem:[%s12503_s8 + $0x140] sm:$0xff] }
 0x940   :  { %12889 = vst [vmem:[#allocation38_spill] sm:$0xff] %v11580_v8 }
 0x941   :  { %v5311_v14 = vadd.f32 %v5260_v63, %v5191_v22  ;;  %v5312_v25 = vadd.f32 %v5283_v57, %v5214_v26  ;;  %v11550_v57 = vld [vmem:[%s12503_s8 + $0x170] sm:$0xff]  ;;  %v11564_v26 = vld [vmem:[%s12503_s8 + $0x158] sm:$0xff] }
 0x942   :  { %12885 = vst [vmem:[#allocation30_spill] sm:$0xff] %v11550_v57  ;;  %5745 = vmatpush.msrb.mxu2 %v11550_v57 }
 0x943   :  { %v7390_v20 = vmul.f32 -1.442695, %v5311_v14  ;;  %v7391_v47 = vmul.f32 -1.442695, %v5312_v25  ;;  %v5217_v25 = vadd.f32 %v5216_v39, %v10934_v31  ;;  %v11557_v14 = vld [vmem:[%s12502_s7 + $0x110] sm:$0xff]  ;;  %12887 = vst [vmem:[#allocation33_spill] sm:$0xff] %v11564_v26 }
 0x944   :  { %12886 = vst [vmem:[#allocation31_spill] sm:$0xff] %v11557_v14  ;;  %5680 = vmatpush.msra.mxu1 %v11557_v14  ;;  %5746 = vmatpush.msrb.mxu2 %v11564_v26  ;;  %v11720_v31 = vld [vmem:[%s12502_s7 + $0x8] sm:$0xff] }
 0x945   :  { %7532 = vpow2.f32 %v7390_v20  ;;  %12907 = vst [vmem:[#allocation68_spill] sm:$0xff] %v11720_v31 }
 0x946   :  { %7534 = vpow2.f32 %v7391_v47  ;;  %v5262_v63 = vpop.f32.mrf.mxu3  ;;  %v5285_v22 = vpop.f32.mrf.mxu2  ;;  %v11573_v47 = vld [vmem:[%s12502_s7 + $0xf8] sm:$0xff]  ;;  %5747 = vmatpush.msrb.mxu2 %v11580_v8  ;;  %v11604_v8 = vld [vmem:[%s12503_s8 + $0x128] sm:$0xff] }
 0x947   :  { %v5263_v20 = vadd.f32 %v5262_v63, %v10918_v51  ;;  %v5286_v18 = vadd.f32 %v5285_v22, %v10940_v60  ;;  %12888 = vst [vmem:[#allocation36_spill] sm:$0xff] %v11573_v47  ;;  %5681 = vmatpush.msra.mxu1 %v11573_v47  ;;  %v5406_v63 = vld [vmem:[#allocation2 + $0x2f8] sm:$0xff]  ;;  %v11586_v22 = vld [vmem:[%s12502_s7 + $0xe0] sm:$0xff]  ;;  %v5305_v26 = vpop.f32.mrf.mxu0 }
 0x948   :  { %12890 = vst [vmem:[#allocation40_spill] sm:$0xff] %v11586_v22  ;;  %7396 = vmatmul.msk.f32.gmra.mxu1 %vm1429_vm2, %v5406_v63  ;;  %7399 = vmatmul.msk.f32.gmra.mxu3 %vm1429_vm2, %v5406_v63  ;;  %v11689_v60 = vld [vmem:[%s12502_s7 + $0x38] sm:$0xff]  ;;  %v5306_v53 = vadd.f32 %v5305_v26, %v10969_v30 }
 0x949   :  { %v5313_v61 = vadd.f32 %v5263_v20, %v5194_v4  ;;  %v5314_v39 = vadd.f32 %v5286_v18, %v5217_v25  ;;  %5682 = vmatpush.msra.mxu1 %v11586_v22  ;;  %7402 = vmatmul.msk.f32.gmra.mxu2 %vm1429_vm2, %v5406_v63  ;;  %v11595_v25 = vld [vmem:[%s12502_s7 + $0xc8] sm:$0xff]  ;;  %12892 = vst [vmem:[#allocation44_spill] sm:$0xff] %v11604_v8  ;;  %v11612_v63 = vld [vmem:[%s12502_s7 + $0xb0] sm:$0xff] }
 0x94a   :  { %12891 = vst [vmem:[#allocation42_spill] sm:$0xff] %v11595_v25  ;;  %5748 = vmatpush.msrb.mxu2 %v11604_v8  ;;  %v11671_v8 = vld [vmem:[%s12502_s7 + $0x50] sm:$0xff] }
 0x94b   :  { %v7533_v23 = vpop.eup %7532  ;;  %v7392_v46 = vmul.f32 -1.442695, %v5313_v61  ;;  %5683 = vmatpush.msra.mxu1 %v11595_v25  ;;  %v7393_v18 = vmul.f32 -1.442695, %v5314_v39  ;;  %12893 = vst [vmem:[#allocation54_spill] sm:$0xff] %v11612_v63  ;;  %v11634_v39 = vld [vmem:[%s12503_s8 + $0xf8] sm:$0xff] }
 0x94c   :  { %v7535_v4 = vpop.eup %7534  ;;  %v11598_v20 = vadd.f32 1.0, %v7533_v23  ;;  %v11620_v23 = vld [vmem:[%s12503_s8 + $0x110] sm:$0xff]  ;;  %12896 = vst [vmem:[#allocation57_spill] sm:$0xff] %v11634_v39 }
 0x94d   :  { %v11607_v61 = vadd.f32 1.0, %v7535_v4  ;;  %7536 = vpow2.f32 %v7392_v46  ;;  %5684 = vmatpush.msra.mxu1 %v11612_v63  ;;  %12894 = vst [vmem:[#allocation55_spill] sm:$0xff] %v11620_v23  ;;  %5749 = vmatpush.msrb.mxu2 %v11620_v23  ;;  %v11627_v46 = vld [vmem:[%s12502_s7 + $0x98] sm:$0xff]  ;;  %v11640_v4 = vld [vmem:[%s12502_s7 + $0x80] sm:$0xff] }
 0x94e   :  { %7538 = vrcp.f32 %v11598_v20  ;;  %12895 = vst [vmem:[#allocation56_spill] sm:$0xff] %v11627_v46  ;;  %v5342_v16 = vand.u32 2147483648, %v11598_v20  ;;  %vm5336_vm0 = vweird.f32 %v11598_v20 }
 0x94f   :  { %7540 = vrcp.f32 %v11607_v61  ;;  %5685 = vmatpush.msra.mxu1 %v11627_v46  ;;  %5750 = vmatpush.msrb.mxu2 %v11634_v39  ;;  %12897 = vst [vmem:[#allocation58_spill] sm:$0xff] %v11640_v4  ;;  %vm5351_vm6 = vweird.f32 %v11607_v61 }
 0x950   :  { %7542 = vpow2.f32 %v7393_v18  ;;  %v11647_v18 = vld [vmem:[%s12503_s8 + $0xe0] sm:$0xff]  ;;  %12901 = vst [vmem:[#allocation62_spill] sm:$0xff] %v11671_v8  ;;  %v5343_v44 = vor.u32 1.1754944e-38, %v5342_v16  ;;  %v11739_v16 = vld [vmem:[%s12503_s8 + $0x50] sm:$0xff] }
 0x951   :  { %5686 = vmatpush.msra.mxu1 %v11640_v4  ;;  %12898 = vst [vmem:[#allocation59_spill] sm:$0xff] %v11647_v18  ;;  %5751 = vmatpush.msrb.mxu2 %v11647_v18 }
 0x952   :  { %12903 = vst [vmem:[#allocation64_spill] sm:$0xff] %v11689_v60 }
 0x953   :  { %v7537_v54 = vpop.eup %7536  ;;  %5687 = vmatpush.msra.mxu1 %v11653_v50  ;;  %5752 = vmatpush.msrb.mxu2 %v11662_v17  ;;  %v11681_v17 = vld [vmem:[%s12503_s8 + $0xb0] sm:$0xff]  ;;  %12909 = vst [vmem:[#allocation70_spill] sm:$0xff] %v11739_v16 }
 0x954   :  { %v7539_v39 = vpop.eup %7538  ;;  %v11656_v59 = vadd.f32 1.0, %v7537_v54  ;;  %12902 = vst [vmem:[#allocation63_spill] sm:$0xff] %v11681_v17 }
 0x955   :  { %v11665_v18 = vpop.eup %7540  ;;  %v5332_v23 = vmul.f32 %v7539_v39, %v11598_v20  ;;  %5688 = vmatpush.msra.mxu1 %v11671_v8  ;;  %5753 = vmatpush.msrb.mxu2 %v11681_v17  ;;  %v11697_v17 = vld [vmem:[%s12503_s8 + $0x98] sm:$0xff]  ;;  %vm5337_vm15 = vweird.f32 %v7539_v39 }
 0x956   :  { %v7543_v54 = vpop.eup %7542  ;;  %v5347_v21 = vmul.f32 %v11665_v18, %v11607_v61  ;;  %7544 = vrcp.f32 %v11656_v59  ;;  %12904 = vst [vmem:[#allocation65_spill] sm:$0xff] %v11697_v17  ;;  %vm5338_vm3 = vmor %vm5336_vm0, %vm5337_vm15  ;;  %vm5352_vm5 = vweird.f32 %v11665_v18  ;;  %v5370_v1 = vand.u32 2147483647, %v11656_v59 }
 0x957   :  { %v11684_v15 = vadd.f32 1.0, %v7543_v54  ;;  %v5333_v57 = vsub.f32 1.0, %v5332_v23  ;;  %5689 = vmatpush.msra.mxu1 %v11689_v60  ;;  %5754 = vmatpush.msrb.mxu2 %v11697_v17  ;;  %v5340_v54 = vand.u32 2147483647, %v11598_v20  ;;  %v11713_v17 = vld [vmem:[%s12503_s8 + $0x80] sm:$0xff]  ;;  %v5237_v20 = vadd.f32 %v5236_v32, %v10988_v33  ;;  %vm11757_vm8 = vmor %vm5351_vm6, %vm5352_vm5 }
 0x958   :  { %v5348_v51 = vsub.f32 1.0, %v5347_v21  ;;  %v11705_v21 = vld [vmem:[%s12502_s7 + $0x20] sm:$0xff]  ;;  %12906 = vst [vmem:[#allocation67_spill] sm:$0xff] %v11713_v17  ;;  %vm5366_vm9 = vweird.f32 %v11656_v59  ;;  %vm5371_vm12 = vcmp.eq.f32.partialorder %v5370_v1, 8.507059e+37 }
 0x959   :  { %7546 = vrcp.f32 %v11684_v15  ;;  %v5334_v23 = vmul.f32 %v7539_v39, %v5333_v57  ;;  %12905 = vst [vmem:[#allocation66_spill] sm:$0xff] %v11705_v21  ;;  %5690 = vmatpush.msra.mxu1 %v11705_v21  ;;  %5755 = vmatpush.msrb.mxu2 %v11713_v17  ;;  %vm5341_vm4 = vcmp.eq.f32.partialorder %v5340_v54, 8.507059e+37  ;;  %v5357_v54 = vand.u32 2147483648, %v11607_v61 }
 0x95a   :  { %v5349_v56 = vmul.f32 %v11665_v18, %v5348_v51  ;;  %vm5381_vm14 = vweird.f32 %v11684_v15 }
 0x95b   :  { %v5335_v57 = vadd.f32 %v7539_v39, %v5334_v23  ;;  %5691 = vmatpush.msra.mxu1 %v11720_v31  ;;  %v11728_v23 = vld [vmem:[%s12503_s8 + $0x68] sm:$0xff] }
 0x95c   :  { %v7545_v51 = vpop.eup %7544  ;;  %12908 = vst [vmem:[#allocation69_spill] sm:$0xff] %v11728_v23  ;;  %5756 = vmatpush.msrb.mxu2 %v11728_v23  ;;  %v5350_v26 = vadd.f32 %v11665_v18, %v5349_v56  ;;  %v5372_v56 = vand.u32 2147483648, %v11656_v59 }
 0x95d   :  { %v5339_v17 = vsel %vm5338_vm3, %v7539_v39, %v5335_v57  ;;  %v5362_v31 = vmul.f32 %v7545_v51, %v11656_v59  ;;  %v11751_v57 = vld [vmem:[%s12503_s8 + $0x38] sm:$0xff]  ;;  %vm5367_vm7 = vweird.f32 %v7545_v51 }
 0x95e   :  { %v5344_v21 = vsel %vm5341_vm4, %v5343_v44, %v5339_v17  ;;  %5757 = vmatpush.msrb.mxu2 %v11739_v16  ;;  %v5355_v44 = vand.u32 2147483647, %v11607_v61  ;;  %12910 = vst [vmem:[#allocation71_spill] sm:$0xff] %v11751_v57  ;;  %v5354_v23 = vsel %vm11757_vm8, %v11665_v18, %v5350_v26  ;;  %vm5368_vm10 = vmor %vm5366_vm9, %vm5367_vm7  ;;  %v11777_v26 = vld [vmem:[%s12503_s8 + $0x8] sm:$0xff]  ;;  %v5240_v16 = vadd.f32 %v5239_v10, %v10988_v33 }
 0x95f   :  { %v7547_v35 = vpop.eup %7546  ;;  %v5391_v32 = vmul.f32 %v5344_v21, %v5306_v53  ;;  %v5363_v39 = vsub.f32 1.0, %v5362_v31  ;;  %v5308_v31 = vpop.f32.mrf.mxu0  ;;  %12914 = vst [vmem:[#allocation73_spill] sm:$0xff] %v11777_v26 }
 0x960   :  { %v5377_v17 = vmul.f32 %v7547_v35, %v11684_v15  ;;  %5758 = vmatpush.msrb.mxu2 %v11751_v57  ;;  %v5373_v57 = vor.u32 1.1754944e-38, %v5372_v56  ;;  %vm5356_vm11 = vcmp.eq.f32.partialorder %v5355_v44, 8.507059e+37  ;;  %vm5382_vm13 = vweird.f32 %v7547_v35 }
 0x961   :  { %v5393_v53 = vadd.f32 %v5391_v32, %v5237_v20  ;;  %v5364_v21 = vmul.f32 %v7545_v51, %v5363_v39  ;;  %v11768_v20 = vld [vmem:[%s12503_s8 + $0x20] sm:$0xff]  ;;  %v5358_v39 = vor.u32 1.1754944e-38, %v5357_v54  ;;  %v5387_v44 = vand.u32 2147483648, %v11684_v15  ;;  %vm5383_vm15 = vmor %vm5381_vm14, %vm5382_vm13 }
 0x962   :  { %v5378_v61 = vsub.f32 1.0, %v5377_v17  ;;  %12913 = vst [vmem:[#allocation72_spill] sm:$0xff] %v11768_v20  ;;  %5759 = vmatpush.msrb.mxu2 %v11768_v20  ;;  %v5309_v17 = vadd.f32 %v5308_v31, %v10969_v30 }
 0x963   :  { %7548 = vtanh.f32 %v5393_v53  ;;  %v5365_v32 = vadd.f32 %v7545_v51, %v5364_v21  ;;  %v5359_v59 = vsel %vm5356_vm11, %v5358_v39, %v5354_v23  ;;  %v5388_v1 = vor.u32 1.1754944e-38, %v5387_v44  ;;  %v12917_v39 = vld [vmem:[#allocation16_spill] sm:$0xff] }
 0x964   :  { %v5379_v18 = vmul.f32 %v7547_v35, %v5378_v61  ;;  %5760 = vmatpush.msrb.mxu2 %v11777_v26  ;;  %v5397_v21 = vsub.f32 1.0, %v5359_v59  ;;  %v5385_v61 = vand.u32 2147483647, %v11684_v15  ;;  %v5401_v10 = vmul.f32 %v5359_v59, %v11267_v2  ;;  %v5453_v59 = vpop.f32.mrf.mxu3 }
 0x965   :  { %v5369_v53 = vsel %vm5368_vm10, %v7545_v51, %v5365_v32  ;;  %v12916_v32 = vld [vmem:[#allocation53_spill] sm:$0xff] }
 0x966   :  { %v5374_v54 = vsel %vm5371_vm12, %v5373_v57, %v5369_v53  ;;  %v5380_v31 = vadd.f32 %v7547_v35, %v5379_v18  ;;  %vm5386_vm0 = vcmp.eq.f32.partialorder %v5385_v61, 8.507059e+37  ;;  %v12919_v18 = vld [vmem:[#allocation19_spill] sm:$0xff] }
 0x967   :  { %v5392_v56 = vmul.f32 %v5374_v54, %v5309_v17  ;;  %v12918_v17 = vld [vmem:[#allocation68_spill] sm:$0xff]  ;;  %v12921_v54 = vld [vmem:[#allocation26_spill] sm:$0xff] }
 0x968   :  { %v5384_v51 = vsel %vm5383_vm15, %v7547_v35, %v5380_v31  ;;  %v5454_v31 = vadd.f32 %v5453_v59, %v12921_v54  ;;  %v12925_v59 = vld [vmem:[#allocation30_spill] sm:$0xff] }
 0x969   :  { %v7549_v45 = vpop.eup %7548  ;;  %v5394_v58 = vadd.f32 %v5392_v56, %v5240_v16  ;;  %v5389_v57 = vsel %vm5386_vm0, %v5388_v1, %v5384_v51  ;;  %v5430_v16 = vpop.f32.mrf.mxu1  ;;  %v12924_v1 = vld [vmem:[#allocation29_spill] sm:$0xff] }
 0x96a   :  { %v5399_v26 = vmul.f32 %v7549_v45, %v5397_v21  ;;  %v5398_v15 = vsub.f32 1.0, %v5389_v57  ;;  %v5402_v45 = vmul.f32 %v5389_v57, %v11317_v12  ;;  %v12915_v12 = vld [vmem:[#allocation66_spill] sm:$0xff] }
 0x96b   :  { %7550 = vtanh.f32 %v5394_v58  ;;  %v12922_v21 = vld [vmem:[#allocation22_spill] sm:$0xff] }
 0x96c   :  { %v11785_v23 = vadd.f32 %v5401_v10, %v5399_v26  ;;  %v12920_v26 = vld [vmem:[#allocation21_spill] sm:$0xff]  ;;  %v5431_v61 = vadd.f32 %v5430_v16, %v12922_v21  ;;  %v12923_v10 = vld [vmem:[#allocation24_spill] sm:$0xff] }
 0x96d   :  { %v12927_v16 = vld [vmem:[#allocation41_spill] sm:$0xff] }
 0x96e   :  { %5498 = vmatmul.f32.vlgmr.msrb.gmra.mxu1 %v11785_v23  ;;  %5521 = vmatmul.f32.vlgmr.msrb.gmra.mxu0 %v11785_v23 }
 0x96f   :  { %5544 = vmatmul.f32.vlgmr.msrb.gmra.mxu3 %v11785_v23  ;;  %5768 = vmatpush.msrb.mxu1 %v11275_v9 }
 0x970   :  { %7420 = vmatpush.msk.msrb.mxu0 %vm2317_vm1, %v11281_v38  ;;  %7423 = vmatpush.msk.msrb.mxu3 %vm2317_vm1, %v11542_v42 }
 0x971   :  { %v7551_v35 = vpop.eup %7550  ;;  %5769 = vmatpush.msrb.mxu1 %v11295_v5 }
 0x972   :  { %v5400_v58 = vmul.f32 %v7551_v35, %v5398_v15  ;;  %5897 = vmatpush.msrb.mxu0 %v11302_v11  ;;  %5920 = vmatpush.msrb.mxu3 %v11557_v14 }
 0x973   :  { %5770 = vmatpush.msrb.mxu1 %v11314_v52 }
 0x974   :  { %v11800_v2 = vadd.f32 %v5402_v45, %v5400_v58  ;;  %5898 = vmatpush.msrb.mxu0 %v11322_v0  ;;  %5921 = vmatpush.msrb.mxu3 %v11573_v47  ;;  %v5645_v58 = vld [vmem:[#allocation2 + $0x3b0] sm:$0xff] }
 0x975   :  { %5771 = vmatpush.msrb.mxu1 %v11334_v19  ;;  %7408 = vmatmul.msk.f32.vlgmr.msra.gmra.mxu2 %vm1429_vm2, %v5645_v58 }
 0x976   :  { %5501 = vmatmul.f32.gmra.mxu1 %v11800_v2  ;;  %5524 = vmatmul.f32.gmra.mxu0 %v11800_v2 }
 0x977   :  { %5547 = vmatmul.f32.gmra.mxu3 %v11800_v2  ;;  %5772 = vmatpush.msrb.mxu1 %v11343_v49 }
 0x978   :  { %5899 = vmatpush.msrb.mxu0 %v11349_v3  ;;  %5922 = vmatpush.msrb.mxu3 %v11586_v22  ;;  %v12950_v22 = vld [vmem:[#allocation65_spill] sm:$0xff] }
 0x979   :  { %5773 = vmatpush.msrb.mxu1 %v11361_v28  ;;  %7426 = vmatpush.msk.msra.mxu2 %vm2317_vm1, %v12927_v16 }
 0x97a   :  { %5900 = vmatpush.msrb.mxu0 %v11367_v6  ;;  %5923 = vmatpush.msrb.mxu3 %v11595_v25  ;;  %v12948_v25 = vld [vmem:[#allocation46_spill] sm:$0xff] }
 0x97b   :  { %5774 = vmatpush.msrb.mxu1 %v11379_v27 }
 0x97c   :  { %5901 = vmatpush.msrb.mxu0 %v11385_v7  ;;  %5924 = vmatpush.msrb.mxu3 %v11612_v63  ;;  %v12936_v63 = vld [vmem:[#allocation12_spill] sm:$0xff] }
 0x97d   :  { %5775 = vmatpush.msrb.mxu1 %v11397_v55 }
 0x97e   :  { %5902 = vmatpush.msrb.mxu0 %v11403_v24  ;;  %5925 = vmatpush.msrb.mxu3 %v11627_v46 }
 0x97f   :  { %5776 = vmatpush.msrb.mxu1 %v11415_v43  ;;  %7414 = vmatmul.msk.f32.vlgmr.msra.gmra.mxu0 %vm1429_vm2, %v5645_v58 }
 0x980   :  { %5903 = vmatpush.msrb.mxu0 %v11421_v62  ;;  %5926 = vmatpush.msrb.mxu3 %v11640_v4  ;;  %v12934_v4 = vld [vmem:[#allocation44_spill] sm:$0xff] }
 0x981   :  { %5777 = vmatpush.msrb.mxu1 %v11433_v41 }
 0x982   :  { %5904 = vmatpush.msrb.mxu0 %v11439_v29  ;;  %5927 = vmatpush.msrb.mxu3 %v11653_v50  ;;  %v5646_v50 = vld [vmem:[#allocation2 + $0x3b8] sm:$0xff] }
 0x983   :  { %5778 = vmatpush.msrb.mxu1 %v11451_v37  ;;  %7409 = vmatmul.msk.f32.gmra.mxu2 %vm1429_vm2, %v5646_v50 }
 0x984   :  { %5905 = vmatpush.msrb.mxu0 %v11457_v48  ;;  %5928 = vmatpush.msrb.mxu3 %v11671_v8  ;;  %v12932_v8 = vld [vmem:[#allocation11_spill] sm:$0xff] }
 0x985   :  { %5779 = vmatpush.msrb.mxu1 %v11469_v40 }
 0x986   :  { %5906 = vmatpush.msrb.mxu0 %v11475_v34  ;;  %5929 = vmatpush.msrb.mxu3 %v11689_v60  ;;  %v12926_v60 = vld [vmem:[#allocation8_spill] sm:$0xff] }
 0x987   :  { %5780 = vmatpush.msrb.mxu1 %v11487_v13  ;;  %7415 = vmatmul.msk.f32.gmra.mxu0 %vm1429_vm2, %v5646_v50 }
 0x988   :  { %5907 = vmatpush.msrb.mxu0 %v11493_v36  ;;  %5930 = vmatpush.msrb.mxu3 %v12915_v12 }
 0x989   :  { %5781 = vmatpush.msrb.mxu1 %v12916_v32  ;;  %v12962_v32 = vld [vmem:[#allocation71_spill] sm:$0xff] }
 0x98a   :  { %5908 = vmatpush.msrb.mxu0 %v12917_v39  ;;  %5931 = vmatpush.msrb.mxu3 %v12918_v17  ;;  %v12961_v39 = vld [vmem:[#allocation28_spill] sm:$0xff] }
 0x98b   :  { %5782 = vmatpush.msrb.mxu1 %v12919_v18  ;;  %v12960_v18 = vld [vmem:[#allocation35_spill] sm:$0xff] }
 0x98c   :  { %7411 = vmatmul.msk.f32.vlgmr.msra.gmra.mxu1 %vm1429_vm2, %v5645_v58  ;;  %5962 = vmatpush.msra.mxu0 %v12926_v60  ;;  %v12931_v58 = vld [vmem:[#allocation38_spill] sm:$0xff] }
 0x98d   :  { %5783 = vmatpush.msrb.mxu1 %v12920_v26 }
 0x98f   :  { %5985 = vmatpush.msra.mxu1 %v12925_v59 }
 0x994   :  { %7412 = vmatmul.msk.f32.gmra.mxu1 %vm1429_vm2, %v5646_v50  ;;  %v12941_v50 = vld [vmem:[#allocation59_spill] sm:$0xff] }
 0x9c5   :  { %v5433_v53 = vpop.f32.mrf.mxu1 }
 0x9cb   :  { %v5456_v12 = vpop.f32.mrf.mxu3 }
 0x9eb   :  { %v5499_v56 = vpop.f32.mrf.mxu1  ;;  %v5522_v44 = vpop.f32.mrf.mxu0 }
 0x9ec   :  { %v5500_v51 = vadd.f32 %v5499_v56, %v12923_v10  ;;  %v5523_v57 = vadd.f32 %v5522_v44, %v12924_v1  ;;  %v5457_v56 = vadd.f32 %v5456_v12, %v12921_v54  ;;  %v12933_v12 = vld [vmem:[#allocation43_spill] sm:$0xff] }
 0x9ed   :  { %v12958_v54 = vld [vmem:[#allocation51_spill] sm:$0xff] }
 0x9ee   :  { %v5551_v15 = vadd.f32 %v5500_v51, %v5431_v61  ;;  %v5552_v35 = vadd.f32 %v5523_v57, %v5454_v31  ;;  %v12928_v31 = vld [vmem:[#allocation33_spill] sm:$0xff]  ;;  %v12929_v51 = vld [vmem:[#allocation10_spill] sm:$0xff] }
 0x9ef   :  { %5986 = vmatpush.msra.mxu1 %v12928_v31  ;;  %5963 = vmatpush.msra.mxu0 %v12929_v51  ;;  %v12930_v57 = vld [vmem:[#allocation14_spill] sm:$0xff]  ;;  %v12953_v31 = vld [vmem:[#allocation67_spill] sm:$0xff] }
 0x9f0   :  { %v7403_v45 = vmul.f32 -1.442695, %v5551_v15  ;;  %v7404_v17 = vmul.f32 -1.442695, %v5552_v35  ;;  %5943 = vmatpush.msra.mxu2 %v12930_v57  ;;  %v5434_v15 = vadd.f32 %v5433_v53, %v12922_v21 }
 0x9f1   :  { %5987 = vmatpush.msra.mxu1 %v12931_v58  ;;  %5964 = vmatpush.msra.mxu0 %v12932_v8  ;;  %v12951_v58 = vld [vmem:[#allocation32_spill] sm:$0xff] }
 0x9f2   :  { %7552 = vpow2.f32 %v7403_v45  ;;  %5944 = vmatpush.msra.mxu2 %v12933_v12  ;;  %v5545_v59 = vpop.f32.mrf.mxu3 }
 0x9f3   :  { %7554 = vpow2.f32 %v7404_v17  ;;  %v5502_v44 = vpop.f32.mrf.mxu1  ;;  %v5525_v61 = vpop.f32.mrf.mxu0  ;;  %5988 = vmatpush.msra.mxu1 %v12934_v4  ;;  %5965 = vmatpush.msra.mxu0 %v12936_v63  ;;  %v12943_v63 = vld [vmem:[#allocation18_spill] sm:$0xff] }
 0x9f4   :  { %v5503_v35 = vadd.f32 %v5502_v44, %v12923_v10  ;;  %v5526_v60 = vadd.f32 %v5525_v61, %v12924_v1  ;;  %v12935_v44 = vld [vmem:[#allocation55_spill] sm:$0xff] }
 0x9f5   :  { %5989 = vmatpush.msra.mxu1 %v12935_v44  ;;  %v12947_v44 = vld [vmem:[#allocation63_spill] sm:$0xff] }
 0x9f6   :  { %v5553_v45 = vadd.f32 %v5503_v35, %v5434_v15  ;;  %v5554_v17 = vadd.f32 %v5526_v60, %v5457_v56  ;;  %v12937_v15 = vld [vmem:[#allocation15_spill] sm:$0xff]  ;;  %v12938_v35 = vld [vmem:[#allocation57_spill] sm:$0xff]  ;;  %v12939_v60 = vld [vmem:[#allocation6_spill] sm:$0xff] }
 0x9f7   :  { %5945 = vmatpush.msra.mxu2 %v12937_v15  ;;  %5990 = vmatpush.msra.mxu1 %v12938_v35  ;;  %v12955_v1 = vld [vmem:[#allocation23_spill] sm:$0xff] }
 0x9f8   :  { %v7553_v53 = vpop.eup %7552  ;;  %v7405_v51 = vmul.f32 -1.442695, %v5553_v45  ;;  %v7406_v8 = vmul.f32 -1.442695, %v5554_v17  ;;  %5966 = vmatpush.msra.mxu0 %v12939_v60  ;;  %v12940_v45 = vld [vmem:[#allocation45_spill] sm:$0xff]  ;;  %v12942_v17 = vld [vmem:[#allocation7_spill] sm:$0xff] }
 0x9f9   :  { %v7555_v61 = vpop.eup %7554  ;;  %v5567_v46 = vadd.f32 1.0, %v7553_v53  ;;  %5946 = vmatpush.msra.mxu2 %v12940_v45  ;;  %5991 = vmatpush.msra.mxu1 %v12941_v50  ;;  %v12944_v53 = vld [vmem:[#allocation61_spill] sm:$0xff]  ;;  %v12949_v50 = vld [vmem:[#allocation20_spill] sm:$0xff] }
 0x9fa   :  { %v11868_v56 = vadd.f32 1.0, %v7555_v61  ;;  %7556 = vpow2.f32 %v7405_v51  ;;  %5967 = vmatpush.msra.mxu0 %v12942_v17  ;;  %v12945_v61 = vld [vmem:[#allocation9_spill] sm:$0xff]  ;;  %v12946_v51 = vld [vmem:[#allocation47_spill] sm:$0xff] }
 0x9fb   :  { %7558 = vrcp.f32 %v5567_v46  ;;  %5947 = vmatpush.msra.mxu2 %v12943_v63  ;;  %5992 = vmatpush.msra.mxu1 %v12944_v53  ;;  %v5582_v42 = vand.u32 2147483648, %v5567_v46  ;;  %v5580_v21 = vand.u32 2147483647, %v5567_v46  ;;  %vm5576_vm4 = vweird.f32 %v5567_v46 }
 0x9fc   :  { %7560 = vrcp.f32 %v11868_v56  ;;  %5968 = vmatpush.msra.mxu0 %v12945_v61  ;;  %vm5591_vm8 = vweird.f32 %v11868_v56 }
 0x9fd   :  { %7562 = vpow2.f32 %v7406_v8  ;;  %5948 = vmatpush.msra.mxu2 %v12946_v51  ;;  %5993 = vmatpush.msra.mxu1 %v12947_v44  ;;  %v12952_v44 = vld [vmem:[#allocation49_spill] sm:$0xff]  ;;  %v5583_v26 = vor.u32 1.1754944e-38, %v5582_v42  ;;  %vm5581_vm6 = vcmp.eq.f32.partialorder %v5580_v21, 8.507059e+37  ;;  %v12963_v42 = vld [vmem:[#allocation50_spill] sm:$0xff] }
 0x9fe   :  { %5969 = vmatpush.msra.mxu0 %v12948_v25  ;;  %v5476_v25 = vpop.f32.mrf.mxu2 }
 0x9ff   :  { %5949 = vmatpush.msra.mxu2 %v12949_v50  ;;  %5994 = vmatpush.msra.mxu1 %v12950_v22  ;;  %v12954_v22 = vld [vmem:[#allocation34_spill] sm:$0xff] }
 0xa00   :  { %v7557_v35 = vpop.eup %7556  ;;  %5970 = vmatpush.msra.mxu0 %v12951_v58  ;;  %v12956_v58 = vld [vmem:[#allocation69_spill] sm:$0xff] }
 0xa01   :  { %v7559_v60 = vpop.eup %7558  ;;  %v11881_v4 = vadd.f32 1.0, %v7557_v35  ;;  %5950 = vmatpush.msra.mxu2 %v12952_v44  ;;  %5995 = vmatpush.msra.mxu1 %v12953_v31  ;;  %v12959_v31 = vld [vmem:[#allocation70_spill] sm:$0xff] }
 0xa02   :  { %v11885_v8 = vpop.eup %7560  ;;  %v5572_v17 = vmul.f32 %v7559_v60, %v5567_v46  ;;  %5971 = vmatpush.msra.mxu0 %v12954_v22  ;;  %vm5577_vm3 = vweird.f32 %v7559_v60 }
 0xa03   :  { %v7563_v53 = vpop.eup %7562  ;;  %v5587_v61 = vmul.f32 %v11885_v8, %v11868_v56  ;;  %7564 = vrcp.f32 %v11881_v4  ;;  %5951 = vmatpush.msra.mxu2 %v12955_v1  ;;  %5996 = vmatpush.msra.mxu1 %v12956_v58  ;;  %vm5578_vm5 = vmor %vm5576_vm4, %vm5577_vm3  ;;  %v5546_v58 = vadd.f32 %v5545_v59, %v10969_v30  ;;  %vm5592_vm7 = vweird.f32 %v11885_v8 }
 0xa04   :  { %v5573_v35 = vsub.f32 1.0, %v5572_v17  ;;  %v11893_v47 = vadd.f32 1.0, %v7563_v53  ;;  %v12957_v17 = vld [vmem:[#allocation48_spill] sm:$0xff]  ;;  %v5597_v59 = vand.u32 2147483648, %v11868_v56  ;;  %vm11924_vm10 = vmor %vm5591_vm8, %vm5592_vm7  ;;  %vm5606_vm11 = vweird.f32 %v11881_v4 }
 0xa05   :  { %v5588_v14 = vsub.f32 1.0, %v5587_v61  ;;  %5972 = vmatpush.msra.mxu0 %v12957_v17  ;;  %5952 = vmatpush.msra.mxu2 %v12958_v54 }
 0xa06   :  { %v5574_v10 = vmul.f32 %v7559_v60, %v5573_v35  ;;  %7566 = vrcp.f32 %v11893_v47  ;;  %5997 = vmatpush.msra.mxu1 %v12959_v31  ;;  %v5477_v35 = vadd.f32 %v5476_v25, %v10988_v33  ;;  %v12964_v25 = vld [vmem:[#allocation17_spill] sm:$0xff]  ;;  %vm5621_vm0 = vweird.f32 %v11893_v47 }
 0xa07   :  { %v5589_v53 = vmul.f32 %v11885_v8, %v5588_v14  ;;  %5973 = vmatpush.msra.mxu0 %v12960_v18  ;;  %5953 = vmatpush.msra.mxu2 %v12961_v39 }
 0xa08   :  { %v5575_v61 = vadd.f32 %v7559_v60, %v5574_v10  ;;  %5998 = vmatpush.msra.mxu1 %v12962_v32  ;;  %v5548_v32 = vpop.f32.mrf.mxu3 }
 0xa09   :  { %v7565_v22 = vpop.eup %7564  ;;  %v5590_v10 = vadd.f32 %v11885_v8, %v5589_v53  ;;  %5974 = vmatpush.msra.mxu0 %v12963_v42  ;;  %5954 = vmatpush.msra.mxu2 %v12964_v25  ;;  %v12965_v53 = vld [vmem:[#allocation37_spill] sm:$0xff] }
 0xa0a   :  { %v5579_v14 = vsel %vm5578_vm5, %v7559_v60, %v5575_v61  ;;  %v5602_v17 = vmul.f32 %v7565_v22, %v11881_v4  ;;  %5999 = vmatpush.msra.mxu1 %v11768_v20  ;;  %v5612_v60 = vand.u32 2147483648, %v11881_v4  ;;  %vm5607_vm9 = vweird.f32 %v7565_v22  ;;  %v12968_v42 = vld [vmem:[#allocation73_spill] sm:$0xff] }
 0xa0b   :  { %v5584_v46 = vsel %vm5581_vm6, %v5583_v26, %v5579_v14  ;;  %v5595_v26 = vand.u32 2147483647, %v11868_v56  ;;  %5975 = vmatpush.msra.mxu0 %v12965_v53  ;;  %v5610_v14 = vand.u32 2147483647, %v11881_v4  ;;  %v5594_v56 = vsel %vm11924_vm10, %v11885_v8, %v5590_v10  ;;  %vm5608_vm12 = vmor %vm5606_vm11, %vm5607_vm9 }
 0xa0c   :  { %v7567_v18 = vpop.eup %7566  ;;  %v5631_v31 = vmul.f32 %v5584_v46, %v5546_v58  ;;  %v5603_v39 = vsub.f32 1.0, %v5602_v17  ;;  %v5479_v17 = vpop.f32.mrf.mxu2  ;;  %6000 = vmatpush.msra.mxu1 %v12968_v42  ;;  %v12970_v42 = vld [vmem:[#allocation13_spill] sm:$0xff]  ;;  %v5627_v4 = vand.u32 2147483648, %v11893_v47 }
 0xa0d   :  { %v5617_v21 = vmul.f32 %v7567_v18, %v11893_v47  ;;  %v5480_v25 = vadd.f32 %v5479_v17, %v10988_v33  ;;  %vm5596_vm13 = vcmp.eq.f32.partialorder %v5595_v26, 8.507059e+37  ;;  %vm5611_vm14 = vcmp.eq.f32.partialorder %v5610_v14, 8.507059e+37  ;;  %v7730_v17 = vld [vmem:[%s12503_s8 + $0x150] sm:$0xff] }
 0xa0e   :  { %v5604_v61 = vmul.f32 %v7565_v22, %v5603_v39  ;;  %v5633_v58 = vadd.f32 %v5631_v31, %v5477_v35  ;;  %v12969_v39 = vld [vmem:[#allocation39_spill] sm:$0xff]  ;;  %v5598_v31 = vor.u32 1.1754944e-38, %v5597_v59  ;;  %v5613_v35 = vor.u32 1.1754944e-38, %v5612_v60 }
 0xa0f   :  { %v5618_v20 = vsub.f32 1.0, %v5617_v21  ;;  %5976 = vmatpush.msra.mxu0 %v12969_v39  ;;  %v5549_v21 = vadd.f32 %v5548_v32, %v10969_v30  ;;  %vm5622_vm15 = vweird.f32 %v7567_v18  ;;  %v5625_v60 = vand.u32 2147483647, %v11893_v47 }
 0xa10   :  { %v5605_v53 = vadd.f32 %v7565_v22, %v5604_v61  ;;  %7568 = vtanh.f32 %v5633_v58  ;;  %v5599_v8 = vsel %vm5596_vm13, %v5598_v31, %v5594_v56  ;;  %vm5623_vm3 = vmor %vm5621_vm0, %vm5622_vm15  ;;  %v5628_v14 = vor.u32 1.1754944e-38, %v5627_v4  ;;  %v12987_v31 = vld [vmem:[#allocation36_spill] sm:$0xff] }
 0xa11   :  { %v5619_v36 = vmul.f32 %v7567_v18, %v5618_v20  ;;  %5977 = vmatpush.msra.mxu0 %v12970_v42  ;;  %v5637_v59 = vsub.f32 1.0, %v5599_v8  ;;  %v5641_v32 = vmul.f32 %v5599_v8, %v11785_v23  ;;  %vm5626_vm4 = vcmp.eq.f32.partialorder %v5625_v60, 8.507059e+37  ;;  %v12986_v42 = vld [vmem:[#allocation33_spill] sm:$0xff]  ;;  %v12990_v60 = vld [vmem:[#allocation42_spill] sm:$0xff] }
 0xa12   :  { %v5609_v13 = vsel %vm5608_vm12, %v7565_v22, %v5605_v53 }
 0xa13   :  { %v5614_v10 = vsel %vm5611_vm14, %v5613_v35, %v5609_v13  ;;  %v5620_v46 = vadd.f32 %v7567_v18, %v5619_v36  ;;  %v7731_v35 = vld [vmem:[%s12503_s8 + $0x138] sm:$0xff] }
 0xa14   :  { %v5632_v61 = vmul.f32 %v5614_v10, %v5549_v21  ;;  %v12988_v21 = vld [vmem:[#allocation38_spill] sm:$0xff] }
 0xa15   :  { %v5624_v22 = vsel %vm5623_vm3, %v7567_v18, %v5620_v46  ;;  %v5886_v46 = vld [vmem:[#allocation2 + $0x478] sm:$0xff] }
 0xa16   :  { %v7569_v26 = vpop.eup %7568  ;;  %v5634_v20 = vadd.f32 %v5632_v61, %v5480_v25  ;;  %v5629_v36 = vsel %vm5626_vm4, %v5628_v14, %v5624_v22  ;;  %v12989_v61 = vld [vmem:[#allocation40_spill] sm:$0xff] }
 0xa17   :  { %v5639_v58 = vmul.f32 %v7569_v26, %v5637_v59  ;;  %v5638_v47 = vsub.f32 1.0, %v5629_v36  ;;  %v5642_v18 = vmul.f32 %v5629_v36, %v11800_v2  ;;  %v12991_v22 = vld [vmem:[#allocation44_spill] sm:$0xff]  ;;  %v12992_v36 = vld [vmem:[#allocation54_spill] sm:$0xff] }
 0xa18   :  { %7570 = vtanh.f32 %v5634_v20 }
 0xa19   :  { %v11941_v13 = vadd.f32 %v5641_v32, %v5639_v58  ;;  %v7732_v32 = vld [vmem:[%s12503_s8 + $0x120] sm:$0xff] }
 0xa1b   :  { %5738 = vmatmul.f32.vlgmr.msra.gmra.mxu3 %v11941_v13  ;;  %5761 = vmatmul.f32.vlgmr.msrb.gmra.mxu2 %v11941_v13 }
 0xa1c   :  { %5784 = vmatmul.f32.vlgmr.msrb.gmra.mxu1 %v11941_v13  ;;  %6008 = vmatpush.msra.mxu3 %v11275_v9 }
 0xa1d   :  { %7433 = vmatpush.msk.msrb.mxu2 %vm2317_vm1, %v11281_v38  ;;  %7439 = vmatpush.msk.msrb.mxu1 %vm2317_vm1, %v12927_v16  ;;  %v12971_v38 = vld [vmem:[#allocation25_spill] sm:$0xff] }
 0xa1e   :  { %v7571_v23 = vpop.eup %7570  ;;  %6009 = vmatpush.msra.mxu3 %v11295_v5  ;;  %v12972_v5 = vld [vmem:[#allocation52_spill] sm:$0xff] }
 0xa1f   :  { %v5640_v25 = vmul.f32 %v7571_v23, %v5638_v47  ;;  %6137 = vmatpush.msrb.mxu2 %v11302_v11  ;;  %6183 = vmatpush.msrb.mxu1 %v12930_v57  ;;  %v12973_v11 = vld [vmem:[#allocation28_spill] sm:$0xff]  ;;  %v12983_v57 = vld [vmem:[#allocation27_spill] sm:$0xff]  ;;  %v7733_v47 = vld [vmem:[%s12503_s8 + $0x108] sm:$0xff] }
 0xa20   :  { %6010 = vmatpush.msra.mxu3 %v11314_v52  ;;  %v12974_v52 = vld [vmem:[#allocation53_spill] sm:$0xff]  ;;  %v12993_v23 = vld [vmem:[#allocation55_spill] sm:$0xff] }
 0xa21   :  { %v11956_v9 = vadd.f32 %v5642_v18, %v5640_v25  ;;  %6138 = vmatpush.msrb.mxu2 %v11322_v0  ;;  %6184 = vmatpush.msrb.mxu1 %v12933_v12  ;;  %v12975_v0 = vld [vmem:[#allocation16_spill] sm:$0xff]  ;;  %v7734_v18 = vld [vmem:[%s12503_s8 + $0xf0] sm:$0xff] }
 0xa22   :  { %6011 = vmatpush.msra.mxu3 %v11334_v19  ;;  %v12976_v19 = vld [vmem:[#allocation17_spill] sm:$0xff]  ;;  %v12994_v25 = vld [vmem:[#allocation56_spill] sm:$0xff] }
 0xa23   :  { %5741 = vmatmul.f32.gmra.mxu3 %v11956_v9  ;;  %5764 = vmatmul.f32.gmra.mxu2 %v11956_v9 }
 0xa24   :  { %5787 = vmatmul.f32.gmra.mxu1 %v11956_v9  ;;  %6012 = vmatpush.msra.mxu3 %v11343_v49  ;;  %v12977_v49 = vld [vmem:[#allocation19_spill] sm:$0xff] }
 0xa25   :  { %6139 = vmatpush.msrb.mxu2 %v11349_v3  ;;  %6185 = vmatpush.msrb.mxu1 %v12937_v15  ;;  %v12978_v3 = vld [vmem:[#allocation21_spill] sm:$0xff]  ;;  %v12984_v15 = vld [vmem:[#allocation30_spill] sm:$0xff] }
 0xa26   :  { %6013 = vmatpush.msra.mxu3 %v11361_v28  ;;  %v5670_v28 = vpop.f32.mrf.mxu2 }
 0xa27   :  { %6140 = vmatpush.msrb.mxu2 %v11367_v6  ;;  %6186 = vmatpush.msrb.mxu1 %v12940_v45 }
 0xa28   :  { %6014 = vmatpush.msra.mxu3 %v11379_v27  ;;  %v5693_v27 = vpop.f32.mrf.mxu1 }
 0xa29   :  { %6141 = vmatpush.msrb.mxu2 %v11385_v7  ;;  %6187 = vmatpush.msrb.mxu1 %v12943_v63  ;;  %v12979_v7 = vld [vmem:[#allocation26_spill] sm:$0xff] }
 0xa2a   :  { %6015 = vmatpush.msra.mxu3 %v11397_v55  ;;  %v5694_v55 = vadd.f32 %v5693_v27, %v12979_v7 }
 0xa2b   :  { %6142 = vmatpush.msrb.mxu2 %v11403_v24  ;;  %6188 = vmatpush.msrb.mxu1 %v12946_v51 }
 0xa2c   :  { %6016 = vmatpush.msra.mxu3 %v11415_v43 }
 0xa2d   :  { %6143 = vmatpush.msrb.mxu2 %v11421_v62  ;;  %6189 = vmatpush.msrb.mxu1 %v12949_v50  ;;  %v12980_v62 = vld [vmem:[#allocation22_spill] sm:$0xff]  ;;  %v12985_v50 = vld [vmem:[#allocation31_spill] sm:$0xff] }
 0xa2e   :  { %6017 = vmatpush.msra.mxu3 %v11433_v41  ;;  %v5673_v6 = vpop.f32.mrf.mxu2  ;;  %v5671_v41 = vadd.f32 %v5670_v28, %v12980_v62  ;;  %v7736_v28 = vld [vmem:[%s12503_s8 + $0xc0] sm:$0xff] }
 0xa2f   :  { %6144 = vmatpush.msrb.mxu2 %v11439_v29  ;;  %6190 = vmatpush.msrb.mxu1 %v12952_v44  ;;  %v12981_v29 = vld [vmem:[#allocation24_spill] sm:$0xff]  ;;  %v7729_v44 = vld [vmem:[%s12503_s8 + $0x168] sm:$0xff]  ;;  %v5674_v56 = vadd.f32 %v5673_v6, %v12980_v62 }
 0xa30   :  { %6018 = vmatpush.msra.mxu3 %v11451_v37  ;;  %v5696_v12 = vpop.f32.mrf.mxu1  ;;  %v12999_v6 = vld [vmem:[#allocation61_spill] sm:$0xff] }
 0xa31   :  { %6145 = vmatpush.msrb.mxu2 %v11457_v48  ;;  %6191 = vmatpush.msrb.mxu1 %v12955_v1  ;;  %v12982_v48 = vld [vmem:[#allocation29_spill] sm:$0xff]  ;;  %v5697_v45 = vadd.f32 %v5696_v12, %v12979_v7 }
 0xa32   :  { %6019 = vmatpush.msra.mxu3 %v11469_v40 }
 0xa33   :  { %6146 = vmatpush.msrb.mxu2 %v11475_v34  ;;  %6192 = vmatpush.msrb.mxu1 %v12958_v54  ;;  %v5885_v54 = vld [vmem:[#allocation2 + $0x470] sm:$0xff] }
 0xa34   :  { %6020 = vmatpush.msra.mxu3 %v12971_v38  ;;  %7421 = vmatmul.msk.f32.vlgmr.msrb.gmra.mxu0 %vm1429_vm2, %v5885_v54  ;;  %v12995_v38 = vld [vmem:[#allocation57_spill] sm:$0xff] }
 0xa35   :  { %6147 = vmatpush.msrb.mxu2 %v12972_v5  ;;  %6193 = vmatpush.msrb.mxu1 %v12973_v11  ;;  %v12996_v5 = vld [vmem:[#allocation58_spill] sm:$0xff]  ;;  %v7735_v11 = vld [vmem:[%s12503_s8 + $0xd8] sm:$0xff] }
 0xa36   :  { %6021 = vmatpush.msra.mxu3 %v12974_v52  ;;  %7427 = vmatmul.msk.f32.vlgmr.msra.gmra.mxu2 %vm1429_vm2, %v5885_v54  ;;  %v12997_v52 = vld [vmem:[#allocation59_spill] sm:$0xff] }
 0xa37   :  { %6148 = vmatpush.msrb.mxu2 %v12975_v0  ;;  %6194 = vmatpush.msrb.mxu1 %v12976_v19  ;;  %v12998_v19 = vld [vmem:[#allocation60_spill] sm:$0xff] }
 0xa38   :  { %6022 = vmatpush.msra.mxu3 %v12977_v49  ;;  %7436 = vmatpush.msk.msrb.mxu0 %vm2317_vm1, %v12983_v57  ;;  %v5716_v57 = vpop.f32.mrf.mxu0 }
 0xa39   :  { %7424 = vmatmul.msk.f32.vlgmr.msrb.gmra.mxu3 %vm1429_vm2, %v5885_v54  ;;  %6225 = vmatpush.msra.mxu2 %v12984_v15  ;;  %v13003_v15 = vld [vmem:[#allocation65_spill] sm:$0xff] }
 0xa3a   :  { %6023 = vmatpush.msra.mxu3 %v12978_v3  ;;  %6160 = vmatpush.msrb.mxu0 %v12985_v50 }
 0xa3b   :  { %6226 = vmatpush.msra.mxu2 %v12986_v42  ;;  %v13005_v42 = vld [vmem:[#allocation67_spill] sm:$0xff] }
 0xa3c   :  { %6202 = vmatpush.msrb.mxu3 %v7729_v44  ;;  %6161 = vmatpush.msrb.mxu0 %v12987_v31  ;;  %v7738_v44 = vld [vmem:[%s12503_s8 + $0x90] sm:$0xff] }
 0xa3d   :  { %6227 = vmatpush.msra.mxu2 %v12988_v21  ;;  %7422 = vmatmul.msk.f32.gmra.mxu0 %vm1429_vm2, %v5886_v46  ;;  %v7740_v21 = vld [vmem:[%s12503_s8 + $0x60] sm:$0xff] }
 0xa3e   :  { %6203 = vmatpush.msrb.mxu3 %v7730_v17  ;;  %6162 = vmatpush.msrb.mxu0 %v12989_v61  ;;  %v7739_v17 = vld [vmem:[%s12503_s8 + $0x78] sm:$0xff] }
 0xa3f   :  { %7428 = vmatmul.msk.f32.gmra.mxu2 %vm1429_vm2, %v5886_v46 }
 0xa40   :  { %6204 = vmatpush.msrb.mxu3 %v7731_v35  ;;  %6163 = vmatpush.msrb.mxu0 %v12990_v60  ;;  %v7741_v60 = vld [vmem:[%s12503_s8 + $0x48] sm:$0xff] }
 0xa41   :  { %7425 = vmatmul.msk.f32.gmra.mxu3 %vm1429_vm2, %v5886_v46  ;;  %6228 = vmatpush.msra.mxu2 %v12991_v22 }
 0xa42   :  { %6205 = vmatpush.msrb.mxu3 %v7732_v32  ;;  %6164 = vmatpush.msrb.mxu0 %v12992_v36 }
 0xa43   :  { %6229 = vmatpush.msra.mxu2 %v12993_v23 }
 0xa44   :  { %6206 = vmatpush.msrb.mxu3 %v7733_v47  ;;  %6165 = vmatpush.msrb.mxu0 %v12994_v25  ;;  %v7742_v25 = vld [vmem:[%s12503_s8 + $0x30] sm:$0xff] }
 0xa45   :  { %6230 = vmatpush.msra.mxu2 %v12995_v38 }
 0xa46   :  { %6207 = vmatpush.msrb.mxu3 %v7734_v18  ;;  %6166 = vmatpush.msrb.mxu0 %v12996_v5  ;;  %v13009_v18 = vld [vmem:[#allocation71_spill] sm:$0xff] }
 0xa47   :  { %6231 = vmatpush.msra.mxu2 %v12997_v52 }
 0xa48   :  { %6208 = vmatpush.msrb.mxu3 %v7735_v11  ;;  %6167 = vmatpush.msrb.mxu0 %v12998_v19  ;;  %v5719_v19 = vpop.f32.mrf.mxu0 }
 0xa49   :  { %6232 = vmatpush.msra.mxu2 %v12999_v6  ;;  %v13012_v6 = vld [vmem:[#allocation72_spill] sm:$0xff] }
 0xa4a   :  { %6209 = vmatpush.msrb.mxu3 %v7736_v28  ;;  %v7743_v28 = vld [vmem:[%s12503_s8 + $0x18] sm:$0xff] }
 0xa9e   :  { %v5739_v24 = vpop.f32.mrf.mxu3  ;;  %v5762_v43 = vpop.f32.mrf.mxu2 }
 0xa9f   :  { %v5740_v37 = vadd.f32 %v5739_v24, %v12981_v29  ;;  %v5763_v40 = vadd.f32 %v5762_v43, %v12982_v48  ;;  %v13000_v24 = vld [vmem:[#allocation62_spill] sm:$0xff] }
 0xaa0   :  { %6168 = vmatpush.msrb.mxu0 %v13000_v24 }
 0xaa1   :  { %v5791_v34 = vadd.f32 %v5740_v37, %v5671_v41  ;;  %v5792_v2 = vadd.f32 %v5763_v40, %v5694_v55  ;;  %v7737_v37 = vld [vmem:[%s12503_s8 + $0xa8] sm:$0xff]  ;;  %v13001_v40 = vld [vmem:[#allocation63_spill] sm:$0xff] }
 0xaa2   :  { %6210 = vmatpush.msrb.mxu3 %v7737_v37  ;;  %6233 = vmatpush.msra.mxu2 %v13001_v40  ;;  %v13013_v40 = vld [vmem:[#allocation73_spill] sm:$0xff] }
 0xaa3   :  { %v7416_v1 = vmul.f32 -1.442695, %v5791_v34  ;;  %v7417_v16 = vmul.f32 -1.442695, %v5792_v2  ;;  %v5785_v34 = vpop.f32.mrf.mxu1 }
 0xaa4   :  { %6211 = vmatpush.msrb.mxu3 %v7738_v44  ;;  %6234 = vmatpush.msra.mxu2 %v13003_v15  ;;  %v5786_v31 = vadd.f32 %v5785_v34, %v10969_v30  ;;  %v5720_v34 = vadd.f32 %v5719_v19, %v10988_v33 }
 0xaa5   :  { %7572 = vpow2.f32 %v7416_v1  ;;  %v13002_v1 = vld [vmem:[#allocation64_spill] sm:$0xff] }
 0xaa6   :  { %7574 = vpow2.f32 %v7417_v16  ;;  %v5742_v63 = vpop.f32.mrf.mxu3  ;;  %v5765_v51 = vpop.f32.mrf.mxu2  ;;  %6169 = vmatpush.msrb.mxu0 %v13002_v1  ;;  %6212 = vmatpush.msrb.mxu3 %v7739_v17 }
 0xaa7   :  { %v5743_v39 = vadd.f32 %v5742_v63, %v12981_v29  ;;  %v5766_v53 = vadd.f32 %v5765_v51, %v12982_v48  ;;  %v13004_v63 = vld [vmem:[#allocation66_spill] sm:$0xff]  ;;  %6235 = vmatpush.msra.mxu2 %v13005_v42 }
 0xaa8   :  { %6170 = vmatpush.msrb.mxu0 %v13004_v63  ;;  %6213 = vmatpush.msrb.mxu3 %v7740_v21 }
 0xaa9   :  { %v5793_v8 = vadd.f32 %v5743_v39, %v5674_v56  ;;  %v5794_v10 = vadd.f32 %v5766_v53, %v5697_v45  ;;  %v13006_v39 = vld [vmem:[#allocation68_spill] sm:$0xff] }
 0xaaa   :  { %6171 = vmatpush.msrb.mxu0 %v13006_v39  ;;  %6214 = vmatpush.msrb.mxu3 %v7741_v60  ;;  %v7753_v60 = vld [vmem:[%s12503_s8 + $0xb8] sm:$0xff] }
 0xaab   :  { %v7573_v4 = vpop.eup %7572  ;;  %v7418_v59 = vmul.f32 -1.442695, %v5793_v8  ;;  %v7419_v58 = vmul.f32 -1.442695, %v5794_v10  ;;  %v13007_v8 = vld [vmem:[#allocation69_spill] sm:$0xff]  ;;  %v5717_v10 = vadd.f32 %v5716_v57, %v10988_v33  ;;  %v5788_v38 = vpop.f32.mrf.mxu1 }
 0xaac   :  { %v7575_v26 = vpop.eup %7574  ;;  %v12028_v20 = vadd.f32 1.0, %v7573_v4  ;;  %6236 = vmatpush.msra.mxu2 %v13007_v8  ;;  %6215 = vmatpush.msrb.mxu3 %v7742_v25  ;;  %v7747_v8 = vld [vmem:[%s12503_s8 + $0x148] sm:$0xff] }
 0xaad   :  { %v12034_v14 = vadd.f32 1.0, %v7575_v26  ;;  %7576 = vpow2.f32 %v7418_v59  ;;  %v13008_v26 = vld [vmem:[#allocation70_spill] sm:$0xff] }
 0xaae   :  { %7578 = vrcp.f32 %v12028_v20  ;;  %v5822_v12 = vand.u32 2147483648, %v12028_v20  ;;  %v5820_v50 = vand.u32 2147483647, %v12028_v20  ;;  %vm5816_vm5 = vweird.f32 %v12028_v20  ;;  %6237 = vmatpush.msra.mxu2 %v13008_v26  ;;  %6216 = vmatpush.msrb.mxu3 %v7743_v28  ;;  %v7754_v26 = vld [vmem:[%s12503_s8 + $0xa0] sm:$0xff]  ;;  %v6125_v28 = vld [vmem:[#allocation2 + $0x530] sm:$0xff] }
 0xaaf   :  { %7580 = vrcp.f32 %v12034_v14  ;;  %v5837_v22 = vand.u32 2147483648, %v12034_v14  ;;  %vm5831_vm9 = vweird.f32 %v12034_v14  ;;  %v5835_v23 = vand.u32 2147483647, %v12034_v14  ;;  %7434 = vmatmul.msk.f32.vlgmr.msrb.gmra.mxu2 %vm1429_vm2, %v6125_v28 }
 0xab0   :  { %7582 = vpow2.f32 %v7419_v58  ;;  %v5823_v35 = vor.u32 1.1754944e-38, %v5822_v12  ;;  %vm5821_vm7 = vcmp.eq.f32.partialorder %v5820_v50, 8.507059e+37  ;;  %6238 = vmatpush.msra.mxu2 %v13009_v18 }
 0xab1   :  { %v5838_v24 = vor.u32 1.1754944e-38, %v5837_v22  ;;  %vm5836_vm14 = vcmp.eq.f32.partialorder %v5835_v23, 8.507059e+37  ;;  %v7758_v22 = vld [vmem:[%s12503_s8 + $0x40] sm:$0xff]  ;;  %v5910_v23 = vpop.f32.mrf.mxu0 }
 0xab2   :  { %6239 = vmatpush.msra.mxu2 %v13012_v6 }
 0xab3   :  { %v7577_v0 = vpop.eup %7576 }
 0xab4   :  { %v7579_v49 = vpop.eup %7578  ;;  %v12054_v3 = vadd.f32 1.0, %v7577_v0  ;;  %6240 = vmatpush.msra.mxu2 %v13013_v40 }
 0xab5   :  { %v12060_v27 = vpop.eup %7580  ;;  %v5812_v55 = vmul.f32 %v7579_v49, %v12028_v20  ;;  %vm5817_vm1 = vweird.f32 %v7579_v49 }
 0xab6   :  { %v7583_v43 = vpop.eup %7582  ;;  %v5827_v41 = vmul.f32 %v12060_v27, %v12034_v14  ;;  %7584 = vrcp.f32 %v12054_v3  ;;  %vm5818_vm6 = vmor %vm5816_vm5, %vm5817_vm1  ;;  %vm5832_vm8 = vweird.f32 %v12060_v27  ;;  %v5852_v47 = vand.u32 2147483648, %v12054_v3 }
 0xab7   :  { %v12071_v2 = vadd.f32 1.0, %v7583_v43  ;;  %v5813_v54 = vsub.f32 1.0, %v5812_v55  ;;  %v5850_v52 = vand.u32 2147483647, %v12054_v3  ;;  %vm12114_vm11 = vmor %vm5831_vm9, %vm5832_vm8  ;;  %vm5846_vm12 = vweird.f32 %v12054_v3 }
 0xab8   :  { %v5828_v16 = vsub.f32 1.0, %v5827_v41  ;;  %v5789_v43 = vadd.f32 %v5788_v38, %v10969_v30  ;;  %v5853_v41 = vor.u32 1.1754944e-38, %v5852_v47  ;;  %v7760_v47 = vld [vmem:[%s12503_s8 + $0x10] sm:$0xff] }
 0xab9   :  { %7586 = vrcp.f32 %v12071_v2  ;;  %v5814_v45 = vmul.f32 %v7579_v49, %v5813_v54  ;;  %vm5851_vm15 = vcmp.eq.f32.partialorder %v5850_v52, 8.507059e+37  ;;  %v5867_v12 = vand.u32 2147483648, %v12071_v2 }
 0xaba   :  { %v5829_v51 = vmul.f32 %v12060_v27, %v5828_v16  ;;  %vm5861_vm3 = vweird.f32 %v12071_v2  ;;  %v5865_v15 = vand.u32 2147483647, %v12071_v2  ;;  %v5913_v25 = vpop.f32.mrf.mxu0  ;;  %v5911_v52 = vadd.f32 %v5910_v23, %v12980_v62 }
 0xabb   :  { %v5815_v56 = vadd.f32 %v7579_v49, %v5814_v45  ;;  %v5868_v42 = vor.u32 1.1754944e-38, %v5867_v12 }
 0xabc   :  { %v7585_v53 = vpop.eup %7584  ;;  %v5830_v59 = vadd.f32 %v12060_v27, %v5829_v51  ;;  %vm5866_vm1 = vcmp.eq.f32.partialorder %v5865_v15, 8.507059e+37  ;;  %v5933_v18 = vpop.f32.mrf.mxu3 }
 0xabd   :  { %v5819_v46 = vsel %vm5818_vm6, %v7579_v49, %v5815_v56  ;;  %v5842_v61 = vmul.f32 %v7585_v53, %v12054_v3  ;;  %vm5847_vm10 = vweird.f32 %v7585_v53  ;;  %v5934_v38 = vadd.f32 %v5933_v18, %v12979_v7 }
 0xabe   :  { %v5824_v4 = vsel %vm5821_vm7, %v5823_v35, %v5819_v46  ;;  %v5834_v49 = vsel %vm12114_vm11, %v12060_v27, %v5830_v59  ;;  %vm5848_vm13 = vmor %vm5846_vm12, %vm5847_vm10  ;;  %v7744_v27 = vld [vmem:[%s12503_s8] sm:$0xff]  ;;  %v7748_v46 = vld [vmem:[%s12503_s8 + $0x130] sm:$0xff] }
 0xabf   :  { %v7587_v20 = vpop.eup %7586  ;;  %v5871_v58 = vmul.f32 %v5824_v4, %v5786_v31  ;;  %v5843_v32 = vsub.f32 1.0, %v5842_v61  ;;  %6217 = vmatpush.msrb.mxu3 %v7744_v27  ;;  %v5839_v1 = vsel %vm5836_vm14, %v5838_v24, %v5834_v49  ;;  %v7746_v31 = vld [vmem:[%s12503_s8 + $0x160] sm:$0xff]  ;;  %v7751_v4 = vld [vmem:[%s12503_s8 + $0xe8] sm:$0xff]  ;;  %v7752_v59 = vld [vmem:[%s12503_s8 + $0xd0] sm:$0xff]  ;;  %v5914_v27 = vadd.f32 %v5913_v25, %v12980_v62 }
 0xac0   :  { %v5857_v36 = vmul.f32 %v7587_v20, %v12071_v2  ;;  %vm5862_vm0 = vweird.f32 %v7587_v20  ;;  %v5877_v44 = vsub.f32 1.0, %v5839_v1  ;;  %v5881_v51 = vmul.f32 %v5839_v1, %v11941_v13  ;;  %v7745_v2 = vld [vmem:[%s12503_s8 + $0x178] sm:$0xff]  ;;  %v7750_v61 = vld [vmem:[%s12503_s8 + $0x100] sm:$0xff] }
 0xac1   :  { %v5873_v5 = vadd.f32 %v5871_v58, %v5717_v10  ;;  %v5844_v11 = vmul.f32 %v7585_v53, %v5843_v32  ;;  %vm5863_vm4 = vmor %vm5861_vm3, %vm5862_vm0  ;;  %v7756_v58 = vld [vmem:[%s12503_s8 + $0x70] sm:$0xff]  ;;  %v7757_v32 = vld [vmem:[%s12503_s8 + $0x58] sm:$0xff] }
 0xac2   :  { %v5858_v14 = vsub.f32 1.0, %v5857_v36  ;;  %v7759_v36 = vld [vmem:[%s12503_s8 + $0x28] sm:$0xff] }
 0xac3   :  { %7588 = vtanh.f32 %v5873_v5  ;;  %v5845_v55 = vadd.f32 %v7585_v53, %v5844_v11 }
 0xac4   :  { %v5859_v37 = vmul.f32 %v7587_v20, %v5858_v14  ;;  %v5936_v24 = vpop.f32.mrf.mxu3 }
 0xac5   :  { %v5849_v54 = vsel %vm5848_vm13, %v7585_v53, %v5845_v55 }
 0xac6   :  { %v5854_v3 = vsel %vm5851_vm15, %v5853_v41, %v5849_v54  ;;  %v5860_v16 = vadd.f32 %v7587_v20, %v5859_v37 }
 0xac7   :  { %v5872_v57 = vmul.f32 %v5854_v3, %v5789_v43  ;;  %v5937_v43 = vadd.f32 %v5936_v24, %v12979_v7  ;;  %v6126_v3 = vld [vmem:[#allocation2 + $0x538] sm:$0xff] }
 0xac8   :  { %v5864_v17 = vsel %vm5863_vm4, %v7587_v20, %v5860_v16  ;;  %v7755_v20 = vld [vmem:[%s12503_s8 + $0x88] sm:$0xff]  ;;  %7435 = vmatmul.msk.f32.gmra.mxu2 %vm1429_vm2, %v6126_v3 }
 0xac9   :  { %v7589_v45 = vpop.eup %7588  ;;  %v5874_v50 = vadd.f32 %v5872_v57, %v5720_v34  ;;  %v5869_v39 = vsel %vm5866_vm1, %v5868_v42, %v5864_v17 }
 0xaca   :  { %v5879_v63 = vmul.f32 %v7589_v45, %v5877_v44  ;;  %v5878_v53 = vsub.f32 1.0, %v5869_v39  ;;  %v5882_v21 = vmul.f32 %v5869_v39, %v11956_v9  ;;  %v7749_v9 = vld [vmem:[%s12503_s8 + $0x118] sm:$0xff] }
 0xacb   :  { %7590 = vtanh.f32 %v5874_v50 }
 0xacc   :  { %v12136_v56 = vadd.f32 %v5881_v51, %v5879_v63 }
 0xace   :  { %5978 = vmatmul.f32.vlgmr.msra.gmra.mxu0 %v12136_v56  ;;  %6001 = vmatmul.f32.vlgmr.msra.gmra.mxu1 %v12136_v56 }
 0xacf   :  { %6024 = vmatmul.f32.vlgmr.msra.gmra.mxu3 %v12136_v56  ;;  %6248 = vmatpush.msra.mxu0 %v7745_v2 }
 0xad1   :  { %v7591_v13 = vpop.eup %7590  ;;  %6249 = vmatpush.msra.mxu0 %v7746_v31  ;;  %v5956_v31 = vpop.f32.mrf.mxu2 }
 0xad2   :  { %v5880_v35 = vmul.f32 %v7591_v13, %v5878_v53 }
 0xad3   :  { %6250 = vmatpush.msra.mxu0 %v7747_v8 }
 0xad4   :  { %v12151_v10 = vadd.f32 %v5882_v21, %v5880_v35 }
 0xad5   :  { %6251 = vmatpush.msra.mxu0 %v7748_v46 }
 0xad6   :  { %5981 = vmatmul.f32.gmra.mxu0 %v12151_v10  ;;  %6004 = vmatmul.f32.gmra.mxu1 %v12151_v10 }
 0xad7   :  { %6027 = vmatmul.f32.gmra.mxu3 %v12151_v10  ;;  %6252 = vmatpush.msra.mxu0 %v7749_v9 }
 0xad9   :  { %6253 = vmatpush.msra.mxu0 %v7750_v61 }
 0xadb   :  { %6254 = vmatpush.msra.mxu0 %v7751_v4 }
 0xadd   :  { %6255 = vmatpush.msra.mxu0 %v7752_v59 }
 0xade   :  { %7437 = vmatmul.msk.f32.vlgmr.msrb.gmra.mxu0 %vm1429_vm2, %v6125_v28  ;;  %7440 = vmatmul.msk.f32.vlgmr.msrb.gmra.mxu1 %vm1429_vm2, %v6125_v28 }
 0xadf   :  { %6256 = vmatpush.msra.mxu0 %v7753_v60 }
 0xae1   :  { %6257 = vmatpush.msra.mxu0 %v7754_v26  ;;  %v5957_v26 = vadd.f32 %v5956_v31, %v10988_v33 }
 0xae3   :  { %6258 = vmatpush.msra.mxu0 %v7755_v20 }
 0xae5   :  { %6259 = vmatpush.msra.mxu0 %v7756_v58 }
 0xae6   :  { %7438 = vmatmul.msk.f32.gmra.mxu0 %vm1429_vm2, %v6126_v3  ;;  %7441 = vmatmul.msk.f32.gmra.mxu1 %vm1429_vm2, %v6126_v3 }
 0xae7   :  { %6260 = vmatpush.msra.mxu0 %v7757_v32 }
 0xae9   :  { %6261 = vmatpush.msra.mxu0 %v7758_v22 }
 0xaeb   :  { %6262 = vmatpush.msra.mxu0 %v7759_v36 }
 0xaed   :  { %6263 = vmatpush.msra.mxu0 %v7760_v47 }
 0xb4b   :  { %v5979_v5 = vpop.f32.mrf.mxu0  ;;  %v6002_v11 = vpop.f32.mrf.mxu1 }
 0xb4c   :  { %v5980_v0 = vadd.f32 %v5979_v5, %v12981_v29  ;;  %v6003_v14 = vadd.f32 %v6002_v11, %v12982_v48 }
 0xb4e   :  { %v6031_v19 = vadd.f32 %v5980_v0, %v5911_v52  ;;  %v6032_v49 = vadd.f32 %v6003_v14, %v5934_v38 }
 0xb50   :  { %v7429_v6 = vmul.f32 -1.442695, %v6031_v19  ;;  %v7430_v55 = vmul.f32 -1.442695, %v6032_v49  ;;  %v5959_v19 = vpop.f32.mrf.mxu2 }
 0xb52   :  { %7592 = vpow2.f32 %v7429_v6  ;;  %v6025_v21 = vpop.f32.mrf.mxu3 }
 0xb53   :  { %7594 = vpow2.f32 %v7430_v55  ;;  %v5982_v41 = vpop.f32.mrf.mxu0  ;;  %v6005_v37 = vpop.f32.mrf.mxu1  ;;  %v6026_v20 = vadd.f32 %v6025_v21, %v10969_v30 }
 0xb54   :  { %v5983_v40 = vadd.f32 %v5982_v41, %v12981_v29  ;;  %v6006_v34 = vadd.f32 %v6005_v37, %v12982_v48  ;;  %v5960_v37 = vadd.f32 %v5959_v19, %v10988_v33 }
 0xb56   :  { %v6033_v54 = vadd.f32 %v5983_v40, %v5914_v27  ;;  %v6034_v1 = vadd.f32 %v6006_v34, %v5937_v43 }
 0xb58   :  { %v7593_v16 = vpop.eup %7592  ;;  %v7431_v57 = vmul.f32 -1.442695, %v6033_v54  ;;  %v7432_v15 = vmul.f32 -1.442695, %v6034_v1 }
 0xb59   :  { %v7595_v12 = vpop.eup %7594  ;;  %v6047_v44 = vadd.f32 1.0, %v7593_v16 }
 0xb5a   :  { %v6048_v45 = vadd.f32 1.0, %v7595_v12  ;;  %7596 = vpow2.f32 %v7431_v57  ;;  %v6028_v6 = vpop.f32.mrf.mxu3 }
 0xb5b   :  { %7598 = vrcp.f32 %v6047_v44  ;;  %v6062_v8 = vand.u32 2147483648, %v6047_v44  ;;  %v6060_v9 = vand.u32 2147483647, %v6047_v44  ;;  %vm6056_vm5 = vweird.f32 %v6047_v44 }
 0xb5c   :  { %7600 = vrcp.f32 %v6048_v45  ;;  %v6077_v18 = vand.u32 2147483648, %v6048_v45  ;;  %vm6071_vm9 = vweird.f32 %v6048_v45  ;;  %v6075_v11 = vand.u32 2147483647, %v6048_v45 }
 0xb5d   :  { %7602 = vpow2.f32 %v7432_v15  ;;  %v6063_v60 = vor.u32 1.1754944e-38, %v6062_v8  ;;  %vm6061_vm7 = vcmp.eq.f32.partialorder %v6060_v9, 8.507059e+37  ;;  %v6029_v40 = vadd.f32 %v6028_v6, %v10969_v30  ;;  %v6379_v8 = vld [vmem:[%s12514_s0 + $0x538] sm:$0xff] }
 0xb5e   :  { %v6078_v43 = vor.u32 1.1754944e-38, %v6077_v18  ;;  %vm6076_vm14 = vcmp.eq.f32.partialorder %v6075_v11, 8.507059e+37  ;;  %6392 = vrot.lane.b32.xlu0 %v6379_v8, %s7778_s22 }
 0xb60   :  { %v7597_v50 = vpop.eup %7596 }
 0xb61   :  { %v7599_v63 = vpop.eup %7598  ;;  %v6049_v51 = vadd.f32 1.0, %v7597_v50 }
 0xb62   :  { %v7601_v17 = vpop.eup %7600  ;;  %v6052_v42 = vmul.f32 %v7599_v63, %v6047_v44  ;;  %vm6057_vm2 = vweird.f32 %v7599_v63 }
 0xb63   :  { %v7603_v39 = vpop.eup %7602  ;;  %v6067_v2 = vmul.f32 %v7601_v17, %v6048_v45  ;;  %7604 = vrcp.f32 %v6049_v51  ;;  %vm6058_vm6 = vmor %vm6056_vm5, %vm6057_vm2  ;;  %vm6072_vm8 = vweird.f32 %v7601_v17  ;;  %v6092_v5 = vand.u32 2147483648, %v6049_v51 }
 0xb64   :  { %v6053_v53 = vsub.f32 1.0, %v6052_v42  ;;  %v12209_v13 = vadd.f32 1.0, %v7603_v39  ;;  %v6090_v0 = vand.u32 2147483647, %v6049_v51  ;;  %vm12215_vm11 = vmor %vm6071_vm9, %vm6072_vm8  ;;  %vm6086_vm12 = vweird.f32 %v6049_v51 }
 0xb65   :  { %v6068_v35 = vsub.f32 1.0, %v6067_v2  ;;  %v6093_v41 = vor.u32 1.1754944e-38, %v6092_v5 }
 0xb66   :  { %v6054_v46 = vmul.f32 %v7599_v63, %v6053_v53  ;;  %7606 = vrcp.f32 %v12209_v13  ;;  %vm6091_vm15 = vcmp.eq.f32.partialorder %v6090_v0, 8.507059e+37  ;;  %v6107_v57 = vand.u32 2147483648, %v12209_v13 }
 0xb67   :  { %v6069_v61 = vmul.f32 %v7601_v17, %v6068_v35  ;;  %vm6101_vm3 = vweird.f32 %v12209_v13  ;;  %v6105_v44 = vand.u32 2147483647, %v12209_v13 }
 0xb68   :  { %v6055_v4 = vadd.f32 %v7599_v63, %v6054_v46  ;;  %v6173_v46 = vpop.f32.mrf.mxu0 }
 0xb69   :  { %v7605_v59 = vpop.eup %7604  ;;  %v6070_v36 = vadd.f32 %v7601_v17, %v6069_v61  ;;  %vm6106_vm1 = vcmp.eq.f32.partialorder %v6105_v44, 8.507059e+37  ;;  %v6174_v9 = vadd.f32 %v6173_v46, %v12979_v7 }
 0xb6a   :  { %v6059_v58 = vsel %vm6058_vm6, %v7599_v63, %v6055_v4  ;;  %v6082_v32 = vmul.f32 %v7605_v59, %v6049_v51  ;;  %vm6087_vm10 = vweird.f32 %v7605_v59 }
 0xb6b   :  { %v6064_v22 = vsel %vm6061_vm7, %v6063_v60, %v6059_v58  ;;  %v6074_v55 = vsel %vm12215_vm11, %v7601_v17, %v6070_v36  ;;  %vm6088_vm13 = vmor %vm6086_vm12, %vm6087_vm10  ;;  %v6108_v17 = vor.u32 1.1754944e-38, %v6107_v57 }
 0xb6c   :  { %v7607_v47 = vpop.eup %7606  ;;  %v6111_v23 = vmul.f32 %v6064_v22, %v6026_v20  ;;  %v6083_v25 = vsub.f32 1.0, %v6082_v32  ;;  %v6079_v54 = vsel %vm6076_vm14, %v6078_v43, %v6074_v55  ;;  %v6380_v43 = vld [vmem:[%s12506_s11] sm:$0xff] }
 0xb6d   :  { %v6097_v38 = vmul.f32 %v7607_v47, %v12209_v13  ;;  %vm6102_vm0 = vweird.f32 %v7607_v47  ;;  %v6117_v12 = vsub.f32 1.0, %v6079_v54  ;;  %v6121_v63 = vmul.f32 %v6079_v54, %v12136_v56  ;;  %v6150_v56 = vpop.f32.mrf.mxu2  ;;  %6412 = vmatpush.msra.mxu1 %v6380_v43  ;;  %v6502_v43 = vld [vmem:[%s12507_s12 + $0x168] sm:$0xff] }
 0xb6e   :  { %v6084_v52 = vmul.f32 %v7605_v59, %v6083_v25  ;;  %v6113_v14 = vadd.f32 %v6111_v23, %v5957_v26  ;;  %vm6103_vm4 = vmor %vm6101_vm3, %vm6102_vm0  ;;  %v6151_v4 = vadd.f32 %v6150_v56, %v12980_v62  ;;  %6513 = vmatpush.msrb.mxu2 %v6502_v43 }
 0xb6f   :  { %v6098_v28 = vsub.f32 1.0, %v6097_v38 }
 0xb70   :  { %v6085_v24 = vadd.f32 %v7605_v59, %v6084_v52  ;;  %7608 = vtanh.f32 %v6113_v14  ;;  %v6176_v22 = vpop.f32.mrf.mxu0 }
 0xb71   :  { %v6099_v27 = vmul.f32 %v7607_v47, %v6098_v28  ;;  %v6177_v36 = vadd.f32 %v6176_v22, %v12979_v7 }
 0xb72   :  { %v6089_v34 = vsel %vm6088_vm13, %v7605_v59, %v6085_v24 }
 0xb73   :  { %v6094_v1 = vsel %vm6091_vm15, %v6093_v41, %v6089_v34  ;;  %v6100_v3 = vadd.f32 %v7607_v47, %v6099_v27 }
 0xb74   :  { %v6112_v16 = vmul.f32 %v6094_v1, %v6029_v40  ;;  %v6196_v40 = vpop.f32.mrf.mxu1 }
 0xb75   :  { %v6104_v51 = vsel %vm6103_vm4, %v7607_v47, %v6100_v3  ;;  %v6153_v21 = vpop.f32.mrf.mxu2 }
 0xb76   :  { %v7609_v15 = vpop.eup %7608  ;;  %v6114_v45 = vadd.f32 %v6112_v16, %v5960_v37  ;;  %v6109_v39 = vsel %vm6106_vm1, %v6108_v17, %v6104_v51  ;;  %v6154_v25 = vadd.f32 %v6153_v21, %v12980_v62 }
 0xb77   :  { %v6119_v50 = vmul.f32 %v7609_v15, %v6117_v12  ;;  %v6118_v2 = vsub.f32 1.0, %v6109_v39  ;;  %v6122_v31 = vmul.f32 %v6109_v39, %v12151_v10 }
 0xb78   :  { %7610 = vtanh.f32 %v6114_v45  ;;  %v6197_v45 = vadd.f32 %v6196_v40, %v10988_v33  ;;  %v6498_v40 = vld [vmem:[%s12507_s12 + $0x148] sm:$0xff] }
 0xb79   :  { %v12227_v42 = vadd.f32 %v6121_v63, %v6119_v50 }
 0xb7b   :  { %6218 = vmatmul.f32.vlgmr.msrb.gmra.mxu3 %v12227_v42  ;;  %6241 = vmatmul.f32.vlgmr.msra.gmra.mxu2 %v12227_v42 }
 0xb7c   :  { %6264 = vmatmul.f32.vlgmr.msra.gmra.mxu0 %v12227_v42 }
 0xb7e   :  { %v7611_v53 = vpop.eup %7610 }
 0xb7f   :  { %v6120_v13 = vmul.f32 %v7611_v53, %v6118_v2 }
 0xb81   :  { %v12233_v35 = vadd.f32 %v6122_v31, %v6120_v13 }
 0xb83   :  { %6221 = vmatmul.f32.gmra.mxu3 %v12233_v35  ;;  %6244 = vmatmul.f32.gmra.mxu2 %v12233_v35 }
 0xb84   :  { %6267 = vmatmul.f32.gmra.mxu0 %v12233_v35 }
 0xbf9   :  { %v6265_v41 = vpop.f32.mrf.mxu0 }
 0xbfa   :  { %v6266_v44 = vadd.f32 %v6265_v41, %v10969_v30  ;;  %v6499_v41 = vld [vmem:[%s12507_s12 + $0x150] sm:$0xff] }
 0xbfb   :  { %6514 = vmatpush.msrb.mxu2 %v6499_v41 }
 0xbfe   :  { %v6219_v10 = vpop.f32.mrf.mxu3  ;;  %v6242_v61 = vpop.f32.mrf.mxu2 }
 0xbff   :  { %v6220_v59 = vadd.f32 %v6219_v10, %v12981_v29  ;;  %v6243_v60 = vadd.f32 %v6242_v61, %v12982_v48  ;;  %v6479_v61 = vld [vmem:[%s12507_s12 + $0xb0] sm:$0xff] }
 0xc01   :  { %v6271_v26 = vadd.f32 %v6220_v59, %v6151_v4  ;;  %v6272_v20 = vadd.f32 %v6243_v60, %v6174_v9  ;;  %v6268_v8 = vpop.f32.mrf.mxu0  ;;  %v6199_v4 = vpop.f32.mrf.mxu1 }
 0xc03   :  { %v7442_v58 = vmul.f32 -1.442695, %v6271_v26  ;;  %v7443_v32 = vmul.f32 -1.442695, %v6272_v20 }
 0xc05   :  { %7612 = vpow2.f32 %v7442_v58  ;;  %v6269_v58 = vadd.f32 %v6268_v8, %v10969_v30  ;;  %v6491_v8 = vld [vmem:[%s12507_s12 + $0x110] sm:$0xff] }
 0xc06   :  { %7614 = vpow2.f32 %v7443_v32  ;;  %v6222_v47 = vpop.f32.mrf.mxu3  ;;  %v6245_v23 = vpop.f32.mrf.mxu2 }
 0xc07   :  { %v6223_v18 = vadd.f32 %v6222_v47, %v12981_v29  ;;  %v6246_v38 = vadd.f32 %v6245_v23, %v12982_v48 }
 0xc09   :  { %v6273_v5 = vadd.f32 %v6223_v18, %v6154_v25  ;;  %v6274_v11 = vadd.f32 %v6246_v38, %v6177_v36  ;;  %v6200_v36 = vadd.f32 %v6199_v4, %v10988_v33  ;;  %v6476_v4 = vld [vmem:[%s12507_s12 + $0x98] sm:$0xff] }
 0xc0b   :  { %v7613_v52 = vpop.eup %7612  ;;  %v7444_v0 = vmul.f32 -1.442695, %v6273_v5  ;;  %v7445_v49 = vmul.f32 -1.442695, %v6274_v11 }
 0xc0c   :  { %v7615_v14 = vpop.eup %7614  ;;  %v6287_v19 = vadd.f32 1.0, %v7613_v52 }
 0xc0d   :  { %v12249_v28 = vadd.f32 1.0, %v7615_v14  ;;  %7616 = vpow2.f32 %v7444_v0 }
 0xc0e   :  { %7618 = vrcp.f32 %v6287_v19  ;;  %v6302_v34 = vand.u32 2147483648, %v6287_v19  ;;  %v6300_v3 = vand.u32 2147483647, %v6287_v19  ;;  %vm6296_vm5 = vweird.f32 %v6287_v19 }
 0xc0f   :  { %7620 = vrcp.f32 %v12249_v28  ;;  %v6317_v13 = vand.u32 2147483648, %v12249_v28  ;;  %vm6311_vm9 = vweird.f32 %v12249_v28  ;;  %v6315_v56 = vand.u32 2147483647, %v12249_v28 }
 0xc10   :  { %7622 = vpow2.f32 %v7445_v49  ;;  %v6303_v15 = vor.u32 1.1754944e-38, %v6302_v34  ;;  %vm6301_vm7 = vcmp.eq.f32.partialorder %v6300_v3, 8.507059e+37  ;;  %v6493_v34 = vld [vmem:[%s12507_s12 + $0x120] sm:$0xff]  ;;  %v6492_v3 = vld [vmem:[%s12507_s12 + $0x118] sm:$0xff] }
 0xc11   :  { %v6318_v20 = vor.u32 1.1754944e-38, %v6317_v13  ;;  %vm6316_vm14 = vcmp.eq.f32.partialorder %v6315_v56, 8.507059e+37  ;;  %v6393_v13 = vpop.permute.xlu0 %6392  ;;  %v6497_v56 = vld [vmem:[%s12507_s12 + $0x140] sm:$0xff] }
 0xc13   :  { %v7617_v7 = vpop.eup %7616 }
 0xc14   :  { %v7619_v62 = vpop.eup %7618  ;;  %v6289_v6 = vadd.f32 1.0, %v7617_v7 }
 0xc15   :  { %v7621_v29 = vpop.eup %7620  ;;  %v6292_v55 = vmul.f32 %v7619_v62, %v6287_v19  ;;  %vm6297_vm2 = vweird.f32 %v7619_v62 }
 0xc16   :  { %v7623_v48 = vpop.eup %7622  ;;  %v6307_v24 = vmul.f32 %v7621_v29, %v12249_v28  ;;  %7624 = vrcp.f32 %v6289_v6  ;;  %vm6298_vm6 = vmor %vm6296_vm5, %vm6297_vm2  ;;  %vm6312_vm8 = vweird.f32 %v7621_v29  ;;  %v6332_v31 = vand.u32 2147483648, %v6289_v6 }
 0xc17   :  { %v12256_v37 = vadd.f32 1.0, %v7623_v48  ;;  %v6293_v27 = vsub.f32 1.0, %v6292_v55  ;;  %v6330_v10 = vand.u32 2147483647, %v6289_v6  ;;  %vm12265_vm11 = vmor %vm6311_vm9, %vm6312_vm8  ;;  %vm6326_vm12 = vweird.f32 %v6289_v6 }
 0xc18   :  { %v6308_v54 = vsub.f32 1.0, %v6307_v24  ;;  %v6333_v32 = vor.u32 1.1754944e-38, %v6332_v31  ;;  %v6382_v24 = vld [vmem:[%s12506_s11 + $0x10] sm:$0xff]  ;;  %vm6394_vm2 = vcmask 64512   ;;  %v6500_v31 = vld [vmem:[%s12507_s12 + $0x158] sm:$0xff]  ;;  %vm6373_vm5 = vcmask 408576  }
 0xc19   :  { %7626 = vrcp.f32 %v12256_v37  ;;  %v6294_v1 = vmul.f32 %v7619_v62, %v6293_v27  ;;  %vm6331_vm15 = vcmp.eq.f32.partialorder %v6330_v10, 8.507059e+37  ;;  %v6347_v5 = vand.u32 2147483648, %v12256_v37  ;;  %6452 = vmatpush.msra.mxu3 %v6382_v24  ;;  %v6496_v27 = vld [vmem:[%s12507_s12 + $0x138] sm:$0xff]  ;;  %7446 = vmatmul.msk.f32.vlgmr.msra.gmra.mxu1 %vm6394_vm2, %v6393_v13  ;;  %v6482_v10 = vld [vmem:[%s12507_s12 + $0xc8] sm:$0xff] }
 0xc1a   :  { %v6309_v16 = vmul.f32 %v7621_v29, %v6308_v54  ;;  %vm6341_vm3 = vweird.f32 %v12256_v37  ;;  %v6345_v30 = vand.u32 2147483647, %v12256_v37  ;;  %6515 = vmatpush.msrb.mxu2 %v6496_v27  ;;  %v6495_v54 = vld [vmem:[%s12507_s12 + $0x130] sm:$0xff]  ;;  %7448 = vmatmul.msk.f32.vlgmr.msra.gmra.mxu3 %vm6394_vm2, %v6393_v13  ;;  %v6633_v24 = vld [vmem:[%s12510_s15 + $0x68] sm:$0xff]  ;;  %v6631_v27 = vld [vmem:[%s12510_s15 + $0x58] sm:$0xff] }
 0xc1b   :  { %v6295_v57 = vadd.f32 %v7619_v62, %v6294_v1  ;;  %v6348_v49 = vor.u32 1.1754944e-38, %v6347_v5  ;;  %v6490_v1 = vld [vmem:[%s12507_s12 + $0x108] sm:$0xff]  ;;  %v6457_v5 = vld [vmem:[%s12507_s12] sm:$0xff] }
 0xc1c   :  { %v7625_v12 = vpop.eup %7624  ;;  %v6310_v17 = vadd.f32 %v7621_v29, %v6309_v16  ;;  %vm6346_vm1 = vcmp.eq.f32.partialorder %v6345_v30, 8.507059e+37  ;;  %6516 = vmatpush.msrb.mxu2 %v6493_v34  ;;  %v6487_v16 = vld [vmem:[%s12507_s12 + $0xf0] sm:$0xff] }
 0xc1d   :  { %v6299_v50 = vsel %vm6298_vm6, %v7619_v62, %v6295_v57  ;;  %v6322_v63 = vmul.f32 %v7625_v12, %v6289_v6  ;;  %vm6327_vm10 = vweird.f32 %v7625_v12  ;;  %v6489_v57 = vld [vmem:[%s12507_s12 + $0x100] sm:$0xff]  ;;  %v6459_v30 = vld [vmem:[%s12507_s12 + $0x10] sm:$0xff]  ;;  %vm6375_vm6 = vcmask 515072  }
 0xc1e   :  { %v6304_v51 = vsel %vm6301_vm7, %v6303_v15, %v6299_v50  ;;  %v6314_v59 = vsel %vm12265_vm11, %v7621_v29, %v6310_v17  ;;  %vm6328_vm13 = vmor %vm6326_vm12, %vm6327_vm10  ;;  %6517 = vmatpush.msrb.mxu2 %v6490_v1  ;;  %v6481_v15 = vld [vmem:[%s12507_s12 + $0xc0] sm:$0xff]  ;;  %v6478_v50 = vld [vmem:[%s12507_s12 + $0xa8] sm:$0xff]  ;;  %vm6377_vm7 = vcmask 621568  }
 0xc1f   :  { %v7627_v39 = vpop.eup %7626  ;;  %v6351_v2 = vmul.f32 %v6304_v51, %v6266_v44  ;;  %v6323_v53 = vsub.f32 1.0, %v6322_v63  ;;  %v6319_v23 = vsel %vm6316_vm14, %v6318_v20, %v6314_v59  ;;  %v6486_v44 = vld [vmem:[%s12507_s12 + $0xe8] sm:$0xff]  ;;  %v6480_v63 = vld [vmem:[%s12507_s12 + $0xb8] sm:$0xff]  ;;  %v6475_v51 = vld [vmem:[%s12507_s12 + $0x90] sm:$0xff] }
 0xc20   :  { %v6337_v21 = vmul.f32 %v7627_v39, %v12256_v37  ;;  %vm6342_vm0 = vweird.f32 %v7627_v39  ;;  %v6357_v11 = vsub.f32 1.0, %v6319_v23  ;;  %v6361_v33 = vmul.f32 %v6319_v23, %v12227_v42  ;;  %v6381_v42 = vld [vmem:[%s12506_s11 + $0x8] sm:$0xff]  ;;  %v6501_v37 = vld [vmem:[%s12507_s12 + $0x160] sm:$0xff]  ;;  %6518 = vmatpush.msrb.mxu2 %v6487_v16  ;;  %v6471_v20 = vld [vmem:[%s12507_s12 + $0x70] sm:$0xff] }
 0xc21   :  { %v6353_v46 = vadd.f32 %v6351_v2, %v6197_v45  ;;  %v6324_v9 = vmul.f32 %v7625_v12, %v6323_v53  ;;  %vm6343_vm4 = vmor %vm6341_vm3, %vm6342_vm0  ;;  %6432 = vmatpush.msrb.mxu1 %v6381_v42  ;;  %v6483_v45 = vld [vmem:[%s12507_s12 + $0xd0] sm:$0xff]  ;;  %v6477_v17 = vld [vmem:[%s12507_s12 + $0xa0] sm:$0xff]  ;;  %vm6660_vm0 = vcmask 1024  }
 0xc22   :  { %v6338_v60 = vsub.f32 1.0, %v6337_v21  ;;  %v6474_v2 = vld [vmem:[%s12507_s12 + $0x88] sm:$0xff]  ;;  %v6503_v53 = vld [vmem:[%s12507_s12 + $0x170] sm:$0xff]  ;;  %7447 = vmatmul.msk.f32.vlgmr.msrb.gmra.mxu1 %vm6394_vm2, %v6393_v13  ;;  %v6473_v59 = vld [vmem:[%s12507_s12 + $0x80] sm:$0xff] }
 0xc23   :  { %7628 = vtanh.f32 %v6353_v46  ;;  %v6325_v26 = vadd.f32 %v7625_v12, %v6324_v9  ;;  %6533 = vmatpush.msra.mxu1 %v6503_v53  ;;  %v6494_v21 = vld [vmem:[%s12507_s12 + $0x128] sm:$0xff]  ;;  %v6488_v46 = vld [vmem:[%s12507_s12 + $0xf8] sm:$0xff]  ;;  %v6485_v9 = vld [vmem:[%s12507_s12 + $0xe0] sm:$0xff] }
 0xc24   :  { %v6339_v22 = vmul.f32 %v7627_v39, %v6338_v60  ;;  %v6469_v60 = vld [vmem:[%s12507_s12 + $0x60] sm:$0xff]  ;;  %v6464_v23 = vld [vmem:[%s12507_s12 + $0x38] sm:$0xff]  ;;  %v6630_v1 = vld [vmem:[%s12510_s15 + $0x50] sm:$0xff] }
 0xc25   :  { %v6329_v47 = vsel %vm6328_vm13, %v7625_v12, %v6325_v26  ;;  %v6484_v12 = vld [vmem:[%s12507_s12 + $0xd8] sm:$0xff]  ;;  %6534 = vmatpush.msra.mxu1 %v6500_v31  ;;  %v6470_v26 = vld [vmem:[%s12507_s12 + $0x68] sm:$0xff]  ;;  %v6624_v53 = vld [vmem:[%s12510_s15 + $0x20] sm:$0xff] }
 0xc26   :  { %v6334_v25 = vsel %vm6331_vm15, %v6333_v32, %v6329_v47  ;;  %v6340_v18 = vadd.f32 %v7627_v39, %v6339_v22  ;;  %6519 = vmatpush.msrb.mxu2 %v6484_v12  ;;  %v6468_v32 = vld [vmem:[%s12507_s12 + $0x58] sm:$0xff]  ;;  %v6467_v22 = vld [vmem:[%s12507_s12 + $0x50] sm:$0xff]  ;;  %v6465_v47 = vld [vmem:[%s12507_s12 + $0x40] sm:$0xff] }
 0xc27   :  { %v6352_v38 = vmul.f32 %v6334_v25, %v6269_v58  ;;  %6535 = vmatpush.msra.mxu1 %v6497_v56  ;;  %v6466_v58 = vld [vmem:[%s12507_s12 + $0x48] sm:$0xff]  ;;  %v6460_v25 = vld [vmem:[%s12507_s12 + $0x18] sm:$0xff]  ;;  %v6622_v31 = vld [vmem:[%s12510_s15 + $0x10] sm:$0xff] }
 0xc28   :  { %v6344_v19 = vsel %vm6343_vm4, %v7627_v39, %v6340_v18  ;;  %6520 = vmatpush.msrb.mxu2 %v6481_v15  ;;  %v6472_v39 = vld [vmem:[%s12507_s12 + $0x78] sm:$0xff]  ;;  %v6462_v18 = vld [vmem:[%s12507_s12 + $0x28] sm:$0xff]  ;;  %v6628_v15 = vld [vmem:[%s12510_s15 + $0x40] sm:$0xff] }
 0xc29   :  { %v7629_v52 = vpop.eup %7628  ;;  %v6354_v0 = vadd.f32 %v6352_v38, %v6200_v36  ;;  %v6349_v7 = vsel %vm6346_vm1, %v6348_v49, %v6344_v19  ;;  %6536 = vmatpush.msra.mxu1 %v6494_v21  ;;  %v6463_v36 = vld [vmem:[%s12507_s12 + $0x30] sm:$0xff]  ;;  %v6461_v38 = vld [vmem:[%s12507_s12 + $0x20] sm:$0xff]  ;;  %v6623_v13 = vld [vmem:[%s12510_s15 + $0x18] sm:$0xff] }
 0xc2a   :  { %v6359_v14 = vmul.f32 %v7629_v52, %v6357_v11  ;;  %v6358_v62 = vsub.f32 1.0, %v6349_v7  ;;  %v6362_v55 = vmul.f32 %v6349_v7, %v12233_v35  ;;  %v6504_v35 = vld [vmem:[%s12507_s12 + $0x178] sm:$0xff]  ;;  %6521 = vmatpush.msrb.mxu2 %v6478_v50  ;;  %v6458_v11 = vld [vmem:[%s12507_s12 + $0x8] sm:$0xff] }
 0xc2b   :  { %7630 = vtanh.f32 %v6354_v0  ;;  %6553 = vmatpush.msrb.mxu3 %v6504_v35  ;;  %6537 = vmatpush.msra.mxu1 %v6491_v8  ;;  %v13018_v0 = vld [vmem:[#allocation5_spill] sm:$0xff]  ;;  %v6627_v50 = vld [vmem:[%s12510_s15 + $0x38] sm:$0xff] }
 0xc2c   :  { %v6363_v28 = vadd.f32 %v6361_v33, %v6359_v14  ;;  %6522 = vmatpush.msrb.mxu2 %v6475_v51  ;;  %v6632_v35 = vld [vmem:[%s12510_s15 + $0x60] sm:$0xff]  ;;  %v6626_v51 = vld [vmem:[%s12510_s15 + $0x30] sm:$0xff]  ;;  %v6621_v8 = vld [vmem:[%s12510_s15 + $0x8] sm:$0xff] }
 0xc2d   :  { %6554 = vmatpush.msrb.mxu3 %v6501_v37  ;;  %6538 = vmatpush.msra.mxu1 %v6488_v46  ;;  %v6620_v46 = vld [vmem:[%s12510_s15] sm:$0xff] }
 0xc2e   :  { %6366 = vrot.lane.b32.xlu0 %v6363_v28, %s7779_s5  ;;  %6523 = vmatpush.msrb.mxu2 %v6472_v39 }
 0xc2f   :  { %6555 = vmatpush.msrb.mxu3 %v6498_v40  ;;  %6539 = vmatpush.msra.mxu1 %v6485_v9 }
 0xc30   :  { %6524 = vmatpush.msrb.mxu2 %v6469_v60 }
 0xc31   :  { %v7631_v6 = vpop.eup %7630  ;;  %6556 = vmatpush.msrb.mxu3 %v6495_v54  ;;  %6540 = vmatpush.msra.mxu1 %v6482_v10 }
 0xc32   :  { %v6360_v29 = vmul.f32 %v7631_v6, %v6358_v62  ;;  %6525 = vmatpush.msrb.mxu2 %v6466_v58  ;;  %v12434_v62 = vld [vmem:[%s12508_s13] sm:$0x7] }
 0xc33   :  { %6557 = vmatpush.msrb.mxu3 %v6492_v3  ;;  %6541 = vmatpush.msra.mxu1 %v6479_v61  ;;  %v12439_v6 = vld [vmem:[%s12509_s14] sm:$0x7]  ;;  %v6385_v40 = vperm.slane %v12434_v62, 0 }
 0xc34   :  { %v6364_v48 = vadd.f32 %v6362_v55, %v6360_v29  ;;  %6526 = vmatpush.msrb.mxu2 %v6463_v36  ;;  %v6635_v29 = vld [vmem:[%s12510_s15 + $0x78] sm:$0xff]  ;;  %v6634_v55 = vld [vmem:[%s12510_s15 + $0x70] sm:$0xff]  ;;  %v6508_v42 = vperm.slane %v12439_v6, 1  ;;  %v6507_v54 = vperm.slane %v12439_v6, 0  ;;  %v6509_v58 = vperm.slane %v12439_v6, 2 }
 0xc35   :  { %6558 = vmatpush.msrb.mxu3 %v6489_v57  ;;  %6542 = vmatpush.msra.mxu1 %v6476_v4  ;;  %v6629_v57 = vld [vmem:[%s12510_s15 + $0x48] sm:$0xff] }
 0xc36   :  { %6370 = vrot.lane.b32.xlu1 %v6364_v48, %s7780_s24  ;;  %6527 = vmatpush.msrb.mxu2 %v6460_v25  ;;  %v6386_v48 = vperm.slane %v12434_v62, 1 }
 0xc37   :  { %6559 = vmatpush.msrb.mxu3 %v6486_v44  ;;  %6543 = vmatpush.msra.mxu1 %v6473_v59 }
 0xc38   :  { %6528 = vmatpush.msrb.mxu2 %v6457_v5  ;;  %6640 = vmatpush.msrb.mxu0 %v6635_v29 }
 0xc39   :  { %6560 = vmatpush.msrb.mxu3 %v6483_v45  ;;  %6544 = vmatpush.msra.mxu1 %v6470_v26 }
 0xc3a   :  { %6641 = vmatpush.msrb.mxu0 %v6634_v55 }
 0xc3b   :  { %6561 = vmatpush.msrb.mxu3 %v6480_v63  ;;  %6545 = vmatpush.msra.mxu1 %v6467_v22 }
 0xc3c   :  { %6642 = vmatpush.msrb.mxu0 %v6633_v24  ;;  %v7491_v24 = vld [vmem:[#allocation4] ss:$0 sm:$0xff] }
 0xc3d   :  { %6562 = vmatpush.msrb.mxu3 %v6477_v17  ;;  %6546 = vmatpush.msra.mxu1 %v6464_v23  ;;  %v6625_v17 = vld [vmem:[%s12510_s15 + $0x28] sm:$0xff]  ;;  %v6387_v23 = vperm.slane %v12434_v62, 2 }
 0xc3e   :  { %6643 = vmatpush.msrb.mxu0 %v6632_v35 }
 0xc3f   :  { %6563 = vmatpush.msrb.mxu3 %v6474_v2  ;;  %6547 = vmatpush.msra.mxu1 %v6461_v38 }
 0xc40   :  { %6644 = vmatpush.msrb.mxu0 %v6631_v27 }
 0xc41   :  { %6564 = vmatpush.msrb.mxu3 %v6471_v20  ;;  %6548 = vmatpush.msra.mxu1 %v6458_v11 }
 0xc42   :  { %6645 = vmatpush.msrb.mxu0 %v6630_v1 }
 0xc43   :  { %6565 = vmatpush.msrb.mxu3 %v6468_v32 }
 0xc44   :  { %6646 = vmatpush.msrb.mxu0 %v6629_v57 }
 0xc45   :  { %6566 = vmatpush.msrb.mxu3 %v6465_v47 }
 0xc46   :  { %6647 = vmatpush.msrb.mxu0 %v6628_v15 }
 0xc47   :  { %6567 = vmatpush.msrb.mxu3 %v6462_v18 }
 0xc48   :  { %6648 = vmatpush.msrb.mxu0 %v6627_v50 }
 0xc49   :  { %6568 = vmatpush.msrb.mxu3 %v6459_v30 }
 0xc4a   :  { %6649 = vmatpush.msrb.mxu0 %v6626_v51 }
 0xc4c   :  { %6650 = vmatpush.msrb.mxu0 %v6625_v17 }
 0xc4e   :  { %6651 = vmatpush.msrb.mxu0 %v6624_v53 }
 0xc50   :  { %6652 = vmatpush.msrb.mxu0 %v6623_v13 }
 0xc52   :  { %6653 = vmatpush.msrb.mxu0 %v6622_v31 }
 0xc54   :  { %6654 = vmatpush.msrb.mxu0 %v6621_v8 }
 0xc56   :  { %6655 = vmatpush.msrb.mxu0 %v6620_v46 }
 0xc96   :  { %v6414_v28 = vpop.f32.mrf.mxu1 }
 0xc97   :  { %v6415_v12 = vadd.f32 %v6414_v28, %v6385_v40 }
 0xc9d   :  { %v6454_v10 = vpop.f32.mrf.mxu3 }
 0xc9f   :  { %v6434_v7 = vpop.f32.mrf.mxu1 }
 0xca0   :  { %v6367_v52 = vpop.permute.xlu0 %6366  ;;  %v6435_v41 = vadd.f32 %v6434_v7, %v6386_v48 }
 0xca1   :  { %v6374_v14 = vsel %vm6373_vm5, %v13018_v0, %v6367_v52  ;;  %v6455_v52 = vadd.f32 %v6454_v10, %v6387_v23 }
 0xca8   :  { %v6371_v33 = vpop.permute.xlu1 %6370 }
 0xca9   :  { %v6376_v19 = vsel %vm6375_vm6, %v6374_v14, %v6371_v33 }
 0xcaa   :  { %v12429_v49 = vsel %vm6377_vm7, %v6376_v19, 0.0  ;;  %7449 = vmatmul.msk.f32.vlgmr.msrb.gmra.mxu2 %vm6377_vm7, %v6376_v19  ;;  %7450 = vmatmul.msk.f32.vlgmr.msra.gmra.mxu1 %vm6377_vm7, %v6376_v19 }
 0xcab   :  { %7451 = vmatmul.msk.f32.vlgmr.msrb.gmra.mxu3 %vm6377_vm7, %v6376_v19 }
 0xd27   :  { %v6550_v43 = vpop.f32.mrf.mxu1 }
 0xd28   :  { %v6551_v37 = vadd.f32 %v6550_v43, %v6508_v42 }
 0xd2a   :  { %v6574_v34 = vadd.f32 %v6551_v37, %v6435_v41 }
 0xd2c   :  { %v7453_v3 = vmul.f32 -1.442695, %v6574_v34 }
 0xd2d   :  { %v6530_v16 = vpop.f32.mrf.mxu2 }
 0xd2e   :  { %7632 = vpow2.f32 %v7453_v3  ;;  %v6531_v44 = vadd.f32 %v6530_v16, %v6507_v54  ;;  %v6570_v36 = vpop.f32.mrf.mxu3 }
 0xd2f   :  { %v6571_v38 = vadd.f32 %v6570_v36, %v6509_v58 }
 0xd30   :  { %v6573_v45 = vadd.f32 %v6531_v44, %v6415_v12 }
 0xd32   :  { %v7452_v63 = vmul.f32 -1.442695, %v6573_v45 }
 0xd34   :  { %v7633_v39 = vpop.eup %7632  ;;  %7634 = vpow2.f32 %v7452_v63 }
 0xd35   :  { %v6582_v2 = vadd.f32 1.0, %v7633_v39 }
 0xd37   :  { %7636 = vrcp.f32 %v6582_v2  ;;  %v6609_v14 = vand.u32 2147483648, %v6582_v2  ;;  %vm6603_vm13 = vweird.f32 %v6582_v2  ;;  %v6607_v33 = vand.u32 2147483647, %v6582_v2 }
 0xd39   :  { %v6610_v7 = vor.u32 1.1754944e-38, %v6609_v14  ;;  %vm6608_vm15 = vcmp.eq.f32.partialorder %v6607_v33, 8.507059e+37 }
 0xd3a   :  { %v7635_v56 = vpop.eup %7634 }
 0xd3b   :  { %v6581_v21 = vadd.f32 1.0, %v7635_v56 }
 0xd3d   :  { %7638 = vrcp.f32 %v6581_v21  ;;  %v7637_v9 = vpop.eup %7636  ;;  %v6594_v20 = vand.u32 2147483648, %v6581_v21  ;;  %v6592_v22 = vand.u32 2147483647, %v6581_v21  ;;  %vm6588_vm9 = vweird.f32 %v6581_v21 }
 0xd3e   :  { %v6599_v61 = vmul.f32 %v7637_v9, %v6582_v2  ;;  %vm6604_vm12 = vweird.f32 %v7637_v9 }
 0xd3f   :  { %v6595_v18 = vor.u32 1.1754944e-38, %v6594_v20  ;;  %vm6593_vm11 = vcmp.eq.f32.partialorder %v6592_v22, 8.507059e+37  ;;  %vm6605_vm14 = vmor %vm6603_vm13, %vm6604_vm12 }
 0xd40   :  { %v6600_v60 = vsub.f32 1.0, %v6599_v61 }
 0xd42   :  { %v6601_v47 = vmul.f32 %v7637_v9, %v6600_v60 }
 0xd43   :  { %v7639_v4 = vpop.eup %7638 }
 0xd44   :  { %v6584_v59 = vmul.f32 %v7639_v4, %v6581_v21  ;;  %vm6589_vm8 = vweird.f32 %v7639_v4  ;;  %v6602_v30 = vadd.f32 %v7637_v9, %v6601_v47 }
 0xd45   :  { %vm6590_vm10 = vmor %vm6588_vm9, %vm6589_vm8 }
 0xd46   :  { %v6585_v26 = vsub.f32 1.0, %v6584_v59  ;;  %v6606_v28 = vsel %vm6605_vm14, %v7637_v9, %v6602_v30 }
 0xd47   :  { %v6611_v62 = vsel %vm6608_vm15, %v6610_v7, %v6606_v28 }
 0xd48   :  { %v6586_v32 = vmul.f32 %v7639_v4, %v6585_v26  ;;  %v6616_v6 = vsub.f32 1.0, %v6611_v62  ;;  %v6618_v48 = vmul.f32 %v6611_v62, %v12429_v49 }
 0xd4a   :  { %v6587_v25 = vadd.f32 %v7639_v4, %v6586_v32 }
 0xd4c   :  { %v6591_v5 = vsel %vm6590_vm10, %v7639_v4, %v6587_v25 }
 0xd4d   :  { %v6596_v11 = vsel %vm6593_vm11, %v6595_v18, %v6591_v5 }
 0xd4e   :  { %v6613_v0 = vmul.f32 %v6596_v11, %v6571_v38 }
 0xd50   :  { %v6614_v19 = vadd.f32 %v6613_v0, %v6455_v52 }
 0xd52   :  { %7640 = vtanh.f32 %v6614_v19 }
 0xd58   :  { %v7641_v29 = vpop.eup %7640 }
 0xd59   :  { %v6617_v55 = vmul.f32 %v7641_v29, %v6616_v6 }
 0xd5b   :  { %v6619_v42 = vadd.f32 %v6618_v48, %v6617_v55 }
 0xd5d   :  { %6656 = vmatmul.f32.vlgmr.msrb.gmra.mxu0 %v6619_v42 }
 0xdda   :  { %v6657_v43 = vpop.f32.mrf.mxu0 }
 0xddb   :  { %v6658_v35 = vadd.f32 %v7491_v24, %v6657_v43 }
 0xddd   :  { %6661 = vst.msk [vmem:[%s12512_s17] sm:$0x3] %vm6660_vm0, %v6658_v35 }

</bundles_post_ra>
